<compile_context>
chip_gen: v7x
topology: tpu7x:2x2x1
jax: 0.10.0
libtpu: 0.0.40
codegen_flags: <defaults>
</compile_context>

<pallas_src>
import jax
import jax.numpy as jnp
from jax.experimental import pallas as pl
from jax.experimental.pallas import tpu as pltpu

EPS = 1e-5
IN_PAD = 128          # 100 (z) + 10 (label) zero-padded to 128 lanes
OUT_DIM = 784
OUT_PAD = 896         # 7 * 128 -> lane-dense output store

# Packed (1, VEC_LEN) row layout: [b1 g1 be1 | b2 g2 be2 | b3 g3 be3 | b4]
_OFF = {
    "b1": (0, 512), "g1": (512, 1024), "be1": (1024, 1536),
    "b2": (1536, 2048), "g2": (2048, 2560), "be2": (2560, 3072),
    "b3": (3072, 4096), "g3": (4096, 5120), "be3": (5120, 6144),
    "b4": (6144, 7040),
}
VEC_LEN = 7040


def _bn_relu(h, gamma, beta):
    # BatchNorm1d (training mode, biased var, eps=1e-5) + ReLU in two passes:
    # one statistics sweep (mean, E[x^2]) and one fused apply sweep.
    mean = jnp.mean(h, axis=0, keepdims=True)
    ex2 = jnp.mean(h * h, axis=0, keepdims=True)
    var = jnp.maximum(ex2 - mean * mean, 0.0)      # clamp cancellation to >= 0
    scale = gamma * jax.lax.rsqrt(var + EPS)
    shift = beta - mean * scale
    return jnp.maximum(h * scale + shift, 0.0)


def generator_kernel(
    zl_ref, w1_ref, w2_ref, vec_ref, w3_hbm, w4_hbm,   # inputs
    out_ref,                                           # output
    w3_buf, w4_buf, sem,                               # scratch
):
    # Start the two big weight DMAs immediately; they overlap fc1/fc2 work.
    cp3 = pltpu.make_async_copy(w3_hbm, w3_buf, sem.at[0])
    cp4 = pltpu.make_async_copy(w4_hbm, w4_buf, sem.at[1])
    cp3.start()
    cp4.start()

    def vec(name):
        lo, hi = _OFF[name]
        return vec_ref[:, lo:hi]

    # fused fc1_1 / fc1_2 (block-diagonal bf16 weight on [z | label | 0pad]).
    zl = zl_ref[...].astype(jnp.bfloat16)                               # (N,128)
    h = jnp.dot(zl, w1_ref[...], preferred_element_type=jnp.float32) + vec("b1")
    h = _bn_relu(h, vec("g1"), vec("be1"))                              # (N,512)

    # fc2 -> bn -> relu
    h = jnp.dot(h.astype(jnp.bfloat16), w2_ref[...],
                preferred_element_type=jnp.float32) + vec("b2")
    h = _bn_relu(h, vec("g2"), vec("be2"))                              # (N,512)

    # fc3 -> bn -> relu (wait for its weight DMA only now)
    cp3.wait()
    h = jnp.dot(h.astype(jnp.bfloat16), w3_buf[...],
                preferred_element_type=jnp.float32) + vec("b3")
    h = _bn_relu(h, vec("g3"), vec("be3"))                              # (N,1024)

    # fc4 (padded to 896 lanes) -> tanh -> bf16 store
    cp4.wait()
    h = jnp.dot(h.astype(jnp.bfloat16), w4_buf[...],
                preferred_element_type=jnp.float32) + vec("b4")
    out_ref[...] = jnp.tanh(h).astype(jnp.bfloat16)                     # (N,896)


def generator_forward(z, label, kp, *, return_padded=False):
    """z: (N, 100) f32, label: (N, 10) f32 one-hot, kp: fused kernel params."""
    N = z.shape[0]
    pad = jnp.zeros((N, IN_PAD - 110), jnp.float32)
    zl = jnp.concatenate([z, label, pad], axis=1)                       # (N,128)

    args = (zl, kp["w1"], kp["w2"], kp["vec"], kp["w3"], kp["w4"])

    flops = 2 * N * (IN_PAD * 512 + 512 * 512 + 512 * 1024 + 1024 * OUT_PAD)
    param_bytes = sum(int(kp[k].size) * kp[k].dtype.itemsize for k in kp)
    io_bytes = zl.size * 4 + N * OUT_PAD * 2
    cost = pl.CostEstimate(
        flops=flops,
        transcendentals=N * OUT_PAD + 4 * N,
        bytes_accessed=param_bytes + io_bytes,
    )

    vmem = pl.BlockSpec(memory_space=pltpu.MemorySpace.VMEM)
    hbm = pl.BlockSpec(memory_space=pl.ANY)

    out = pl.pallas_call(
        generator_kernel,
        out_shape=jax.ShapeDtypeStruct((N, OUT_PAD), jnp.bfloat16),
        in_specs=[vmem, vmem, vmem, vmem, hbm, hbm],
        out_specs=vmem,
        scratch_shapes=[
            pltpu.VMEM((512, 1024), jnp.bfloat16),    # w3 landing buffer
            pltpu.VMEM((1024, OUT_PAD), jnp.bfloat16),# w4 landing buffer
            pltpu.SemaphoreType.DMA((2,)),
        ],
        compiler_params=pltpu.CompilerParams(vmem_limit_bytes=32 << 20),
        cost_estimate=cost,
    )(*args)
    if return_padded:
        return out          # (N, 896); columns 784: are exactly 0
    return out[:, :OUT_DIM]


# ----------------------------------------------------------------------------
# Parameter construction (PyTorch layout) + fusion into kernel operands
# ----------------------------------------------------------------------------
def init_params(key, std=0.02):
    # Matches generator.weight_init(0.0, 0.02): Linear W ~ N(0, std), b = 0.
    # normal_init only touches nn.Linear, so BatchNorm keeps gamma=1, beta=0.
    # Weights stored as (in_features, out_features) so y = x @ W + b.
    ks = jax.random.split(key, 5)

    def lin(k, fan_in, fan_out):
        w = jax.random.normal(k, (fan_in, fan_out), jnp.float32) * std
        b = jnp.zeros((1, fan_out), jnp.float32)
        return w, b

    def bn(dim):
        return jnp.ones((1, dim), jnp.float32), jnp.zeros((1, dim), jnp.float32)

    w11, b11 = lin(ks[0], 100, 256)
    g11, be11 = bn(256)
    w12, b12 = lin(ks[1], 10, 256)
    g12, be12 = bn(256)
    w2, b2 = lin(ks[2], 512, 512)
    g2, be2 = bn(512)
    w3, b3 = lin(ks[3], 512, 1024)
    g3, be3 = bn(1024)
    w4, b4 = lin(ks[4], 1024, 784)

    return dict(
        w11=w11, b11=b11, g11=g11, be11=be11,
        w12=w12, b12=b12, g12=g12, be12=be12,
        w2=w2, b2=b2, g2=g2, be2=be2,
        w3=w3, b3=b3, g3=g3, be3=be3,
        w4=w4, b4=b4,
    )


def fuse_params(p):
    """Convert per-layer f32 params into fused / bf16 / lane-padded kernel operands."""
    # Block-diagonal fc1 weight acting on [z | label | 0pad] (128 in-features).
    w1 = jnp.zeros((IN_PAD, 512), jnp.float32)
    w1 = w1.at[:100, :256].set(p["w11"]).at[100:110, 256:].set(p["w12"])
    b1 = jnp.concatenate([p["b11"], p["b12"]], axis=1)
    g1 = jnp.concatenate([p["g11"], p["g12"]], axis=1)
    be1 = jnp.concatenate([p["be11"], p["be12"]], axis=1)

    # Pad fc4 output dim 784 -> 896 with zeros (pad columns give tanh(0)=0;
    # this invariant keeps the wrapper slice / padded output correct).
    w4 = jnp.zeros((1024, OUT_PAD), jnp.float32).at[:, :OUT_DIM].set(p["w4"])
    b4 = jnp.zeros((1, OUT_PAD), jnp.float32).at[:, :OUT_DIM].set(p["b4"])

    # Pack all (1, dim) operands into one row -> single prologue DMA.
    vec = jnp.zeros((1, VEC_LEN), jnp.float32)
    for name, arr in (("b1", b1), ("g1", g1), ("be1", be1),
                      ("b2", p["b2"]), ("g2", p["g2"]), ("be2", p["be2"]),
                      ("b3", p["b3"]), ("g3", p["g3"]), ("be3", p["be3"]),
                      ("b4", b4)):
        lo, hi = _OFF[name]
        vec = vec.at[:, lo:hi].set(arr)

    return dict(
        w1=w1.astype(jnp.bfloat16),
        w2=p["w2"].astype(jnp.bfloat16),
        w3=p["w3"].astype(jnp.bfloat16),
        w4=w4.astype(jnp.bfloat16),
        vec=vec,
    )


# ----------------------------------------------------------------------------
# Pure-JAX references for sanity checking
# ----------------------------------------------------------------------------
def _bn_relu_onepass(h, g, b):
    m = jnp.mean(h, axis=0, keepdims=True)
    ex2 = jnp.mean(h * h, axis=0, keepdims=True)
    var = jnp.maximum(ex2 - m * m, 0.0)
    scale = g * jax.lax.rsqrt(var + EPS)
    return jnp.maximum(h * scale + (b - m * scale), 0.0)


def reference_forward_bf16(z, label, kp):
    # Mimics the kernel math exactly (padding, bf16 dot inputs, f32 accumulation,
    # one-pass BN, f32 tanh then bf16 cast).
    N = z.shape[0]
    vec = kp["vec"]

    def v(name):
        lo, hi = _OFF[name]
        return vec[:, lo:hi]

    zl = jnp.concatenate([z, label, jnp.zeros((N, IN_PAD - 110), jnp.float32)], axis=1)
    h = jnp.dot(zl.astype(jnp.bfloat16), kp["w1"],
                preferred_element_type=jnp.float32) + v("b1")
    h = _bn_relu_onepass(h, v("g1"), v("be1"))
    h = jnp.dot(h.astype(jnp.bfloat16), kp["w2"],
                preferred_element_type=jnp.float32) + v("b2")
    h = _bn_relu_onepass(h, v("g2"), v("be2"))
    h = jnp.dot(h.astype(jnp.bfloat16), kp["w3"],
                preferred_element_type=jnp.float32) + v("b3")
    h = _bn_relu_onepass(h, v("g3"), v("be3"))
    h = jnp.dot(h.astype(jnp.bfloat16), kp["w4"],
                preferred_element_type=jnp.float32) + v("b4")
    return jnp.tanh(h).astype(jnp.bfloat16)[:, :OUT_DIM]


def _bn_relu_f32(h, g, b):
    m = jnp.mean(h, axis=0, keepdims=True)
    v = jnp.mean((h - m) ** 2, axis=0, keepdims=True)
    return jnp.maximum((h - m) * jax.lax.rsqrt(v + EPS) * g + b, 0.0)


def reference_forward_f32(z, label, p):
    # Full-precision reference with the original PyTorch module structure.
    x = _bn_relu_f32(z @ p["w11"] + p["b11"], p["g11"], p["be11"])
    y = _bn_relu_f32(label @ p["w12"] + p["b12"], p["g12"], p["be12"])
    h = jnp.concatenate([x, y], axis=1)
    h = _bn_relu_f32(h @ p["w2"] + p["b2"], p["g2"], p["be2"])
    h = _bn_relu_f32(h @ p["w3"] + p["b3"], p["g3"], p["be3"])
    return jnp.tanh(h @ p["w4"] + p["b4"])


if __name__ == "__main__":
    key = jax.random.PRNGKey(0)
    k_z, k_lab, k_param = jax.random.split(key, 3)

    # Batch of 128: full MXU-height tile, true full-batch BatchNorm statistics,
    # activations well under 1 MB of VMEM.  (>=256 per call recommended on
    # v6e/v7x to fill the 256-wide MXU; kept at 128 here for a small test.)
    N = 128
    z = jax.random.normal(k_z, (N, 100), jnp.float32)             # latent noise
    classes = jax.random.randint(k_lab, (N,), 0, 10)
    label = jax.nn.one_hot(classes, 10, dtype=jnp.float32)        # (N, 10)

    params = init_params(k_param)
    kparams = fuse_params(params)

    out = jax.block_until_ready(generator_forward(z, label, kparams))
    assert out.shape == (N, OUT_DIM), out.shape
    out_f32 = out.astype(jnp.float32)

    # Primary check: reference that mirrors the kernel's bf16/f32 math exactly.
    ref_bf16 = reference_forward_bf16(z, label, kparams).astype(jnp.float32)
    assert jnp.allclose(out_f32, ref_bf16, atol=2e-2), (
        "mismatch vs bf16-matched reference: max err "
        f"{float(jnp.max(jnp.abs(out_f32 - ref_bf16)))}")

    # Sanity check vs full-f32 PyTorch-equivalent forward (difference is only
    # bf16 weight/activation quantization; output bounded in [-1, 1]).
    ref_f32 = reference_forward_f32(z, label, params)
    assert jnp.allclose(out_f32, ref_f32, atol=1e-1), (
        "drift vs f32 reference too large: max err "
        f"{float(jnp.max(jnp.abs(out_f32 - ref_f32)))}")

    print("KERNEL_OK")
</pallas_src>

<mosaic_0001>
module attributes {stable_mosaic.version = 11 : i64} {
  func.func @generator_kernel(%arg0: memref<128x128xf32, #tpu.memory_space<vmem>>, %arg1: memref<128x512xbf16, #tpu.memory_space<vmem>>, %arg2: memref<512x512xbf16, #tpu.memory_space<vmem>>, %arg3: memref<1x7040xf32, #tpu.memory_space<vmem>>, %arg4: memref<512x1024xbf16, #tpu.memory_space<any>>, %arg5: memref<1024x896xbf16, #tpu.memory_space<any>>, %arg6: memref<128x896xbf16, #tpu.memory_space<vmem>>, %arg7: memref<512x1024xbf16, #tpu.memory_space<vmem>>, %arg8: memref<1024x896xbf16, #tpu.memory_space<vmem>>, %arg9: memref<2x!tpu.dma_semaphore, #tpu.memory_space<semaphore_mem>>) attributes {dimension_semantics = [], scalar_prefetch = 0 : i64, scratch_operands = 3 : i64, tpu.core_type = #tpu.core_type<tc>} {
    %c0_i32 = arith.constant 0 : i32
    %0 = tpu.memref_slice %arg9[%c0_i32] : memref<2x!tpu.dma_semaphore, #tpu.memory_space<semaphore_mem>> -> memref<1x!tpu.dma_semaphore, #tpu.memory_space<semaphore_mem>>
    %1 = tpu.memref_squeeze %0 : memref<1x!tpu.dma_semaphore, #tpu.memory_space<semaphore_mem>> -> memref<!tpu.dma_semaphore, #tpu.memory_space<semaphore_mem>>
    tpu.enqueue_dma source(%arg4 : memref<512x1024xbf16, #tpu.memory_space<any>>) target(%arg7 : memref<512x1024xbf16, #tpu.memory_space<vmem>>) target_semaphore(%1 : memref<!tpu.dma_semaphore, #tpu.memory_space<semaphore_mem>>)
    %c1_i32 = arith.constant 1 : i32
    %2 = tpu.memref_slice %arg9[%c1_i32] : memref<2x!tpu.dma_semaphore, #tpu.memory_space<semaphore_mem>> -> memref<1x!tpu.dma_semaphore, #tpu.memory_space<semaphore_mem>>
    %3 = tpu.memref_squeeze %2 : memref<1x!tpu.dma_semaphore, #tpu.memory_space<semaphore_mem>> -> memref<!tpu.dma_semaphore, #tpu.memory_space<semaphore_mem>>
    tpu.enqueue_dma source(%arg5 : memref<1024x896xbf16, #tpu.memory_space<any>>) target(%arg8 : memref<1024x896xbf16, #tpu.memory_space<vmem>>) target_semaphore(%3 : memref<!tpu.dma_semaphore, #tpu.memory_space<semaphore_mem>>)
    %c0 = arith.constant 0 : index
    %c0_0 = arith.constant 0 : index
    %4 = vector.load %arg0[%c0, %c0_0] : memref<128x128xf32, #tpu.memory_space<vmem>>, vector<128x128xf32>
    %5 = arith.truncf %4 : vector<128x128xf32> to vector<128x128xbf16>
    %c0_1 = arith.constant 0 : index
    %c0_2 = arith.constant 0 : index
    %6 = vector.load %arg1[%c0_1, %c0_2] : memref<128x512xbf16, #tpu.memory_space<vmem>>, vector<128x512xbf16>
    %cst = arith.constant dense<0.000000e+00> : vector<128x512xf32>
    %7 = tpu.matmul %5, %6, %cst {dimension_numbers = #tpu.dot_dimension_numbers<[1], [0], [0], [1], [0, 0, 1, 1], [], []>} : vector<128x128xbf16>, vector<128x512xbf16>, vector<128x512xf32> -> vector<128x512xf32>
    %c0_3 = arith.constant 0 : index
    %c0_4 = arith.constant 0 : index
    %8 = vector.load %arg3[%c0_3, %c0_4] : memref<1x7040xf32, #tpu.memory_space<vmem>>, vector<1x512xf32>
    %9 = vector.broadcast %8 : vector<1x512xf32> to vector<128x512xf32>
    %10 = arith.addf %7, %9 : vector<128x512xf32>
    %c0_5 = arith.constant 0 : index
    %c512 = arith.constant 512 : index
    %11 = vector.load %arg3[%c0_5, %c512] : memref<1x7040xf32, #tpu.memory_space<vmem>>, vector<1x512xf32>
    %c0_6 = arith.constant 0 : index
    %c1024 = arith.constant 1024 : index
    %12 = vector.load %arg3[%c0_6, %c1024] : memref<1x7040xf32, #tpu.memory_space<vmem>>, vector<1x512xf32>
    %cst_7 = arith.constant dense<0.000000e+00> : vector<512xf32>
    %13 = vector.multi_reduction <add>, %10, %cst_7 [0] : vector<128x512xf32> to vector<512xf32>
    %14 = vector.shape_cast %13 : vector<512xf32> to vector<1x512xf32>
    %cst_8 = arith.constant 1.280000e+02 : f32
    %15 = vector.broadcast %cst_8 : f32 to vector<1x512xf32>
    %16 = arith.divf %14, %15 : vector<1x512xf32>
    %17 = arith.mulf %10, %10 : vector<128x512xf32>
    %cst_9 = arith.constant dense<0.000000e+00> : vector<512xf32>
    %18 = vector.multi_reduction <add>, %17, %cst_9 [0] : vector<128x512xf32> to vector<512xf32>
    %19 = vector.shape_cast %18 : vector<512xf32> to vector<1x512xf32>
    %cst_10 = arith.constant 1.280000e+02 : f32
    %20 = vector.broadcast %cst_10 : f32 to vector<1x512xf32>
    %21 = arith.divf %19, %20 : vector<1x512xf32>
    %22 = arith.mulf %16, %16 : vector<1x512xf32>
    %23 = arith.subf %21, %22 : vector<1x512xf32>
    %cst_11 = arith.constant 0.000000e+00 : f32
    %24 = vector.broadcast %cst_11 : f32 to vector<1x512xf32>
    %25 = arith.maximumf %23, %24 : vector<1x512xf32>
    %cst_12 = arith.constant 9.99999974E-6 : f32
    %26 = vector.broadcast %cst_12 : f32 to vector<1x512xf32>
    %27 = arith.addf %25, %26 : vector<1x512xf32>
    %28 = math.rsqrt %27 : vector<1x512xf32>
    %29 = arith.mulf %11, %28 : vector<1x512xf32>
    %30 = arith.mulf %16, %29 : vector<1x512xf32>
    %31 = arith.subf %12, %30 : vector<1x512xf32>
    %32 = vector.broadcast %29 : vector<1x512xf32> to vector<128x512xf32>
    %33 = arith.mulf %10, %32 : vector<128x512xf32>
    %34 = vector.broadcast %31 : vector<1x512xf32> to vector<128x512xf32>
    %35 = arith.addf %33, %34 : vector<128x512xf32>
    %cst_13 = arith.constant 0.000000e+00 : f32
    %36 = vector.broadcast %cst_13 : f32 to vector<128x512xf32>
    %37 = arith.maximumf %35, %36 : vector<128x512xf32>
    %38 = arith.truncf %37 : vector<128x512xf32> to vector<128x512xbf16>
    %c0_14 = arith.constant 0 : index
    %c0_15 = arith.constant 0 : index
    %39 = vector.load %arg2[%c0_14, %c0_15] : memref<512x512xbf16, #tpu.memory_space<vmem>>, vector<512x512xbf16>
    %cst_16 = arith.constant dense<0.000000e+00> : vector<128x512xf32>
    %40 = tpu.matmul %38, %39, %cst_16 {dimension_numbers = #tpu.dot_dimension_numbers<[1], [0], [0], [1], [0, 0, 1, 1], [], []>} : vector<128x512xbf16>, vector<512x512xbf16>, vector<128x512xf32> -> vector<128x512xf32>
    %c0_17 = arith.constant 0 : index
    %c1536 = arith.constant 1536 : index
    %41 = vector.load %arg3[%c0_17, %c1536] : memref<1x7040xf32, #tpu.memory_space<vmem>>, vector<1x512xf32>
    %42 = vector.broadcast %41 : vector<1x512xf32> to vector<128x512xf32>
    %43 = arith.addf %40, %42 : vector<128x512xf32>
    %c0_18 = arith.constant 0 : index
    %c2048 = arith.constant 2048 : index
    %44 = vector.load %arg3[%c0_18, %c2048] : memref<1x7040xf32, #tpu.memory_space<vmem>>, vector<1x512xf32>
    %c0_19 = arith.constant 0 : index
    %c2560 = arith.constant 2560 : index
    %45 = vector.load %arg3[%c0_19, %c2560] : memref<1x7040xf32, #tpu.memory_space<vmem>>, vector<1x512xf32>
    %cst_20 = arith.constant dense<0.000000e+00> : vector<512xf32>
    %46 = vector.multi_reduction <add>, %43, %cst_20 [0] : vector<128x512xf32> to vector<512xf32>
    %47 = vector.shape_cast %46 : vector<512xf32> to vector<1x512xf32>
    %cst_21 = arith.constant 1.280000e+02 : f32
    %48 = vector.broadcast %cst_21 : f32 to vector<1x512xf32>
    %49 = arith.divf %47, %48 : vector<1x512xf32>
    %50 = arith.mulf %43, %43 : vector<128x512xf32>
    %cst_22 = arith.constant dense<0.000000e+00> : vector<512xf32>
    %51 = vector.multi_reduction <add>, %50, %cst_22 [0] : vector<128x512xf32> to vector<512xf32>
    %52 = vector.shape_cast %51 : vector<512xf32> to vector<1x512xf32>
    %cst_23 = arith.constant 1.280000e+02 : f32
    %53 = vector.broadcast %cst_23 : f32 to vector<1x512xf32>
    %54 = arith.divf %52, %53 : vector<1x512xf32>
    %55 = arith.mulf %49, %49 : vector<1x512xf32>
    %56 = arith.subf %54, %55 : vector<1x512xf32>
    %cst_24 = arith.constant 0.000000e+00 : f32
    %57 = vector.broadcast %cst_24 : f32 to vector<1x512xf32>
    %58 = arith.maximumf %56, %57 : vector<1x512xf32>
    %cst_25 = arith.constant 9.99999974E-6 : f32
    %59 = vector.broadcast %cst_25 : f32 to vector<1x512xf32>
    %60 = arith.addf %58, %59 : vector<1x512xf32>
    %61 = math.rsqrt %60 : vector<1x512xf32>
    %62 = arith.mulf %44, %61 : vector<1x512xf32>
    %63 = arith.mulf %49, %62 : vector<1x512xf32>
    %64 = arith.subf %45, %63 : vector<1x512xf32>
    %65 = vector.broadcast %62 : vector<1x512xf32> to vector<128x512xf32>
    %66 = arith.mulf %43, %65 : vector<128x512xf32>
    %67 = vector.broadcast %64 : vector<1x512xf32> to vector<128x512xf32>
    %68 = arith.addf %66, %67 : vector<128x512xf32>
    %cst_26 = arith.constant 0.000000e+00 : f32
    %69 = vector.broadcast %cst_26 : f32 to vector<128x512xf32>
    %70 = arith.maximumf %68, %69 : vector<128x512xf32>
    %c0_i32_27 = arith.constant 0 : i32
    %71 = tpu.memref_slice %arg9[%c0_i32_27] : memref<2x!tpu.dma_semaphore, #tpu.memory_space<semaphore_mem>> -> memref<1x!tpu.dma_semaphore, #tpu.memory_space<semaphore_mem>>
    %72 = tpu.memref_squeeze %71 : memref<1x!tpu.dma_semaphore, #tpu.memory_space<semaphore_mem>> -> memref<!tpu.dma_semaphore, #tpu.memory_space<semaphore_mem>>
    tpu.wait_dma2 semaphore(%72 : memref<!tpu.dma_semaphore, #tpu.memory_space<semaphore_mem>>) src(%arg4 : memref<512x1024xbf16, #tpu.memory_space<any>>) dst(%arg7 : memref<512x1024xbf16, #tpu.memory_space<vmem>>)
    %73 = arith.truncf %70 : vector<128x512xf32> to vector<128x512xbf16>
    %c0_28 = arith.constant 0 : index
    %c0_29 = arith.constant 0 : index
    %74 = vector.load %arg7[%c0_28, %c0_29] : memref<512x1024xbf16, #tpu.memory_space<vmem>>, vector<512x1024xbf16>
    %cst_30 = arith.constant dense<0.000000e+00> : vector<128x1024xf32>
    %75 = tpu.matmul %73, %74, %cst_30 {dimension_numbers = #tpu.dot_dimension_numbers<[1], [0], [0], [1], [0, 0, 1, 1], [], []>} : vector<128x512xbf16>, vector<512x1024xbf16>, vector<128x1024xf32> -> vector<128x1024xf32>
    %c0_31 = arith.constant 0 : index
    %c3072 = arith.constant 3072 : index
    %76 = vector.load %arg3[%c0_31, %c3072] : memref<1x7040xf32, #tpu.memory_space<vmem>>, vector<1x1024xf32>
    %77 = vector.broadcast %76 : vector<1x1024xf32> to vector<128x1024xf32>
    %78 = arith.addf %75, %77 : vector<128x1024xf32>
    %c0_32 = arith.constant 0 : index
    %c4096 = arith.constant 4096 : index
    %79 = vector.load %arg3[%c0_32, %c4096] : memref<1x7040xf32, #tpu.memory_space<vmem>>, vector<1x1024xf32>
    %c0_33 = arith.constant 0 : index
    %c5120 = arith.constant 5120 : index
    %80 = vector.load %arg3[%c0_33, %c5120] : memref<1x7040xf32, #tpu.memory_space<vmem>>, vector<1x1024xf32>
    %cst_34 = arith.constant dense<0.000000e+00> : vector<1024xf32>
    %81 = vector.multi_reduction <add>, %78, %cst_34 [0] : vector<128x1024xf32> to vector<1024xf32>
    %82 = vector.shape_cast %81 : vector<1024xf32> to vector<1x1024xf32>
    %cst_35 = arith.constant 1.280000e+02 : f32
    %83 = vector.broadcast %cst_35 : f32 to vector<1x1024xf32>
    %84 = arith.divf %82, %83 : vector<1x1024xf32>
    %85 = arith.mulf %78, %78 : vector<128x1024xf32>
    %cst_36 = arith.constant dense<0.000000e+00> : vector<1024xf32>
    %86 = vector.multi_reduction <add>, %85, %cst_36 [0] : vector<128x1024xf32> to vector<1024xf32>
    %87 = vector.shape_cast %86 : vector<1024xf32> to vector<1x1024xf32>
    %cst_37 = arith.constant 1.280000e+02 : f32
    %88 = vector.broadcast %cst_37 : f32 to vector<1x1024xf32>
    %89 = arith.divf %87, %88 : vector<1x1024xf32>
    %90 = arith.mulf %84, %84 : vector<1x1024xf32>
    %91 = arith.subf %89, %90 : vector<1x1024xf32>
    %cst_38 = arith.constant 0.000000e+00 : f32
    %92 = vector.broadcast %cst_38 : f32 to vector<1x1024xf32>
    %93 = arith.maximumf %91, %92 : vector<1x1024xf32>
    %cst_39 = arith.constant 9.99999974E-6 : f32
    %94 = vector.broadcast %cst_39 : f32 to vector<1x1024xf32>
    %95 = arith.addf %93, %94 : vector<1x1024xf32>
    %96 = math.rsqrt %95 : vector<1x1024xf32>
    %97 = arith.mulf %79, %96 : vector<1x1024xf32>
    %98 = arith.mulf %84, %97 : vector<1x1024xf32>
    %99 = arith.subf %80, %98 : vector<1x1024xf32>
    %100 = vector.broadcast %97 : vector<1x1024xf32> to vector<128x1024xf32>
    %101 = arith.mulf %78, %100 : vector<128x1024xf32>
    %102 = vector.broadcast %99 : vector<1x1024xf32> to vector<128x1024xf32>
    %103 = arith.addf %101, %102 : vector<128x1024xf32>
    %cst_40 = arith.constant 0.000000e+00 : f32
    %104 = vector.broadcast %cst_40 : f32 to vector<128x1024xf32>
    %105 = arith.maximumf %103, %104 : vector<128x1024xf32>
    %c1_i32_41 = arith.constant 1 : i32
    %106 = tpu.memref_slice %arg9[%c1_i32_41] : memref<2x!tpu.dma_semaphore, #tpu.memory_space<semaphore_mem>> -> memref<1x!tpu.dma_semaphore, #tpu.memory_space<semaphore_mem>>
    %107 = tpu.memref_squeeze %106 : memref<1x!tpu.dma_semaphore, #tpu.memory_space<semaphore_mem>> -> memref<!tpu.dma_semaphore, #tpu.memory_space<semaphore_mem>>
    tpu.wait_dma2 semaphore(%107 : memref<!tpu.dma_semaphore, #tpu.memory_space<semaphore_mem>>) src(%arg5 : memref<1024x896xbf16, #tpu.memory_space<any>>) dst(%arg8 : memref<1024x896xbf16, #tpu.memory_space<vmem>>)
    %108 = arith.truncf %105 : vector<128x1024xf32> to vector<128x1024xbf16>
    %c0_42 = arith.constant 0 : index
    %c0_43 = arith.constant 0 : index
    %109 = vector.load %arg8[%c0_42, %c0_43] : memref<1024x896xbf16, #tpu.memory_space<vmem>>, vector<1024x896xbf16>
    %cst_44 = arith.constant dense<0.000000e+00> : vector<128x896xf32>
    %110 = tpu.matmul %108, %109, %cst_44 {dimension_numbers = #tpu.dot_dimension_numbers<[1], [0], [0], [1], [0, 0, 1, 1], [], []>} : vector<128x1024xbf16>, vector<1024x896xbf16>, vector<128x896xf32> -> vector<128x896xf32>
    %c0_45 = arith.constant 0 : index
    %c6144 = arith.constant 6144 : index
    %111 = vector.load %arg3[%c0_45, %c6144] : memref<1x7040xf32, #tpu.memory_space<vmem>>, vector<1x896xf32>
    %112 = vector.broadcast %111 : vector<1x896xf32> to vector<128x896xf32>
    %113 = arith.addf %110, %112 : vector<128x896xf32>
    %114 = math.tanh %113 : vector<128x896xf32>
    %115 = arith.truncf %114 : vector<128x896xf32> to vector<128x896xbf16>
    %c0_46 = arith.constant 0 : index
    %c0_47 = arith.constant 0 : index
    %116 = vector.load %arg6[%c0_46, %c0_47] : memref<128x896xbf16, #tpu.memory_space<vmem>>, vector<128x896xbf16>
    tpu.vector_store %arg6[%c0_46, %c0_47], %115 {strides = array<i32>} : memref<128x896xbf16, #tpu.memory_space<vmem>>, vector<128x896xbf16>,
    return
  }
}

</mosaic_0001>

<bundles_post_ra>
// kernel: tpu_custom_call.1
= control target key start
LH: loop header
LB: loop body
LE: loop exit
PB: predicated region body
PF: predicated region fallthrough
CT: control target
= control target key end

     0   :  { %11 = vsyncpa [#allocation6], 0  ;;  %s15451_s0 = inlined_call_operand.hbm [shape: f32[128,128], index: 0, kind: input, shape index: {}]   ;;  %s15452_s1 = inlined_call_operand.hbm [shape: bf16[128,512], index: 1, kind: input, shape index: {}]   ;;  %s15453_s2 = inlined_call_operand.hbm [shape: bf16[512,512], index: 2, kind: input, shape index: {}]   ;;  %s15454_s3 = inlined_call_operand.hbm [shape: f32[1,7040], index: 3, kind: input, shape index: {}]   ;;  %s15455_s4 = inlined_call_operand.hbm [shape: bf16[512,1024], index: 4, kind: input, shape index: {}]   ;;  %s15456_s5 = inlined_call_operand.hbm [shape: bf16[1024,896], index: 5, kind: input, shape index: {}]   ;;  %s15457_s6 = inlined_call_operand.hbm [shape: bf16[128,896], index: 6, kind: output, shape index: {}]  }
   0x1   :  { %12 = vsyncpa [#allocation9], 0 }
   0x2   :  { %13 = vsyncpa [#allocation12], 0 }
   0x3   :  { %14 = vsyncpa [#allocation7], 0  ;;  %s10175_s21 = smov [#allocation8]   ;;  %s10053_s25 = scalar_lea.hbm %s15452_s1, 4096 }
   0x4   :  { %s32_s22 = sshll.u32 %s10175_s21, 4  ;;  %p10054_p0 = scmp.ne.s32.totalorder %s15452_s1, %s10053_s25  ;;  %s33_s22 = int_to_ptr.vmem [resolvable:$true] %s32_s22 }
   0x5   :  { %p10057_p1 = scmp.lt.u32.totalorder %s10053_s25, %s15452_s1 }
   0x7   :  { %p10059_p2 = pnand %p10057_p1, %p10054_p0 }
   0x9   :  { %10062 = shalt.err (!%p10059_p2)
}
   0xa   :  { %s10063_s30 = scalar_lea.vmem %s33_s22, 4096  ;;  %p10068_p4 = scmp.lt.s32.totalorder %s33_s22, %s33_s22 }
   0xb   :  { %p10064_p3 = scmp.ne.s32.totalorder %s33_s22, %s10063_s30  ;;  %p10069_p5 = scmp.lt.s32.totalorder %s10063_s30, %s10063_s30 }
   0xd   :  { %p10070_p6 = por %p10069_p5, %p10068_p4 }
   0xf   :  { %p10071_p7 = pnand %p10070_p6, %p10064_p3 }
  0x11   :  { %10074 = shalt.err (!%p10071_p7)
}
  0x12   :  { %s10176_s7 = smov 256   ;;  %s10177_s8 = smov 16  }
  0x13   :  { %38 = dma.hbm_to_vmem [thread:$0]  %s15452_s1, 4096, %s33_s22, [#allocation9], %s10176_s7, %s10176_s7, %s10177_s8  }
  0x14   :  { %s10178_s11 = smov [#allocation5]   ;;  %s10075_s15 = scalar_lea.hbm %s15451_s0, 2048 }
  0x15   :  { %s20_s12 = sshll.u32 %s10178_s11, 4  ;;  %p10076_p8 = scmp.ne.s32.totalorder %s15451_s0, %s10075_s15  ;;  %s21_s12 = int_to_ptr.vmem [resolvable:$true] %s20_s12 }
  0x16   :  { %p10079_p9 = scmp.lt.u32.totalorder %s10075_s15, %s15451_s0 }
  0x18   :  { %p10081_p10 = pnand %p10079_p9, %p10076_p8 }
  0x1a   :  { %10084 = shalt.err (!%p10081_p10)
}
  0x1b   :  { %s10085_s20 = scalar_lea.vmem %s21_s12, 2048  ;;  %p10090_p12 = scmp.lt.s32.totalorder %s21_s12, %s21_s12 }
  0x1c   :  { %p10086_p11 = scmp.ne.s32.totalorder %s21_s12, %s10085_s20  ;;  %p10091_p13 = scmp.lt.s32.totalorder %s10085_s20, %s10085_s20 }
  0x1e   :  { %p10092_p0 = por %p10091_p13, %p10090_p12 }
  0x20   :  { %p10093_p1 = pnand %p10092_p0, %p10086_p11 }
  0x22   :  { %10096 = shalt.err (!%p10093_p1)
}
  0x23   :  { %s10179_s1 = smov 128   ;;  %s10180_s21 = smov 8  }
  0x24   :  { %26 = dma.hbm_to_vmem [thread:$0]  %s15451_s0, 2048, %s21_s12, [#allocation6], %s10179_s1, %s10179_s1, %s10180_s21  }
  0x25   :  { %s10181_s24 = smov [#allocation10]   ;;  %s10182_s26 = smov [#allocation11]  }
  0x26   :  { %s44_s25 = sshll.u32 %s10181_s24, 4  ;;  %s57_s27 = sshll.u32 %s10182_s26, 4  ;;  %s45_s25 = int_to_ptr.vmem [resolvable:$true] %s44_s25  ;;  %s58_s27 = int_to_ptr.vmem [resolvable:$true] %s57_s27 }
  0x27   :  { %s10097_s30 = scalar_lea.hbm %s15453_s2, 16384 }
  0x28   :  { %p10098_p2 = scmp.ne.s32.totalorder %s15453_s2, %s10097_s30  ;;  %p10101_p3 = scmp.lt.u32.totalorder %s10097_s30, %s15453_s2 }
  0x2a   :  { %p10103_p4 = pnand %p10101_p3, %p10098_p2 }
  0x2c   :  { %10106 = shalt.err (!%p10103_p4)
}
  0x2d   :  { %s10107_s0 = scalar_lea.vmem %s45_s25, 16384  ;;  %p10112_p6 = scmp.lt.s32.totalorder %s45_s25, %s45_s25 }
  0x2e   :  { %p10108_p5 = scmp.ne.s32.totalorder %s45_s25, %s10107_s0  ;;  %p10113_p7 = scmp.lt.s32.totalorder %s10107_s0, %s10107_s0 }
  0x30   :  { %p10114_p8 = por %p10113_p7, %p10112_p6 }
  0x32   :  { %p10115_p9 = pnand %p10114_p8, %p10108_p5 }
  0x34   :  { %10118 = shalt.err (!%p10115_p9)
}
  0x35   :  { %50 = dma.hbm_to_vmem [thread:$0]  %s15453_s2, 16384, %s45_s25, [#allocation9], %s10176_s7, %s10176_s7, %s10177_s8  }
  0x36   :  { %s10119_s17 = scalar_lea.hbm %s15454_s3, 880 }
  0x37   :  { %p10120_p10 = scmp.ne.s32.totalorder %s15454_s3, %s10119_s17  ;;  %p10123_p11 = scmp.lt.u32.totalorder %s10119_s17, %s15454_s3 }
  0x39   :  { %p10125_p12 = pnand %p10123_p11, %p10120_p10 }
  0x3b   :  { %10128 = shalt.err (!%p10125_p12)
}
  0x3c   :  { %s10129_s23 = scalar_lea.vmem %s58_s27, 880  ;;  %s10133_s24 = scalar_lea.vmem %s58_s27, 896 }
  0x3d   :  { %p10130_p13 = scmp.ne.s32.totalorder %s58_s27, %s10129_s23  ;;  %p10134_p0 = scmp.lt.s32.totalorder %s58_s27, %s58_s27 }
  0x3e   :  { %p10135_p1 = scmp.lt.s32.totalorder %s10133_s24, %s10129_s23 }
  0x40   :  { %p10136_p2 = por %p10135_p1, %p10134_p0 }
  0x42   :  { %p10137_p3 = pnand %p10136_p2, %p10130_p13 }
  0x44   :  { %10140 = shalt.err (!%p10137_p3)
}
  0x45   :  { %60 = dma.hbm_to_vmem [thread:$0]  %s15454_s3, 880, %s58_s27, [#allocation12]  }
  0x46   :  { %10163 = dma.done.wait [#allocation6], 2048  }
  0x47   :  { %10164 = vsyncadd [#allocation6], 4294965248 }
  0x48   :  { %10165 = dma.done.wait [#allocation9], 20480  }
  0x49   :  { %10166 = vsyncadd [#allocation9], 4294946816 }
  0x4a   :  { %10167 = dma.done.wait [#allocation12], 880  }
  0x4b   :  { %10168 = vsyncadd [#allocation12], 4294966416  ;;  %s78_s8 = sld [smem:[#allocation0]]   ;;  %s10183_s25 = smov 1024   ;;  %v10184_v0 = vmov 0  }
  0x4c   :  { %90 = sst [smem:[#allocation15]] %s10183_s25  ;;  %414 = vmatprep.mubr.bf16.mxu0 %v10184_v0  ;;  %527 = vmatprep.mubr.bf16.mxu1 %v10184_v0  ;;  %s10185_s26 = smov [#allocation2]  }
  0x4d   :  { %92 = sst [smem:[#allocation15 + $0x1]] %s10183_s25  ;;  %s86_s28 = sshll.u32 %s10185_s26, 4  ;;  %s87_s28 = int_to_ptr.vmem [resolvable:$true] %s86_s28 }
  0x4e   :  { %94 = sst [smem:[#allocation15 + $0x2]] %s10180_s21  ;;  %s10186_s3 = smov 512  }
  0x4f   :  { %98 = sst [smem:[#allocation15 + $0x4]] %s10179_s1  ;;  %s10187_s27 = smov 64  }
  0x50   :  { %102 = sst [smem:[#allocation15 + $0x6]] %s10186_s3  ;;  %s10188_s30 = smov 2  }
  0x51   :  { %96 = sst [smem:[#allocation15 + $0x3]] %s10187_s27  ;;  %s8212_s29 = sshll.u32 %s78_s8, 26 }
  0x52   :  { %100 = sst [smem:[#allocation15 + $0x5]] %s10188_s30  ;;  %s8213_s9 = sadd.s32 134217728, %s8212_s29 }
  0x53   :  { %104 = sst [smem:[#allocation15 + $0x7]] %s10187_s27  ;;  %s10189_s10 = smov 4  }
  0x54   :  { %106 = sst [smem:[#allocation15 + $0x8]] %s10189_s10  ;;  %s10190_s11 = smov [#allocation4]  }
  0x55   :  { %s10191_s13 = smov [#allocation14]   ;;  %s10192_s12 = smov 896  }
  0x56   :  { %108 = dma.general %s15455_s4, 32768, %s87_s28, %s10190_s11, %s10191_s13, [#allocation15], %s8213_s9, 0  }
  0x57   :  { %125 = sst [smem:[#allocation17]] %s10192_s12  ;;  %s10193_s14 = smov 7  }
  0x58   :  { %127 = sst [smem:[#allocation17 + $0x1]] %s10192_s12  ;;  %s10194_s15 = smov [#allocation3]  }
  0x59   :  { %129 = sst [smem:[#allocation17 + $0x2]] %s10193_s14  ;;  %s121_s16 = sshll.u32 %s10194_s15, 4  ;;  %s122_s16 = int_to_ptr.vmem [resolvable:$true] %s121_s16 }
  0x5a   :  { %131 = sst [smem:[#allocation17 + $0x3]] %s10187_s27  ;;  %s10195_s17 = smov 448  }
  0x5b   :  { %133 = sst [smem:[#allocation17 + $0x4]] %s10179_s1  ;;  %s10196_s18 = smov [#allocation4 + $0x1]  }
  0x5c   :  { %135 = sst [smem:[#allocation17 + $0x5]] %s10188_s30  ;;  %s10197_s19 = smov [#allocation16]  }
  0x5d   :  { %137 = sst [smem:[#allocation17 + $0x6]] %s10195_s17 }
  0x5e   :  { %139 = sst [smem:[#allocation17 + $0x7]] %s10187_s27 }
  0x5f   :  { %141 = sst [smem:[#allocation17 + $0x8]] %s10189_s10 }
  0x60   :  { %143 = dma.general %s15456_s5, 57344, %s122_s16, %s10196_s18, %s10197_s19, [#allocation17], %s8213_s9, 0  }
  0x61   :  { %v9556_v1 = vld [vmem:[#allocation8 + $0x4] ss:$16 sps:$4 sm:$0xff]   ;;  %v9558_v2 = vld [vmem:[#allocation8 + $0xc] ss:$16 sps:$4 sm:$0xff]   ;;  %v9560_v3 = vld [vmem:[#allocation8] ss:$16 sps:$4 sm:$0xff]  }
  0x62   :  { %382 = vmatprep.subr.bf16.mxu0 %v9556_v1  ;;  %v9561_v4 = vld [vmem:[#allocation8 + $0x8] ss:$16 sps:$4 sm:$0xff]   ;;  %495 = vmatprep.subr.bf16.mxu1 %v9558_v2  ;;  %v9562_v5 = vld [vmem:[#allocation8 + $0x24] ss:$16 sps:$4 sm:$0xff]   ;;  %v9564_v6 = vld [vmem:[#allocation8 + $0x2c] ss:$16 sps:$4 sm:$0xff]  }
  0x63   :  { %383 = vmatpush1.bf16.msra.mxu0 %v9560_v3  ;;  %496 = vmatpush1.bf16.msra.mxu1 %v9561_v4  ;;  %v9566_v7 = vld [vmem:[#allocation8 + $0x20] ss:$16 sps:$4 sm:$0xff]   ;;  %v9567_v8 = vld [vmem:[#allocation8 + $0x28] ss:$16 sps:$4 sm:$0xff]   ;;  %v9568_v9 = vld [vmem:[#allocation8 + $0x44] ss:$16 sps:$4 sm:$0xff]  }
  0x64   :  { %384 = vmatprep.subr.bf16.mxu0 %v9562_v5  ;;  %497 = vmatprep.subr.bf16.mxu1 %v9564_v6  ;;  %v9570_v10 = vld [vmem:[#allocation8 + $0x4c] ss:$16 sps:$4 sm:$0xff]   ;;  %v9572_v11 = vld [vmem:[#allocation8 + $0x40] ss:$16 sps:$4 sm:$0xff]   ;;  %v9573_v12 = vld [vmem:[#allocation8 + $0x48] ss:$16 sps:$4 sm:$0xff]  }
  0x65   :  { %v9574_v13 = vld [vmem:[#allocation8 + $0x64] ss:$16 sps:$4 sm:$0xff]   ;;  %v9576_v14 = vld [vmem:[#allocation8 + $0x6c] ss:$16 sps:$4 sm:$0xff]   ;;  %v9578_v15 = vld [vmem:[#allocation8 + $0x60] ss:$16 sps:$4 sm:$0xff]  }
  0x66   :  { %v9579_v16 = vld [vmem:[#allocation8 + $0x68] ss:$16 sps:$4 sm:$0xff]   ;;  %v9580_v17 = vld [vmem:[#allocation8 + $0x84] ss:$16 sps:$4 sm:$0xff]   ;;  %v9582_v18 = vld [vmem:[#allocation8 + $0x8c] ss:$16 sps:$4 sm:$0xff]  }
  0x67   :  { %385 = vmatpush1.bf16.msra.mxu0 %v9566_v7  ;;  %498 = vmatpush1.bf16.msra.mxu1 %v9567_v8  ;;  %v9584_v19 = vld [vmem:[#allocation8 + $0x80] ss:$16 sps:$4 sm:$0xff]   ;;  %v9585_v20 = vld [vmem:[#allocation8 + $0x88] ss:$16 sps:$4 sm:$0xff]   ;;  %v9586_v21 = vld [vmem:[#allocation8 + $0xa4] ss:$16 sps:$4 sm:$0xff]  }
  0x68   :  { %386 = vmatprep.subr.bf16.mxu0 %v9568_v9  ;;  %499 = vmatprep.subr.bf16.mxu1 %v9570_v10  ;;  %v9588_v22 = vld [vmem:[#allocation8 + $0xac] ss:$16 sps:$4 sm:$0xff]   ;;  %v9590_v23 = vld [vmem:[#allocation8 + $0xa0] ss:$16 sps:$4 sm:$0xff]   ;;  %v9591_v24 = vld [vmem:[#allocation8 + $0xa8] ss:$16 sps:$4 sm:$0xff]  }
  0x69   :  { %v9592_v25 = vld [vmem:[#allocation8 + $0xc4] ss:$16 sps:$4 sm:$0xff]   ;;  %v9594_v26 = vld [vmem:[#allocation8 + $0xcc] ss:$16 sps:$4 sm:$0xff]   ;;  %v9596_v27 = vld [vmem:[#allocation8 + $0xc0] ss:$16 sps:$4 sm:$0xff]  }
  0x6a   :  { %v9597_v28 = vld [vmem:[#allocation8 + $0xc8] ss:$16 sps:$4 sm:$0xff]   ;;  %v9598_v29 = vld [vmem:[#allocation8 + $0xe4] ss:$16 sps:$4 sm:$0xff]   ;;  %v9600_v30 = vld [vmem:[#allocation8 + $0xec] ss:$16 sps:$4 sm:$0xff]  }
  0x6b   :  { %387 = vmatpush1.bf16.msra.mxu0 %v9572_v11  ;;  %500 = vmatpush1.bf16.msra.mxu1 %v9573_v12  ;;  %v9602_v31 = vld [vmem:[#allocation8 + $0xe0] ss:$16 sps:$4 sm:$0xff]   ;;  %v9603_v32 = vld [vmem:[#allocation8 + $0xe8] ss:$16 sps:$4 sm:$0xff]   ;;  %v9606_v57 = vld [vmem:[#allocation10 + $0x4] ss:$16 sps:$4 sm:$0xff]  }
  0x6c   :  { %388 = vmatprep.subr.bf16.mxu0 %v9574_v13  ;;  %501 = vmatprep.subr.bf16.mxu1 %v9576_v14  ;;  %v144_v33 = vld [vmem:[#allocation5] sm:$0xff]  ;;  %v145_v34 = vld [vmem:[#allocation5 + $0x8] sm:$0xff]  ;;  %v146_v36 = vld [vmem:[#allocation5 + $0x10] sm:$0xff] }
  0x6d   :  { %v160_v35 = vpack.c.bf16 %v145_v34, %v144_v33  ;;  %v147_v37 = vld [vmem:[#allocation5 + $0x18] sm:$0xff]  ;;  %v148_v39 = vld [vmem:[#allocation5 + $0x20] sm:$0xff]  ;;  %v149_v40 = vld [vmem:[#allocation5 + $0x28] sm:$0xff] }
  0x6e   :  { %v161_v38 = vpack.c.bf16 %v147_v37, %v146_v36  ;;  %v162_v41 = vpack.c.bf16 %v149_v40, %v148_v39  ;;  %v150_v42 = vld [vmem:[#allocation5 + $0x30] sm:$0xff]  ;;  %v151_v43 = vld [vmem:[#allocation5 + $0x38] sm:$0xff]  ;;  %v152_v45 = vld [vmem:[#allocation5 + $0x40] sm:$0xff]  ;;  %v202_v39 = vlaneseq }
  0x6f   :  { %389 = vmatpush1.bf16.msra.mxu0 %v9578_v15  ;;  %502 = vmatpush1.bf16.msra.mxu1 %v9579_v16  ;;  %v163_v44 = vpack.c.bf16 %v151_v43, %v150_v42  ;;  %v153_v46 = vld [vmem:[#allocation5 + $0x48] sm:$0xff]  ;;  %v154_v48 = vld [vmem:[#allocation5 + $0x50] sm:$0xff]  ;;  %v155_v49 = vld [vmem:[#allocation5 + $0x58] sm:$0xff] }
  0x70   :  { %390 = vmatprep.subr.bf16.mxu0 %v9580_v17  ;;  %503 = vmatprep.subr.bf16.mxu1 %v9582_v18  ;;  %v164_v47 = vpack.c.bf16 %v153_v46, %v152_v45  ;;  %v165_v50 = vpack.c.bf16 %v155_v49, %v154_v48  ;;  %v156_v51 = vld [vmem:[#allocation5 + $0x60] sm:$0xff]  ;;  %v157_v52 = vld [vmem:[#allocation5 + $0x68] sm:$0xff]  ;;  %v158_v54 = vld [vmem:[#allocation5 + $0x70] sm:$0xff] }
  0x71   :  { %v166_v53 = vpack.c.bf16 %v157_v52, %v156_v51  ;;  %v159_v55 = vld [vmem:[#allocation5 + $0x78] sm:$0xff]  ;;  %v9604_v59 = vld [vmem:[#allocation10] ss:$16 sps:$4 sm:$0xff]   ;;  %v9612_v61 = vld [vmem:[#allocation10 + $0x24] ss:$16 sps:$4 sm:$0xff]  }
  0x72   :  { %v167_v56 = vpack.c.bf16 %v159_v55, %v158_v54  ;;  %v9609_v58 = vld [vmem:[#allocation10 + $0xc] ss:$16 sps:$4 sm:$0xff]   ;;  %v9607_v60 = vld [vmem:[#allocation10 + $0x8] ss:$16 sps:$4 sm:$0xff]   ;;  %v9610_v63 = vld [vmem:[#allocation10 + $0x20] ss:$16 sps:$4 sm:$0xff]  }
  0x73   :  { %391 = vmatpush1.bf16.msra.mxu0 %v9584_v19  ;;  %504 = vmatpush1.bf16.msra.mxu1 %v9585_v20  ;;  %v9615_v62 = vld [vmem:[#allocation10 + $0x2c] ss:$16 sps:$4 sm:$0xff]   ;;  %v9613_v1 = vld [vmem:[#allocation10 + $0x28] ss:$16 sps:$4 sm:$0xff]   ;;  %v9616_v3 = vld [vmem:[#allocation10 + $0x40] ss:$16 sps:$4 sm:$0xff]  }
  0x74   :  { %392 = vmatprep.subr.bf16.mxu0 %v9586_v21  ;;  %505 = vmatprep.subr.bf16.mxu1 %v9588_v22  ;;  %v9621_v2 = vld [vmem:[#allocation10 + $0x4c] ss:$16 sps:$4 sm:$0xff]   ;;  %v9619_v4 = vld [vmem:[#allocation10 + $0x48] ss:$16 sps:$4 sm:$0xff]   ;;  %v9624_v5 = vld [vmem:[#allocation10 + $0x64] ss:$16 sps:$4 sm:$0xff]  }
  0x75   :  { %v9627_v6 = vld [vmem:[#allocation10 + $0x6c] ss:$16 sps:$4 sm:$0xff]   ;;  %v9622_v7 = vld [vmem:[#allocation10 + $0x60] ss:$16 sps:$4 sm:$0xff]   ;;  %v9625_v8 = vld [vmem:[#allocation10 + $0x68] ss:$16 sps:$4 sm:$0xff]  }
  0x76   :  { %v9630_v9 = vld [vmem:[#allocation10 + $0x84] ss:$16 sps:$4 sm:$0xff]   ;;  %v9633_v10 = vld [vmem:[#allocation10 + $0x8c] ss:$16 sps:$4 sm:$0xff]   ;;  %v9628_v11 = vld [vmem:[#allocation10 + $0x80] ss:$16 sps:$4 sm:$0xff]  }
  0x77   :  { %393 = vmatpush1.bf16.msra.mxu0 %v9590_v23  ;;  %506 = vmatpush1.bf16.msra.mxu1 %v9591_v24  ;;  %v9631_v12 = vld [vmem:[#allocation10 + $0x88] ss:$16 sps:$4 sm:$0xff]   ;;  %v9636_v13 = vld [vmem:[#allocation10 + $0xa4] ss:$16 sps:$4 sm:$0xff]   ;;  %v9639_v14 = vld [vmem:[#allocation10 + $0xac] ss:$16 sps:$4 sm:$0xff]  }
  0x78   :  { %394 = vmatprep.subr.bf16.mxu0 %v9592_v25  ;;  %507 = vmatprep.subr.bf16.mxu1 %v9594_v26  ;;  %v9634_v15 = vld [vmem:[#allocation10 + $0xa0] ss:$16 sps:$4 sm:$0xff]   ;;  %v9637_v16 = vld [vmem:[#allocation10 + $0xa8] ss:$16 sps:$4 sm:$0xff]   ;;  %v9642_v17 = vld [vmem:[#allocation10 + $0xc4] ss:$16 sps:$4 sm:$0xff]  }
  0x79   :  { %v9645_v18 = vld [vmem:[#allocation10 + $0xcc] ss:$16 sps:$4 sm:$0xff]   ;;  %v9640_v19 = vld [vmem:[#allocation10 + $0xc0] ss:$16 sps:$4 sm:$0xff]   ;;  %v9643_v20 = vld [vmem:[#allocation10 + $0xc8] ss:$16 sps:$4 sm:$0xff]  }
  0x7a   :  { %v9648_v21 = vld [vmem:[#allocation10 + $0xe4] ss:$16 sps:$4 sm:$0xff]   ;;  %v9651_v22 = vld [vmem:[#allocation10 + $0xec] ss:$16 sps:$4 sm:$0xff]   ;;  %v9646_v23 = vld [vmem:[#allocation10 + $0xe0] ss:$16 sps:$4 sm:$0xff]  }
  0x7b   :  { %395 = vmatpush1.bf16.msra.mxu0 %v9596_v27  ;;  %508 = vmatpush1.bf16.msra.mxu1 %v9597_v28  ;;  %v9649_v24 = vld [vmem:[#allocation10 + $0xe8] ss:$16 sps:$4 sm:$0xff]   ;;  %v9654_v25 = vld [vmem:[#allocation10 + $0x104] ss:$16 sps:$4 sm:$0xff]   ;;  %v9657_v26 = vld [vmem:[#allocation10 + $0x10c] ss:$16 sps:$4 sm:$0xff]  }
  0x7c   :  { %396 = vmatprep.subr.bf16.mxu0 %v9598_v29  ;;  %509 = vmatprep.subr.bf16.mxu1 %v9600_v30  ;;  %v9652_v27 = vld [vmem:[#allocation10 + $0x100] ss:$16 sps:$4 sm:$0xff]   ;;  %v9655_v28 = vld [vmem:[#allocation10 + $0x108] ss:$16 sps:$4 sm:$0xff]   ;;  %v9660_v29 = vld [vmem:[#allocation10 + $0x124] ss:$16 sps:$4 sm:$0xff]  }
  0x7d   :  { %v9663_v30 = vld [vmem:[#allocation10 + $0x12c] ss:$16 sps:$4 sm:$0xff]   ;;  %v9666_v33 = vld [vmem:[#allocation10 + $0x144] ss:$16 sps:$4 sm:$0xff]   ;;  %v9667_v36 = vld [vmem:[#allocation10 + $0x148] ss:$16 sps:$4 sm:$0xff]  }
  0x7e   :  { %v9669_v34 = vld [vmem:[#allocation10 + $0x14c] ss:$16 sps:$4 sm:$0xff]   ;;  %v9672_v37 = vld [vmem:[#allocation10 + $0x164] ss:$16 sps:$4 sm:$0xff]   ;;  %v9670_v40 = vld [vmem:[#allocation10 + $0x160] ss:$16 sps:$4 sm:$0xff]  }
  0x7f   :  { %397 = vmatpush1.bf16.msra.mxu0 %v9602_v31  ;;  %510 = vmatpush1.bf16.msra.mxu1 %v9603_v32  ;;  %v9658_v31 = vld [vmem:[#allocation10 + $0x120] ss:$16 sps:$4 sm:$0xff]   ;;  %v9661_v32 = vld [vmem:[#allocation10 + $0x128] ss:$16 sps:$4 sm:$0xff]   ;;  %v9678_v42 = vld [vmem:[#allocation10 + $0x184] ss:$16 sps:$4 sm:$0xff]  }
  0x80   :  { %1991 = vmatprep.subr.bf16.mxu0 %v9606_v57  ;;  %2217 = vmatprep.subr.bf16.mxu1 %v9609_v58  ;;  %v9681_v43 = vld [vmem:[#allocation10 + $0x18c] ss:$16 sps:$4 sm:$0xff]   ;;  %v9676_v45 = vld [vmem:[#allocation10 + $0x180] ss:$16 sps:$4 sm:$0xff]   ;;  %v9679_v46 = vld [vmem:[#allocation10 + $0x188] ss:$16 sps:$4 sm:$0xff]  }
  0x81   :  { %v9687_v48 = vld [vmem:[#allocation10 + $0x1ac] ss:$16 sps:$4 sm:$0xff]   ;;  %v9682_v51 = vld [vmem:[#allocation10 + $0x1a0] ss:$16 sps:$4 sm:$0xff]   ;;  %v9685_v52 = vld [vmem:[#allocation10 + $0x1a8] ss:$16 sps:$4 sm:$0xff]  }
  0x82   :  { %415 = vmatmul.mubr.bf16.vlgmr.msra.gmra.mrb[0].mxu0 %v160_v35  ;;  %528 = vmatmul.mubr.bf16.vlgmr.msra.gmra.mrb[0].mxu1 %v160_v35  ;;  %v9664_v35 = vld [vmem:[#allocation10 + $0x140] ss:$16 sps:$4 sm:$0xff]   ;;  %v9690_v57 = vld [vmem:[#allocation10 + $0x1c4] ss:$16 sps:$4 sm:$0xff]   ;;  %v9691_v58 = vld [vmem:[#allocation10 + $0x1c8] ss:$16 sps:$4 sm:$0xff]  }
  0x83   :  { %424 = vmatprep.mubr.bf16.mxu0 %v10184_v0  ;;  %537 = vmatprep.mubr.bf16.mxu1 %v10184_v0 }
  0x84   :  { %1992 = vmatpush1.bf16.msra.mxu0 %v9604_v59  ;;  %2218 = vmatpush1.bf16.msra.mxu1 %v9607_v60 }
  0x85   :  { %1993 = vmatprep.subr.bf16.mxu0 %v9612_v61  ;;  %2219 = vmatprep.subr.bf16.mxu1 %v9615_v62  ;;  %v9693_v61 = vld [vmem:[#allocation10 + $0x1cc] ss:$16 sps:$4 sm:$0xff]   ;;  %v9696_v62 = vld [vmem:[#allocation10 + $0x1e4] ss:$16 sps:$4 sm:$0xff]  }
  0x88   :  { %1994 = vmatpush1.bf16.msra.mxu0 %v9610_v63  ;;  %2220 = vmatpush1.bf16.msra.mxu1 %v9613_v1 }
  0x89   :  { %2221 = vmatprep.subr.bf16.mxu1 %v9621_v2 }
  0x8a   :  { %425 = vmatmul.mubr.bf16.gmra.mrb[4].mxu0 %v161_v38  ;;  %538 = vmatmul.mubr.bf16.gmra.mrb[4].mxu1 %v161_v38  ;;  %v9675_v38 = vld [vmem:[#allocation10 + $0x16c] ss:$16 sps:$4 sm:$0xff]  }
  0x8b   :  { %434 = vmatprep.mubr.bf16.mxu0 %v10184_v0  ;;  %547 = vmatprep.mubr.bf16.mxu1 %v10184_v0 }
  0x8c   :  { %2222 = vmatpush1.bf16.msra.mxu1 %v9619_v4  ;;  %v9694_v4 = vld [vmem:[#allocation10 + $0x1e0] ss:$16 sps:$4 sm:$0xff]  }
  0x8d   :  { %2223 = vmatprep.subr.bf16.mxu1 %v9627_v6 }
  0x90   :  { %2224 = vmatpush1.bf16.msra.mxu1 %v9625_v8 }
  0x91   :  { %2225 = vmatprep.subr.bf16.mxu1 %v9633_v10 }
  0x92   :  { %435 = vmatmul.mubr.bf16.gmra.mrb[8].mxu0 %v162_v41  ;;  %548 = vmatmul.mubr.bf16.gmra.mrb[8].mxu1 %v162_v41  ;;  %v9673_v41 = vld [vmem:[#allocation10 + $0x168] ss:$16 sps:$4 sm:$0xff]  }
  0x93   :  { %444 = vmatprep.mubr.bf16.mxu0 %v10184_v0  ;;  %557 = vmatprep.mubr.bf16.mxu1 %v10184_v0 }
  0x94   :  { %2226 = vmatpush1.bf16.msra.mxu1 %v9631_v12 }
  0x95   :  { %2227 = vmatprep.subr.bf16.mxu1 %v9639_v14 }
  0x98   :  { %2228 = vmatpush1.bf16.msra.mxu1 %v9637_v16 }
  0x99   :  { %2229 = vmatprep.subr.bf16.mxu1 %v9645_v18 }
  0x9a   :  { %445 = vmatmul.mubr.bf16.gmra.mrb[12].mxu0 %v163_v44  ;;  %558 = vmatmul.mubr.bf16.gmra.mrb[12].mxu1 %v163_v44  ;;  %v10319_v44 = vshrl.u32 %v202_v39, 7 }
  0x9b   :  { %454 = vmatprep.mubr.bf16.mxu0 %v10184_v0  ;;  %567 = vmatprep.mubr.bf16.mxu1 %v10184_v0 }
  0x9c   :  { %2230 = vmatpush1.bf16.msra.mxu1 %v9643_v20  ;;  %15824 = vst [vmem:[#allocation24_spill] sm:$0xff] %v10319_v44  ;;  %v10322_v49 = vsub.s32 0, %v10319_v44  ;;  %v10328_v54 = vsub.s32 1, %v10319_v44  ;;  %v10331_v55 = vsub.s32 3, %v10319_v44 }
  0x9d   :  { %2231 = vmatprep.subr.bf16.mxu1 %v9651_v22  ;;  %v9702_v22 = vld [vmem:[#allocation10 + $0x204] ss:$16 sps:$4 sm:$0xff]  }
  0x9e   :  { %15825 = vst [vmem:[#allocation25_spill] sm:$0xff] %v10322_v49  ;;  %15827 = vst [vmem:[#allocation27_spill] sm:$0xff] %v10328_v54 }
  0x9f   :  { %15828 = vst [vmem:[#allocation28_spill] sm:$0xff] %v10331_v55 }
  0xa0   :  { %2232 = vmatpush1.bf16.msra.mxu1 %v9649_v24 }
  0xa1   :  { %2233 = vmatprep.subr.bf16.mxu1 %v9657_v26 }
  0xa2   :  { %455 = vmatmul.mubr.bf16.gmra.mrb[16].mxu0 %v164_v47  ;;  %568 = vmatmul.mubr.bf16.gmra.mrb[16].mxu1 %v164_v47  ;;  %v9684_v47 = vld [vmem:[#allocation10 + $0x1a4] ss:$16 sps:$4 sm:$0xff]  }
  0xa3   :  { %464 = vmatprep.mubr.bf16.mxu0 %v10184_v0  ;;  %577 = vmatprep.mubr.bf16.mxu1 %v10184_v0 }
  0xa4   :  { %2234 = vmatpush1.bf16.msra.mxu1 %v9655_v28 }
  0xa5   :  { %2235 = vmatprep.subr.bf16.mxu1 %v9663_v30 }
  0xa8   :  { %2236 = vmatpush1.bf16.msra.mxu1 %v9661_v32 }
  0xa9   :  { %2237 = vmatprep.subr.bf16.mxu1 %v9669_v34 }
  0xaa   :  { %465 = vmatmul.mubr.bf16.gmra.mrb[20].mxu0 %v165_v50  ;;  %578 = vmatmul.mubr.bf16.gmra.mrb[20].mxu1 %v165_v50  ;;  %v10325_v50 = vsub.s32 2, %v10319_v44 }
  0xab   :  { %474 = vmatprep.mubr.bf16.mxu0 %v10184_v0  ;;  %587 = vmatprep.mubr.bf16.mxu1 %v10184_v0 }
  0xac   :  { %2238 = vmatpush1.bf16.msra.mxu1 %v9667_v36  ;;  %15826 = vst [vmem:[#allocation26_spill] sm:$0xff] %v10325_v50 }
  0xad   :  { %2239 = vmatprep.subr.bf16.mxu1 %v9675_v38 }
  0xb0   :  { %2240 = vmatpush1.bf16.msra.mxu1 %v9673_v41 }
  0xb1   :  { %2241 = vmatprep.subr.bf16.mxu1 %v9681_v43 }
  0xb2   :  { %475 = vmatmul.mubr.bf16.gmra.mrb[24].mxu0 %v166_v53  ;;  %588 = vmatmul.mubr.bf16.gmra.mrb[24].mxu1 %v166_v53  ;;  %v200_v53 = vld [vmem:[#allocation11] sm:$0xf] }
  0xb3   :  { %484 = vmatprep.mubr.bf16.mxu0 %v10184_v0  ;;  %597 = vmatprep.mubr.bf16.mxu1 %v10184_v0  ;;  %v9618_v0 = vld [vmem:[#allocation10 + $0x44] ss:$16 sps:$4 sm:$0xff]   ;;  %v10334_v59 = vrot.slane %v200_v53, %v10322_v49  ;;  %v10337_v60 = vrot.slane %v200_v53, %v10325_v50  ;;  %v10340_v63 = vrot.slane %v200_v53, %v10328_v54 }
  0xb4   :  { %1995 = vmatprep.subr.bf16.mxu0 %v9618_v0  ;;  %2242 = vmatpush1.bf16.msra.mxu1 %v9679_v46  ;;  %v10343_v1 = vrot.slane %v200_v53, %v10331_v55  ;;  %v9699_v0 = vld [vmem:[#allocation10 + $0x1ec] ss:$16 sps:$4 sm:$0xff]  }
  0xb5   :  { %1996 = vmatpush1.bf16.msra.mxu0 %v9616_v3  ;;  %2243 = vmatprep.subr.bf16.mxu1 %v9687_v48 }
  0xb6   :  { %1997 = vmatprep.subr.bf16.mxu0 %v9624_v5 }
  0xb8   :  { %2244 = vmatpush1.bf16.msra.mxu1 %v9685_v52 }
  0xb9   :  { %1998 = vmatpush1.bf16.msra.mxu0 %v9622_v7  ;;  %2245 = vmatprep.subr.bf16.mxu1 %v9693_v61  ;;  %v9697_v7 = vld [vmem:[#allocation10 + $0x1e8] ss:$16 sps:$4 sm:$0xff]  }
  0xba   :  { %485 = vmatmul.mubr.bf16.gmra.mrb[28].mxu0 %v167_v56  ;;  %598 = vmatmul.mubr.bf16.gmra.mrb[28].mxu1 %v167_v56  ;;  %v9688_v56 = vld [vmem:[#allocation10 + $0x1c0] ss:$16 sps:$4 sm:$0xff]  }
  0xbb   :  { %1999 = vmatprep.subr.bf16.mxu0 %v9630_v9 }
  0xbc   :  { %2246 = vmatpush1.bf16.msra.mxu1 %v9691_v58 }
  0xbd   :  { %2000 = vmatpush1.bf16.msra.mxu0 %v9628_v11  ;;  %2247 = vmatprep.subr.bf16.mxu1 %v9699_v0 }
  0xbe   :  { %2001 = vmatprep.subr.bf16.mxu0 %v9636_v13 }
  0xc0   :  { %2248 = vmatpush1.bf16.msra.mxu1 %v9697_v7 }
  0xc1   :  { %2002 = vmatpush1.bf16.msra.mxu0 %v9634_v15 }
  0xc2   :  { %2003 = vmatprep.subr.bf16.mxu0 %v9642_v17 }
  0xc5   :  { %2004 = vmatpush1.bf16.msra.mxu0 %v9640_v19 }
  0xc6   :  { %2005 = vmatprep.subr.bf16.mxu0 %v9648_v21 }
  0xc9   :  { %2006 = vmatpush1.bf16.msra.mxu0 %v9646_v23 }
  0xca   :  { %2007 = vmatprep.subr.bf16.mxu0 %v9654_v25  ;;  %v9705_v25 = vld [vmem:[#allocation10 + $0x20c] ss:$16 sps:$4 sm:$0xff]  }
  0xcb   :  { %2330 = vmatprep.subr.bf16.mxu1 %v9705_v25 }
  0xcd   :  { %2008 = vmatpush1.bf16.msra.mxu0 %v9652_v27 }
  0xce   :  { %2009 = vmatprep.subr.bf16.mxu0 %v9660_v29 }
  0xd1   :  { %2010 = vmatpush1.bf16.msra.mxu0 %v9658_v31 }
  0xd2   :  { %2011 = vmatprep.subr.bf16.mxu0 %v9666_v33 }
  0xd5   :  { %2012 = vmatpush1.bf16.msra.mxu0 %v9664_v35 }
  0xd6   :  { %2013 = vmatprep.subr.bf16.mxu0 %v9672_v37 }
  0xd9   :  { %2014 = vmatpush1.bf16.msra.mxu0 %v9670_v40 }
  0xda   :  { %2015 = vmatprep.subr.bf16.mxu0 %v9678_v42 }
  0xdd   :  { %2016 = vmatpush1.bf16.msra.mxu0 %v9676_v45 }
  0xde   :  { %2017 = vmatprep.subr.bf16.mxu0 %v9684_v47 }
  0xe1   :  { %2018 = vmatpush1.bf16.msra.mxu0 %v9682_v51 }
  0xe2   :  { %2019 = vmatprep.subr.bf16.mxu0 %v9690_v57 }
  0xe5   :  { %2020 = vmatpush1.bf16.msra.mxu0 %v9688_v56 }
  0xe6   :  { %2021 = vmatprep.subr.bf16.mxu0 %v9696_v62 }
  0xe9   :  { %2022 = vmatpush1.bf16.msra.mxu0 %v9694_v4 }
  0xea   :  { %2104 = vmatprep.subr.bf16.mxu0 %v9702_v22 }
 0x155   :  { %v416_v2 = vpop.f32.mrb[0].mxu0  ;;  %v529_v3 = vpop.f32.mrb[0].mxu1 }
 0x156   :  { %v418_v5 = vpop.f32.mrb[1].mxu0  ;;  %v531_v6 = vpop.f32.mrb[1].mxu1  ;;  %v10346_v8 = vadd.f32 %v416_v2, %v10334_v59  ;;  %v10349_v9 = vadd.f32 %v529_v3, %v10337_v60 }
 0x157   :  { %v420_v10 = vpop.f32.mrb[2].mxu0  ;;  %v533_v11 = vpop.f32.mrb[2].mxu1  ;;  %v10352_v12 = vadd.f32 %v418_v5, %v10340_v63  ;;  %v10355_v13 = vadd.f32 %v531_v6, %v10343_v1 }
 0x158   :  { %15829 = vst [vmem:[#allocation29_spill] sm:$0xff] %v10349_v9  ;;  %v10358_v14 = vadd.f32 %v420_v10, %v10334_v59  ;;  %v10361_v15 = vadd.f32 %v533_v11, %v10337_v60  ;;  %v422_v16 = vpop.f32.mrb[3].mxu0  ;;  %v535_v17 = vpop.f32.mrb[3].mxu1  ;;  %v699_v26 = vmul.f32 %v10346_v8, %v10346_v8  ;;  %v701_v27 = vmul.f32 %v10349_v9, %v10349_v9 }
 0x159   :  { %15830 = vst [vmem:[#allocation30_spill] sm:$0xff] %v10355_v13  ;;  %v10364_v18 = vadd.f32 %v422_v16, %v10340_v63  ;;  %v10367_v19 = vadd.f32 %v535_v17, %v10343_v1  ;;  %v700_v28 = vmul.f32 %v10352_v12, %v10352_v12  ;;  %v702_v29 = vmul.f32 %v10355_v13, %v10355_v13 }
 0x15a   :  { %15831 = vst [vmem:[#allocation31_spill] sm:$0xff] %v10361_v15  ;;  %v703_v20 = vmul.f32 %v10358_v14, %v10358_v14  ;;  %v705_v21 = vmul.f32 %v10361_v15, %v10361_v15  ;;  %v610_v30 = vadd.f32 %v10358_v14, %v10346_v8  ;;  %v652_v31 = vadd.f32 %v10361_v15, %v10349_v9 }
 0x15b   :  { %15832 = vst [vmem:[#allocation32_spill] sm:$0xff] %v10367_v19  ;;  %v704_v23 = vmul.f32 %v10364_v18, %v10364_v18  ;;  %v706_v24 = vmul.f32 %v10367_v19, %v10367_v19  ;;  %v631_v32 = vadd.f32 %v10364_v18, %v10352_v12  ;;  %v673_v33 = vadd.f32 %v10367_v19, %v10355_v13 }
 0x15c   :  { %v763_v36 = vadd.f32 %v703_v20, %v699_v26  ;;  %v805_v37 = vadd.f32 %v705_v21, %v701_v27 }
 0x15d   :  { %v426_v34 = vpop.f32.mrb[4].mxu0  ;;  %v539_v35 = vpop.f32.mrb[4].mxu1  ;;  %v784_v42 = vadd.f32 %v704_v23, %v700_v28  ;;  %v826_v43 = vadd.f32 %v706_v24, %v702_v29 }
 0x15e   :  { %v10394_v38 = vadd.f32 %v426_v34, %v10334_v59  ;;  %v10397_v39 = vadd.f32 %v539_v35, %v10337_v60  ;;  %v428_v40 = vpop.f32.mrb[5].mxu0  ;;  %v541_v41 = vpop.f32.mrb[5].mxu1 }
 0x15f   :  { %v10400_v45 = vadd.f32 %v428_v40, %v10340_v63  ;;  %v10403_v46 = vadd.f32 %v541_v41, %v10343_v1  ;;  %v430_v47 = vpop.f32.mrb[6].mxu0  ;;  %v543_v48 = vpop.f32.mrb[6].mxu1 }
 0x160   :  { %15833 = vst [vmem:[#allocation33_spill] sm:$0xff] %v10397_v39  ;;  %v611_v51 = vadd.f32 %v610_v30, %v10394_v38  ;;  %v707_v52 = vmul.f32 %v10394_v38, %v10394_v38  ;;  %v653_v53 = vadd.f32 %v652_v31, %v10397_v39  ;;  %v709_v56 = vmul.f32 %v10397_v39, %v10397_v39  ;;  %v432_v57 = vpop.f32.mrb[7].mxu0  ;;  %v545_v58 = vpop.f32.mrb[7].mxu1 }
 0x161   :  { %15834 = vst [vmem:[#allocation34_spill] sm:$0xff] %v10403_v46  ;;  %v632_v61 = vadd.f32 %v631_v32, %v10400_v45  ;;  %v708_v62 = vmul.f32 %v10400_v45, %v10400_v45  ;;  %v674_v0 = vadd.f32 %v673_v33, %v10403_v46  ;;  %v710_v2 = vmul.f32 %v10403_v46, %v10403_v46 }
 0x162   :  { %v764_v3 = vadd.f32 %v763_v36, %v707_v52  ;;  %v806_v4 = vadd.f32 %v805_v37, %v709_v56  ;;  %v10418_v5 = vadd.f32 %v430_v47, %v10334_v59  ;;  %v10421_v6 = vadd.f32 %v543_v48, %v10337_v60 }
 0x163   :  { %v785_v7 = vadd.f32 %v784_v42, %v708_v62  ;;  %v827_v10 = vadd.f32 %v826_v43, %v710_v2  ;;  %v10424_v11 = vadd.f32 %v432_v57, %v10340_v63  ;;  %v10427_v16 = vadd.f32 %v545_v58, %v10343_v1 }
 0x164   :  { %15835 = vst [vmem:[#allocation35_spill] sm:$0xff] %v10421_v6  ;;  %v612_v17 = vadd.f32 %v611_v51, %v10418_v5  ;;  %v711_v20 = vmul.f32 %v10418_v5, %v10418_v5  ;;  %v654_v21 = vadd.f32 %v653_v53, %v10421_v6  ;;  %v713_v22 = vmul.f32 %v10421_v6, %v10421_v6 }
 0x165   :  { %15836 = vst [vmem:[#allocation36_spill] sm:$0xff] %v10427_v16  ;;  %v633_v23 = vadd.f32 %v632_v61, %v10424_v11  ;;  %v712_v24 = vmul.f32 %v10424_v11, %v10424_v11  ;;  %v675_v25 = vadd.f32 %v674_v0, %v10427_v16  ;;  %v714_v26 = vmul.f32 %v10427_v16, %v10427_v16  ;;  %v436_v27 = vpop.f32.mrb[8].mxu0  ;;  %v549_v28 = vpop.f32.mrb[8].mxu1 }
 0x166   :  { %v765_v29 = vadd.f32 %v764_v3, %v711_v20  ;;  %v807_v30 = vadd.f32 %v806_v4, %v713_v22  ;;  %v10442_v31 = vadd.f32 %v436_v27, %v10334_v59  ;;  %v10445_v32 = vadd.f32 %v549_v28, %v10337_v60  ;;  %v438_v33 = vpop.f32.mrb[9].mxu0  ;;  %v551_v34 = vpop.f32.mrb[9].mxu1 }
 0x167   :  { %v786_v35 = vadd.f32 %v785_v7, %v712_v24  ;;  %v828_v36 = vadd.f32 %v827_v10, %v714_v26  ;;  %v10448_v37 = vadd.f32 %v438_v33, %v10340_v63  ;;  %v10451_v40 = vadd.f32 %v551_v34, %v10343_v1  ;;  %v440_v41 = vpop.f32.mrb[10].mxu0  ;;  %v553_v42 = vpop.f32.mrb[10].mxu1 }
 0x168   :  { %15837 = vst [vmem:[#allocation37_spill] sm:$0xff] %v10445_v32  ;;  %v613_v43 = vadd.f32 %v612_v17, %v10442_v31  ;;  %v715_v47 = vmul.f32 %v10442_v31, %v10442_v31  ;;  %v655_v48 = vadd.f32 %v654_v21, %v10445_v32  ;;  %v717_v51 = vmul.f32 %v10445_v32, %v10445_v32  ;;  %v442_v52 = vpop.f32.mrb[11].mxu0  ;;  %v555_v53 = vpop.f32.mrb[11].mxu1 }
 0x169   :  { %15838 = vst [vmem:[#allocation38_spill] sm:$0xff] %v10451_v40  ;;  %v634_v56 = vadd.f32 %v633_v23, %v10448_v37  ;;  %v716_v57 = vmul.f32 %v10448_v37, %v10448_v37  ;;  %v676_v58 = vadd.f32 %v675_v25, %v10451_v40  ;;  %v718_v61 = vmul.f32 %v10451_v40, %v10451_v40 }
 0x16a   :  { %v766_v62 = vadd.f32 %v765_v29, %v715_v47  ;;  %v808_v0 = vadd.f32 %v807_v30, %v717_v51  ;;  %v10466_v2 = vadd.f32 %v440_v41, %v10334_v59  ;;  %v10469_v3 = vadd.f32 %v553_v42, %v10337_v60 }
 0x16b   :  { %v787_v4 = vadd.f32 %v786_v35, %v716_v57  ;;  %v829_v7 = vadd.f32 %v828_v36, %v718_v61  ;;  %v10472_v10 = vadd.f32 %v442_v52, %v10340_v63  ;;  %v10475_v17 = vadd.f32 %v555_v53, %v10343_v1 }
 0x16c   :  { %15839 = vst [vmem:[#allocation39_spill] sm:$0xff] %v10469_v3  ;;  %v614_v20 = vadd.f32 %v613_v43, %v10466_v2  ;;  %v719_v21 = vmul.f32 %v10466_v2, %v10466_v2  ;;  %v656_v22 = vadd.f32 %v655_v48, %v10469_v3  ;;  %v721_v23 = vmul.f32 %v10469_v3, %v10469_v3 }
 0x16d   :  { %15840 = vst [vmem:[#allocation40_spill] sm:$0xff] %v10475_v17  ;;  %v635_v24 = vadd.f32 %v634_v56, %v10472_v10  ;;  %v720_v25 = vmul.f32 %v10472_v10, %v10472_v10  ;;  %v677_v26 = vadd.f32 %v676_v58, %v10475_v17  ;;  %v722_v27 = vmul.f32 %v10475_v17, %v10475_v17  ;;  %v446_v28 = vpop.f32.mrb[12].mxu0  ;;  %v559_v29 = vpop.f32.mrb[12].mxu1 }
 0x16e   :  { %v767_v30 = vadd.f32 %v766_v62, %v719_v21  ;;  %v809_v33 = vadd.f32 %v808_v0, %v721_v23  ;;  %v10490_v34 = vadd.f32 %v446_v28, %v10334_v59  ;;  %v10493_v35 = vadd.f32 %v559_v29, %v10337_v60  ;;  %v448_v36 = vpop.f32.mrb[13].mxu0  ;;  %v561_v41 = vpop.f32.mrb[13].mxu1 }
 0x16f   :  { %v788_v42 = vadd.f32 %v787_v4, %v720_v25  ;;  %v830_v43 = vadd.f32 %v829_v7, %v722_v27  ;;  %v10496_v47 = vadd.f32 %v448_v36, %v10340_v63  ;;  %v10499_v48 = vadd.f32 %v561_v41, %v10343_v1  ;;  %v450_v51 = vpop.f32.mrb[14].mxu0  ;;  %v563_v52 = vpop.f32.mrb[14].mxu1 }
 0x170   :  { %15841 = vst [vmem:[#allocation41_spill] sm:$0xff] %v10493_v35  ;;  %v615_v53 = vadd.f32 %v614_v20, %v10490_v34  ;;  %v723_v56 = vmul.f32 %v10490_v34, %v10490_v34  ;;  %v657_v57 = vadd.f32 %v656_v22, %v10493_v35  ;;  %v725_v58 = vmul.f32 %v10493_v35, %v10493_v35  ;;  %v452_v61 = vpop.f32.mrb[15].mxu0  ;;  %v565_v62 = vpop.f32.mrb[15].mxu1 }
 0x171   :  { %15842 = vst [vmem:[#allocation42_spill] sm:$0xff] %v10499_v48  ;;  %v636_v0 = vadd.f32 %v635_v24, %v10496_v47  ;;  %v724_v4 = vmul.f32 %v10496_v47, %v10496_v47  ;;  %v678_v7 = vadd.f32 %v677_v26, %v10499_v48  ;;  %v726_v20 = vmul.f32 %v10499_v48, %v10499_v48 }
 0x172   :  { %v768_v21 = vadd.f32 %v767_v30, %v723_v56  ;;  %v810_v23 = vadd.f32 %v809_v33, %v725_v58  ;;  %v10514_v25 = vadd.f32 %v450_v51, %v10334_v59  ;;  %v10517_v22 = vadd.f32 %v563_v52, %v10337_v60 }
 0x173   :  { %v789_v27 = vadd.f32 %v788_v42, %v724_v4  ;;  %v831_v28 = vadd.f32 %v830_v43, %v726_v20  ;;  %v10520_v24 = vadd.f32 %v452_v61, %v10340_v63  ;;  %v10523_v29 = vadd.f32 %v565_v62, %v10343_v1 }
 0x174   :  { %15843 = vst [vmem:[#allocation43_spill] sm:$0xff] %v10517_v22  ;;  %v616_v26 = vadd.f32 %v615_v53, %v10514_v25  ;;  %v727_v30 = vmul.f32 %v10514_v25, %v10514_v25  ;;  %v658_v33 = vadd.f32 %v657_v57, %v10517_v22  ;;  %v729_v36 = vmul.f32 %v10517_v22, %v10517_v22 }
 0x175   :  { %15844 = vst [vmem:[#allocation44_spill] sm:$0xff] %v10523_v29  ;;  %v637_v41 = vadd.f32 %v636_v0, %v10520_v24  ;;  %v728_v42 = vmul.f32 %v10520_v24, %v10520_v24  ;;  %v679_v43 = vadd.f32 %v678_v7, %v10523_v29  ;;  %v730_v51 = vmul.f32 %v10523_v29, %v10523_v29  ;;  %v456_v52 = vpop.f32.mrb[16].mxu0  ;;  %v569_v53 = vpop.f32.mrb[16].mxu1 }
 0x176   :  { %v769_v56 = vadd.f32 %v768_v21, %v727_v30  ;;  %v811_v58 = vadd.f32 %v810_v23, %v729_v36  ;;  %v10538_v61 = vadd.f32 %v456_v52, %v10334_v59  ;;  %v10541_v57 = vadd.f32 %v569_v53, %v10337_v60  ;;  %v458_v62 = vpop.f32.mrb[17].mxu0  ;;  %v571_v0 = vpop.f32.mrb[17].mxu1 }
 0x177   :  { %v790_v4 = vadd.f32 %v789_v27, %v728_v42  ;;  %v832_v20 = vadd.f32 %v831_v28, %v730_v51  ;;  %v10544_v22 = vadd.f32 %v458_v62, %v10340_v63  ;;  %v10547_v7 = vadd.f32 %v571_v0, %v10343_v1  ;;  %v460_v35 = vpop.f32.mrb[18].mxu0  ;;  %v573_v29 = vpop.f32.mrb[18].mxu1 }
 0x178   :  { %15845 = vst [vmem:[#allocation45_spill] sm:$0xff] %v10541_v57  ;;  %v617_v21 = vadd.f32 %v616_v26, %v10538_v61  ;;  %v731_v23 = vmul.f32 %v10538_v61, %v10538_v61  ;;  %v659_v30 = vadd.f32 %v658_v33, %v10541_v57  ;;  %v733_v36 = vmul.f32 %v10541_v57, %v10541_v57  ;;  %v462_v27 = vpop.f32.mrb[19].mxu0  ;;  %v575_v28 = vpop.f32.mrb[19].mxu1 }
 0x179   :  { %15846 = vst [vmem:[#allocation46_spill] sm:$0xff] %v10547_v7  ;;  %v638_v42 = vadd.f32 %v637_v41, %v10544_v22  ;;  %v732_v51 = vmul.f32 %v10544_v22, %v10544_v22  ;;  %v680_v52 = vadd.f32 %v679_v43, %v10547_v7  ;;  %v734_v26 = vmul.f32 %v10547_v7, %v10547_v7 }
 0x17a   :  { %v770_v53 = vadd.f32 %v769_v56, %v731_v23  ;;  %v812_v62 = vadd.f32 %v811_v58, %v733_v36  ;;  %v10562_v0 = vadd.f32 %v460_v35, %v10334_v59  ;;  %v10565_v33 = vadd.f32 %v573_v29, %v10337_v60 }
 0x17b   :  { %v791_v57 = vadd.f32 %v790_v4, %v732_v51  ;;  %v833_v48 = vadd.f32 %v832_v20, %v734_v26  ;;  %v10568_v41 = vadd.f32 %v462_v27, %v10340_v63  ;;  %v10571_v3 = vadd.f32 %v575_v28, %v10343_v1 }
 0x17c   :  { %15847 = vst [vmem:[#allocation47_spill] sm:$0xff] %v10565_v33  ;;  %v618_v43 = vadd.f32 %v617_v21, %v10562_v0  ;;  %v735_v56 = vmul.f32 %v10562_v0, %v10562_v0  ;;  %v660_v58 = vadd.f32 %v659_v30, %v10565_v33  ;;  %v737_v35 = vmul.f32 %v10565_v33, %v10565_v33 }
 0x17d   :  { %15848 = vst [vmem:[#allocation48_spill] sm:$0xff] %v10571_v3  ;;  %v639_v29 = vadd.f32 %v638_v42, %v10568_v41  ;;  %v736_v4 = vmul.f32 %v10568_v41, %v10568_v41  ;;  %v681_v20 = vadd.f32 %v680_v52, %v10571_v3  ;;  %v738_v23 = vmul.f32 %v10571_v3, %v10571_v3  ;;  %v466_v36 = vpop.f32.mrb[20].mxu0  ;;  %v579_v21 = vpop.f32.mrb[20].mxu1 }
 0x17e   :  { %v771_v27 = vadd.f32 %v770_v53, %v735_v56  ;;  %v813_v28 = vadd.f32 %v812_v62, %v737_v35  ;;  %v10586_v51 = vadd.f32 %v466_v36, %v10334_v59  ;;  %v10589_v30 = vadd.f32 %v579_v21, %v10337_v60  ;;  %v468_v26 = vpop.f32.mrb[21].mxu0  ;;  %v581_v42 = vpop.f32.mrb[21].mxu1 }
 0x17f   :  { %v792_v33 = vadd.f32 %v791_v57, %v736_v4  ;;  %v834_v7 = vadd.f32 %v833_v48, %v738_v23  ;;  %v10592_v32 = vadd.f32 %v468_v26, %v10340_v63  ;;  %v10595_v52 = vadd.f32 %v581_v42, %v10343_v1  ;;  %v470_v3 = vpop.f32.mrb[22].mxu0  ;;  %v583_v17 = vpop.f32.mrb[22].mxu1 }
 0x180   :  { %15849 = vst [vmem:[#allocation49_spill] sm:$0xff] %v10589_v30  ;;  %v619_v53 = vadd.f32 %v618_v43, %v10586_v51  ;;  %v739_v62 = vmul.f32 %v10586_v51, %v10586_v51  ;;  %v661_v56 = vadd.f32 %v660_v58, %v10589_v30  ;;  %v741_v35 = vmul.f32 %v10589_v30, %v10589_v30  ;;  %v472_v57 = vpop.f32.mrb[23].mxu0  ;;  %v585_v48 = vpop.f32.mrb[23].mxu1 }
 0x181   :  { %15850 = vst [vmem:[#allocation50_spill] sm:$0xff] %v10595_v52  ;;  %v640_v4 = vadd.f32 %v639_v29, %v10592_v32  ;;  %v740_v23 = vmul.f32 %v10592_v32, %v10592_v32  ;;  %v682_v36 = vadd.f32 %v681_v20, %v10595_v52  ;;  %v742_v43 = vmul.f32 %v10595_v52, %v10595_v52 }
 0x182   :  { %v772_v21 = vadd.f32 %v771_v27, %v739_v62  ;;  %v814_v26 = vadd.f32 %v813_v28, %v741_v35  ;;  %v10610_v42 = vadd.f32 %v470_v3, %v10334_v59  ;;  %v10613_v58 = vadd.f32 %v583_v17, %v10337_v60 }
 0x183   :  { %v793_v30 = vadd.f32 %v792_v33, %v740_v23  ;;  %v835_v40 = vadd.f32 %v834_v7, %v742_v43  ;;  %v10616_v29 = vadd.f32 %v472_v57, %v10340_v63  ;;  %v10619_v6 = vadd.f32 %v585_v48, %v10343_v1 }
 0x184   :  { %15851 = vst [vmem:[#allocation51_spill] sm:$0xff] %v10613_v58  ;;  %v620_v20 = vadd.f32 %v619_v53, %v10610_v42  ;;  %v743_v27 = vmul.f32 %v10610_v42, %v10610_v42  ;;  %v662_v28 = vadd.f32 %v661_v56, %v10613_v58  ;;  %v745_v3 = vmul.f32 %v10613_v58, %v10613_v58 }
 0x185   :  { %15852 = vst [vmem:[#allocation52_spill] sm:$0xff] %v10619_v6  ;;  %v641_v17 = vadd.f32 %v640_v4, %v10616_v29  ;;  %v744_v7 = vmul.f32 %v10616_v29, %v10616_v29  ;;  %v683_v33 = vadd.f32 %v682_v36, %v10619_v6  ;;  %v746_v62 = vmul.f32 %v10619_v6, %v10619_v6  ;;  %v476_v35 = vpop.f32.mrb[24].mxu0  ;;  %v589_v53 = vpop.f32.mrb[24].mxu1 }
 0x186   :  { %v773_v57 = vadd.f32 %v772_v21, %v743_v27  ;;  %v815_v48 = vadd.f32 %v814_v26, %v745_v3  ;;  %v10634_v23 = vadd.f32 %v476_v35, %v10334_v59  ;;  %v10637_v56 = vadd.f32 %v589_v53, %v10337_v60  ;;  %v478_v43 = vpop.f32.mrb[25].mxu0  ;;  %v591_v4 = vpop.f32.mrb[25].mxu1 }
 0x187   :  { %v794_v58 = vadd.f32 %v793_v30, %v744_v7  ;;  %v836_v52 = vadd.f32 %v835_v40, %v746_v62  ;;  %v10640_v39 = vadd.f32 %v478_v43, %v10340_v63  ;;  %v10643_v36 = vadd.f32 %v591_v4, %v10343_v1  ;;  %v480_v6 = vpop.f32.mrb[26].mxu0  ;;  %v593_v16 = vpop.f32.mrb[26].mxu1 }
 0x188   :  { %15853 = vst [vmem:[#allocation53_spill] sm:$0xff] %v10634_v23  ;;  %15854 = vst [vmem:[#allocation54_spill] sm:$0xff] %v10637_v56  ;;  %v621_v21 = vadd.f32 %v620_v20, %v10634_v23  ;;  %v747_v26 = vmul.f32 %v10634_v23, %v10634_v23  ;;  %v663_v27 = vadd.f32 %v662_v28, %v10637_v56  ;;  %v482_v30 = vpop.f32.mrb[27].mxu0  ;;  %v595_v40 = vpop.f32.mrb[27].mxu1 }
 0x189   :  { %15855 = vst [vmem:[#allocation55_spill] sm:$0xff] %v10643_v36  ;;  %v749_v3 = vmul.f32 %v10637_v56, %v10637_v56  ;;  %v642_v7 = vadd.f32 %v641_v17, %v10640_v39  ;;  %v748_v62 = vmul.f32 %v10640_v39, %v10640_v39  ;;  %v684_v35 = vadd.f32 %v683_v33, %v10643_v36 }
 0x18a   :  { %v750_v20 = vmul.f32 %v10643_v36, %v10643_v36  ;;  %v774_v53 = vadd.f32 %v773_v57, %v747_v26  ;;  %v10658_v4 = vadd.f32 %v480_v6, %v10334_v59  ;;  %v10661_v28 = vadd.f32 %v593_v16, %v10337_v60 }
 0x18b   :  { %v816_v43 = vadd.f32 %v815_v48, %v749_v3  ;;  %v795_v56 = vadd.f32 %v794_v58, %v748_v62  ;;  %v10664_v17 = vadd.f32 %v482_v30, %v10340_v63  ;;  %v10667_v15 = vadd.f32 %v595_v40, %v10343_v1 }
 0x18c   :  { %15856 = vst [vmem:[#allocation56_spill] sm:$0xff] %v10658_v4  ;;  %15857 = vst [vmem:[#allocation57_spill] sm:$0xff] %v10661_v28  ;;  %v837_v46 = vadd.f32 %v836_v52, %v750_v20  ;;  %v622_v33 = vadd.f32 %v621_v21, %v10658_v4  ;;  %v751_v57 = vmul.f32 %v10658_v4, %v10658_v4 }
 0x18d   :  { %15858 = vst [vmem:[#allocation58_spill] sm:$0xff] %v10664_v17  ;;  %15859 = vst [vmem:[#allocation59_spill] sm:$0xff] %v10667_v15  ;;  %v664_v48 = vadd.f32 %v663_v27, %v10661_v28  ;;  %v753_v6 = vmul.f32 %v10661_v28, %v10661_v28  ;;  %v643_v16 = vadd.f32 %v642_v7, %v10664_v17  ;;  %v486_v3 = vpop.f32.mrb[28].mxu0  ;;  %v599_v21 = vpop.f32.mrb[28].mxu1 }
 0x18e   :  { %v752_v52 = vmul.f32 %v10664_v17, %v10664_v17  ;;  %v685_v58 = vadd.f32 %v684_v35, %v10667_v15  ;;  %v754_v26 = vmul.f32 %v10667_v15, %v10667_v15  ;;  %v775_v30 = vadd.f32 %v774_v53, %v751_v57  ;;  %v488_v20 = vpop.f32.mrb[29].mxu0  ;;  %v601_v7 = vpop.f32.mrb[29].mxu1 }
 0x18f   :  { %v817_v40 = vadd.f32 %v816_v43, %v753_v6  ;;  %v10682_v62 = vadd.f32 %v486_v3, %v10334_v59  ;;  %v10685_v27 = vadd.f32 %v599_v21, %v10337_v60  ;;  %v10688_v9 = vadd.f32 %v488_v20, %v10340_v63  ;;  %v490_v15 = vpop.f32.mrb[30].mxu0  ;;  %v603_v19 = vpop.f32.mrb[30].mxu1 }
 0x190   :  { %v796_v28 = vadd.f32 %v795_v56, %v752_v52  ;;  %v838_v36 = vadd.f32 %v837_v46, %v754_v26  ;;  %v10691_v35 = vadd.f32 %v601_v7, %v10343_v1  ;;  %v492_v56 = vpop.f32.mrb[31].mxu0  ;;  %v605_v46 = vpop.f32.mrb[31].mxu1  ;;  %v10706_v7 = vadd.f32 %v490_v15, %v10334_v59 }
 0x191   :  { %15860 = vst [vmem:[#allocation60_spill] sm:$0xff] %v10682_v62  ;;  %15861 = vst [vmem:[#allocation61_spill] sm:$0xff] %v10685_v27  ;;  %v623_v53 = vadd.f32 %v622_v33, %v10682_v62  ;;  %v755_v43 = vmul.f32 %v10682_v62, %v10682_v62  ;;  %v665_v57 = vadd.f32 %v664_v48, %v10685_v27 }
 0x192   :  { %15862 = vst [vmem:[#allocation62_spill] sm:$0xff] %v10688_v9  ;;  %15863 = vst [vmem:[#allocation63_spill] sm:$0xff] %v10691_v35  ;;  %v757_v6 = vmul.f32 %v10685_v27, %v10685_v27  ;;  %v644_v52 = vadd.f32 %v643_v16, %v10688_v9  ;;  %v756_v26 = vmul.f32 %v10688_v9, %v10688_v9 }
 0x193   :  { %v686_v3 = vadd.f32 %v685_v58, %v10691_v35  ;;  %v758_v33 = vmul.f32 %v10691_v35, %v10691_v35  ;;  %v776_v21 = vadd.f32 %v775_v30, %v755_v43  ;;  %15864 = vst [vmem:[#allocation64_spill] sm:$0xff] %v10706_v7  ;;  %v10709_v48 = vadd.f32 %v603_v19, %v10337_v60 }
 0x194   :  { %v818_v20 = vadd.f32 %v817_v40, %v757_v6  ;;  %v797_v27 = vadd.f32 %v796_v28, %v756_v26  ;;  %v10712_v16 = vadd.f32 %v492_v56, %v10340_v63  ;;  %v10715_v62 = vadd.f32 %v605_v46, %v10343_v1 }
 0x195   :  { %15865 = vst [vmem:[#allocation65_spill] sm:$0xff] %v10709_v48  ;;  %v839_v13 = vadd.f32 %v838_v36, %v758_v33  ;;  %v624_v58 = vadd.f32 %v623_v53, %v10706_v7  ;;  %v759_v30 = vmul.f32 %v10706_v7, %v10706_v7  ;;  %v666_v40 = vadd.f32 %v665_v57, %v10709_v48 }
 0x196   :  { %15866 = vst [vmem:[#allocation66_spill] sm:$0xff] %v10712_v16  ;;  %v761_v59 = vmul.f32 %v10709_v48, %v10709_v48  ;;  %v645_v60 = vadd.f32 %v644_v52, %v10712_v16  ;;  %v760_v15 = vmul.f32 %v10712_v16, %v10712_v16  ;;  %v687_v63 = vadd.f32 %v686_v3, %v10715_v62 }
 0x197   :  { %v762_v1 = vmul.f32 %v10715_v62, %v10715_v62  ;;  %v625_v19 = vrot.slane %v624_v58, 4  ;;  %v777_v36 = vadd.f32 %v776_v21, %v759_v30  ;;  %v667_v28 = vrot.slane %v666_v40, 4 }
 0x198   :  { %v819_v53 = vadd.f32 %v818_v20, %v761_v59  ;;  %v646_v43 = vrot.slane %v645_v60, 4  ;;  %v798_v6 = vadd.f32 %v797_v27, %v760_v15  ;;  %v688_v57 = vrot.slane %v687_v63, 4 }
 0x199   :  { %v840_v56 = vadd.f32 %v839_v13, %v762_v1  ;;  %v626_v46 = vadd.f32 %v625_v19, %v624_v58  ;;  %v778_v26 = vrot.slane %v777_v36, 4  ;;  %v668_v33 = vadd.f32 %v667_v28, %v666_v40 }
 0x19a   :  { %v820_v52 = vrot.slane %v819_v53, 4  ;;  %v647_v48 = vadd.f32 %v646_v43, %v645_v60  ;;  %v799_v35 = vrot.slane %v798_v6, 4  ;;  %v689_v7 = vadd.f32 %v688_v57, %v687_v63 }
 0x19b   :  { %v841_v16 = vrot.slane %v840_v56, 4  ;;  %v627_v3 = vrot.slane %v626_v46, 2  ;;  %v779_v9 = vadd.f32 %v778_v26, %v777_v36  ;;  %v669_v4 = vrot.slane %v668_v33, 2 }
 0x19c   :  { %v821_v23 = vadd.f32 %v820_v52, %v819_v53  ;;  %v648_v17 = vrot.slane %v647_v48, 2  ;;  %v800_v21 = vadd.f32 %v799_v35, %v798_v6  ;;  %v690_v30 = vrot.slane %v689_v7, 2 }
 0x19d   :  { %v842_v20 = vadd.f32 %v841_v16, %v840_v56  ;;  %v628_v59 = vadd.f32 %v627_v3, %v626_v46  ;;  %v780_v27 = vrot.slane %v779_v9, 2  ;;  %v670_v15 = vadd.f32 %v669_v4, %v668_v33 }
 0x19e   :  { %v822_v13 = vrot.slane %v821_v23, 2  ;;  %v649_v58 = vadd.f32 %v648_v17, %v647_v48  ;;  %v801_v1 = vrot.slane %v800_v21, 2  ;;  %v691_v40 = vadd.f32 %v690_v30, %v689_v7 }
 0x19f   :  { %v843_v19 = vrot.slane %v842_v20, 2  ;;  %v629_v60 = vrot.slane %v628_v59, 1  ;;  %v781_v28 = vadd.f32 %v780_v27, %v779_v9  ;;  %v671_v63 = vrot.slane %v670_v15, 1 }
 0x1a0   :  { %v823_v43 = vadd.f32 %v822_v13, %v821_v23  ;;  %v650_v57 = vrot.slane %v649_v58, 1  ;;  %v802_v36 = vadd.f32 %v801_v1, %v800_v21  ;;  %v692_v26 = vrot.slane %v691_v40, 1 }
 0x1a1   :  { %v844_v53 = vadd.f32 %v843_v19, %v842_v20  ;;  %v630_v52 = vadd.f32 %v629_v60, %v628_v59  ;;  %v782_v35 = vrot.slane %v781_v28, 1  ;;  %v672_v6 = vadd.f32 %v671_v63, %v670_v15 }
 0x1a2   :  { %v824_v16 = vrot.slane %v823_v43, 1  ;;  %v651_v56 = vadd.f32 %v650_v57, %v649_v58  ;;  %v803_v46 = vrot.slane %v802_v36, 1  ;;  %v693_v4 = vadd.f32 %v692_v26, %v691_v40 }
 0x1a3   :  { %v845_v33 = vrot.slane %v844_v53, 1  ;;  %v695_v17 = vmul.f32 0.0078125, %v630_v52  ;;  %v783_v48 = vadd.f32 %v782_v35, %v781_v28  ;;  %v697_v7 = vmul.f32 0.0078125, %v672_v6 }
 0x1a4   :  { %v825_v3 = vadd.f32 %v824_v16, %v823_v43  ;;  %v696_v30 = vmul.f32 0.0078125, %v651_v56  ;;  %v804_v9 = vadd.f32 %v803_v46, %v802_v36  ;;  %v698_v27 = vmul.f32 0.0078125, %v693_v4 }
 0x1a5   :  { %v846_v23 = vadd.f32 %v845_v33, %v844_v53  ;;  %v847_v13 = vmul.f32 0.0078125, %v783_v48  ;;  %v851_v21 = vmul.f32 %v695_v17, %v695_v17  ;;  %v853_v20 = vmul.f32 %v697_v7, %v697_v7 }
 0x1a6   :  { %v849_v1 = vmul.f32 0.0078125, %v825_v3  ;;  %v848_v59 = vmul.f32 0.0078125, %v804_v9  ;;  %v852_v19 = vmul.f32 %v696_v30, %v696_v30  ;;  %v854_v60 = vmul.f32 %v698_v27, %v698_v27 }
 0x1a7   :  { %v850_v15 = vmul.f32 0.0078125, %v846_v23  ;;  %v855_v58 = vsub.f32 %v847_v13, %v851_v21  ;;  %v10198_v16 = vmov 1966171168  }
 0x1a8   :  { %v857_v63 = vsub.f32 %v849_v1, %v853_v20  ;;  %v856_v40 = vsub.f32 %v848_v59, %v852_v19  ;;  %v878_v56 = vunpack.c.l.s4 %v10198_v16  ;;  %v608_v59 = vld [vmem:[#allocation11 + $0x4] sm:$0xf] }
 0x1a9   :  { %v858_v57 = vsub.f32 %v850_v15, %v854_v60  ;;  %v859_v26 = vmax.f32 %v855_v58, 0.0 }
 0x1aa   :  { %v861_v28 = vmax.f32 %v857_v63, 0.0  ;;  %v860_v52 = vmax.f32 %v856_v40, 0.0  ;;  %v879_v46 = vunpack.c.0.s8 %v878_v56 }
 0x1ab   :  { %v862_v43 = vmax.f32 %v858_v57, 0.0  ;;  %v863_v35 = vadd.f32 1e-05, %v859_v26 }
 0x1ac   :  { %v865_v36 = vadd.f32 1e-05, %v861_v28  ;;  %v864_v6 = vadd.f32 1e-05, %v860_v52  ;;  %v10730_v48 = vsub.s32 %v879_v46, %v10319_v44 }
 0x1ad   :  { %v866_v53 = vadd.f32 1e-05, %v862_v43  ;;  %9796 = vrsqrt.f32 %v863_v35 }
 0x1ae   :  { %9798 = vrsqrt.f32 %v865_v36  ;;  %15867 = vst [vmem:[#allocation67_spill] sm:$0xff] %v10730_v48 }
 0x1af   :  { %9800 = vrsqrt.f32 %v864_v6 }
 0x1b0   :  { %9802 = vrsqrt.f32 %v866_v53 }
 0x1b7   :  { %v9797_v4 = vpop.eup %9796 }
 0x1b8   :  { %v9799_v33 = vpop.eup %9798 }
 0x1b9   :  { %v9801_v3 = vpop.eup %9800 }
 0x1ba   :  { %v9803_v9 = vpop.eup %9802  ;;  %v875_v23 = vcombine.low %v9797_v4, %v9801_v3  ;;  %v15869_v3 = vld [vmem:[#allocation53_spill] sm:$0xff] }
 0x1bb   :  { %v876_v13 = vcombine.low %v9799_v33, %v9803_v9  ;;  %v15868_v33 = vld [vmem:[#allocation58_spill] sm:$0xff]  ;;  %v15870_v9 = vld [vmem:[#allocation56_spill] sm:$0xff] }
 0x1bc   :  { %v883_v21 = vrot.slane %v875_v23, %v10730_v48  ;;  %v15871_v23 = vld [vmem:[#allocation62_spill] sm:$0xff] }
 0x1bd   :  { %v890_v1 = vrot.slane %v876_v13, %v10730_v48 }
 0x1bf   :  { %v891_v20 = vcombine.low %v883_v21, %v890_v1  ;;  %v15872_v21 = vld [vmem:[#allocation66_spill] sm:$0xff] }
 0x1c1   :  { %v898_v19 = vrot.slane %v891_v20, %v10730_v48 }
 0x1c3   :  { %v900_v15 = vmul.f32 %v898_v19, %v608_v59  ;;  %v15875_v19 = vld [vmem:[#allocation30_spill] sm:$0xff] }
 0x1c5   :  { %v905_v60 = vrot.slane %v900_v15, %v10322_v49  ;;  %v909_v58 = vrot.slane %v900_v15, %v10328_v54  ;;  %v10738_v63 = vrot.slane %v900_v15, %v10325_v50  ;;  %v10741_v40 = vrot.slane %v900_v15, %v10331_v55 }
 0x1c7   :  { %v922_v57 = vmul.f32 %v905_v60, %v695_v17  ;;  %v923_v26 = vmul.f32 %v909_v58, %v696_v30  ;;  %v924_v28 = vmul.f32 %v10738_v63, %v697_v7  ;;  %v925_v52 = vmul.f32 %v10741_v40, %v698_v27 }
 0x1c8   :  { %v10747_v43 = vmul.f32 %v10741_v40, %v10715_v62  ;;  %v957_v35 = vmul.f32 %v909_v58, %v10352_v12  ;;  %v961_v36 = vmul.f32 %v909_v58, %v10364_v18  ;;  %v956_v6 = vmul.f32 %v905_v60, %v10346_v8 }
 0x1c9   :  { %v930_v53 = vcombine.low %v922_v57, %v923_v26  ;;  %v931_v16 = vcombine.low %v924_v28, %v925_v52  ;;  %v960_v56 = vmul.f32 %v905_v60, %v10358_v14  ;;  %v965_v17 = vmul.f32 %v909_v58, %v10400_v45  ;;  %v15876_v57 = vld [vmem:[#allocation32_spill] sm:$0xff]  ;;  %v15877_v28 = vld [vmem:[#allocation29_spill] sm:$0xff] }
 0x1ca   :  { %v969_v7 = vmul.f32 %v909_v58, %v10424_v11  ;;  %v964_v30 = vmul.f32 %v905_v60, %v10394_v38  ;;  %v968_v27 = vmul.f32 %v905_v60, %v10418_v5  ;;  %v973_v62 = vmul.f32 %v909_v58, %v10448_v37 }
 0x1cb   :  { %v938_v12 = vrot.slane %v930_v53, %v10730_v48  ;;  %v945_v18 = vrot.slane %v931_v16, %v10730_v48  ;;  %v977_v8 = vmul.f32 %v909_v58, %v10472_v10  ;;  %v972_v46 = vmul.f32 %v905_v60, %v10442_v31 }
 0x1cc   :  { %v976_v14 = vmul.f32 %v905_v60, %v10466_v2  ;;  %v10764_v45 = vmul.f32 %v909_v58, %v10496_v47  ;;  %v10767_v11 = vmul.f32 %v909_v58, %v10520_v24  ;;  %v10770_v38 = vmul.f32 %v905_v60, %v10490_v34  ;;  %v609_v2 = vld [vmem:[#allocation11 + $0x8] sm:$0xf] }
 0x1cd   :  { %v946_v5 = vcombine.low %v938_v12, %v945_v18  ;;  %v10773_v37 = vmul.f32 %v905_v60, %v10514_v25  ;;  %v10776_v4 = vmul.f32 %v909_v58, %v10544_v22  ;;  %v10779_v31 = vmul.f32 %v909_v58, %v10568_v41 }
 0x1ce   :  { %v10782_v10 = vmul.f32 %v905_v60, %v10538_v61  ;;  %v10785_v47 = vmul.f32 %v905_v60, %v10562_v0  ;;  %v10788_v34 = vmul.f32 %v909_v58, %v10592_v32  ;;  %v10791_v24 = vmul.f32 %v909_v58, %v10616_v29 }
 0x1cf   :  { %v953_v25 = vrot.slane %v946_v5, %v10730_v48  ;;  %v10795_v22 = vmul.f32 %v905_v60, %v10586_v51  ;;  %v10798_v41 = vmul.f32 %v905_v60, %v10610_v42  ;;  %v10801_v61 = vmul.f32 %v909_v58, %v10640_v39  ;;  %v15873_v42 = vld [vmem:[#allocation60_spill] sm:$0xff]  ;;  %v15879_v5 = vld [vmem:[#allocation34_spill] sm:$0xff] }
 0x1d0   :  { %v10804_v0 = vmul.f32 %v909_v58, %v15868_v33  ;;  %v10807_v32 = vmul.f32 %v905_v60, %v15869_v3  ;;  %v10810_v29 = vmul.f32 %v905_v60, %v15870_v9  ;;  %v10813_v13 = vmul.f32 %v909_v58, %v15871_v23  ;;  %v15874_v39 = vld [vmem:[#allocation64_spill] sm:$0xff]  ;;  %v15881_v3 = vld [vmem:[#allocation33_spill] sm:$0xff]  ;;  %v15882_v23 = vld [vmem:[#allocation35_spill] sm:$0xff] }
 0x1d1   :  { %v955_v51 = vsub.f32 %v609_v2, %v953_v25  ;;  %v10816_v1 = vmul.f32 %v909_v58, %v15872_v21  ;;  %v10819_v20 = vmul.f32 %v905_v60, %v15873_v42  ;;  %v10822_v59 = vmul.f32 %v905_v60, %v15874_v39  ;;  %v15878_v58 = vld [vmem:[#allocation31_spill] sm:$0xff]  ;;  %v15880_v25 = vld [vmem:[#allocation36_spill] sm:$0xff] }
 0x1d2   :  { %v10826_v15 = vmul.f32 %v10741_v40, %v15875_v19  ;;  %v10830_v26 = vmul.f32 %v10741_v40, %v15876_v57  ;;  %v10834_v52 = vmul.f32 %v10738_v63, %v15877_v28  ;;  %v10838_v53 = vmul.f32 %v10738_v63, %v15878_v58 }
 0x1d3   :  { %v10841_v16 = vrot.slane %v955_v51, %v10322_v49  ;;  %v10844_v60 = vrot.slane %v955_v51, %v10328_v54  ;;  %v10847_v12 = vrot.slane %v955_v51, %v10325_v50  ;;  %v10850_v18 = vrot.slane %v955_v51, %v10331_v55  ;;  %v9703_v50 = vld [vmem:[#allocation10 + $0x208] ss:$16 sps:$4 sm:$0xff]  }
 0x1d4   :  { %v10854_v2 = vmul.f32 %v10741_v40, %v15879_v5  ;;  %v10858_v33 = vmul.f32 %v10741_v40, %v15880_v25  ;;  %v10862_v9 = vmul.f32 %v10738_v63, %v15881_v3  ;;  %v10866_v21 = vmul.f32 %v10738_v63, %v15882_v23 }
 0x1d5   :  { %v1042_v42 = vadd.f32 %v10844_v60, %v957_v35  ;;  %v1046_v51 = vadd.f32 %v10844_v60, %v961_v36  ;;  %v1041_v39 = vadd.f32 %v10841_v16, %v956_v6  ;;  %v1045_v19 = vadd.f32 %v10841_v16, %v960_v56  ;;  %v9700_v6 = vld [vmem:[#allocation10 + $0x200] ss:$16 sps:$4 sm:$0xff]  }
 0x1d6   :  { %v1050_v57 = vadd.f32 %v10844_v60, %v965_v17  ;;  %v1054_v28 = vadd.f32 %v10844_v60, %v969_v7  ;;  %v1049_v58 = vadd.f32 %v10841_v16, %v964_v30  ;;  %v1053_v5 = vadd.f32 %v10841_v16, %v968_v27 }
 0x1d7   :  { %v1106_v25 = vmax.f32 %v1042_v42, 0.0  ;;  %v1110_v3 = vmax.f32 %v1046_v51, 0.0  ;;  %v1105_v23 = vmax.f32 %v1041_v39, 0.0  ;;  %v1109_v44 = vmax.f32 %v1045_v19, 0.0  ;;  %v9708_v51 = vld [vmem:[#allocation10 + $0x224] ss:$16 sps:$4 sm:$0xff]  }
 0x1d8   :  { %v1114_v48 = vmax.f32 %v1050_v57, 0.0  ;;  %v1118_v35 = vmax.f32 %v1054_v28, 0.0  ;;  %v1113_v55 = vmax.f32 %v1049_v58, 0.0  ;;  %v1117_v36 = vmax.f32 %v1053_v5, 0.0  ;;  %v9711_v39 = vld [vmem:[#allocation10 + $0x22c] ss:$16 sps:$4 sm:$0xff]  }
 0x1d9   :  { %v1170_v54 = vpack.c.bf16 %v1110_v3, %v1106_v25  ;;  %v1169_v56 = vpack.c.bf16 %v1109_v44, %v1105_v23  ;;  %v1058_v17 = vadd.f32 %v10844_v60, %v973_v62  ;;  %v1062_v7 = vadd.f32 %v10844_v60, %v977_v8  ;;  %v9714_v5 = vld [vmem:[#allocation10 + $0x244] ss:$16 sps:$4 sm:$0xff]   ;;  %v9717_v25 = vld [vmem:[#allocation10 + $0x24c] ss:$16 sps:$4 sm:$0xff]  }
 0x1da   :  { %v1174_v49 = vpack.c.bf16 %v1118_v35, %v1114_v48  ;;  %v10878_v30 = vpack.c.bf16 %v1117_v36, %v1113_v55  ;;  %v1057_v27 = vadd.f32 %v10841_v16, %v972_v46  ;;  %v1061_v42 = vadd.f32 %v10841_v16, %v976_v14  ;;  %v9706_v46 = vld [vmem:[#allocation10 + $0x220] ss:$16 sps:$4 sm:$0xff]   ;;  %v9709_v14 = vld [vmem:[#allocation10 + $0x228] ss:$16 sps:$4 sm:$0xff]  }
 0x1db   :  { %2023 = vmatprep.mubr.bf16.mxu0 %v1170_v54  ;;  %2249 = vmatprep.mubr.bf16.mxu1 %v1170_v54  ;;  %v1122_v19 = vmax.f32 %v1058_v17, 0.0  ;;  %v1126_v57 = vmax.f32 %v1062_v7, 0.0  ;;  %v1066_v44 = vadd.f32 %v10844_v60, %v10764_v45  ;;  %v1070_v62 = vadd.f32 %v10844_v60, %v10767_v11  ;;  %v9712_v17 = vld [vmem:[#allocation10 + $0x240] ss:$16 sps:$4 sm:$0xff]   ;;  %v9715_v7 = vld [vmem:[#allocation10 + $0x248] ss:$16 sps:$4 sm:$0xff]  }
 0x1dc   :  { %2024 = vmatmul.mubr.bf16.vlgmr.msra.gmra.mrb[32].mxu0 %v1169_v56  ;;  %2250 = vmatmul.mubr.bf16.vlgmr.msra.gmra.mrb[32].mxu1 %v1169_v56  ;;  %v1121_v55 = vmax.f32 %v1057_v27, 0.0  ;;  %v1125_v48 = vmax.f32 %v1061_v42, 0.0  ;;  %v1065_v8 = vadd.f32 %v10841_v16, %v10770_v38  ;;  %v1069_v54 = vadd.f32 %v10841_v16, %v10773_v37 }
 0x1dd   :  { %2105 = vmatpush1.bf16.msra.mxu0 %v9700_v6  ;;  %2331 = vmatpush1.bf16.msra.mxu1 %v9703_v50  ;;  %v1178_v28 = vpack.c.bf16 %v1126_v57, %v1122_v19  ;;  %v1130_v58 = vmax.f32 %v1066_v44, 0.0  ;;  %v1134_v45 = vmax.f32 %v1070_v62, 0.0  ;;  %v1074_v11 = vadd.f32 %v10844_v60, %v10776_v4  ;;  %v9720_v19 = vld [vmem:[#allocation10 + $0x264] ss:$16 sps:$4 sm:$0xff]   ;;  %v9723_v57 = vld [vmem:[#allocation10 + $0x26c] ss:$16 sps:$4 sm:$0xff]  }
 0x1de   :  { %2033 = vmatprep.mubr.bf16.mxu0 %v1174_v49  ;;  %2259 = vmatprep.mubr.bf16.mxu1 %v1174_v49  ;;  %v10892_v3 = vpack.c.bf16 %v1125_v48, %v1121_v55  ;;  %v1129_v38 = vmax.f32 %v1065_v8, 0.0  ;;  %v1133_v23 = vmax.f32 %v1069_v54, 0.0  ;;  %v1078_v37 = vadd.f32 %v10844_v60, %v10779_v31  ;;  %v9718_v54 = vld [vmem:[#allocation10 + $0x260] ss:$16 sps:$4 sm:$0xff]  }
 0x1df   :  { %2106 = vmatprep.subr.bf16.mxu0 %v9708_v51  ;;  %2332 = vmatprep.subr.bf16.mxu1 %v9711_v39  ;;  %v10896_v50 = vpack.c.bf16 %v1134_v45, %v1130_v58  ;;  %v1138_v35 = vmax.f32 %v1074_v11, 0.0  ;;  %v1073_v36 = vadd.f32 %v10841_v16, %v10782_v10  ;;  %v1077_v49 = vadd.f32 %v10841_v16, %v10785_v47  ;;  %v9726_v45 = vld [vmem:[#allocation10 + $0x284] ss:$16 sps:$4 sm:$0xff]  }
 0x1e0   :  { %v10902_v4 = vpack.c.bf16 %v1133_v23, %v1129_v38  ;;  %v1142_v6 = vmax.f32 %v1078_v37, 0.0  ;;  %v1082_v56 = vadd.f32 %v10844_v60, %v10788_v34  ;;  %v1086_v31 = vadd.f32 %v10844_v60, %v10791_v24 }
 0x1e1   :  { %2107 = vmatpush1.bf16.msra.mxu0 %v9706_v46  ;;  %2333 = vmatpush1.bf16.msra.mxu1 %v9709_v14  ;;  %v1137_v27 = vmax.f32 %v1073_v36, 0.0  ;;  %v1141_v42 = vmax.f32 %v1077_v49, 0.0  ;;  %v1081_v10 = vadd.f32 %v10841_v16, %v10795_v22  ;;  %v1085_v47 = vadd.f32 %v10841_v16, %v10798_v41  ;;  %v9721_v46 = vld [vmem:[#allocation10 + $0x268] ss:$16 sps:$4 sm:$0xff]  }
 0x1e2   :  { %2108 = vmatprep.subr.bf16.mxu0 %v9714_v5  ;;  %2334 = vmatprep.subr.bf16.mxu1 %v9717_v25  ;;  %v10912_v51 = vpack.c.bf16 %v1142_v6, %v1138_v35  ;;  %v1146_v34 = vmax.f32 %v1082_v56, 0.0  ;;  %v1150_v39 = vmax.f32 %v1086_v31, 0.0  ;;  %v1090_v24 = vadd.f32 %v10844_v60, %v10801_v61 }
 0x1e3   :  { %v10916_v44 = vpack.c.bf16 %v1141_v42, %v1137_v27  ;;  %v1145_v62 = vmax.f32 %v1081_v10, 0.0  ;;  %v1149_v55 = vmax.f32 %v1085_v47, 0.0  ;;  %v1094_v22 = vadd.f32 %v10844_v60, %v10804_v0 }
 0x1e4   :  { %2034 = vmatmul.mubr.bf16.gmra.mrb[36].mxu0 %v10878_v30  ;;  %2260 = vmatmul.mubr.bf16.gmra.mrb[36].mxu1 %v10878_v30  ;;  %v10922_v41 = vpack.c.bf16 %v1150_v39, %v1146_v34  ;;  %v1154_v48 = vmax.f32 %v1090_v24, 0.0  ;;  %v1089_v8 = vadd.f32 %v10841_v16, %v10807_v32  ;;  %v1093_v61 = vadd.f32 %v10841_v16, %v10810_v29  ;;  %v9729_v32 = vld [vmem:[#allocation10 + $0x28c] ss:$16 sps:$4 sm:$0xff]   ;;  %v9730_v39 = vld [vmem:[#allocation10 + $0x2a0] ss:$16 sps:$4 sm:$0xff]  }
 0x1e5   :  { %2109 = vmatpush1.bf16.msra.mxu0 %v9712_v17  ;;  %2335 = vmatpush1.bf16.msra.mxu1 %v9715_v7  ;;  %v10928_v14 = vpack.c.bf16 %v1149_v55, %v1145_v62  ;;  %v1158_v0 = vmax.f32 %v1094_v22, 0.0  ;;  %v1098_v58 = vadd.f32 %v10844_v60, %v10813_v13  ;;  %v1102_v30 = vadd.f32 %v10844_v60, %v10816_v1  ;;  %v9732_v17 = vld [vmem:[#allocation10 + $0x2a4] ss:$16 sps:$4 sm:$0xff]   ;;  %v9735_v7 = vld [vmem:[#allocation10 + $0x2ac] ss:$16 sps:$4 sm:$0xff]  }
 0x1e6   :  { %2043 = vmatprep.mubr.bf16.mxu0 %v1178_v28  ;;  %2269 = vmatprep.mubr.bf16.mxu1 %v1178_v28  ;;  %v1153_v11 = vmax.f32 %v1089_v8, 0.0  ;;  %v1157_v5 = vmax.f32 %v1093_v61, 0.0  ;;  %v1097_v29 = vadd.f32 %v10841_v16, %v10819_v20  ;;  %v1101_v25 = vadd.f32 %v10841_v16, %v10822_v59  ;;  %v9724_v20 = vld [vmem:[#allocation10 + $0x280] ss:$16 sps:$4 sm:$0xff]   ;;  %v9727_v59 = vld [vmem:[#allocation10 + $0x288] ss:$16 sps:$4 sm:$0xff]  }
 0x1e7   :  { %2110 = vmatprep.subr.bf16.mxu0 %v9720_v19  ;;  %2336 = vmatprep.subr.bf16.mxu1 %v9723_v57  ;;  %v10938_v38 = vpack.c.bf16 %v1158_v0, %v1154_v48  ;;  %v1162_v13 = vmax.f32 %v1098_v58, 0.0  ;;  %v1166_v23 = vmax.f32 %v1102_v30, 0.0  ;;  %v1044_v1 = vadd.f32 %v10850_v18, %v10826_v15  ;;  %v15883_v34 = vld [vmem:[#allocation38_spill] sm:$0xff]  ;;  %v15885_v8 = vld [vmem:[#allocation37_spill] sm:$0xff]  ;;  %v15886_v0 = vld [vmem:[#allocation39_spill] sm:$0xff] }
 0x1e8   :  { %v10942_v60 = vpack.c.bf16 %v1157_v5, %v1153_v11  ;;  %v1161_v28 = vmax.f32 %v1097_v29, 0.0  ;;  %v1165_v37 = vmax.f32 %v1101_v25, 0.0  ;;  %v1048_v35 = vadd.f32 %v10850_v18, %v10830_v26  ;;  %v9733_v24 = vld [vmem:[#allocation10 + $0x2a8] ss:$16 sps:$4 sm:$0xff]   ;;  %v9741_v55 = vld [vmem:[#allocation10 + $0x2cc] ss:$16 sps:$4 sm:$0xff]  }
 0x1e9   :  { %2111 = vmatpush1.bf16.msra.mxu0 %v9718_v54  ;;  %2337 = vmatpush1.bf16.msra.mxu1 %v9721_v46  ;;  %v10946_v16 = vpack.c.bf16 %v1166_v23, %v1162_v13  ;;  %v1108_v36 = vmax.f32 %v1044_v1, 0.0  ;;  %v1043_v49 = vadd.f32 %v10847_v12, %v10834_v52  ;;  %v1047_v15 = vadd.f32 %v10847_v12, %v10838_v53  ;;  %v15888_v11 = vld [vmem:[#allocation44_spill] sm:$0xff]  ;;  %v9736_v29 = vld [vmem:[#allocation10 + $0x2c0] ss:$16 sps:$4 sm:$0xff]  }
 0x1ea   :  { %2112 = vmatprep.subr.bf16.mxu0 %v9726_v45  ;;  %2338 = vmatprep.subr.bf16.mxu1 %v9729_v32  ;;  %v10952_v6 = vpack.c.bf16 %v1165_v37, %v1161_v28  ;;  %v1112_v56 = vmax.f32 %v1048_v35, 0.0  ;;  %v1052_v26 = vadd.f32 %v10850_v18, %v10854_v2  ;;  %v1056_v31 = vadd.f32 %v10850_v18, %v10858_v33  ;;  %v15887_v45 = vld [vmem:[#allocation42_spill] sm:$0xff]  ;;  %v15889_v1 = vld [vmem:[#allocation41_spill] sm:$0xff]  ;;  %v15890_v37 = vld [vmem:[#allocation43_spill] sm:$0xff] }
 0x1eb   :  { %v1107_v27 = vmax.f32 %v1043_v49, 0.0  ;;  %v1111_v42 = vmax.f32 %v1047_v15, 0.0  ;;  %v1051_v52 = vadd.f32 %v10847_v12, %v10862_v9  ;;  %v1055_v53 = vadd.f32 %v10847_v12, %v10866_v21  ;;  %v15884_v21 = vld [vmem:[#allocation40_spill] sm:$0xff]  ;;  %v15891_v49 = vld [vmem:[#allocation46_spill] sm:$0xff] }
 0x1ec   :  { %2044 = vmatmul.mubr.bf16.gmra.mrb[40].mxu0 %v10892_v3  ;;  %2270 = vmatmul.mubr.bf16.gmra.mrb[40].mxu1 %v10892_v3  ;;  %v10964_v10 = vpack.c.bf16 %v1112_v56, %v1108_v36  ;;  %v1116_v2 = vmax.f32 %v1052_v26, 0.0  ;;  %v1120_v47 = vmax.f32 %v1056_v31, 0.0  ;;  %v975_v33 = vmul.f32 %v10741_v40, %v15883_v34  ;;  %v9738_v3 = vld [vmem:[#allocation10 + $0x2c4] ss:$16 sps:$4 sm:$0xff]   ;;  %v9739_v25 = vld [vmem:[#allocation10 + $0x2c8] ss:$16 sps:$4 sm:$0xff]  }
 0x1ed   :  { %2113 = vmatpush1.bf16.msra.mxu0 %v9724_v20  ;;  %2339 = vmatpush1.bf16.msra.mxu1 %v9727_v59  ;;  %v10968_v19 = vpack.c.bf16 %v1111_v42, %v1107_v27  ;;  %v1115_v9 = vmax.f32 %v1051_v52, 0.0  ;;  %v1119_v57 = vmax.f32 %v1055_v53, 0.0  ;;  %v979_v62 = vmul.f32 %v10741_v40, %v15884_v21  ;;  %v9744_v56 = vld [vmem:[#allocation10 + $0x2e4] ss:$16 sps:$4 sm:$0xff]   ;;  %v9747_v26 = vld [vmem:[#allocation10 + $0x2ec] ss:$16 sps:$4 sm:$0xff]  }
 0x1ee   :  { %2053 = vmatprep.mubr.bf16.mxu0 %v10896_v50  ;;  %2279 = vmatprep.mubr.bf16.mxu1 %v10896_v50  ;;  %v10974_v22 = vpack.c.bf16 %v1120_v47, %v1116_v2  ;;  %v1060_v48 = vadd.f32 %v10850_v18, %v975_v33  ;;  %v974_v61 = vmul.f32 %v10738_v63, %v15885_v8  ;;  %v15892_v53 = vld [vmem:[#allocation48_spill] sm:$0xff]  ;;  %v9742_v34 = vld [vmem:[#allocation10 + $0x2e0] ss:$16 sps:$4 sm:$0xff]  }
 0x1ef   :  { %2114 = vmatprep.subr.bf16.mxu0 %v9732_v17  ;;  %2340 = vmatprep.subr.bf16.mxu1 %v9735_v7  ;;  %v10979_v54 = vpack.c.bf16 %v1119_v57, %v1115_v9  ;;  %v1064_v46 = vadd.f32 %v10850_v18, %v979_v62  ;;  %v978_v58 = vmul.f32 %v10738_v63, %v15886_v0  ;;  %v9745_v33 = vld [vmem:[#allocation10 + $0x2e8] ss:$16 sps:$4 sm:$0xff]   ;;  %v15893_v57 = vld [vmem:[#allocation45_spill] sm:$0xff]  ;;  %v9753_v62 = vld [vmem:[#allocation10 + $0x30c] ss:$16 sps:$4 sm:$0xff]  }
 0x1f0   :  { %v1124_v30 = vmax.f32 %v1060_v48, 0.0  ;;  %v1059_v50 = vadd.f32 %v10847_v12, %v974_v61  ;;  %v983_v32 = vmul.f32 %v10741_v40, %v15887_v45  ;;  %v987_v5 = vmul.f32 %v10741_v40, %v15888_v11  ;;  %v15894_v8 = vld [vmem:[#allocation47_spill] sm:$0xff]  ;;  %v15896_v45 = vld [vmem:[#allocation52_spill] sm:$0xff]  ;;  %v15897_v11 = vld [vmem:[#allocation49_spill] sm:$0xff] }
 0x1f1   :  { %2115 = vmatpush1.bf16.msra.mxu0 %v9730_v39  ;;  %2341 = vmatpush1.bf16.msra.mxu1 %v9733_v24  ;;  %v1128_v13 = vmax.f32 %v1064_v46, 0.0  ;;  %v1063_v23 = vadd.f32 %v10847_v12, %v978_v58  ;;  %v982_v28 = vmul.f32 %v10738_v63, %v15889_v1  ;;  %v986_v35 = vmul.f32 %v10738_v63, %v15890_v37  ;;  %v15895_v58 = vld [vmem:[#allocation50_spill] sm:$0xff]  ;;  %v15898_v1 = vld [vmem:[#allocation51_spill] sm:$0xff] }
 0x1f2   :  { %2116 = vmatprep.subr.bf16.mxu0 %v9738_v3  ;;  %2342 = vmatprep.subr.bf16.mxu1 %v9741_v55  ;;  %v1123_v20 = vmax.f32 %v1059_v50, 0.0  ;;  %v1068_v59 = vadd.f32 %v10850_v18, %v983_v32  ;;  %v1072_v36 = vadd.f32 %v10850_v18, %v987_v5  ;;  %v991_v15 = vmul.f32 %v10741_v40, %v15891_v49  ;;  %v15899_v37 = vld [vmem:[#allocation55_spill] sm:$0xff] }
 0x1f3   :  { %v10998_v31 = vpack.c.bf16 %v1128_v13, %v1124_v30  ;;  %v1127_v17 = vmax.f32 %v1063_v23, 0.0  ;;  %v1067_v7 = vadd.f32 %v10847_v12, %v982_v28  ;;  %v1071_v27 = vadd.f32 %v10847_v12, %v986_v35 }
 0x1f4   :  { %2054 = vmatmul.mubr.bf16.gmra.mrb[44].mxu0 %v10902_v4  ;;  %2280 = vmatmul.mubr.bf16.gmra.mrb[44].mxu1 %v10902_v4  ;;  %v1132_v42 = vmax.f32 %v1068_v59, 0.0  ;;  %v1136_v52 = vmax.f32 %v1072_v36, 0.0  ;;  %v995_v2 = vmul.f32 %v10741_v40, %v15892_v53  ;;  %v1076_v47 = vadd.f32 %v10850_v18, %v991_v15  ;;  %v9750_v4 = vld [vmem:[#allocation10 + $0x304] ss:$16 sps:$4 sm:$0xff]  }
 0x1f5   :  { %2117 = vmatpush1.bf16.msra.mxu0 %v9736_v29  ;;  %2343 = vmatpush1.bf16.msra.mxu1 %v9739_v25  ;;  %v11007_v39 = vpack.c.bf16 %v1127_v17, %v1123_v20  ;;  %v1131_v24 = vmax.f32 %v1067_v7, 0.0  ;;  %v1135_v9 = vmax.f32 %v1071_v27, 0.0  ;;  %v990_v21 = vmul.f32 %v10738_v63, %v15893_v57  ;;  %v9748_v29 = vld [vmem:[#allocation10 + $0x300] ss:$16 sps:$4 sm:$0xff]   ;;  %v9751_v25 = vld [vmem:[#allocation10 + $0x308] ss:$16 sps:$4 sm:$0xff]  }
 0x1f6   :  { %2063 = vmatprep.mubr.bf16.mxu0 %v10912_v51  ;;  %2289 = vmatprep.mubr.bf16.mxu1 %v10912_v51  ;;  %v11013_v3 = vpack.c.bf16 %v1136_v52, %v1132_v42  ;;  %v1080_v55 = vadd.f32 %v10850_v18, %v995_v2  ;;  %v1140_v48 = vmax.f32 %v1076_v47, 0.0  ;;  %v994_v61 = vmul.f32 %v10738_v63, %v15894_v8  ;;  %v9756_v15 = vld [vmem:[#allocation10 + $0x324] ss:$16 sps:$4 sm:$0xff]   ;;  %v15901_v47 = vld [vmem:[#allocation54_spill] sm:$0xff] }
 0x1f7   :  { %2118 = vmatprep.subr.bf16.mxu0 %v9744_v56  ;;  %2344 = vmatprep.subr.bf16.mxu1 %v9747_v26  ;;  %v11018_v46 = vpack.c.bf16 %v1135_v9, %v1131_v24  ;;  %v1075_v0 = vadd.f32 %v10847_v12, %v990_v21  ;;  %v999_v30 = vmul.f32 %v10741_v40, %v15895_v58  ;;  %v9759_v56 = vld [vmem:[#allocation10 + $0x32c] ss:$16 sps:$4 sm:$0xff]   ;;  %v15900_v7 = vld [vmem:[#allocation59_spill] sm:$0xff]  ;;  %v9757_v24 = vld [vmem:[#allocation10 + $0x328] ss:$16 sps:$4 sm:$0xff]  }
 0x1f8   :  { %v1144_v51 = vmax.f32 %v1080_v55, 0.0  ;;  %v1079_v50 = vadd.f32 %v10847_v12, %v994_v61  ;;  %v1003_v32 = vmul.f32 %v10741_v40, %v15896_v45  ;;  %v998_v5 = vmul.f32 %v10738_v63, %v15897_v11  ;;  %v9765_v55 = vld [vmem:[#allocation10 + $0x34c] ss:$16 sps:$4 sm:$0xff]   ;;  %v15903_v61 = vld [vmem:[#allocation63_spill] sm:$0xff] }
 0x1f9   :  { %2119 = vmatpush1.bf16.msra.mxu0 %v9742_v34  ;;  %2345 = vmatpush1.bf16.msra.mxu1 %v9745_v33  ;;  %v1139_v13 = vmax.f32 %v1075_v0, 0.0  ;;  %v1084_v23 = vadd.f32 %v10850_v18, %v999_v30  ;;  %v1002_v28 = vmul.f32 %v10738_v63, %v15898_v1  ;;  %v1007_v35 = vmul.f32 %v10741_v40, %v15899_v37  ;;  %v9754_v33 = vld [vmem:[#allocation10 + $0x320] ss:$16 sps:$4 sm:$0xff]   ;;  %v9768_v37 = vld [vmem:[#allocation10 + $0x364] ss:$16 sps:$4 sm:$0xff]  }
 0x1fa   :  { %2120 = vmatprep.subr.bf16.mxu0 %v9750_v4  ;;  %2346 = vmatprep.subr.bf16.mxu1 %v9753_v62  ;;  %v11033_v20 = vpack.c.bf16 %v1144_v51, %v1140_v48  ;;  %v1143_v59 = vmax.f32 %v1079_v50, 0.0  ;;  %v1088_v36 = vadd.f32 %v10850_v18, %v1003_v32  ;;  %v1083_v49 = vadd.f32 %v10847_v12, %v998_v5  ;;  %v15902_v4 = vld [vmem:[#allocation57_spill] sm:$0xff] }
 0x1fb   :  { %v1148_v26 = vmax.f32 %v1084_v23, 0.0  ;;  %v1087_v17 = vadd.f32 %v10847_v12, %v1002_v28  ;;  %v1011_v27 = vmul.f32 %v10741_v40, %v15900_v7  ;;  %v1092_v42 = vadd.f32 %v10850_v18, %v1007_v35  ;;  %v15904_v32 = vld [vmem:[#allocation61_spill] sm:$0xff]  ;;  %v9771_v35 = vld [vmem:[#allocation10 + $0x36c] ss:$16 sps:$4 sm:$0xff]   ;;  %v9775_v7 = vld [vmem:[#allocation10 + $0x388] ss:$16 sps:$4 sm:$0xff]  }
 0x1fc   :  { %2064 = vmatmul.mubr.bf16.gmra.mrb[48].mxu0 %v10916_v44  ;;  %2290 = vmatmul.mubr.bf16.gmra.mrb[48].mxu1 %v10916_v44  ;;  %v11043_v52 = vpack.c.bf16 %v1143_v59, %v1139_v13  ;;  %v1152_v53 = vmax.f32 %v1088_v36, 0.0  ;;  %v1147_v2 = vmax.f32 %v1083_v49, 0.0  ;;  %v1006_v34 = vmul.f32 %v10738_v63, %v15901_v47  ;;  %v9762_v44 = vld [vmem:[#allocation10 + $0x344] ss:$16 sps:$4 sm:$0xff]   ;;  %v9789_v47 = vld [vmem:[#allocation10 + $0x3cc] ss:$16 sps:$4 sm:$0xff]  }
 0x1fd   :  { %2121 = vmatpush1.bf16.msra.mxu0 %v9748_v29  ;;  %2347 = vmatpush1.bf16.msra.mxu1 %v9751_v25  ;;  %v1151_v9 = vmax.f32 %v1087_v17, 0.0  ;;  %v1096_v57 = vadd.f32 %v10850_v18, %v1011_v27  ;;  %v1156_v21 = vmax.f32 %v1092_v42, 0.0  ;;  %v1010_v62 = vmul.f32 %v10738_v63, %v15902_v4  ;;  %v15905_v5 = vld [vmem:[#allocation65_spill] sm:$0xff]  ;;  %v9763_v25 = vld [vmem:[#allocation10 + $0x348] ss:$16 sps:$4 sm:$0xff]  }
 0x1fe   :  { %2073 = vmatprep.mubr.bf16.mxu0 %v10922_v41  ;;  %2299 = vmatprep.mubr.bf16.mxu1 %v10922_v41  ;;  %v11052_v48 = vpack.c.bf16 %v1152_v53, %v1148_v26  ;;  %v1091_v8 = vadd.f32 %v10847_v12, %v1006_v34  ;;  %v1015_v0 = vmul.f32 %v10741_v40, %v15903_v61  ;;  %v9760_v40 = vld [vmem:[#allocation10 + $0x340] ss:$16 sps:$4 sm:$0xff]   ;;  %v9777_v26 = vld [vmem:[#allocation10 + $0x38c] ss:$16 sps:$4 sm:$0xff]   ;;  %v9780_v27 = vld [vmem:[#allocation10 + $0x3a4] ss:$16 sps:$4 sm:$0xff]  }
 0x1ff   :  { %2122 = vmatprep.subr.bf16.mxu0 %v9756_v15  ;;  %2348 = vmatprep.subr.bf16.mxu1 %v9759_v56  ;;  %v11057_v58 = vpack.c.bf16 %v1151_v9, %v1147_v2  ;;  %v1160_v30 = vmax.f32 %v1096_v57, 0.0  ;;  %v1095_v51 = vadd.f32 %v10847_v12, %v1010_v62  ;;  %v1104_v50 = vadd.f32 %v10850_v18, %v10747_v43  ;;  %v9766_v15 = vld [vmem:[#allocation10 + $0x360] ss:$16 sps:$4 sm:$0xff]   ;;  %v9769_v56 = vld [vmem:[#allocation10 + $0x368] ss:$16 sps:$4 sm:$0xff]  }
 0x200   :  { %v1155_v41 = vmax.f32 %v1091_v8, 0.0  ;;  %v1100_v45 = vadd.f32 %v10850_v18, %v1015_v0  ;;  %v1014_v11 = vmul.f32 %v10738_v63, %v15904_v32  ;;  %v1018_v29 = vmul.f32 %v10738_v63, %v15905_v5  ;;  %v9783_v42 = vld [vmem:[#allocation10 + $0x3ac] ss:$16 sps:$4 sm:$0xff]   ;;  %v9781_v53 = vld [vmem:[#allocation10 + $0x3a8] ss:$16 sps:$4 sm:$0xff]  }
 0x201   :  { %2123 = vmatpush1.bf16.msra.mxu0 %v9754_v33  ;;  %2349 = vmatpush1.bf16.msra.mxu1 %v9757_v24  ;;  %v11067_v13 = vpack.c.bf16 %v1160_v30, %v1156_v21  ;;  %v1159_v23 = vmax.f32 %v1095_v51, 0.0  ;;  %v1168_v1 = vmax.f32 %v1104_v50, 0.0  ;;  %v9786_v2 = vld [vmem:[#allocation10 + $0x3c4] ss:$16 sps:$4 sm:$0xff]   ;;  %v9784_v34 = vld [vmem:[#allocation10 + $0x3c0] ss:$16 sps:$4 sm:$0xff]  }
 0x202   :  { %2124 = vmatprep.subr.bf16.mxu0 %v9762_v44  ;;  %2350 = vmatprep.subr.bf16.mxu1 %v9765_v55  ;;  %v1164_v43 = vmax.f32 %v1100_v45, 0.0  ;;  %v1099_v28 = vadd.f32 %v10847_v12, %v1014_v11  ;;  %v1103_v18 = vadd.f32 %v10847_v12, %v1018_v29  ;;  %v9774_v12 = vld [vmem:[#allocation10 + $0x384] ss:$16 sps:$4 sm:$0xff]   ;;  %v9787_v33 = vld [vmem:[#allocation10 + $0x3c8] ss:$16 sps:$4 sm:$0xff]  }
 0x203   :  { %v11071_v59 = vpack.c.bf16 %v1159_v23, %v1155_v41  ;;  %v9792_v24 = vld [vmem:[#allocation10 + $0x3e4] ss:$16 sps:$4 sm:$0xff]   ;;  %v9790_v9 = vld [vmem:[#allocation10 + $0x3e0] ss:$16 sps:$4 sm:$0xff]  }
 0x204   :  { %2074 = vmatmul.mubr.bf16.gmra.mrb[52].mxu0 %v10928_v14  ;;  %2300 = vmatmul.mubr.bf16.gmra.mrb[52].mxu1 %v10928_v14  ;;  %v11075_v63 = vpack.c.bf16 %v1168_v1, %v1164_v43  ;;  %v1163_v36 = vmax.f32 %v1099_v28, 0.0  ;;  %v1167_v49 = vmax.f32 %v1103_v18, 0.0  ;;  %v9772_v14 = vld [vmem:[#allocation10 + $0x380] ss:$16 sps:$4 sm:$0xff]  }
 0x205   :  { %2125 = vmatpush1.bf16.msra.mxu0 %v9760_v40  ;;  %2351 = vmatpush1.bf16.msra.mxu1 %v9763_v25 }
 0x206   :  { %2083 = vmatprep.mubr.bf16.mxu0 %v10938_v38  ;;  %2309 = vmatprep.mubr.bf16.mxu1 %v10938_v38  ;;  %v11079_v17 = vpack.c.bf16 %v1167_v49, %v1163_v36  ;;  %v9778_v38 = vld [vmem:[#allocation10 + $0x3a0] ss:$16 sps:$4 sm:$0xff]  }
 0x207   :  { %2126 = vmatprep.subr.bf16.mxu0 %v9768_v37  ;;  %2352 = vmatprep.subr.bf16.mxu1 %v9771_v35 }
 0x209   :  { %2127 = vmatpush1.bf16.msra.mxu0 %v9766_v15  ;;  %2353 = vmatpush1.bf16.msra.mxu1 %v9769_v56 }
 0x20a   :  { %2128 = vmatprep.subr.bf16.mxu0 %v9774_v12  ;;  %2354 = vmatprep.subr.bf16.mxu1 %v9777_v26 }
 0x20c   :  { %2084 = vmatmul.mubr.bf16.gmra.mrb[56].mxu0 %v10942_v60  ;;  %2310 = vmatmul.mubr.bf16.gmra.mrb[56].mxu1 %v10942_v60  ;;  %v9795_v60 = vld [vmem:[#allocation10 + $0x3ec] ss:$16 sps:$4 sm:$0xff]  }
 0x20d   :  { %2129 = vmatpush1.bf16.msra.mxu0 %v9772_v14  ;;  %2355 = vmatpush1.bf16.msra.mxu1 %v9775_v7 }
 0x20e   :  { %2093 = vmatprep.mubr.bf16.mxu0 %v10946_v16  ;;  %2319 = vmatprep.mubr.bf16.mxu1 %v10946_v16  ;;  %v9793_v16 = vld [vmem:[#allocation10 + $0x3e8] ss:$16 sps:$4 sm:$0xff]  }
 0x20f   :  { %2130 = vmatprep.subr.bf16.mxu0 %v9780_v27  ;;  %2356 = vmatprep.subr.bf16.mxu1 %v9783_v42 }
 0x211   :  { %2131 = vmatpush1.bf16.msra.mxu0 %v9778_v38  ;;  %2357 = vmatpush1.bf16.msra.mxu1 %v9781_v53 }
 0x212   :  { %2132 = vmatprep.subr.bf16.mxu0 %v9786_v2  ;;  %2358 = vmatprep.subr.bf16.mxu1 %v9789_v47 }
 0x214   :  { %2094 = vmatmul.mubr.bf16.gmra.mrb[60].mxu0 %v10952_v6  ;;  %2320 = vmatmul.mubr.bf16.gmra.mrb[60].mxu1 %v10952_v6  ;;  %v1329_v6 = vld [vmem:[#allocation11 + $0xc] sm:$0xf] }
 0x215   :  { %2133 = vmatpush1.bf16.msra.mxu0 %v9784_v34  ;;  %2359 = vmatpush1.bf16.msra.mxu1 %v9787_v33 }
 0x216   :  { %2136 = vmatprep.mubr.bf16.mxu0 %v10964_v10  ;;  %2362 = vmatprep.mubr.bf16.mxu1 %v10964_v10  ;;  %v15906_v10 = vld [vmem:[#allocation25_spill] sm:$0xff] }
 0x217   :  { %2134 = vmatprep.subr.bf16.mxu0 %v9792_v24  ;;  %2360 = vmatprep.subr.bf16.mxu1 %v9795_v60 }
 0x219   :  { %2135 = vmatpush1.bf16.msra.mxu0 %v9790_v9  ;;  %2361 = vmatpush1.bf16.msra.mxu1 %v9793_v16 }
 0x21c   :  { %2137 = vmatmul.mubr.bf16.vlgmr.msra.gmra.mrb[32].mxu0 %v10968_v19  ;;  %2363 = vmatmul.mubr.bf16.vlgmr.msra.gmra.mrb[32].mxu1 %v10968_v19  ;;  %v11120_v19 = vrot.slane %v1329_v6, %v15906_v10 }
 0x21d   :  { %2146 = vmatprep.mubr.bf16.mxu0 %v10974_v22  ;;  %2372 = vmatprep.mubr.bf16.mxu1 %v10974_v22  ;;  %v15907_v22 = vld [vmem:[#allocation26_spill] sm:$0xff] }
 0x224   :  { %2147 = vmatmul.mubr.bf16.gmra.mrb[36].mxu0 %v10979_v54  ;;  %2373 = vmatmul.mubr.bf16.gmra.mrb[36].mxu1 %v10979_v54  ;;  %v11123_v54 = vrot.slane %v1329_v6, %v15907_v22 }
 0x225   :  { %2156 = vmatprep.mubr.bf16.mxu0 %v10998_v31  ;;  %2382 = vmatprep.mubr.bf16.mxu1 %v10998_v31  ;;  %v15908_v31 = vld [vmem:[#allocation27_spill] sm:$0xff] }
 0x22c   :  { %2157 = vmatmul.mubr.bf16.gmra.mrb[40].mxu0 %v11007_v39  ;;  %2383 = vmatmul.mubr.bf16.gmra.mrb[40].mxu1 %v11007_v39  ;;  %v11126_v39 = vrot.slane %v1329_v6, %v15908_v31 }
 0x22d   :  { %2166 = vmatprep.mubr.bf16.mxu0 %v11013_v3  ;;  %2392 = vmatprep.mubr.bf16.mxu1 %v11013_v3  ;;  %v15909_v3 = vld [vmem:[#allocation28_spill] sm:$0xff] }
 0x234   :  { %2167 = vmatmul.mubr.bf16.gmra.mrb[44].mxu0 %v11018_v46  ;;  %2393 = vmatmul.mubr.bf16.gmra.mrb[44].mxu1 %v11018_v46  ;;  %v11129_v46 = vrot.slane %v1329_v6, %v15909_v3 }
 0x235   :  { %2176 = vmatprep.mubr.bf16.mxu0 %v11033_v20  ;;  %2402 = vmatprep.mubr.bf16.mxu1 %v11033_v20 }
 0x23c   :  { %2177 = vmatmul.mubr.bf16.gmra.mrb[48].mxu0 %v11043_v52  ;;  %2403 = vmatmul.mubr.bf16.gmra.mrb[48].mxu1 %v11043_v52 }
 0x23d   :  { %2186 = vmatprep.mubr.bf16.mxu0 %v11052_v48  ;;  %2412 = vmatprep.mubr.bf16.mxu1 %v11052_v48 }
 0x244   :  { %2187 = vmatmul.mubr.bf16.gmra.mrb[52].mxu0 %v11057_v58  ;;  %2413 = vmatmul.mubr.bf16.gmra.mrb[52].mxu1 %v11057_v58 }
 0x245   :  { %2196 = vmatprep.mubr.bf16.mxu0 %v11067_v13  ;;  %2422 = vmatprep.mubr.bf16.mxu1 %v11067_v13 }
 0x24c   :  { %2197 = vmatmul.mubr.bf16.gmra.mrb[56].mxu0 %v11071_v59  ;;  %2423 = vmatmul.mubr.bf16.gmra.mrb[56].mxu1 %v11071_v59 }
 0x24d   :  { %2206 = vmatprep.mubr.bf16.mxu0 %v11075_v63  ;;  %2432 = vmatprep.mubr.bf16.mxu1 %v11075_v63 }
 0x254   :  { %2207 = vmatmul.mubr.bf16.gmra.mrb[60].mxu0 %v11079_v17  ;;  %2433 = vmatmul.mubr.bf16.gmra.mrb[60].mxu1 %v11079_v17 }
 0x2ef   :  { %v2138_v20 = vpop.f32.mrb[32].mxu0  ;;  %v2364_v52 = vpop.f32.mrb[32].mxu1 }
 0x2f0   :  { %v2140_v57 = vpop.f32.mrb[33].mxu0  ;;  %v2366_v21 = vpop.f32.mrb[33].mxu1  ;;  %v11132_v4 = vadd.f32 %v2138_v20, %v11120_v19  ;;  %v11135_v62 = vadd.f32 %v2364_v52, %v11123_v54 }
 0x2f1   :  { %v2142_v44 = vpop.f32.mrb[34].mxu0  ;;  %v2368_v55 = vpop.f32.mrb[34].mxu1  ;;  %v11138_v48 = vadd.f32 %v2140_v57, %v11126_v39  ;;  %v11141_v8 = vadd.f32 %v2366_v21, %v11129_v46 }
 0x2f2   :  { %v11144_v61 = vadd.f32 %v2142_v44, %v11120_v19  ;;  %v11147_v0 = vadd.f32 %v2368_v55, %v11123_v54  ;;  %v2144_v58 = vpop.f32.mrb[35].mxu0  ;;  %v2370_v30 = vpop.f32.mrb[35].mxu1  ;;  %v2533_v5 = vmul.f32 %v11132_v4, %v11132_v4  ;;  %v2535_v29 = vmul.f32 %v11135_v62, %v11135_v62 }
 0x2f3   :  { %v11150_v51 = vadd.f32 %v2144_v58, %v11126_v39  ;;  %v11153_v50 = vadd.f32 %v2370_v30, %v11129_v46  ;;  %v2534_v40 = vmul.f32 %v11138_v48, %v11138_v48  ;;  %v2536_v25 = vmul.f32 %v11141_v8, %v11141_v8 }
 0x2f4   :  { %v2537_v41 = vmul.f32 %v11144_v61, %v11144_v61  ;;  %v2539_v45 = vmul.f32 %v11147_v0, %v11147_v0  ;;  %v2445_v13 = vadd.f32 %v11144_v61, %v11132_v4  ;;  %v2487_v23 = vadd.f32 %v11147_v0, %v11135_v62 }
 0x2f5   :  { %v2538_v32 = vmul.f32 %v11150_v51, %v11150_v51  ;;  %v2540_v11 = vmul.f32 %v11153_v50, %v11153_v50  ;;  %v2466_v1 = vadd.f32 %v11150_v51, %v11138_v48  ;;  %v2508_v43 = vadd.f32 %v11153_v50, %v11141_v8 }
 0x2f6   :  { %v2597_v37 = vadd.f32 %v2537_v41, %v2533_v5  ;;  %v2639_v35 = vadd.f32 %v2539_v45, %v2535_v29 }
 0x2f7   :  { %v2148_v28 = vpop.f32.mrb[36].mxu0  ;;  %v2374_v18 = vpop.f32.mrb[36].mxu1  ;;  %v2618_v15 = vadd.f32 %v2538_v32, %v2534_v40  ;;  %v2660_v56 = vadd.f32 %v2540_v11, %v2536_v25 }
 0x2f8   :  { %v11180_v59 = vadd.f32 %v2148_v28, %v11120_v19  ;;  %v11183_v63 = vadd.f32 %v2374_v18, %v11123_v54  ;;  %v2150_v36 = vpop.f32.mrb[37].mxu0  ;;  %v2376_v49 = vpop.f32.mrb[37].mxu1 }
 0x2f9   :  { %v11186_v12 = vadd.f32 %v2150_v36, %v11126_v39  ;;  %v11189_v26 = vadd.f32 %v2376_v49, %v11129_v46  ;;  %v2152_v17 = vpop.f32.mrb[38].mxu0  ;;  %v2378_v14 = vpop.f32.mrb[38].mxu1 }
 0x2fa   :  { %v2446_v7 = vadd.f32 %v11180_v59, %v2445_v13  ;;  %v2541_v27 = vmul.f32 %v11180_v59, %v11180_v59  ;;  %v2488_v42 = vadd.f32 %v11183_v63, %v2487_v23  ;;  %v2543_v38 = vmul.f32 %v11183_v63, %v11183_v63  ;;  %v2154_v53 = vpop.f32.mrb[39].mxu0  ;;  %v2380_v2 = vpop.f32.mrb[39].mxu1 }
 0x2fb   :  { %v2467_v47 = vadd.f32 %v11186_v12, %v2466_v1  ;;  %v2542_v34 = vmul.f32 %v11186_v12, %v11186_v12  ;;  %v2509_v33 = vadd.f32 %v11189_v26, %v2508_v43  ;;  %v2544_v24 = vmul.f32 %v11189_v26, %v11189_v26 }
 0x2fc   :  { %v2598_v60 = vadd.f32 %v2597_v37, %v2541_v27  ;;  %v2640_v9 = vadd.f32 %v2639_v35, %v2543_v38  ;;  %v11204_v16 = vadd.f32 %v2152_v17, %v11120_v19  ;;  %v11207_v6 = vadd.f32 %v2378_v14, %v11123_v54 }
 0x2fd   :  { %v2619_v20 = vadd.f32 %v2618_v15, %v2542_v34  ;;  %v2661_v52 = vadd.f32 %v2660_v56, %v2544_v24  ;;  %v11210_v57 = vadd.f32 %v2154_v53, %v11126_v39  ;;  %v11213_v21 = vadd.f32 %v2380_v2, %v11129_v46 }
 0x2fe   :  { %v2447_v44 = vadd.f32 %v11204_v16, %v2446_v7  ;;  %v2545_v55 = vmul.f32 %v11204_v16, %v11204_v16  ;;  %v2489_v58 = vadd.f32 %v11207_v6, %v2488_v42  ;;  %v2547_v30 = vmul.f32 %v11207_v6, %v11207_v6 }
 0x2ff   :  { %v2468_v41 = vadd.f32 %v11210_v57, %v2467_v47  ;;  %v2546_v45 = vmul.f32 %v11210_v57, %v11210_v57  ;;  %v2510_v32 = vadd.f32 %v11213_v21, %v2509_v33  ;;  %v2548_v11 = vmul.f32 %v11213_v21, %v11213_v21  ;;  %v2158_v5 = vpop.f32.mrb[40].mxu0  ;;  %v2384_v29 = vpop.f32.mrb[40].mxu1 }
 0x300   :  { %v2599_v40 = vadd.f32 %v2598_v60, %v2545_v55  ;;  %v2641_v25 = vadd.f32 %v2640_v9, %v2547_v30  ;;  %v11228_v13 = vadd.f32 %v2158_v5, %v11120_v19  ;;  %v11231_v23 = vadd.f32 %v2384_v29, %v11123_v54  ;;  %v2160_v1 = vpop.f32.mrb[41].mxu0  ;;  %v2386_v43 = vpop.f32.mrb[41].mxu1 }
 0x301   :  { %v2620_v28 = vadd.f32 %v2619_v20, %v2546_v45  ;;  %v2662_v18 = vadd.f32 %v2661_v52, %v2548_v11  ;;  %v11234_v37 = vadd.f32 %v2160_v1, %v11126_v39  ;;  %v11237_v35 = vadd.f32 %v2386_v43, %v11129_v46  ;;  %v2162_v36 = vpop.f32.mrb[42].mxu0  ;;  %v2388_v49 = vpop.f32.mrb[42].mxu1 }
 0x302   :  { %v2448_v15 = vadd.f32 %v11228_v13, %v2447_v44  ;;  %v2549_v56 = vmul.f32 %v11228_v13, %v11228_v13  ;;  %v2490_v17 = vadd.f32 %v11231_v23, %v2489_v58  ;;  %v2551_v14 = vmul.f32 %v11231_v23, %v11231_v23  ;;  %v2164_v7 = vpop.f32.mrb[43].mxu0  ;;  %v2390_v27 = vpop.f32.mrb[43].mxu1 }
 0x303   :  { %v2469_v42 = vadd.f32 %v11234_v37, %v2468_v41  ;;  %v2550_v38 = vmul.f32 %v11234_v37, %v11234_v37  ;;  %v2511_v53 = vadd.f32 %v11237_v35, %v2510_v32  ;;  %v2552_v2 = vmul.f32 %v11237_v35, %v11237_v35 }
 0x304   :  { %v2600_v47 = vadd.f32 %v2599_v40, %v2549_v56  ;;  %v2642_v34 = vadd.f32 %v2641_v25, %v2551_v14  ;;  %v11252_v33 = vadd.f32 %v2162_v36, %v11120_v19  ;;  %v11255_v24 = vadd.f32 %v2388_v49, %v11123_v54 }
 0x305   :  { %v2621_v60 = vadd.f32 %v2620_v28, %v2550_v38  ;;  %v2663_v9 = vadd.f32 %v2662_v18, %v2552_v2  ;;  %v11258_v20 = vadd.f32 %v2164_v7, %v11126_v39  ;;  %v11261_v52 = vadd.f32 %v2390_v27, %v11129_v46 }
 0x306   :  { %v2449_v44 = vadd.f32 %v11252_v33, %v2448_v15  ;;  %v2553_v55 = vmul.f32 %v11252_v33, %v11252_v33  ;;  %v2491_v58 = vadd.f32 %v11255_v24, %v2490_v17  ;;  %v2555_v30 = vmul.f32 %v11255_v24, %v11255_v24 }
 0x307   :  { %v2470_v41 = vadd.f32 %v11258_v20, %v2469_v42  ;;  %v2554_v45 = vmul.f32 %v11258_v20, %v11258_v20  ;;  %v2512_v32 = vadd.f32 %v11261_v52, %v2511_v53  ;;  %v2556_v11 = vmul.f32 %v11261_v52, %v11261_v52  ;;  %v2168_v5 = vpop.f32.mrb[44].mxu0  ;;  %v2394_v29 = vpop.f32.mrb[44].mxu1 }
 0x308   :  { %v2601_v40 = vadd.f32 %v2600_v47, %v2553_v55  ;;  %v2643_v25 = vadd.f32 %v2642_v34, %v2555_v30  ;;  %v11276_v1 = vadd.f32 %v2168_v5, %v11120_v19  ;;  %v11279_v43 = vadd.f32 %v2394_v29, %v11123_v54  ;;  %v2170_v28 = vpop.f32.mrb[45].mxu0  ;;  %v2396_v18 = vpop.f32.mrb[45].mxu1 }
 0x309   :  { %v2622_v36 = vadd.f32 %v2621_v60, %v2554_v45  ;;  %v2664_v49 = vadd.f32 %v2663_v9, %v2556_v11  ;;  %v11282_v15 = vadd.f32 %v2170_v28, %v11126_v39  ;;  %v11285_v56 = vadd.f32 %v2396_v18, %v11129_v46  ;;  %v2172_v17 = vpop.f32.mrb[46].mxu0  ;;  %v2398_v14 = vpop.f32.mrb[46].mxu1 }
 0x30a   :  { %v2450_v7 = vadd.f32 %v11276_v1, %v2449_v44  ;;  %v2557_v27 = vmul.f32 %v11276_v1, %v11276_v1  ;;  %v2492_v42 = vadd.f32 %v11279_v43, %v2491_v58  ;;  %v2559_v38 = vmul.f32 %v11279_v43, %v11279_v43  ;;  %v2174_v53 = vpop.f32.mrb[47].mxu0  ;;  %v2400_v2 = vpop.f32.mrb[47].mxu1 }
 0x30b   :  { %15910 = vst [vmem:[#allocation58_spill] sm:$0xff] %v11285_v56  ;;  %v2471_v47 = vadd.f32 %v11282_v15, %v2470_v41  ;;  %v2558_v34 = vmul.f32 %v11282_v15, %v11282_v15  ;;  %v2513_v60 = vadd.f32 %v11285_v56, %v2512_v32  ;;  %v2560_v9 = vmul.f32 %v11285_v56, %v11285_v56 }
 0x30c   :  { %v2602_v44 = vadd.f32 %v2601_v40, %v2557_v27  ;;  %v2644_v55 = vadd.f32 %v2643_v25, %v2559_v38  ;;  %v11300_v30 = vadd.f32 %v2172_v17, %v11120_v19  ;;  %v11303_v58 = vadd.f32 %v2398_v14, %v11123_v54 }
 0x30d   :  { %v2623_v45 = vadd.f32 %v2622_v36, %v2558_v34  ;;  %v2665_v11 = vadd.f32 %v2664_v49, %v2560_v9  ;;  %v11306_v41 = vadd.f32 %v2174_v53, %v11126_v39  ;;  %v11309_v5 = vadd.f32 %v2400_v2, %v11129_v46 }
 0x30e   :  { %15911 = vst [vmem:[#allocation53_spill] sm:$0xff] %v11300_v30  ;;  %15912 = vst [vmem:[#allocation56_spill] sm:$0xff] %v11303_v58  ;;  %v2451_v32 = vadd.f32 %v11300_v30, %v2450_v7  ;;  %v2561_v29 = vmul.f32 %v11300_v30, %v11300_v30  ;;  %v2493_v40 = vadd.f32 %v11303_v58, %v2492_v42 }
 0x30f   :  { %15913 = vst [vmem:[#allocation62_spill] sm:$0xff] %v11306_v41  ;;  %15914 = vst [vmem:[#allocation66_spill] sm:$0xff] %v11309_v5  ;;  %v2563_v25 = vmul.f32 %v11303_v58, %v11303_v58  ;;  %v2472_v28 = vadd.f32 %v11306_v41, %v2471_v47  ;;  %v2562_v18 = vmul.f32 %v11306_v41, %v11306_v41  ;;  %v2178_v17 = vpop.f32.mrb[48].mxu0  ;;  %v2404_v14 = vpop.f32.mrb[48].mxu1 }
 0x310   :  { %v2514_v36 = vadd.f32 %v11309_v5, %v2513_v60  ;;  %v2564_v49 = vmul.f32 %v11309_v5, %v11309_v5  ;;  %v2603_v7 = vadd.f32 %v2602_v44, %v2561_v29  ;;  %v11324_v38 = vadd.f32 %v2178_v17, %v11120_v19  ;;  %v2180_v53 = vpop.f32.mrb[49].mxu0  ;;  %v2406_v2 = vpop.f32.mrb[49].mxu1 }
 0x311   :  { %v2645_v27 = vadd.f32 %v2644_v55, %v2563_v25  ;;  %v11327_v42 = vadd.f32 %v2404_v14, %v11123_v54  ;;  %v2624_v47 = vadd.f32 %v2623_v45, %v2562_v18  ;;  %v11330_v9 = vadd.f32 %v2180_v53, %v11126_v39  ;;  %v2182_v5 = vpop.f32.mrb[50].mxu0  ;;  %v2408_v58 = vpop.f32.mrb[50].mxu1 }
 0x312   :  { %15915 = vst [vmem:[#allocation60_spill] sm:$0xff] %v11324_v38  ;;  %v2666_v34 = vadd.f32 %v2665_v11, %v2564_v49  ;;  %v11333_v60 = vadd.f32 %v2406_v2, %v11129_v46  ;;  %v2452_v44 = vadd.f32 %v11324_v38, %v2451_v32  ;;  %v2565_v55 = vmul.f32 %v11324_v38, %v11324_v38  ;;  %v2184_v45 = vpop.f32.mrb[51].mxu0  ;;  %v2410_v11 = vpop.f32.mrb[51].mxu1 }
 0x313   :  { %15916 = vst [vmem:[#allocation64_spill] sm:$0xff] %v11327_v42  ;;  %15917 = vst [vmem:[#allocation30_spill] sm:$0xff] %v11330_v9  ;;  %v2494_v29 = vadd.f32 %v11327_v42, %v2493_v40  ;;  %v2567_v25 = vmul.f32 %v11327_v42, %v11327_v42  ;;  %v2473_v18 = vadd.f32 %v11330_v9, %v2472_v28 }
 0x314   :  { %15918 = vst [vmem:[#allocation32_spill] sm:$0xff] %v11333_v60  ;;  %v2566_v49 = vmul.f32 %v11330_v9, %v11330_v9  ;;  %v2515_v17 = vadd.f32 %v11333_v60, %v2514_v36  ;;  %v2568_v32 = vmul.f32 %v11333_v60, %v11333_v60  ;;  %v2604_v14 = vadd.f32 %v2603_v7, %v2565_v55 }
 0x315   :  { %v2646_v53 = vadd.f32 %v2645_v27, %v2567_v25  ;;  %v11348_v2 = vadd.f32 %v2182_v5, %v11120_v19  ;;  %v11351_v40 = vadd.f32 %v2408_v58, %v11123_v54  ;;  %v11354_v28 = vadd.f32 %v2184_v45, %v11126_v39 }
 0x316   :  { %v2625_v42 = vadd.f32 %v2624_v47, %v2566_v49  ;;  %v2667_v38 = vadd.f32 %v2666_v34, %v2568_v32  ;;  %v11357_v9 = vadd.f32 %v2410_v11, %v11129_v46 }
 0x317   :  { %15919 = vst [vmem:[#allocation29_spill] sm:$0xff] %v11348_v2  ;;  %15920 = vst [vmem:[#allocation31_spill] sm:$0xff] %v11351_v40  ;;  %v2453_v36 = vadd.f32 %v11348_v2, %v2452_v44  ;;  %v2569_v7 = vmul.f32 %v11348_v2, %v11348_v2  ;;  %v2495_v27 = vadd.f32 %v11351_v40, %v2494_v29  ;;  %v2188_v25 = vpop.f32.mrb[52].mxu0  ;;  %v2414_v44 = vpop.f32.mrb[52].mxu1 }
 0x318   :  { %15921 = vst [vmem:[#allocation34_spill] sm:$0xff] %v11354_v28  ;;  %15922 = vst [vmem:[#allocation36_spill] sm:$0xff] %v11357_v9  ;;  %v2571_v5 = vmul.f32 %v11351_v40, %v11351_v40  ;;  %v2474_v58 = vadd.f32 %v11354_v28, %v2473_v18  ;;  %v2570_v47 = vmul.f32 %v11354_v28, %v11354_v28  ;;  %v2190_v32 = vpop.f32.mrb[53].mxu0  ;;  %v2416_v18 = vpop.f32.mrb[53].mxu1 }
 0x319   :  { %v2516_v34 = vadd.f32 %v11357_v9, %v2515_v17  ;;  %v2572_v55 = vmul.f32 %v11357_v9, %v11357_v9  ;;  %v2605_v45 = vadd.f32 %v2604_v14, %v2569_v7  ;;  %v11372_v49 = vadd.f32 %v2188_v25, %v11120_v19  ;;  %v2192_v9 = vpop.f32.mrb[54].mxu0  ;;  %v2418_v60 = vpop.f32.mrb[54].mxu1 }
 0x31a   :  { %v2647_v11 = vadd.f32 %v2646_v53, %v2571_v5  ;;  %v11375_v29 = vadd.f32 %v2414_v44, %v11123_v54  ;;  %v2626_v40 = vadd.f32 %v2625_v42, %v2570_v47  ;;  %v11378_v28 = vadd.f32 %v2190_v32, %v11126_v39  ;;  %v2194_v42 = vpop.f32.mrb[55].mxu0 }
 0x31b   :  { %15923 = vst [vmem:[#allocation33_spill] sm:$0xff] %v11372_v49  ;;  %v2668_v2 = vadd.f32 %v2667_v38, %v2572_v55  ;;  %v11381_v17 = vadd.f32 %v2416_v18, %v11129_v46  ;;  %v2454_v14 = vadd.f32 %v11372_v49, %v2453_v36  ;;  %v2573_v53 = vmul.f32 %v11372_v49, %v11372_v49  ;;  %v2420_v38 = vpop.f32.mrb[55].mxu1 }
 0x31c   :  { %15924 = vst [vmem:[#allocation35_spill] sm:$0xff] %v11375_v29  ;;  %15925 = vst [vmem:[#allocation38_spill] sm:$0xff] %v11378_v28  ;;  %v2496_v7 = vadd.f32 %v11375_v29, %v2495_v27  ;;  %v2575_v5 = vmul.f32 %v11375_v29, %v11375_v29  ;;  %v2475_v47 = vadd.f32 %v11378_v28, %v2474_v58 }
 0x31d   :  { %15926 = vst [vmem:[#allocation40_spill] sm:$0xff] %v11381_v17  ;;  %v2574_v55 = vmul.f32 %v11378_v28, %v11378_v28  ;;  %v2517_v25 = vadd.f32 %v11381_v17, %v2516_v34  ;;  %v2576_v36 = vmul.f32 %v11381_v17, %v11381_v17  ;;  %v2606_v44 = vadd.f32 %v2605_v45, %v2573_v53 }
 0x31e   :  { %v2648_v32 = vadd.f32 %v2647_v11, %v2575_v5  ;;  %v11396_v18 = vadd.f32 %v2192_v9, %v11120_v19  ;;  %v11399_v27 = vadd.f32 %v2418_v60, %v11123_v54  ;;  %v11402_v58 = vadd.f32 %v2194_v42, %v11126_v39 }
 0x31f   :  { %v2627_v29 = vadd.f32 %v2626_v40, %v2574_v55  ;;  %v2669_v49 = vadd.f32 %v2668_v2, %v2576_v36  ;;  %v11405_v28 = vadd.f32 %v2420_v38, %v11129_v46  ;;  %v2198_v5 = vpop.f32.mrb[56].mxu0 }
 0x320   :  { %15927 = vst [vmem:[#allocation37_spill] sm:$0xff] %v11396_v18  ;;  %15928 = vst [vmem:[#allocation39_spill] sm:$0xff] %v11399_v27  ;;  %v2455_v34 = vadd.f32 %v11396_v18, %v2454_v14  ;;  %v2577_v45 = vmul.f32 %v11396_v18, %v11396_v18  ;;  %v2497_v11 = vadd.f32 %v11399_v27, %v2496_v7  ;;  %v2424_v14 = vpop.f32.mrb[56].mxu1  ;;  %v2200_v36 = vpop.f32.mrb[57].mxu0 }
 0x321   :  { %15929 = vst [vmem:[#allocation42_spill] sm:$0xff] %v11402_v58  ;;  %15930 = vst [vmem:[#allocation44_spill] sm:$0xff] %v11405_v28  ;;  %v2579_v9 = vmul.f32 %v11399_v27, %v11399_v27  ;;  %v2476_v60 = vadd.f32 %v11402_v58, %v2475_v47  ;;  %v2578_v2 = vmul.f32 %v11402_v58, %v11402_v58  ;;  %v2426_v47 = vpop.f32.mrb[57].mxu1 }
 0x322   :  { %v2518_v40 = vadd.f32 %v11405_v28, %v2517_v25  ;;  %v2580_v53 = vmul.f32 %v11405_v28, %v11405_v28  ;;  %v2607_v42 = vadd.f32 %v2606_v44, %v2577_v45  ;;  %v11420_v55 = vadd.f32 %v2198_v5, %v11120_v19  ;;  %v2202_v28 = vpop.f32.mrb[58].mxu0  ;;  %v2428_v17 = vpop.f32.mrb[58].mxu1 }
 0x323   :  { %v2649_v38 = vadd.f32 %v2648_v32, %v2579_v9  ;;  %v11423_v7 = vadd.f32 %v2424_v14, %v11123_v54  ;;  %v2628_v27 = vadd.f32 %v2627_v29, %v2578_v2  ;;  %v11426_v58 = vadd.f32 %v2200_v36, %v11126_v39  ;;  %v2204_v29 = vpop.f32.mrb[59].mxu0 }
 0x324   :  { %15931 = vst [vmem:[#allocation41_spill] sm:$0xff] %v11420_v55  ;;  %v2670_v18 = vadd.f32 %v2669_v49, %v2580_v53  ;;  %v11429_v25 = vadd.f32 %v2426_v47, %v11129_v46  ;;  %v2456_v44 = vadd.f32 %v11420_v55, %v2455_v34  ;;  %v2581_v32 = vmul.f32 %v11420_v55, %v11420_v55  ;;  %v2430_v49 = vpop.f32.mrb[59].mxu1 }
 0x325   :  { %15932 = vst [vmem:[#allocation43_spill] sm:$0xff] %v11423_v7  ;;  %15933 = vst [vmem:[#allocation46_spill] sm:$0xff] %v11426_v58  ;;  %v2498_v45 = vadd.f32 %v11423_v7, %v2497_v11  ;;  %v2583_v9 = vmul.f32 %v11423_v7, %v11423_v7  ;;  %v2477_v2 = vadd.f32 %v11426_v58, %v2476_v60 }
 0x326   :  { %15934 = vst [vmem:[#allocation48_spill] sm:$0xff] %v11429_v25  ;;  %v2582_v53 = vmul.f32 %v11426_v58, %v11426_v58  ;;  %v2519_v5 = vadd.f32 %v11429_v25, %v2518_v40  ;;  %v2584_v34 = vmul.f32 %v11429_v25, %v11429_v25  ;;  %v2608_v14 = vadd.f32 %v2607_v42, %v2581_v32 }
 0x327   :  { %v2650_v36 = vadd.f32 %v2649_v38, %v2583_v9  ;;  %v11444_v47 = vadd.f32 %v2202_v28, %v11120_v19  ;;  %v11447_v11 = vadd.f32 %v2428_v17, %v11123_v54  ;;  %v11450_v60 = vadd.f32 %v2204_v29, %v11126_v39  ;;  %v2208_v9 = vpop.f32.mrb[60].mxu0 }
 0x328   :  { %v2629_v7 = vadd.f32 %v2628_v27, %v2582_v53  ;;  %v2671_v55 = vadd.f32 %v2670_v18, %v2584_v34  ;;  %v11453_v58 = vadd.f32 %v2430_v49, %v11129_v46  ;;  %v11468_v53 = vadd.f32 %v2208_v9, %v11120_v19  ;;  %v2210_v34 = vpop.f32.mrb[61].mxu0 }
 0x329   :  { %15935 = vst [vmem:[#allocation45_spill] sm:$0xff] %v11444_v47  ;;  %15936 = vst [vmem:[#allocation47_spill] sm:$0xff] %v11447_v11  ;;  %v2457_v40 = vadd.f32 %v11444_v47, %v2456_v44  ;;  %v2585_v42 = vmul.f32 %v11444_v47, %v11444_v47  ;;  %v2499_v38 = vadd.f32 %v11447_v11, %v2498_v45  ;;  %v2434_v44 = vpop.f32.mrb[60].mxu1 }
 0x32a   :  { %15937 = vst [vmem:[#allocation50_spill] sm:$0xff] %v11450_v60  ;;  %15938 = vst [vmem:[#allocation52_spill] sm:$0xff] %v11453_v58  ;;  %v2587_v28 = vmul.f32 %v11447_v11, %v11447_v11  ;;  %v2478_v17 = vadd.f32 %v11450_v60, %v2477_v2  ;;  %v2586_v18 = vmul.f32 %v11450_v60, %v11450_v60  ;;  %v2436_v2 = vpop.f32.mrb[61].mxu1 }
 0x32b   :  { %v2520_v27 = vadd.f32 %v11453_v58, %v2519_v5  ;;  %v2588_v32 = vmul.f32 %v11453_v58, %v11453_v58  ;;  %v2609_v29 = vadd.f32 %v2608_v14, %v2585_v42  ;;  %15939 = vst [vmem:[#allocation49_spill] sm:$0xff] %v11468_v53  ;;  %v11471_v45 = vadd.f32 %v2434_v44, %v11123_v54  ;;  %v2212_v58 = vpop.f32.mrb[62].mxu0  ;;  %v2438_v47 = vpop.f32.mrb[62].mxu1 }
 0x32c   :  { %v2651_v49 = vadd.f32 %v2650_v36, %v2587_v28  ;;  %v2630_v25 = vadd.f32 %v2629_v7, %v2586_v18  ;;  %v11474_v60 = vadd.f32 %v2210_v34, %v11126_v39  ;;  %v11477_v5 = vadd.f32 %v2436_v2, %v11129_v46  ;;  %v2214_v7 = vpop.f32.mrb[63].mxu0 }
 0x32d   :  { %15940 = vst [vmem:[#allocation51_spill] sm:$0xff] %v11471_v45  ;;  %v2672_v11 = vadd.f32 %v2671_v55, %v2588_v32  ;;  %v2458_v14 = vadd.f32 %v11468_v53, %v2457_v40  ;;  %v2589_v36 = vmul.f32 %v11468_v53, %v11468_v53  ;;  %v2500_v42 = vadd.f32 %v11471_v45, %v2499_v38  ;;  %v2440_v55 = vpop.f32.mrb[63].mxu1 }
 0x32e   :  { %15941 = vst [vmem:[#allocation55_spill] sm:$0xff] %v11474_v60  ;;  %15942 = vst [vmem:[#allocation59_spill] sm:$0xff] %v11477_v5  ;;  %v2591_v28 = vmul.f32 %v11471_v45, %v11471_v45  ;;  %v2479_v18 = vadd.f32 %v11474_v60, %v2478_v17  ;;  %v2590_v32 = vmul.f32 %v11474_v60, %v11474_v60 }
 0x32f   :  { %v2521_v9 = vadd.f32 %v11477_v5, %v2520_v27  ;;  %v2592_v40 = vmul.f32 %v11477_v5, %v11477_v5  ;;  %v2610_v44 = vadd.f32 %v2609_v29, %v2589_v36  ;;  %v11492_v2 = vadd.f32 %v2212_v58, %v11120_v19 }
 0x330   :  { %v2652_v34 = vadd.f32 %v2651_v49, %v2591_v28  ;;  %v11495_v38 = vadd.f32 %v2438_v47, %v11123_v54  ;;  %v2631_v45 = vadd.f32 %v2630_v25, %v2590_v32  ;;  %v11498_v17 = vadd.f32 %v2214_v7, %v11126_v39 }
 0x331   :  { %15943 = vst [vmem:[#allocation54_spill] sm:$0xff] %v11492_v2  ;;  %v2673_v53 = vadd.f32 %v2672_v11, %v2592_v40  ;;  %v11501_v60 = vadd.f32 %v2440_v55, %v11129_v46  ;;  %v2459_v27 = vadd.f32 %v11492_v2, %v2458_v14  ;;  %v2593_v29 = vmul.f32 %v11492_v2, %v11492_v2 }
 0x332   :  { %15944 = vst [vmem:[#allocation57_spill] sm:$0xff] %v11495_v38  ;;  %15945 = vst [vmem:[#allocation63_spill] sm:$0xff] %v11498_v17  ;;  %v2501_v49 = vadd.f32 %v11495_v38, %v2500_v42  ;;  %v2595_v19 = vmul.f32 %v11495_v38, %v11495_v38  ;;  %v2480_v54 = vadd.f32 %v11498_v17, %v2479_v18 }
 0x333   :  { %15946 = vst [vmem:[#allocation61_spill] sm:$0xff] %v11501_v60  ;;  %v2594_v58 = vmul.f32 %v11498_v17, %v11498_v17  ;;  %v2522_v39 = vadd.f32 %v11501_v60, %v2521_v9  ;;  %v2596_v46 = vmul.f32 %v11501_v60, %v11501_v60  ;;  %v2460_v25 = vrot.slane %v2459_v27, 4 }
 0x334   :  { %v2611_v47 = vadd.f32 %v2610_v44, %v2593_v29  ;;  %v2502_v11 = vrot.slane %v2501_v49, 4  ;;  %v2653_v14 = vadd.f32 %v2652_v34, %v2595_v19  ;;  %v2481_v36 = vrot.slane %v2480_v54, 4 }
 0x335   :  { %v2632_v28 = vadd.f32 %v2631_v45, %v2594_v58  ;;  %v2523_v42 = vrot.slane %v2522_v39, 4  ;;  %v2674_v7 = vadd.f32 %v2673_v53, %v2596_v46  ;;  %v2461_v55 = vadd.f32 %v2460_v25, %v2459_v27 }
 0x336   :  { %v2612_v32 = vrot.slane %v2611_v47, 4  ;;  %v2503_v40 = vadd.f32 %v2502_v11, %v2501_v49  ;;  %v2654_v18 = vrot.slane %v2653_v14, 4  ;;  %v2482_v38 = vadd.f32 %v2481_v36, %v2480_v54 }
 0x337   :  { %v2633_v2 = vrot.slane %v2632_v28, 4  ;;  %v2524_v17 = vadd.f32 %v2523_v42, %v2522_v39  ;;  %v2675_v5 = vrot.slane %v2674_v7, 4  ;;  %v2462_v9 = vrot.slane %v2461_v55, 2 }
 0x338   :  { %v2613_v41 = vadd.f32 %v2612_v32, %v2611_v47  ;;  %v2504_v30 = vrot.slane %v2503_v40, 2  ;;  %v2655_v60 = vadd.f32 %v2654_v18, %v2653_v14  ;;  %v2483_v56 = vrot.slane %v2482_v38, 2 }
 0x339   :  { %v2634_v44 = vadd.f32 %v2633_v2, %v2632_v28  ;;  %v2525_v29 = vrot.slane %v2524_v17, 2  ;;  %v2676_v34 = vadd.f32 %v2675_v5, %v2674_v7  ;;  %v2463_v19 = vadd.f32 %v2462_v9, %v2461_v55 }
 0x33a   :  { %v2614_v45 = vrot.slane %v2613_v41, 2  ;;  %v2505_v58 = vadd.f32 %v2504_v30, %v2503_v40  ;;  %v2656_v53 = vrot.slane %v2655_v60, 2  ;;  %v2484_v27 = vadd.f32 %v2483_v56, %v2482_v38 }
 0x33b   :  { %v2635_v46 = vrot.slane %v2634_v44, 2  ;;  %v2526_v49 = vadd.f32 %v2525_v29, %v2524_v17  ;;  %v2677_v25 = vrot.slane %v2676_v34, 2  ;;  %v2464_v54 = vrot.slane %v2463_v19, 1 }
 0x33c   :  { %v2615_v11 = vadd.f32 %v2614_v45, %v2613_v41  ;;  %v2506_v39 = vrot.slane %v2505_v58, 1  ;;  %v2657_v36 = vadd.f32 %v2656_v53, %v2655_v60  ;;  %v2485_v42 = vrot.slane %v2484_v27, 1 }
 0x33d   :  { %v2636_v47 = vadd.f32 %v2635_v46, %v2634_v44  ;;  %v2527_v32 = vrot.slane %v2526_v49, 1  ;;  %v2678_v14 = vadd.f32 %v2677_v25, %v2676_v34  ;;  %v2465_v18 = vadd.f32 %v2464_v54, %v2463_v19 }
 0x33e   :  { %v2616_v2 = vrot.slane %v2615_v11, 1  ;;  %v2507_v28 = vadd.f32 %v2506_v39, %v2505_v58  ;;  %v2658_v5 = vrot.slane %v2657_v36, 1  ;;  %v2486_v7 = vadd.f32 %v2485_v42, %v2484_v27 }
 0x33f   :  { %v2637_v55 = vrot.slane %v2636_v47, 1  ;;  %v2528_v30 = vadd.f32 %v2527_v32, %v2526_v49  ;;  %v2679_v40 = vrot.slane %v2678_v14, 1  ;;  %v2529_v56 = vmul.f32 0.0078125, %v2465_v18 }
 0x340   :  { %v2617_v38 = vadd.f32 %v2616_v2, %v2615_v11  ;;  %v2531_v17 = vmul.f32 0.0078125, %v2507_v28  ;;  %v2659_v9 = vadd.f32 %v2658_v5, %v2657_v36  ;;  %v2530_v29 = vmul.f32 0.0078125, %v2486_v7 }
 0x341   :  { %v2638_v41 = vadd.f32 %v2637_v55, %v2636_v47  ;;  %v2532_v45 = vmul.f32 0.0078125, %v2528_v30  ;;  %v2680_v60 = vadd.f32 %v2679_v40, %v2678_v14  ;;  %v2685_v44 = vmul.f32 %v2529_v56, %v2529_v56 }
 0x342   :  { %v2681_v53 = vmul.f32 0.0078125, %v2617_v38  ;;  %v2683_v46 = vmul.f32 0.0078125, %v2659_v9  ;;  %v2687_v34 = vmul.f32 %v2531_v17, %v2531_v17  ;;  %v2686_v25 = vmul.f32 %v2530_v29, %v2530_v29  ;;  %v15947_v9 = vld [vmem:[#allocation67_spill] sm:$0xff] }
 0x343   :  { %v2682_v19 = vmul.f32 0.0078125, %v2638_v41  ;;  %v2684_v58 = vmul.f32 0.0078125, %v2680_v60  ;;  %v2688_v54 = vmul.f32 %v2532_v45, %v2532_v45 }
 0x344   :  { %v2689_v27 = vsub.f32 %v2681_v53, %v2685_v44  ;;  %v2691_v39 = vsub.f32 %v2683_v46, %v2687_v34  ;;  %v2443_v44 = vld [vmem:[#allocation11 + $0x10] sm:$0xf] }
 0x345   :  { %v2690_v49 = vsub.f32 %v2682_v19, %v2686_v25  ;;  %v2692_v42 = vsub.f32 %v2684_v58, %v2688_v54 }
 0x346   :  { %v2693_v32 = vmax.f32 %v2689_v27, 0.0  ;;  %v2695_v11 = vmax.f32 %v2691_v39, 0.0 }
 0x347   :  { %v2694_v18 = vmax.f32 %v2690_v49, 0.0  ;;  %v2696_v36 = vmax.f32 %v2692_v42, 0.0 }
 0x348   :  { %v2697_v2 = vadd.f32 1e-05, %v2693_v32  ;;  %v2699_v47 = vadd.f32 1e-05, %v2695_v11 }
 0x349   :  { %v2698_v28 = vadd.f32 1e-05, %v2694_v18  ;;  %v2700_v14 = vadd.f32 1e-05, %v2696_v36 }
 0x34a   :  { %9804 = vrsqrt.f32 %v2697_v2 }
 0x34b   :  { %9806 = vrsqrt.f32 %v2699_v47 }
 0x34c   :  { %9808 = vrsqrt.f32 %v2698_v28  ;;  %v2444_v28 = vld [vmem:[#allocation11 + $0x14] sm:$0xf] }
 0x34d   :  { %9810 = vrsqrt.f32 %v2700_v14 }
 0x354   :  { %v9805_v5 = vpop.eup %9804 }
 0x355   :  { %v9807_v7 = vpop.eup %9806 }
 0x356   :  { %v9809_v55 = vpop.eup %9808 }
 0x357   :  { %v9811_v30 = vpop.eup %9810  ;;  %v2709_v40 = vcombine.low %v9805_v5, %v9809_v55  ;;  %v15948_v5 = vld [vmem:[#allocation58_spill] sm:$0xff] }
 0x358   :  { %v2710_v38 = vcombine.low %v9807_v7, %v9811_v30  ;;  %v15949_v7 = vld [vmem:[#allocation53_spill] sm:$0xff] }
 0x359   :  { %v2717_v41 = vrot.slane %v2709_v40, %v15947_v9 }
 0x35a   :  { %v2724_v60 = vrot.slane %v2710_v38, %v15947_v9 }
 0x35c   :  { %v2725_v53 = vcombine.low %v2717_v41, %v2724_v60  ;;  %v15953_v41 = vld [vmem:[#allocation60_spill] sm:$0xff] }
 0x35e   :  { %v2732_v46 = vrot.slane %v2725_v53, %v15947_v9  ;;  %v15954_v53 = vld [vmem:[#allocation30_spill] sm:$0xff] }
 0x360   :  { %v2734_v34 = vmul.f32 %v2732_v46, %v2443_v44  ;;  %v15955_v46 = vld [vmem:[#allocation64_spill] sm:$0xff] }
 0x362   :  { %v11519_v19 = vrot.slane %v2734_v34, %v15906_v10  ;;  %v11522_v25 = vrot.slane %v2734_v34, %v15908_v31  ;;  %v11525_v58 = vrot.slane %v2734_v34, %v15907_v22  ;;  %v11528_v54 = vrot.slane %v2734_v34, %v15909_v3 }
 0x364   :  { %v2756_v27 = vmul.f32 %v11519_v19, %v2529_v56  ;;  %v2757_v39 = vmul.f32 %v11522_v25, %v2530_v29  ;;  %v2758_v49 = vmul.f32 %v11525_v58, %v2531_v17  ;;  %v2759_v42 = vmul.f32 %v11528_v54, %v2532_v45 }
 0x365   :  { %v11536_v32 = vmul.f32 %v11132_v4, %v11519_v19  ;;  %v11540_v11 = vmul.f32 %v11138_v48, %v11522_v25  ;;  %v11544_v18 = vmul.f32 %v11135_v62, %v11525_v58  ;;  %v11548_v29 = vmul.f32 %v11141_v8, %v11528_v54 }
 0x366   :  { %v2764_v36 = vcombine.low %v2756_v27, %v2757_v39  ;;  %v2765_v56 = vcombine.low %v2758_v49, %v2759_v42  ;;  %v11552_v17 = vmul.f32 %v11144_v61, %v11519_v19  ;;  %v11556_v4 = vmul.f32 %v11150_v51, %v11522_v25  ;;  %v15956_v27 = vld [vmem:[#allocation32_spill] sm:$0xff]  ;;  %v15957_v49 = vld [vmem:[#allocation29_spill] sm:$0xff] }
 0x367   :  { %v11560_v48 = vmul.f32 %v11147_v0, %v11525_v58  ;;  %v11564_v62 = vmul.f32 %v11153_v50, %v11528_v54  ;;  %v11568_v8 = vmul.f32 %v11180_v59, %v11519_v19  ;;  %v11574_v51 = vmul.f32 %v11186_v12, %v11522_v25 }
 0x368   :  { %v2772_v45 = vrot.slane %v2764_v36, %v15947_v9  ;;  %v2779_v61 = vrot.slane %v2765_v56, %v15947_v9  ;;  %v11578_v0 = vmul.f32 %v11183_v63, %v11525_v58  ;;  %v11582_v50 = vmul.f32 %v11189_v26, %v11528_v54  ;;  %v15958_v36 = vld [vmem:[#allocation34_spill] sm:$0xff] }
 0x369   :  { %v11586_v59 = vmul.f32 %v11204_v16, %v11519_v19  ;;  %v11590_v2 = vmul.f32 %v11210_v57, %v11522_v25  ;;  %v11594_v12 = vmul.f32 %v11207_v6, %v11525_v58  ;;  %v11598_v63 = vmul.f32 %v11213_v21, %v11528_v54 }
 0x36a   :  { %v2780_v47 = vcombine.low %v2772_v45, %v2779_v61  ;;  %v11602_v26 = vmul.f32 %v11228_v13, %v11519_v19  ;;  %v11606_v16 = vmul.f32 %v11234_v37, %v11522_v25  ;;  %v11610_v57 = vmul.f32 %v11231_v23, %v11525_v58  ;;  %v15959_v45 = vld [vmem:[#allocation31_spill] sm:$0xff] }
 0x36b   :  { %v11614_v6 = vmul.f32 %v11237_v35, %v11528_v54  ;;  %v11618_v21 = vmul.f32 %v11252_v33, %v11519_v19  ;;  %v11622_v13 = vmul.f32 %v11258_v20, %v11522_v25  ;;  %v11627_v14 = vmul.f32 %v11255_v24, %v11525_v58 }
 0x36c   :  { %v2787_v37 = vrot.slane %v2780_v47, %v15947_v9  ;;  %v11631_v23 = vmul.f32 %v11261_v52, %v11528_v54  ;;  %v11635_v35 = vmul.f32 %v11276_v1, %v11519_v19  ;;  %v11639_v33 = vmul.f32 %v11282_v15, %v11522_v25  ;;  %v15950_v1 = vld [vmem:[#allocation62_spill] sm:$0xff]  ;;  %v15951_v15 = vld [vmem:[#allocation56_spill] sm:$0xff] }
 0x36d   :  { %v11643_v20 = vmul.f32 %v11279_v43, %v11525_v58  ;;  %v11647_v24 = vmul.f32 %v15948_v5, %v11528_v54  ;;  %v11651_v52 = vmul.f32 %v15949_v7, %v11519_v19  ;;  %v11655_v30 = vmul.f32 %v15950_v1, %v11522_v25  ;;  %v15952_v43 = vld [vmem:[#allocation66_spill] sm:$0xff]  ;;  %v15960_v47 = vld [vmem:[#allocation36_spill] sm:$0xff] }
 0x36e   :  { %v2789_v55 = vsub.f32 %v2444_v28, %v2787_v37  ;;  %v11659_v40 = vmul.f32 %v15951_v15, %v11525_v58  ;;  %v11663_v38 = vmul.f32 %v15952_v43, %v11528_v54  ;;  %v11667_v60 = vmul.f32 %v15953_v41, %v11519_v19  ;;  %v15961_v37 = vld [vmem:[#allocation33_spill] sm:$0xff]  ;;  %v15962_v7 = vld [vmem:[#allocation38_spill] sm:$0xff]  ;;  %v15963_v15 = vld [vmem:[#allocation35_spill] sm:$0xff] }
 0x36f   :  { %v11671_v44 = vmul.f32 %v15954_v53, %v11522_v25  ;;  %v11675_v34 = vmul.f32 %v15955_v46, %v11525_v58  ;;  %v11679_v39 = vmul.f32 %v15956_v27, %v11528_v54  ;;  %v11683_v42 = vmul.f32 %v15957_v49, %v11519_v19  ;;  %v15964_v41 = vld [vmem:[#allocation40_spill] sm:$0xff]  ;;  %v15965_v46 = vld [vmem:[#allocation37_spill] sm:$0xff]  ;;  %v15967_v49 = vld [vmem:[#allocation42_spill] sm:$0xff] }
 0x370   :  { %v11687_v56 = vmul.f32 %v15958_v36, %v11522_v25  ;;  %v11691_v61 = vmul.f32 %v15959_v45, %v11525_v58  ;;  %v11695_v28 = vmul.f32 %v15960_v47, %v11528_v54  ;;  %v11699_v5 = vmul.f32 %v15961_v37, %v11519_v19  ;;  %v15969_v45 = vld [vmem:[#allocation39_spill] sm:$0xff]  ;;  %v15971_v37 = vld [vmem:[#allocation44_spill] sm:$0xff]  ;;  %v15975_v9 = vld [vmem:[#allocation46_spill] sm:$0xff] }
 0x371   :  { %v11703_v1 = vmul.f32 %v15962_v7, %v11522_v25  ;;  %v11707_v43 = vmul.f32 %v15963_v15, %v11525_v58  ;;  %v11711_v53 = vmul.f32 %v15964_v41, %v11528_v54  ;;  %v11715_v27 = vmul.f32 %v15965_v46, %v11519_v19  ;;  %v15973_v15 = vld [vmem:[#allocation41_spill] sm:$0xff] }
 0x372   :  { %v11719_v36 = vmul.f32 %v15967_v49, %v11522_v25  ;;  %v11723_v47 = vmul.f32 %v15969_v45, %v11525_v58  ;;  %v11727_v7 = vmul.f32 %v15971_v37, %v11528_v54  ;;  %v11731_v41 = vmul.f32 %v15973_v15, %v11519_v19 }
 0x373   :  { %15966 = vst [vmem:[#allocation65_spill] sm:$0xff] %v11715_v27  ;;  %v11735_v46 = vmul.f32 %v15975_v9, %v11522_v25  ;;  %v15977_v27 = vld [vmem:[#allocation43_spill] sm:$0xff] }
 0x374   :  { %15968 = vst [vmem:[#allocation58_spill] sm:$0xff] %v11719_v36  ;;  %15970 = vst [vmem:[#allocation53_spill] sm:$0xff] %v11723_v47  ;;  %v11739_v49 = vmul.f32 %v15977_v27, %v11525_v58  ;;  %v15979_v36 = vld [vmem:[#allocation45_spill] sm:$0xff]  ;;  %v15981_v47 = vld [vmem:[#allocation50_spill] sm:$0xff] }
 0x375   :  { %15972 = vst [vmem:[#allocation62_spill] sm:$0xff] %v11727_v7  ;;  %15974 = vst [vmem:[#allocation56_spill] sm:$0xff] %v11731_v41  ;;  %v11743_v45 = vmul.f32 %v15979_v36, %v11519_v19  ;;  %v11747_v37 = vmul.f32 %v15981_v47, %v11522_v25  ;;  %v15983_v7 = vld [vmem:[#allocation47_spill] sm:$0xff]  ;;  %v15985_v41 = vld [vmem:[#allocation52_spill] sm:$0xff] }
 0x376   :  { %15976 = vst [vmem:[#allocation66_spill] sm:$0xff] %v11735_v46  ;;  %15978 = vst [vmem:[#allocation60_spill] sm:$0xff] %v11739_v49  ;;  %v11751_v15 = vmul.f32 %v15983_v7, %v11525_v58  ;;  %v11755_v9 = vmul.f32 %v15985_v41, %v11528_v54  ;;  %v15987_v46 = vld [vmem:[#allocation49_spill] sm:$0xff]  ;;  %v15989_v49 = vld [vmem:[#allocation55_spill] sm:$0xff] }
 0x377   :  { %15980 = vst [vmem:[#allocation30_spill] sm:$0xff] %v11743_v45  ;;  %15982 = vst [vmem:[#allocation64_spill] sm:$0xff] %v11747_v37  ;;  %v11759_v27 = vmul.f32 %v15987_v46, %v11519_v19  ;;  %v11763_v36 = vmul.f32 %v15989_v49, %v11522_v25  ;;  %v15991_v45 = vld [vmem:[#allocation51_spill] sm:$0xff] }
 0x378   :  { %15984 = vst [vmem:[#allocation32_spill] sm:$0xff] %v11751_v15  ;;  %15986 = vst [vmem:[#allocation29_spill] sm:$0xff] %v11755_v9  ;;  %v11767_v47 = vmul.f32 %v15991_v45, %v11525_v58  ;;  %v15993_v37 = vld [vmem:[#allocation59_spill] sm:$0xff]  ;;  %v15995_v15 = vld [vmem:[#allocation54_spill] sm:$0xff] }
 0x379   :  { %15988 = vst [vmem:[#allocation34_spill] sm:$0xff] %v11759_v27  ;;  %15990 = vst [vmem:[#allocation31_spill] sm:$0xff] %v11763_v36  ;;  %v11771_v7 = vmul.f32 %v15993_v37, %v11528_v54  ;;  %v11775_v41 = vmul.f32 %v15995_v15, %v11519_v19  ;;  %v15996_v9 = vld [vmem:[#allocation63_spill] sm:$0xff]  ;;  %v15997_v27 = vld [vmem:[#allocation57_spill] sm:$0xff]  ;;  %v11795_v19 = vrot.slane %v2789_v55, %v15908_v31 }
 0x37a   :  { %15992 = vst [vmem:[#allocation36_spill] sm:$0xff] %v11767_v47  ;;  %v11779_v46 = vmul.f32 %v15996_v9, %v11522_v25  ;;  %v11783_v49 = vmul.f32 %v15997_v27, %v11525_v58  ;;  %v15998_v36 = vld [vmem:[#allocation61_spill] sm:$0xff]  ;;  %v11790_v47 = vrot.slane %v2789_v55, %v15906_v10  ;;  %v15999_v37 = vld [vmem:[#allocation48_spill] sm:$0xff]  ;;  %v11798_v25 = vrot.slane %v2789_v55, %v15907_v22 }
 0x37b   :  { %15994 = vst [vmem:[#allocation33_spill] sm:$0xff] %v11771_v7  ;;  %v11787_v45 = vmul.f32 %v15998_v36, %v11528_v54  ;;  %v2841_v7 = vmul.f32 %v15999_v37, %v11528_v54  ;;  %v11801_v15 = vrot.slane %v2789_v55, %v15909_v3  ;;  %v11821_v55 = vadd.f32 %v11795_v19, %v11540_v11  ;;  %v16008_v36 = vld [vmem:[#allocation65_spill] sm:$0xff]  ;;  %v16010_v37 = vld [vmem:[#allocation58_spill] sm:$0xff] }
 0x37c   :  { %v11805_v58 = vadd.f32 %v11790_v47, %v11536_v32  ;;  %v11809_v9 = vadd.f32 %v11790_v47, %v11552_v17  ;;  %v11813_v54 = vadd.f32 %v11790_v47, %v11568_v8  ;;  %v11817_v27 = vadd.f32 %v11790_v47, %v11586_v59  ;;  %v16012_v3 = vld [vmem:[#allocation53_spill] sm:$0xff]  ;;  %v16014_v31 = vld [vmem:[#allocation62_spill] sm:$0xff]  ;;  %v16016_v22 = vld [vmem:[#allocation56_spill] sm:$0xff] }
 0x37d   :  { %v11825_v32 = vadd.f32 %v11798_v25, %v11544_v18  ;;  %v11829_v17 = vadd.f32 %v11801_v15, %v11548_v29  ;;  %v11833_v8 = vadd.f32 %v11795_v19, %v11556_v4  ;;  %v11837_v59 = vadd.f32 %v11798_v25, %v11560_v48  ;;  %v16018_v10 = vld [vmem:[#allocation66_spill] sm:$0xff] }
 0x37e   :  { %v11841_v11 = vadd.f32 %v11801_v15, %v11564_v62  ;;  %v11845_v18 = vadd.f32 %v11795_v19, %v11574_v51  ;;  %v11849_v29 = vadd.f32 %v11798_v25, %v11578_v0  ;;  %v11853_v4 = vadd.f32 %v11801_v15, %v11582_v50 }
 0x37f   :  { %v11857_v48 = vadd.f32 %v11795_v19, %v11590_v2  ;;  %v11861_v62 = vadd.f32 %v11798_v25, %v11594_v12  ;;  %v11865_v51 = vadd.f32 %v11801_v15, %v11598_v63  ;;  %v11869_v0 = vadd.f32 %v11790_v47, %v11602_v26 }
 0x380   :  { %v11873_v50 = vadd.f32 %v11795_v19, %v11606_v16  ;;  %v11877_v2 = vadd.f32 %v11798_v25, %v11610_v57  ;;  %v11881_v12 = vadd.f32 %v11801_v15, %v11614_v6  ;;  %v11885_v63 = vadd.f32 %v11790_v47, %v11618_v21 }
 0x381   :  { %v11889_v26 = vadd.f32 %v11795_v19, %v11622_v13  ;;  %v11893_v16 = vadd.f32 %v11798_v25, %v11627_v14  ;;  %v11897_v57 = vadd.f32 %v11801_v15, %v11631_v23  ;;  %v11901_v6 = vadd.f32 %v11790_v47, %v11635_v35 }
 0x382   :  { %v11905_v21 = vadd.f32 %v11795_v19, %v11639_v33  ;;  %v11909_v13 = vadd.f32 %v11798_v25, %v11643_v20  ;;  %v11913_v14 = vadd.f32 %v11801_v15, %v11647_v24  ;;  %v11917_v23 = vadd.f32 %v11790_v47, %v11651_v52 }
 0x383   :  { %v11921_v35 = vadd.f32 %v11795_v19, %v11655_v30  ;;  %v11925_v33 = vadd.f32 %v11798_v25, %v11659_v40  ;;  %v11929_v20 = vadd.f32 %v11801_v15, %v11663_v38  ;;  %v11933_v24 = vadd.f32 %v11790_v47, %v11667_v60 }
 0x384   :  { %16000 = vst [vmem:[#allocation38_spill] sm:$0xff] %v11909_v13  ;;  %v11937_v52 = vadd.f32 %v11795_v19, %v11671_v44  ;;  %v11941_v30 = vadd.f32 %v11798_v25, %v11675_v34  ;;  %v11945_v40 = vadd.f32 %v11801_v15, %v11679_v39  ;;  %v11949_v38 = vadd.f32 %v11790_v47, %v11683_v42 }
 0x385   :  { %16001 = vst [vmem:[#allocation35_spill] sm:$0xff] %v11925_v33  ;;  %16002 = vst [vmem:[#allocation40_spill] sm:$0xff] %v11929_v20  ;;  %v11953_v60 = vadd.f32 %v11795_v19, %v11687_v56  ;;  %v11957_v44 = vadd.f32 %v11798_v25, %v11691_v61  ;;  %v11961_v34 = vadd.f32 %v11801_v15, %v11695_v28 }
 0x386   :  { %16003 = vst [vmem:[#allocation37_spill] sm:$0xff] %v11941_v30  ;;  %16004 = vst [vmem:[#allocation42_spill] sm:$0xff] %v11945_v40  ;;  %v11965_v39 = vadd.f32 %v11790_v47, %v11699_v5  ;;  %v11969_v42 = vadd.f32 %v11795_v19, %v11703_v1  ;;  %v11973_v56 = vadd.f32 %v11798_v25, %v11707_v43 }
 0x387   :  { %16005 = vst [vmem:[#allocation39_spill] sm:$0xff] %v11957_v44  ;;  %16006 = vst [vmem:[#allocation44_spill] sm:$0xff] %v11961_v34  ;;  %v11977_v61 = vadd.f32 %v11801_v15, %v11711_v53  ;;  %v11981_v28 = vadd.f32 %v11790_v47, %v16008_v36  ;;  %v11985_v5 = vadd.f32 %v11795_v19, %v16010_v37 }
 0x388   :  { %16007 = vst [vmem:[#allocation41_spill] sm:$0xff] %v11973_v56  ;;  %v11989_v1 = vadd.f32 %v11798_v25, %v16012_v3  ;;  %v11993_v43 = vadd.f32 %v11801_v15, %v16014_v31  ;;  %v11997_v53 = vadd.f32 %v11790_v47, %v16016_v22  ;;  %v12001_v36 = vadd.f32 %v11795_v19, %v16018_v10  ;;  %v16022_v3 = vld [vmem:[#allocation30_spill] sm:$0xff]  ;;  %v16024_v31 = vld [vmem:[#allocation64_spill] sm:$0xff]  ;;  %v16027_v10 = vld [vmem:[#allocation29_spill] sm:$0xff] }
 0x389   :  { %16009 = vst [vmem:[#allocation46_spill] sm:$0xff] %v11981_v28  ;;  %16011 = vst [vmem:[#allocation43_spill] sm:$0xff] %v11985_v5  ;;  %v16020_v28 = vld [vmem:[#allocation60_spill] sm:$0xff]  ;;  %v12008_v5 = vadd.f32 %v11801_v15, %v2841_v7 }
 0x38a   :  { %16013 = vst [vmem:[#allocation45_spill] sm:$0xff] %v11989_v1  ;;  %16015 = vst [vmem:[#allocation50_spill] sm:$0xff] %v11993_v43  ;;  %v12005_v37 = vadd.f32 %v11798_v25, %v16020_v28  ;;  %v12012_v1 = vadd.f32 %v11790_v47, %v16022_v3  ;;  %v12016_v43 = vadd.f32 %v11795_v19, %v16024_v31  ;;  %v16026_v22 = vld [vmem:[#allocation32_spill] sm:$0xff]  ;;  %v16028_v28 = vld [vmem:[#allocation34_spill] sm:$0xff] }
 0x38b   :  { %16017 = vst [vmem:[#allocation47_spill] sm:$0xff] %v11997_v53  ;;  %16019 = vst [vmem:[#allocation52_spill] sm:$0xff] %v12001_v36  ;;  %v12020_v53 = vadd.f32 %v11798_v25, %v16026_v22  ;;  %v12024_v36 = vadd.f32 %v11801_v15, %v16027_v10  ;;  %v12028_v7 = vadd.f32 %v11790_v47, %v16028_v28 }
 0x38c   :  { %16021 = vst [vmem:[#allocation49_spill] sm:$0xff] %v12008_v5  ;;  %16023 = vst [vmem:[#allocation55_spill] sm:$0xff] %v12012_v1  ;;  %v16029_v5 = vld [vmem:[#allocation31_spill] sm:$0xff]  ;;  %v16030_v1 = vld [vmem:[#allocation36_spill] sm:$0xff]  ;;  %v12044_v10 = vadd.f32 %v11790_v47, %v11775_v41  ;;  %v12048_v28 = vadd.f32 %v11795_v19, %v11779_v46  ;;  %v2944_v46 = vmax.f32 %v11833_v8, 0.0 }
 0x38d   :  { %16025 = vst [vmem:[#allocation51_spill] sm:$0xff] %v12016_v43  ;;  %v12032_v3 = vadd.f32 %v11795_v19, %v16029_v5  ;;  %v12036_v31 = vadd.f32 %v11798_v25, %v16030_v1  ;;  %v16032_v43 = vld [vmem:[#allocation33_spill] sm:$0xff]  ;;  %v12052_v5 = vadd.f32 %v11798_v25, %v11783_v49  ;;  %v12056_v1 = vadd.f32 %v11801_v15, %v11787_v45 }
 0x38e   :  { %v12040_v22 = vadd.f32 %v11801_v15, %v16032_v43 }
 0x38f   :  { %16031 = vst [vmem:[#allocation59_spill] sm:$0xff] %v12036_v31  ;;  %16034 = vst [vmem:[#allocation63_spill] sm:$0xff] %v12052_v5 }
 0x390   :  { %16033 = vst [vmem:[#allocation54_spill] sm:$0xff] %v12040_v22  ;;  %v16035_v43 = vld [vmem:[#allocation46_spill] sm:$0xff]  ;;  %v16036_v30 = vld [vmem:[#allocation43_spill] sm:$0xff]  ;;  %v16045_v33 = vmov %v12040_v22 }
 0x392   :  { %v16039_v13 = vld [vmem:[#allocation47_spill] sm:$0xff]  ;;  %v16040_v44 = vld [vmem:[#allocation52_spill] sm:$0xff] }
 0x393   :  { %v16041_v34 = vld [vmem:[#allocation49_spill] sm:$0xff]  ;;  %v16042_v20 = vld [vmem:[#allocation55_spill] sm:$0xff] }
 0x394   :  { %v16043_v56 = vld [vmem:[#allocation51_spill] sm:$0xff] }
 0x395   :  { %10169 = dma.done.wait [#allocation4], 32768 }
 0x396   :  { %10170 = vsyncadd [#allocation4], 4294934528  ;;  %v16046_v41 = vmax.f32 %v11821_v55, 0.0  ;;  %v3040_v25 = vld [vmem:[#allocation2 + $0x8] sm:$0xff]  ;;  %v3042_v45 = vld [vmem:[#allocation2 + $0x18] sm:$0xff]  ;;  %v16049_v40 = vmax.f32 %v11809_v9, 0.0 }
 0x397   :  { %v3039_v19 = vld [vmem:[#allocation2] sm:$0xff]  ;;  %3337 = vmatprep.subr.bf16.mxu0 %v3040_v25  ;;  %3563 = vmatprep.subr.bf16.mxu1 %v3042_v45  ;;  %v3041_v15 = vld [vmem:[#allocation2 + $0x10] sm:$0xff]  ;;  %v3048_v31 = vld [vmem:[#allocation2 + $0x48] sm:$0xff] }
 0x398   :  { %v12124_v8 = vpack.c.bf16 %v2944_v46, %v16046_v41  ;;  %v3050_v22 = vld [vmem:[#allocation2 + $0x58] sm:$0xff]  ;;  %3338 = vmatpush1.bf16.msra.mxu0 %v3039_v19  ;;  %3564 = vmatpush1.bf16.msra.mxu1 %v3041_v15  ;;  %v3047_v47 = vld [vmem:[#allocation2 + $0x40] sm:$0xff]  ;;  %v3049_v55 = vld [vmem:[#allocation2 + $0x50] sm:$0xff] }
 0x399   :  { %3339 = vmatprep.subr.bf16.mxu0 %v3048_v31  ;;  %3565 = vmatprep.subr.bf16.mxu1 %v3050_v22  ;;  %v3056_v41 = vld [vmem:[#allocation2 + $0x88] sm:$0xff]  ;;  %v3058_v46 = vld [vmem:[#allocation2 + $0x98] sm:$0xff]  ;;  %v3055_v49 = vld [vmem:[#allocation2 + $0x80] sm:$0xff] }
 0x39a   :  { %16047 = vst [vmem:[#allocation57_spill] sm:$0xff] %v12124_v8  ;;  %3369 = vmatprep.mubr.bf16.mxu0 %v12124_v8  ;;  %3595 = vmatprep.mubr.bf16.mxu1 %v12124_v8  ;;  %v3057_v8 = vld [vmem:[#allocation2 + $0x90] sm:$0xff]  ;;  %v3064_v5 = vld [vmem:[#allocation2 + $0xc8] sm:$0xff]  ;;  %v3066_v25 = vld [vmem:[#allocation2 + $0xd8] sm:$0xff] }
 0x39b   :  { %v3063_v19 = vld [vmem:[#allocation2 + $0xc0] sm:$0xff]  ;;  %v3065_v45 = vld [vmem:[#allocation2 + $0xd0] sm:$0xff]  ;;  %v3072_v31 = vld [vmem:[#allocation2 + $0x108] sm:$0xff] }
 0x39c   :  { %3340 = vmatpush1.bf16.msra.mxu0 %v3047_v47  ;;  %3566 = vmatpush1.bf16.msra.mxu1 %v3049_v55  ;;  %v3074_v22 = vld [vmem:[#allocation2 + $0x118] sm:$0xff]  ;;  %v3071_v47 = vld [vmem:[#allocation2 + $0x100] sm:$0xff]  ;;  %v3073_v15 = vld [vmem:[#allocation2 + $0x110] sm:$0xff] }
 0x39d   :  { %3341 = vmatprep.subr.bf16.mxu0 %v3056_v41  ;;  %3567 = vmatprep.subr.bf16.mxu1 %v3058_v46  ;;  %v3080_v55 = vld [vmem:[#allocation2 + $0x148] sm:$0xff]  ;;  %v3082_v41 = vld [vmem:[#allocation2 + $0x158] sm:$0xff]  ;;  %v3177_v9 = vld [vmem:[#allocation2 + $0x450] sm:$0xff] }
 0x39e   :  { %v3090_v46 = vld [vmem:[#allocation2 + $0x198] sm:$0xff] }
 0x3a0   :  { %3342 = vmatpush1.bf16.msra.mxu0 %v3055_v49  ;;  %3568 = vmatpush1.bf16.msra.mxu1 %v3057_v8  ;;  %v3079_v49 = vld [vmem:[#allocation2 + $0x140] sm:$0xff]  ;;  %v3081_v8 = vld [vmem:[#allocation2 + $0x150] sm:$0xff] }
 0x3a1   :  { %3343 = vmatprep.subr.bf16.mxu0 %v3064_v5  ;;  %3569 = vmatprep.subr.bf16.mxu1 %v3066_v25  ;;  %v3088_v5 = vld [vmem:[#allocation2 + $0x188] sm:$0xff]  ;;  %v3087_v25 = vld [vmem:[#allocation2 + $0x180] sm:$0xff] }
 0x3a4   :  { %3344 = vmatpush1.bf16.msra.mxu0 %v3063_v19  ;;  %3570 = vmatpush1.bf16.msra.mxu1 %v3065_v45  ;;  %v3089_v19 = vld [vmem:[#allocation2 + $0x190] sm:$0xff]  ;;  %v3096_v45 = vld [vmem:[#allocation2 + $0x1c8] sm:$0xff] }
 0x3a5   :  { %3345 = vmatprep.subr.bf16.mxu0 %v3072_v31  ;;  %3571 = vmatprep.subr.bf16.mxu1 %v3074_v22  ;;  %v3098_v31 = vld [vmem:[#allocation2 + $0x1d8] sm:$0xff]  ;;  %v3095_v22 = vld [vmem:[#allocation2 + $0x1c0] sm:$0xff] }
 0x3a8   :  { %3346 = vmatpush1.bf16.msra.mxu0 %v3071_v47  ;;  %3572 = vmatpush1.bf16.msra.mxu1 %v3073_v15  ;;  %v3097_v47 = vld [vmem:[#allocation2 + $0x1d0] sm:$0xff]  ;;  %v3104_v15 = vld [vmem:[#allocation2 + $0x208] sm:$0xff] }
 0x3a9   :  { %3347 = vmatprep.subr.bf16.mxu0 %v3080_v55  ;;  %3573 = vmatprep.subr.bf16.mxu1 %v3082_v41  ;;  %v3106_v55 = vld [vmem:[#allocation2 + $0x218] sm:$0xff]  ;;  %v3103_v41 = vld [vmem:[#allocation2 + $0x200] sm:$0xff] }
 0x3ac   :  { %3348 = vmatpush1.bf16.msra.mxu0 %v3079_v49  ;;  %3574 = vmatpush1.bf16.msra.mxu1 %v3081_v8  ;;  %v3105_v49 = vld [vmem:[#allocation2 + $0x210] sm:$0xff]  ;;  %v3112_v8 = vld [vmem:[#allocation2 + $0x248] sm:$0xff] }
 0x3ad   :  { %3349 = vmatprep.subr.bf16.mxu0 %v3088_v5  ;;  %3575 = vmatprep.subr.bf16.mxu1 %v3090_v46  ;;  %v3114_v5 = vld [vmem:[#allocation2 + $0x258] sm:$0xff]  ;;  %v3111_v46 = vld [vmem:[#allocation2 + $0x240] sm:$0xff] }
 0x3b0   :  { %3350 = vmatpush1.bf16.msra.mxu0 %v3087_v25  ;;  %3576 = vmatpush1.bf16.msra.mxu1 %v3089_v19  ;;  %v3113_v25 = vld [vmem:[#allocation2 + $0x250] sm:$0xff]  ;;  %v3120_v19 = vld [vmem:[#allocation2 + $0x288] sm:$0xff] }
 0x3b1   :  { %3351 = vmatprep.subr.bf16.mxu0 %v3096_v45  ;;  %3577 = vmatprep.subr.bf16.mxu1 %v3098_v31  ;;  %v3122_v45 = vld [vmem:[#allocation2 + $0x298] sm:$0xff]  ;;  %v3119_v31 = vld [vmem:[#allocation2 + $0x280] sm:$0xff] }
 0x3b4   :  { %3352 = vmatpush1.bf16.msra.mxu0 %v3095_v22  ;;  %3578 = vmatpush1.bf16.msra.mxu1 %v3097_v47  ;;  %v3121_v22 = vld [vmem:[#allocation2 + $0x290] sm:$0xff]  ;;  %v3128_v47 = vld [vmem:[#allocation2 + $0x2c8] sm:$0xff] }
 0x3b5   :  { %3353 = vmatprep.subr.bf16.mxu0 %v3104_v15  ;;  %3579 = vmatprep.subr.bf16.mxu1 %v3106_v55  ;;  %v3130_v15 = vld [vmem:[#allocation2 + $0x2d8] sm:$0xff]  ;;  %v3127_v55 = vld [vmem:[#allocation2 + $0x2c0] sm:$0xff] }
 0x3b8   :  { %3354 = vmatpush1.bf16.msra.mxu0 %v3103_v41  ;;  %3580 = vmatpush1.bf16.msra.mxu1 %v3105_v49  ;;  %v3129_v41 = vld [vmem:[#allocation2 + $0x2d0] sm:$0xff]  ;;  %v3136_v49 = vld [vmem:[#allocation2 + $0x308] sm:$0xff] }
 0x3b9   :  { %3355 = vmatprep.subr.bf16.mxu0 %v3112_v8  ;;  %3581 = vmatprep.subr.bf16.mxu1 %v3114_v5  ;;  %v3138_v8 = vld [vmem:[#allocation2 + $0x318] sm:$0xff]  ;;  %v3135_v5 = vld [vmem:[#allocation2 + $0x300] sm:$0xff] }
 0x3bc   :  { %3356 = vmatpush1.bf16.msra.mxu0 %v3111_v46  ;;  %3582 = vmatpush1.bf16.msra.mxu1 %v3113_v25  ;;  %v3137_v46 = vld [vmem:[#allocation2 + $0x310] sm:$0xff]  ;;  %v3144_v25 = vld [vmem:[#allocation2 + $0x348] sm:$0xff] }
 0x3bd   :  { %3357 = vmatprep.subr.bf16.mxu0 %v3120_v19  ;;  %3583 = vmatprep.subr.bf16.mxu1 %v3122_v45  ;;  %v3146_v19 = vld [vmem:[#allocation2 + $0x358] sm:$0xff]  ;;  %v3143_v45 = vld [vmem:[#allocation2 + $0x340] sm:$0xff] }
 0x3c0   :  { %3358 = vmatpush1.bf16.msra.mxu0 %v3119_v31  ;;  %3584 = vmatpush1.bf16.msra.mxu1 %v3121_v22  ;;  %v3145_v31 = vld [vmem:[#allocation2 + $0x350] sm:$0xff]  ;;  %v3152_v22 = vld [vmem:[#allocation2 + $0x388] sm:$0xff] }
 0x3c1   :  { %3359 = vmatprep.subr.bf16.mxu0 %v3128_v47  ;;  %3585 = vmatprep.subr.bf16.mxu1 %v3130_v15  ;;  %v3154_v47 = vld [vmem:[#allocation2 + $0x398] sm:$0xff]  ;;  %v3151_v15 = vld [vmem:[#allocation2 + $0x380] sm:$0xff] }
 0x3c4   :  { %3360 = vmatpush1.bf16.msra.mxu0 %v3127_v55  ;;  %3586 = vmatpush1.bf16.msra.mxu1 %v3129_v41  ;;  %v3153_v55 = vld [vmem:[#allocation2 + $0x390] sm:$0xff]  ;;  %v3160_v41 = vld [vmem:[#allocation2 + $0x3c8] sm:$0xff] }
 0x3c5   :  { %3361 = vmatprep.subr.bf16.mxu0 %v3136_v49  ;;  %3587 = vmatprep.subr.bf16.mxu1 %v3138_v8  ;;  %v3162_v49 = vld [vmem:[#allocation2 + $0x3d8] sm:$0xff]  ;;  %v3159_v8 = vld [vmem:[#allocation2 + $0x3c0] sm:$0xff] }
 0x3c8   :  { %3362 = vmatpush1.bf16.msra.mxu0 %v3135_v5  ;;  %3588 = vmatpush1.bf16.msra.mxu1 %v3137_v46  ;;  %v3161_v5 = vld [vmem:[#allocation2 + $0x3d0] sm:$0xff]  ;;  %v3168_v46 = vld [vmem:[#allocation2 + $0x408] sm:$0xff] }
 0x3c9   :  { %3363 = vmatprep.subr.bf16.mxu0 %v3144_v25  ;;  %3589 = vmatprep.subr.bf16.mxu1 %v3146_v19  ;;  %v3170_v25 = vld [vmem:[#allocation2 + $0x418] sm:$0xff]  ;;  %v16048_v19 = vmax.f32 %v11805_v58, 0.0  ;;  %v3175_v58 = vld [vmem:[#allocation2 + $0x440] sm:$0xff] }
 0x3cc   :  { %3364 = vmatpush1.bf16.msra.mxu0 %v3143_v45  ;;  %3590 = vmatpush1.bf16.msra.mxu1 %v3145_v31  ;;  %v12132_v45 = vpack.c.bf16 %v16049_v40, %v16048_v19  ;;  %v3167_v31 = vld [vmem:[#allocation2 + $0x400] sm:$0xff]  ;;  %v3184_v40 = vld [vmem:[#allocation2 + $0x488] sm:$0xff] }
 0x3cd   :  { %3365 = vmatprep.subr.bf16.mxu0 %v3152_v22  ;;  %3591 = vmatprep.subr.bf16.mxu1 %v3154_v47  ;;  %v3169_v22 = vld [vmem:[#allocation2 + $0x410] sm:$0xff]  ;;  %v3176_v47 = vld [vmem:[#allocation2 + $0x448] sm:$0xff] }
 0x3ce   :  { %v3192_v19 = vld [vmem:[#allocation2 + $0x4c8] sm:$0xff] }
 0x3d0   :  { %3366 = vmatpush1.bf16.msra.mxu0 %v3151_v15  ;;  %3592 = vmatpush1.bf16.msra.mxu1 %v3153_v55  ;;  %v3178_v15 = vld [vmem:[#allocation2 + $0x458] sm:$0xff]  ;;  %v16050_v55 = vmax.f32 %v11845_v18, 0.0 }
 0x3d1   :  { %3367 = vmatprep.subr.bf16.mxu0 %v3160_v41  ;;  %3593 = vmatprep.subr.bf16.mxu1 %v3162_v49  ;;  %v16051_v41 = vmax.f32 %v11857_v48, 0.0  ;;  %v3186_v18 = vld [vmem:[#allocation2 + $0x498] sm:$0xff]  ;;  %v16052_v48 = vmax.f32 %v11813_v54, 0.0  ;;  %v3191_v54 = vld [vmem:[#allocation2 + $0x4c0] sm:$0xff] }
 0x3d3   :  { %v12138_v49 = vpack.c.bf16 %v16051_v41, %v16050_v55  ;;  %v3200_v55 = vld [vmem:[#allocation2 + $0x508] sm:$0xff]  ;;  %v16057_v41 = vmax.f32 %v11885_v63, 0.0  ;;  %v3209_v63 = vld [vmem:[#allocation2 + $0x550] sm:$0xff] }
 0x3d4   :  { %3368 = vmatpush1.bf16.msra.mxu0 %v3159_v8  ;;  %3594 = vmatpush1.bf16.msra.mxu1 %v3161_v5  ;;  %v16053_v8 = vmax.f32 %v11817_v27, 0.0  ;;  %v3193_v27 = vld [vmem:[#allocation2 + $0x4d0] sm:$0xff] }
 0x3d5   :  { %3450 = vmatprep.subr.bf16.mxu0 %v3168_v46  ;;  %3676 = vmatprep.subr.bf16.mxu1 %v3170_v25  ;;  %v3183_v46 = vld [vmem:[#allocation2 + $0x480] sm:$0xff]  ;;  %v3185_v25 = vld [vmem:[#allocation2 + $0x490] sm:$0xff] }
 0x3d6   :  { %v12148_v5 = vpack.c.bf16 %v16053_v8, %v16052_v48  ;;  %v3210_v48 = vld [vmem:[#allocation2 + $0x558] sm:$0xff]  ;;  %v16058_v8 = vmax.f32 %v11905_v21, 0.0 }
 0x3d7   :  { %3370 = vmatmul.mubr.bf16.vlgmr.msra.gmra.mrb[64].mxu0 %v12132_v45  ;;  %3596 = vmatmul.mubr.bf16.vlgmr.msra.gmra.mrb[64].mxu1 %v12132_v45  ;;  %v3218_v21 = vld [vmem:[#allocation2 + $0x598] sm:$0xff] }
 0x3d8   :  { %3451 = vmatpush1.bf16.msra.mxu0 %v3167_v31  ;;  %3677 = vmatpush1.bf16.msra.mxu1 %v3169_v22  ;;  %v3194_v31 = vld [vmem:[#allocation2 + $0x4d8] sm:$0xff]  ;;  %v16054_v22 = vmax.f32 %v11873_v50, 0.0 }
 0x3d9   :  { %3452 = vmatprep.subr.bf16.mxu0 %v3176_v47  ;;  %3678 = vmatprep.subr.bf16.mxu1 %v3178_v15  ;;  %v16055_v47 = vmax.f32 %v11889_v26, 0.0  ;;  %v3202_v50 = vld [vmem:[#allocation2 + $0x518] sm:$0xff]  ;;  %v16056_v26 = vmax.f32 %v11869_v0, 0.0  ;;  %v3207_v0 = vld [vmem:[#allocation2 + $0x540] sm:$0xff] }
 0x3da   :  { %3379 = vmatprep.mubr.bf16.mxu0 %v12138_v49  ;;  %3605 = vmatprep.mubr.bf16.mxu1 %v12138_v49 }
 0x3db   :  { %v12154_v15 = vpack.c.bf16 %v16055_v47, %v16054_v22  ;;  %v3215_v47 = vld [vmem:[#allocation2 + $0x580] sm:$0xff] }
 0x3dc   :  { %3453 = vmatpush1.bf16.msra.mxu0 %v3175_v58  ;;  %3679 = vmatpush1.bf16.msra.mxu1 %v3177_v9  ;;  %v12164_v58 = vpack.c.bf16 %v16057_v41, %v16056_v26  ;;  %v3199_v9 = vld [vmem:[#allocation2 + $0x500] sm:$0xff]  ;;  %v16063_v26 = vmax.f32 %v11953_v60, 0.0  ;;  %v16064_v60 = vmax.f32 %v11933_v24, 0.0 }
 0x3dd   :  { %3454 = vmatprep.subr.bf16.mxu0 %v3184_v40  ;;  %3680 = vmatprep.subr.bf16.mxu1 %v3186_v18  ;;  %v3201_v40 = vld [vmem:[#allocation2 + $0x510] sm:$0xff]  ;;  %v3208_v18 = vld [vmem:[#allocation2 + $0x548] sm:$0xff]  ;;  %v3239_v24 = vld [vmem:[#allocation2 + $0x640] sm:$0xff] }
 0x3df   :  { %3380 = vmatmul.mubr.bf16.gmra.mrb[68].mxu0 %v12148_v5  ;;  %3606 = vmatmul.mubr.bf16.gmra.mrb[68].mxu1 %v12148_v5 }
 0x3e0   :  { %3455 = vmatpush1.bf16.msra.mxu0 %v3183_v46  ;;  %3681 = vmatpush1.bf16.msra.mxu1 %v3185_v25  ;;  %v16059_v46 = vmax.f32 %v11921_v35, 0.0  ;;  %v16060_v35 = vmax.f32 %v11901_v6, 0.0  ;;  %v3223_v6 = vld [vmem:[#allocation2 + $0x5c0] sm:$0xff] }
 0x3e1   :  { %3456 = vmatprep.subr.bf16.mxu0 %v3192_v19  ;;  %3682 = vmatprep.subr.bf16.mxu1 %v3194_v31  ;;  %v3216_v19 = vld [vmem:[#allocation2 + $0x588] sm:$0xff]  ;;  %v16061_v31 = vmax.f32 %v11917_v23, 0.0  ;;  %v3225_v23 = vld [vmem:[#allocation2 + $0x5d0] sm:$0xff] }
 0x3e2   :  { %3389 = vmatprep.mubr.bf16.mxu0 %v12154_v15  ;;  %3615 = vmatprep.mubr.bf16.mxu1 %v12154_v15  ;;  %v12170_v25 = vpack.c.bf16 %v16059_v46, %v16058_v8  ;;  %v3233_v8 = vld [vmem:[#allocation2 + $0x610] sm:$0xff]  ;;  %v3240_v46 = vld [vmem:[#allocation2 + $0x648] sm:$0xff] }
 0x3e3   :  { %v12180_v22 = vpack.c.bf16 %v16061_v31, %v16060_v35  ;;  %v3248_v35 = vld [vmem:[#allocation2 + $0x688] sm:$0xff]  ;;  %v16069_v31 = vmax.f32 %v16035_v43, 0.0  ;;  %v3257_v43 = vld [vmem:[#allocation2 + $0x6d0] sm:$0xff] }
 0x3e4   :  { %3457 = vmatpush1.bf16.msra.mxu0 %v3191_v54  ;;  %3683 = vmatpush1.bf16.msra.mxu1 %v3193_v27  ;;  %v3217_v54 = vld [vmem:[#allocation2 + $0x590] sm:$0xff]  ;;  %v3224_v27 = vld [vmem:[#allocation2 + $0x5c8] sm:$0xff] }
 0x3e5   :  { %3458 = vmatprep.subr.bf16.mxu0 %v3200_v55  ;;  %3684 = vmatprep.subr.bf16.mxu1 %v3202_v50  ;;  %v3226_v55 = vld [vmem:[#allocation2 + $0x5d8] sm:$0xff]  ;;  %v16062_v50 = vmax.f32 %v11937_v52, 0.0 }
 0x3e6   :  { %v3234_v52 = vld [vmem:[#allocation2 + $0x618] sm:$0xff] }
 0x3e7   :  { %3390 = vmatmul.mubr.bf16.gmra.mrb[72].mxu0 %v12164_v58  ;;  %3616 = vmatmul.mubr.bf16.gmra.mrb[72].mxu1 %v12164_v58  ;;  %v12186_v41 = vpack.c.bf16 %v16063_v26, %v16062_v50  ;;  %v3258_v50 = vld [vmem:[#allocation2 + $0x6d8] sm:$0xff]  ;;  %v16070_v26 = vmax.f32 %v16040_v44, 0.0 }
 0x3e8   :  { %3459 = vmatpush1.bf16.msra.mxu0 %v3199_v9  ;;  %3685 = vmatpush1.bf16.msra.mxu1 %v3201_v40  ;;  %v3232_v9 = vld [vmem:[#allocation2 + $0x608] sm:$0xff]  ;;  %v16065_v40 = vmax.f32 %v11949_v38, 0.0  ;;  %v3241_v38 = vld [vmem:[#allocation2 + $0x650] sm:$0xff]  ;;  %v3266_v44 = vld [vmem:[#allocation2 + $0x718] sm:$0xff] }
 0x3e9   :  { %3460 = vmatprep.subr.bf16.mxu0 %v3208_v18  ;;  %3686 = vmatprep.subr.bf16.mxu1 %v3210_v48  ;;  %v3231_v48 = vld [vmem:[#allocation2 + $0x600] sm:$0xff] }
 0x3ea   :  { %3399 = vmatprep.mubr.bf16.mxu0 %v12170_v25  ;;  %3625 = vmatprep.mubr.bf16.mxu1 %v12170_v25  ;;  %v12196_v18 = vpack.c.bf16 %v16065_v40, %v16064_v60  ;;  %v3263_v40 = vld [vmem:[#allocation2 + $0x700] sm:$0xff] }
 0x3ec   :  { %3461 = vmatpush1.bf16.msra.mxu0 %v3207_v0  ;;  %3687 = vmatpush1.bf16.msra.mxu1 %v3209_v63  ;;  %v3242_v0 = vld [vmem:[#allocation2 + $0x658] sm:$0xff]  ;;  %v16066_v63 = vmax.f32 %v11969_v42, 0.0 }
 0x3ed   :  { %3462 = vmatprep.subr.bf16.mxu0 %v3216_v19  ;;  %3688 = vmatprep.subr.bf16.mxu1 %v3218_v21  ;;  %v16067_v19 = vmax.f32 %v16036_v30, 0.0  ;;  %v3250_v42 = vld [vmem:[#allocation2 + $0x698] sm:$0xff]  ;;  %v16068_v30 = vmax.f32 %v11965_v39, 0.0  ;;  %v3255_v39 = vld [vmem:[#allocation2 + $0x6c0] sm:$0xff] }
 0x3ef   :  { %3400 = vmatmul.mubr.bf16.gmra.mrb[76].mxu0 %v12180_v22  ;;  %3626 = vmatmul.mubr.bf16.gmra.mrb[76].mxu1 %v12180_v22  ;;  %v12202_v21 = vpack.c.bf16 %v16067_v19, %v16066_v63  ;;  %v16075_v63 = vmax.f32 %v12048_v28, 0.0  ;;  %v16076_v28 = vmax.f32 %v12028_v7, 0.0  ;;  %v3287_v7 = vld [vmem:[#allocation2 + $0x7c0] sm:$0xff] }
 0x3f0   :  { %3463 = vmatpush1.bf16.msra.mxu0 %v3215_v47  ;;  %3689 = vmatpush1.bf16.msra.mxu1 %v3217_v54  ;;  %v12212_v47 = vpack.c.bf16 %v16069_v31, %v16068_v30  ;;  %v3247_v54 = vld [vmem:[#allocation2 + $0x680] sm:$0xff]  ;;  %v3281_v30 = vld [vmem:[#allocation2 + $0x790] sm:$0xff]  ;;  %v3288_v31 = vld [vmem:[#allocation2 + $0x7c8] sm:$0xff] }
 0x3f1   :  { %3464 = vmatprep.subr.bf16.mxu0 %v3224_v27  ;;  %3690 = vmatprep.subr.bf16.mxu1 %v3226_v55  ;;  %v3249_v27 = vld [vmem:[#allocation2 + $0x690] sm:$0xff]  ;;  %v3256_v55 = vld [vmem:[#allocation2 + $0x6c8] sm:$0xff] }
 0x3f2   :  { %3409 = vmatprep.mubr.bf16.mxu0 %v12186_v41  ;;  %3635 = vmatprep.mubr.bf16.mxu1 %v12186_v41 }
 0x3f4   :  { %3465 = vmatpush1.bf16.msra.mxu0 %v3223_v6  ;;  %3691 = vmatpush1.bf16.msra.mxu1 %v3225_v23  ;;  %v16071_v6 = vmax.f32 %v16043_v56, 0.0  ;;  %v16072_v56 = vmax.f32 %v16039_v13, 0.0  ;;  %v3271_v13 = vld [vmem:[#allocation2 + $0x740] sm:$0xff] }
 0x3f5   :  { %3466 = vmatprep.subr.bf16.mxu0 %v3232_v9  ;;  %3692 = vmatprep.subr.bf16.mxu1 %v3234_v52  ;;  %v3264_v9 = vld [vmem:[#allocation2 + $0x708] sm:$0xff]  ;;  %v16073_v52 = vmax.f32 %v16042_v20, 0.0  ;;  %v3273_v20 = vld [vmem:[#allocation2 + $0x750] sm:$0xff] }
 0x3f6   :  { %v12218_v23 = vpack.c.bf16 %v16071_v6, %v16070_v26  ;;  %v3044_v26 = vld [vmem:[#allocation2 + $0x28] sm:$0xff]  ;;  %v16081_v6 = vmax.f32 %v11837_v59, 0.0  ;;  %v3053_v59 = vld [vmem:[#allocation2 + $0x70] sm:$0xff] }
 0x3f7   :  { %3410 = vmatmul.mubr.bf16.gmra.mrb[80].mxu0 %v12196_v18  ;;  %3636 = vmatmul.mubr.bf16.gmra.mrb[80].mxu1 %v12196_v18  ;;  %v12228_v60 = vpack.c.bf16 %v16073_v52, %v16072_v56  ;;  %v3054_v56 = vld [vmem:[#allocation2 + $0x78] sm:$0xff]  ;;  %v16082_v52 = vmax.f32 %v11853_v4, 0.0 }
 0x3f8   :  { %3467 = vmatpush1.bf16.msra.mxu0 %v3231_v48  ;;  %3693 = vmatpush1.bf16.msra.mxu1 %v3233_v8  ;;  %v3265_v48 = vld [vmem:[#allocation2 + $0x710] sm:$0xff]  ;;  %v3272_v8 = vld [vmem:[#allocation2 + $0x748] sm:$0xff]  ;;  %v3062_v4 = vld [vmem:[#allocation2 + $0xb8] sm:$0xff] }
 0x3f9   :  { %3468 = vmatprep.subr.bf16.mxu0 %v3240_v46  ;;  %3694 = vmatprep.subr.bf16.mxu1 %v3242_v0  ;;  %v3274_v46 = vld [vmem:[#allocation2 + $0x758] sm:$0xff]  ;;  %v16074_v0 = vmax.f32 %v12032_v3, 0.0 }
 0x3fa   :  { %3419 = vmatprep.mubr.bf16.mxu0 %v12202_v21  ;;  %3645 = vmatprep.mubr.bf16.mxu1 %v12202_v21  ;;  %v3282_v3 = vld [vmem:[#allocation2 + $0x798] sm:$0xff] }
 0x3fb   :  { %v12234_v19 = vpack.c.bf16 %v16075_v63, %v16074_v0  ;;  %v3059_v63 = vld [vmem:[#allocation2 + $0xa0] sm:$0xff] }
 0x3fc   :  { %3469 = vmatpush1.bf16.msra.mxu0 %v3239_v24  ;;  %3695 = vmatpush1.bf16.msra.mxu1 %v3241_v38  ;;  %v3280_v24 = vld [vmem:[#allocation2 + $0x788] sm:$0xff]  ;;  %v16077_v38 = vmax.f32 %v12044_v10, 0.0  ;;  %v3289_v10 = vld [vmem:[#allocation2 + $0x7d0] sm:$0xff] }
 0x3fd   :  { %3470 = vmatprep.subr.bf16.mxu0 %v3248_v35  ;;  %3696 = vmatprep.subr.bf16.mxu1 %v3250_v42  ;;  %v3279_v42 = vld [vmem:[#allocation2 + $0x780] sm:$0xff] }
 0x3fe   :  { %v12244_v35 = vpack.c.bf16 %v16077_v38, %v16076_v28  ;;  %v16087_v28 = vmax.f32 %v11897_v57, 0.0  ;;  %v16088_v57 = vmax.f32 %v11877_v2, 0.0  ;;  %v3083_v2 = vld [vmem:[#allocation2 + $0x160] sm:$0xff] }
 0x3ff   :  { %3420 = vmatmul.mubr.bf16.gmra.mrb[84].mxu0 %v12212_v47  ;;  %3646 = vmatmul.mubr.bf16.gmra.mrb[84].mxu1 %v12212_v47 }
 0x400   :  { %3471 = vmatpush1.bf16.msra.mxu0 %v3247_v54  ;;  %3697 = vmatpush1.bf16.msra.mxu1 %v3249_v27  ;;  %v3290_v54 = vld [vmem:[#allocation2 + $0x7d8] sm:$0xff]  ;;  %v16078_v27 = vmax.f32 %v11829_v17, 0.0 }
 0x401   :  { %3472 = vmatprep.subr.bf16.mxu0 %v3256_v55  ;;  %3698 = vmatprep.subr.bf16.mxu1 %v3258_v50  ;;  %v16079_v55 = vmax.f32 %v11841_v11, 0.0  ;;  %v3046_v17 = vld [vmem:[#allocation2 + $0x38] sm:$0xff]  ;;  %v16080_v11 = vmax.f32 %v11825_v32, 0.0  ;;  %v3051_v32 = vld [vmem:[#allocation2 + $0x60] sm:$0xff] }
 0x402   :  { %3429 = vmatprep.mubr.bf16.mxu0 %v12218_v23  ;;  %3655 = vmatprep.mubr.bf16.mxu1 %v12218_v23 }
 0x403   :  { %v12250_v50 = vpack.c.bf16 %v16079_v55, %v16078_v27  ;;  %v3077_v27 = vld [vmem:[#allocation2 + $0x130] sm:$0xff]  ;;  %v3084_v55 = vld [vmem:[#allocation2 + $0x168] sm:$0xff] }
 0x404   :  { %3473 = vmatpush1.bf16.msra.mxu0 %v3255_v39  ;;  %3699 = vmatpush1.bf16.msra.mxu1 %v3257_v43  ;;  %v12260_v39 = vpack.c.bf16 %v16081_v6, %v16080_v11  ;;  %v3043_v43 = vld [vmem:[#allocation2 + $0x20] sm:$0xff]  ;;  %v3092_v6 = vld [vmem:[#allocation2 + $0x1a8] sm:$0xff] }
 0x405   :  { %3474 = vmatprep.subr.bf16.mxu0 %v3264_v9  ;;  %3700 = vmatprep.subr.bf16.mxu1 %v3266_v44  ;;  %v3045_v9 = vld [vmem:[#allocation2 + $0x30] sm:$0xff]  ;;  %v3052_v44 = vld [vmem:[#allocation2 + $0x68] sm:$0xff] }
 0x407   :  { %3430 = vmatmul.mubr.bf16.gmra.mrb[88].mxu0 %v12228_v60  ;;  %3656 = vmatmul.mubr.bf16.gmra.mrb[88].mxu1 %v12228_v60 }
 0x408   :  { %3475 = vmatpush1.bf16.msra.mxu0 %v3263_v40  ;;  %3701 = vmatpush1.bf16.msra.mxu1 %v3265_v48  ;;  %v16083_v40 = vmax.f32 %v11865_v51, 0.0  ;;  %v16084_v51 = vmax.f32 %v11849_v29, 0.0  ;;  %v3067_v29 = vld [vmem:[#allocation2 + $0xe0] sm:$0xff] }
 0x409   :  { %3476 = vmatprep.subr.bf16.mxu0 %v3272_v8  ;;  %3702 = vmatprep.subr.bf16.mxu1 %v3274_v46  ;;  %v3060_v8 = vld [vmem:[#allocation2 + $0xa8] sm:$0xff]  ;;  %v16085_v46 = vmax.f32 %v11861_v62, 0.0  ;;  %v3069_v62 = vld [vmem:[#allocation2 + $0xf0] sm:$0xff] }
 0x40a   :  { %3439 = vmatprep.mubr.bf16.mxu0 %v12234_v19  ;;  %3665 = vmatprep.mubr.bf16.mxu1 %v12234_v19  ;;  %v12266_v48 = vpack.c.bf16 %v16083_v40, %v16082_v52  ;;  %v3091_v40 = vld [vmem:[#allocation2 + $0x1a0] sm:$0xff] }
 0x40b   :  { %v12276_v0 = vpack.c.bf16 %v16085_v46, %v16084_v51  ;;  %v16099_v46 = vld [vmem:[#allocation44_spill] sm:$0xff] }
 0x40c   :  { %3477 = vmatpush1.bf16.msra.mxu0 %v3271_v13  ;;  %3703 = vmatpush1.bf16.msra.mxu1 %v3273_v20  ;;  %v3061_v13 = vld [vmem:[#allocation2 + $0xb0] sm:$0xff]  ;;  %v3068_v20 = vld [vmem:[#allocation2 + $0xe8] sm:$0xff] }
 0x40d   :  { %3478 = vmatprep.subr.bf16.mxu0 %v3280_v24  ;;  %3704 = vmatprep.subr.bf16.mxu1 %v3282_v3  ;;  %v3070_v24 = vld [vmem:[#allocation2 + $0xf8] sm:$0xff]  ;;  %v16086_v3 = vmax.f32 %v11881_v12, 0.0 }
 0x40e   :  { %v3078_v12 = vld [vmem:[#allocation2 + $0x138] sm:$0xff] }
 0x40f   :  { %3440 = vmatmul.mubr.bf16.gmra.mrb[92].mxu0 %v12244_v35  ;;  %3666 = vmatmul.mubr.bf16.gmra.mrb[92].mxu1 %v12244_v35  ;;  %v12282_v38 = vpack.c.bf16 %v16087_v28, %v16086_v3  ;;  %v3108_v3 = vld [vmem:[#allocation2 + $0x228] sm:$0xff]  ;;  %v3110_v28 = vld [vmem:[#allocation2 + $0x238] sm:$0xff] }
 0x410   :  { %3479 = vmatpush1.bf16.msra.mxu0 %v3279_v42  ;;  %3705 = vmatpush1.bf16.msra.mxu1 %v3281_v30  ;;  %v3076_v42 = vld [vmem:[#allocation2 + $0x128] sm:$0xff]  ;;  %v16089_v30 = vmax.f32 %v11893_v16, 0.0  ;;  %v3085_v16 = vld [vmem:[#allocation2 + $0x170] sm:$0xff] }
 0x411   :  { %3480 = vmatprep.subr.bf16.mxu0 %v3288_v31  ;;  %3706 = vmatprep.subr.bf16.mxu1 %v3290_v54  ;;  %v3075_v54 = vld [vmem:[#allocation2 + $0x120] sm:$0xff] }
 0x412   :  { %3482 = vmatprep.mubr.bf16.mxu0 %v12250_v50  ;;  %3708 = vmatprep.mubr.bf16.mxu1 %v12250_v50  ;;  %v12292_v31 = vpack.c.bf16 %v16089_v30, %v16088_v57  ;;  %v3107_v30 = vld [vmem:[#allocation2 + $0x220] sm:$0xff] }
 0x414   :  { %3481 = vmatpush1.bf16.msra.mxu0 %v3287_v7  ;;  %3707 = vmatpush1.bf16.msra.mxu1 %v3289_v10  ;;  %v3086_v7 = vld [vmem:[#allocation2 + $0x178] sm:$0xff]  ;;  %v16090_v10 = vmax.f32 %v11913_v14, 0.0 }
 0x415   :  { %3789 = vmatprep.subr.bf16.mxu0 %v3044_v26  ;;  %4015 = vmatprep.subr.bf16.mxu1 %v3046_v17  ;;  %v16091_v26 = vld [vmem:[#allocation40_spill] sm:$0xff] }
 0x416   :  { %v16092_v17 = vmax.f32 %v16091_v26, 0.0  ;;  %v3094_v14 = vld [vmem:[#allocation2 + $0x1b8] sm:$0xff] }
 0x417   :  { %3483 = vmatmul.mubr.bf16.vlgmr.msra.gmra.mrb[64].mxu0 %v12260_v39  ;;  %3709 = vmatmul.mubr.bf16.vlgmr.msra.gmra.mrb[64].mxu1 %v12260_v39 }
 0x418   :  { %3790 = vmatpush1.bf16.msra.mxu0 %v3043_v43  ;;  %4016 = vmatpush1.bf16.msra.mxu1 %v3045_v9  ;;  %v12298_v11 = vpack.c.bf16 %v16092_v17, %v16090_v10  ;;  %v16093_v43 = vld [vmem:[#allocation38_spill] sm:$0xff] }
 0x419   :  { %3791 = vmatprep.subr.bf16.mxu0 %v3052_v44  ;;  %4017 = vmatprep.subr.bf16.mxu1 %v3054_v56  ;;  %v16094_v9 = vmax.f32 %v16093_v43, 0.0  ;;  %v16095_v44 = vld [vmem:[#allocation35_spill] sm:$0xff]  ;;  %v16106_v10 = vld [vmem:[#allocation50_spill] sm:$0xff] }
 0x41a   :  { %3492 = vmatprep.mubr.bf16.mxu0 %v12266_v48  ;;  %3718 = vmatprep.mubr.bf16.mxu1 %v12266_v48  ;;  %v16096_v56 = vmax.f32 %v16095_v44, 0.0  ;;  %v16107_v26 = vmax.f32 %v16106_v10, 0.0  ;;  %v16120_v10 = vld [vmem:[#allocation63_spill] sm:$0xff] }
 0x41c   :  { %3792 = vmatpush1.bf16.msra.mxu0 %v3051_v32  ;;  %4018 = vmatpush1.bf16.msra.mxu1 %v3053_v59  ;;  %v12308_v52 = vpack.c.bf16 %v16096_v56, %v16094_v9  ;;  %v3093_v32 = vld [vmem:[#allocation2 + $0x1b0] sm:$0xff]  ;;  %v3100_v59 = vld [vmem:[#allocation2 + $0x1e8] sm:$0xff]  ;;  %v16110_v9 = vld [vmem:[#allocation45_spill] sm:$0xff] }
 0x41d   :  { %3793 = vmatprep.subr.bf16.mxu0 %v3060_v8  ;;  %4019 = vmatprep.subr.bf16.mxu1 %v3062_v4  ;;  %v3102_v8 = vld [vmem:[#allocation2 + $0x1f8] sm:$0xff]  ;;  %v16097_v4 = vld [vmem:[#allocation42_spill] sm:$0xff]  ;;  %v16111_v44 = vmax.f32 %v16110_v9, 0.0  ;;  %v3165_v9 = vld [vmem:[#allocation2 + $0x3f0] sm:$0xff] }
 0x41e   :  { %v16098_v51 = vmax.f32 %v16097_v4, 0.0  ;;  %v16112_v4 = vmax.f32 %v16041_v34, 0.0  ;;  %v3142_v34 = vld [vmem:[#allocation2 + $0x338] sm:$0xff] }
 0x41f   :  { %3493 = vmatmul.mubr.bf16.gmra.mrb[68].mxu0 %v12276_v0  ;;  %3719 = vmatmul.mubr.bf16.gmra.mrb[68].mxu1 %v12276_v0 }
 0x420   :  { %3794 = vmatpush1.bf16.msra.mxu0 %v3059_v63  ;;  %4020 = vmatpush1.bf16.msra.mxu1 %v3061_v13  ;;  %v16100_v63 = vmax.f32 %v16099_v46, 0.0 }
 0x421   :  { %3795 = vmatprep.subr.bf16.mxu0 %v3068_v20  ;;  %4021 = vmatprep.subr.bf16.mxu1 %v3070_v24  ;;  %v3099_v20 = vld [vmem:[#allocation2 + $0x1e0] sm:$0xff]  ;;  %v3101_v24 = vld [vmem:[#allocation2 + $0x1f0] sm:$0xff] }
 0x422   :  { %3502 = vmatprep.mubr.bf16.mxu0 %v12282_v38  ;;  %3728 = vmatprep.mubr.bf16.mxu1 %v12282_v38  ;;  %v12314_v13 = vpack.c.bf16 %v16100_v63, %v16098_v51  ;;  %v16113_v51 = vmax.f32 %v12024_v36, 0.0  ;;  %v3131_v63 = vld [vmem:[#allocation2 + $0x2e0] sm:$0xff]  ;;  %v16114_v36 = vmax.f32 %v12005_v37, 0.0  ;;  %v3149_v37 = vld [vmem:[#allocation2 + $0x370] sm:$0xff] }
 0x424   :  { %3796 = vmatpush1.bf16.msra.mxu0 %v3067_v29  ;;  %4022 = vmatpush1.bf16.msra.mxu1 %v3069_v62  ;;  %v16101_v29 = vld [vmem:[#allocation37_spill] sm:$0xff]  ;;  %v12346_v46 = vpack.c.bf16 %v16113_v51, %v16112_v4  ;;  %v3180_v4 = vld [vmem:[#allocation2 + $0x468] sm:$0xff]  ;;  %v3182_v51 = vld [vmem:[#allocation2 + $0x478] sm:$0xff] }
 0x425   :  { %3797 = vmatprep.subr.bf16.mxu0 %v3076_v42  ;;  %4023 = vmatprep.subr.bf16.mxu1 %v3078_v12  ;;  %v16102_v62 = vmax.f32 %v16101_v29, 0.0  ;;  %v16103_v42 = vld [vmem:[#allocation39_spill] sm:$0xff]  ;;  %v3139_v29 = vld [vmem:[#allocation2 + $0x320] sm:$0xff] }
 0x426   :  { %v16104_v12 = vmax.f32 %v16103_v42, 0.0  ;;  %v3148_v42 = vld [vmem:[#allocation2 + $0x368] sm:$0xff] }
 0x427   :  { %3503 = vmatmul.mubr.bf16.gmra.mrb[72].mxu0 %v12292_v31  ;;  %3729 = vmatmul.mubr.bf16.gmra.mrb[72].mxu1 %v12292_v31 }
 0x428   :  { %3798 = vmatpush1.bf16.msra.mxu0 %v3075_v54  ;;  %4024 = vmatpush1.bf16.msra.mxu1 %v3077_v27  ;;  %v12324_v57 = vpack.c.bf16 %v16104_v12, %v16102_v62  ;;  %v3109_v54 = vld [vmem:[#allocation2 + $0x230] sm:$0xff]  ;;  %v3116_v27 = vld [vmem:[#allocation2 + $0x268] sm:$0xff]  ;;  %v3150_v12 = vld [vmem:[#allocation2 + $0x378] sm:$0xff] }
 0x429   :  { %3799 = vmatprep.subr.bf16.mxu0 %v3084_v55  ;;  %4025 = vmatprep.subr.bf16.mxu1 %v3086_v7  ;;  %v3118_v55 = vld [vmem:[#allocation2 + $0x278] sm:$0xff]  ;;  %v16105_v7 = vmax.f32 %v11977_v61, 0.0  ;;  %v3141_v62 = vld [vmem:[#allocation2 + $0x330] sm:$0xff] }
 0x42a   :  { %3512 = vmatprep.mubr.bf16.mxu0 %v12298_v11  ;;  %3738 = vmatprep.mubr.bf16.mxu1 %v12298_v11  ;;  %v3126_v61 = vld [vmem:[#allocation2 + $0x2b8] sm:$0xff] }
 0x42b   :  { %v12330_v17 = vpack.c.bf16 %v16107_v26, %v16105_v7  ;;  %v16118_v7 = vld [vmem:[#allocation59_spill] sm:$0xff]  ;;  %v16121_v26 = vmax.f32 %v16120_v10, 0.0  ;;  %v3228_v10 = vld [vmem:[#allocation2 + $0x5e8] sm:$0xff] }
 0x42c   :  { %3800 = vmatpush1.bf16.msra.mxu0 %v3083_v2  ;;  %4026 = vmatpush1.bf16.msra.mxu1 %v3085_v16  ;;  %v3115_v2 = vld [vmem:[#allocation2 + $0x260] sm:$0xff]  ;;  %v3117_v16 = vld [vmem:[#allocation2 + $0x270] sm:$0xff] }
 0x42d   :  { %3801 = vmatprep.subr.bf16.mxu0 %v3092_v6  ;;  %4027 = vmatprep.subr.bf16.mxu1 %v3094_v14  ;;  %v3124_v6 = vld [vmem:[#allocation2 + $0x2a8] sm:$0xff]  ;;  %v16108_v14 = vld [vmem:[#allocation41_spill] sm:$0xff] }
 0x42e   :  { %v16109_v43 = vmax.f32 %v16108_v14, 0.0  ;;  %v3166_v14 = vld [vmem:[#allocation2 + $0x3f8] sm:$0xff] }
 0x42f   :  { %3513 = vmatmul.mubr.bf16.gmra.mrb[76].mxu0 %v12308_v52  ;;  %3739 = vmatmul.mubr.bf16.gmra.mrb[76].mxu1 %v12308_v52 }
 0x430   :  { %3802 = vmatpush1.bf16.msra.mxu0 %v3091_v40  ;;  %4028 = vmatpush1.bf16.msra.mxu1 %v3093_v32  ;;  %v12340_v56 = vpack.c.bf16 %v16111_v44, %v16109_v43  ;;  %v3123_v40 = vld [vmem:[#allocation2 + $0x2a0] sm:$0xff]  ;;  %v3125_v32 = vld [vmem:[#allocation2 + $0x2b0] sm:$0xff] }
 0x431   :  { %3803 = vmatprep.subr.bf16.mxu0 %v3100_v59  ;;  %4029 = vmatprep.subr.bf16.mxu1 %v3102_v8  ;;  %v3132_v59 = vld [vmem:[#allocation2 + $0x2e8] sm:$0xff]  ;;  %v3134_v8 = vld [vmem:[#allocation2 + $0x2f8] sm:$0xff]  ;;  %v3163_v43 = vld [vmem:[#allocation2 + $0x3e0] sm:$0xff] }
 0x432   :  { %3522 = vmatprep.mubr.bf16.mxu0 %v12314_v13  ;;  %3748 = vmatprep.mubr.bf16.mxu1 %v12314_v13  ;;  %v16122_v44 = vld [vmem:[#allocation57_spill] sm:$0xff] }
 0x434   :  { %3804 = vmatpush1.bf16.msra.mxu0 %v3099_v20  ;;  %4030 = vmatpush1.bf16.msra.mxu1 %v3101_v24  ;;  %v3133_v20 = vld [vmem:[#allocation2 + $0x2f0] sm:$0xff]  ;;  %v3140_v24 = vld [vmem:[#allocation2 + $0x328] sm:$0xff] }
 0x435   :  { %3805 = vmatprep.subr.bf16.mxu0 %v3108_v3  ;;  %4031 = vmatprep.subr.bf16.mxu1 %v3110_v28  ;;  %v16115_v3 = vmax.f32 %v12020_v53, 0.0  ;;  %v3147_v53 = vld [vmem:[#allocation2 + $0x360] sm:$0xff] }
 0x437   :  { %3523 = vmatmul.mubr.bf16.gmra.mrb[80].mxu0 %v12324_v57  ;;  %3749 = vmatmul.mubr.bf16.gmra.mrb[80].mxu1 %v12324_v57  ;;  %v12356_v28 = vpack.c.bf16 %v16115_v3, %v16114_v36  ;;  %v3187_v36 = vld [vmem:[#allocation2 + $0x4a0] sm:$0xff]  ;;  %v3189_v3 = vld [vmem:[#allocation2 + $0x4b0] sm:$0xff] }
 0x438   :  { %3806 = vmatpush1.bf16.msra.mxu0 %v3107_v30  ;;  %4032 = vmatpush1.bf16.msra.mxu1 %v3109_v54  ;;  %v16116_v30 = vmax.f32 %v16045_v33, 0.0  ;;  %v16117_v54 = vmax.f32 %v12056_v1, 0.0  ;;  %v3158_v33 = vld [vmem:[#allocation2 + $0x3b8] sm:$0xff]  ;;  %v16119_v1 = vmax.f32 %v16118_v7, 0.0  ;;  %v3219_v7 = vld [vmem:[#allocation2 + $0x5a0] sm:$0xff] }
 0x439   :  { %3807 = vmatprep.subr.bf16.mxu0 %v3116_v27  ;;  %4033 = vmatprep.subr.bf16.mxu1 %v3118_v55  ;;  %v3156_v55 = vld [vmem:[#allocation2 + $0x3a8] sm:$0xff] }
 0x43a   :  { %3532 = vmatprep.mubr.bf16.mxu0 %v12330_v17  ;;  %3758 = vmatprep.mubr.bf16.mxu1 %v12330_v17  ;;  %v12362_v27 = vpack.c.bf16 %v16117_v54, %v16116_v30  ;;  %v3203_v30 = vld [vmem:[#allocation2 + $0x520] sm:$0xff]  ;;  %v3205_v54 = vld [vmem:[#allocation2 + $0x530] sm:$0xff] }
 0x43c   :  { %3808 = vmatpush1.bf16.msra.mxu0 %v3115_v2  ;;  %4034 = vmatpush1.bf16.msra.mxu1 %v3117_v16  ;;  %v12372_v2 = vpack.c.bf16 %v16121_v26, %v16119_v1  ;;  %v3155_v16 = vld [vmem:[#allocation2 + $0x3a0] sm:$0xff]  ;;  %v3221_v1 = vld [vmem:[#allocation2 + $0x5b0] sm:$0xff] }
 0x43d   :  { %3809 = vmatprep.subr.bf16.mxu0 %v3124_v6  ;;  %4035 = vmatprep.subr.bf16.mxu1 %v3126_v61  ;;  %v3157_v6 = vld [vmem:[#allocation2 + $0x3b0] sm:$0xff]  ;;  %v3164_v61 = vld [vmem:[#allocation2 + $0x3e8] sm:$0xff]  ;;  %v3227_v26 = vld [vmem:[#allocation2 + $0x5e0] sm:$0xff] }
 0x43f   :  { %3533 = vmatmul.mubr.bf16.gmra.mrb[84].mxu0 %v12340_v56  ;;  %3759 = vmatmul.mubr.bf16.gmra.mrb[84].mxu1 %v12340_v56 }
 0x440   :  { %3810 = vmatpush1.bf16.msra.mxu0 %v3123_v40  ;;  %4036 = vmatpush1.bf16.msra.mxu1 %v3125_v32  ;;  %v3172_v40 = vld [vmem:[#allocation2 + $0x428] sm:$0xff]  ;;  %v3174_v32 = vld [vmem:[#allocation2 + $0x438] sm:$0xff] }
 0x441   :  { %3811 = vmatprep.subr.bf16.mxu0 %v3132_v59  ;;  %4037 = vmatprep.subr.bf16.mxu1 %v3134_v8  ;;  %v3171_v59 = vld [vmem:[#allocation2 + $0x420] sm:$0xff]  ;;  %v3173_v8 = vld [vmem:[#allocation2 + $0x430] sm:$0xff] }
 0x442   :  { %3542 = vmatprep.mubr.bf16.mxu0 %v12346_v46  ;;  %3768 = vmatprep.mubr.bf16.mxu1 %v12346_v46 }
 0x444   :  { %3812 = vmatpush1.bf16.msra.mxu0 %v3131_v63  ;;  %4038 = vmatpush1.bf16.msra.mxu1 %v3133_v20  ;;  %v3179_v63 = vld [vmem:[#allocation2 + $0x460] sm:$0xff]  ;;  %v3181_v20 = vld [vmem:[#allocation2 + $0x470] sm:$0xff] }
 0x445   :  { %3813 = vmatprep.subr.bf16.mxu0 %v3140_v24  ;;  %4039 = vmatprep.subr.bf16.mxu1 %v3142_v34  ;;  %v3188_v24 = vld [vmem:[#allocation2 + $0x4a8] sm:$0xff]  ;;  %v3190_v34 = vld [vmem:[#allocation2 + $0x4b8] sm:$0xff] }
 0x447   :  { %3543 = vmatmul.mubr.bf16.gmra.mrb[88].mxu0 %v12356_v28  ;;  %3769 = vmatmul.mubr.bf16.gmra.mrb[88].mxu1 %v12356_v28 }
 0x448   :  { %3814 = vmatpush1.bf16.msra.mxu0 %v3139_v29  ;;  %4040 = vmatpush1.bf16.msra.mxu1 %v3141_v62  ;;  %v3196_v29 = vld [vmem:[#allocation2 + $0x4e8] sm:$0xff]  ;;  %v3195_v62 = vld [vmem:[#allocation2 + $0x4e0] sm:$0xff] }
 0x449   :  { %3815 = vmatprep.subr.bf16.mxu0 %v3148_v42  ;;  %4041 = vmatprep.subr.bf16.mxu1 %v3150_v12  ;;  %v3204_v42 = vld [vmem:[#allocation2 + $0x528] sm:$0xff]  ;;  %v3206_v12 = vld [vmem:[#allocation2 + $0x538] sm:$0xff] }
 0x44a   :  { %3552 = vmatprep.mubr.bf16.mxu0 %v12362_v27  ;;  %3778 = vmatprep.mubr.bf16.mxu1 %v12362_v27 }
 0x44c   :  { %3816 = vmatpush1.bf16.msra.mxu0 %v3147_v53  ;;  %4042 = vmatpush1.bf16.msra.mxu1 %v3149_v37  ;;  %v3212_v53 = vld [vmem:[#allocation2 + $0x568] sm:$0xff]  ;;  %v3211_v37 = vld [vmem:[#allocation2 + $0x560] sm:$0xff] }
 0x44d   :  { %3817 = vmatprep.subr.bf16.mxu0 %v3156_v55  ;;  %4043 = vmatprep.subr.bf16.mxu1 %v3158_v33  ;;  %v3220_v55 = vld [vmem:[#allocation2 + $0x5a8] sm:$0xff]  ;;  %v3222_v33 = vld [vmem:[#allocation2 + $0x5b8] sm:$0xff] }
 0x44f   :  { %3553 = vmatmul.mubr.bf16.gmra.mrb[92].mxu0 %v12372_v2  ;;  %3779 = vmatmul.mubr.bf16.gmra.mrb[92].mxu1 %v12372_v2 }
 0x450   :  { %3818 = vmatpush1.bf16.msra.mxu0 %v3155_v16  ;;  %4044 = vmatpush1.bf16.msra.mxu1 %v3157_v6  ;;  %v3236_v16 = vld [vmem:[#allocation2 + $0x628] sm:$0xff]  ;;  %v3238_v6 = vld [vmem:[#allocation2 + $0x638] sm:$0xff] }
 0x451   :  { %3819 = vmatprep.subr.bf16.mxu0 %v3164_v61  ;;  %4045 = vmatprep.subr.bf16.mxu1 %v3166_v14  ;;  %v3235_v61 = vld [vmem:[#allocation2 + $0x620] sm:$0xff]  ;;  %v3237_v14 = vld [vmem:[#allocation2 + $0x630] sm:$0xff] }
 0x452   :  { %3821 = vmatprep.mubr.bf16.mxu0 %v16122_v44  ;;  %4047 = vmatprep.mubr.bf16.mxu1 %v16122_v44  ;;  %v3252_v44 = vld [vmem:[#allocation2 + $0x6a8] sm:$0xff] }
 0x454   :  { %3820 = vmatpush1.bf16.msra.mxu0 %v3163_v43  ;;  %4046 = vmatpush1.bf16.msra.mxu1 %v3165_v9  ;;  %v3244_v43 = vld [vmem:[#allocation2 + $0x668] sm:$0xff]  ;;  %v3243_v9 = vld [vmem:[#allocation2 + $0x660] sm:$0xff] }
 0x455   :  { %3902 = vmatprep.subr.bf16.mxu0 %v3172_v40  ;;  %4128 = vmatprep.subr.bf16.mxu1 %v3174_v32  ;;  %v3254_v40 = vld [vmem:[#allocation2 + $0x6b8] sm:$0xff]  ;;  %v3251_v32 = vld [vmem:[#allocation2 + $0x6a0] sm:$0xff] }
 0x457   :  { %3822 = vmatmul.mubr.bf16.vlgmr.msra.gmra.mrb[96].mxu0 %v12132_v45  ;;  %4048 = vmatmul.mubr.bf16.vlgmr.msra.gmra.mrb[96].mxu1 %v12132_v45  ;;  %v3198_v45 = vld [vmem:[#allocation2 + $0x4f8] sm:$0xff] }
 0x458   :  { %3903 = vmatpush1.bf16.msra.mxu0 %v3171_v59  ;;  %4129 = vmatpush1.bf16.msra.mxu1 %v3173_v8  ;;  %v3253_v59 = vld [vmem:[#allocation2 + $0x6b0] sm:$0xff]  ;;  %v3260_v8 = vld [vmem:[#allocation2 + $0x6e8] sm:$0xff] }
 0x459   :  { %3904 = vmatprep.subr.bf16.mxu0 %v3180_v4  ;;  %4130 = vmatprep.subr.bf16.mxu1 %v3182_v51  ;;  %v3259_v4 = vld [vmem:[#allocation2 + $0x6e0] sm:$0xff]  ;;  %v3268_v51 = vld [vmem:[#allocation2 + $0x728] sm:$0xff] }
 0x45a   :  { %3831 = vmatprep.mubr.bf16.mxu0 %v12138_v49  ;;  %4057 = vmatprep.mubr.bf16.mxu1 %v12138_v49  ;;  %v3197_v49 = vld [vmem:[#allocation2 + $0x4f0] sm:$0xff] }
 0x45c   :  { %3905 = vmatpush1.bf16.msra.mxu0 %v3179_v63  ;;  %4131 = vmatpush1.bf16.msra.mxu1 %v3181_v20  ;;  %v3270_v63 = vld [vmem:[#allocation2 + $0x738] sm:$0xff]  ;;  %v3267_v20 = vld [vmem:[#allocation2 + $0x720] sm:$0xff] }
 0x45d   :  { %3906 = vmatprep.subr.bf16.mxu0 %v3188_v24  ;;  %4132 = vmatprep.subr.bf16.mxu1 %v3190_v34  ;;  %v3269_v24 = vld [vmem:[#allocation2 + $0x730] sm:$0xff]  ;;  %v3276_v34 = vld [vmem:[#allocation2 + $0x768] sm:$0xff] }
 0x45f   :  { %3832 = vmatmul.mubr.bf16.gmra.mrb[100].mxu0 %v12148_v5  ;;  %4058 = vmatmul.mubr.bf16.gmra.mrb[100].mxu1 %v12148_v5  ;;  %v3214_v5 = vld [vmem:[#allocation2 + $0x578] sm:$0xff] }
 0x460   :  { %3907 = vmatpush1.bf16.msra.mxu0 %v3187_v36  ;;  %4133 = vmatpush1.bf16.msra.mxu1 %v3189_v3  ;;  %v3275_v36 = vld [vmem:[#allocation2 + $0x760] sm:$0xff]  ;;  %v3284_v3 = vld [vmem:[#allocation2 + $0x7a8] sm:$0xff] }
 0x461   :  { %3908 = vmatprep.subr.bf16.mxu0 %v3196_v29  ;;  %4134 = vmatprep.subr.bf16.mxu1 %v3198_v45  ;;  %v3286_v29 = vld [vmem:[#allocation2 + $0x7b8] sm:$0xff]  ;;  %v3283_v45 = vld [vmem:[#allocation2 + $0x7a0] sm:$0xff] }
 0x462   :  { %3841 = vmatprep.mubr.bf16.mxu0 %v12154_v15  ;;  %4067 = vmatprep.mubr.bf16.mxu1 %v12154_v15  ;;  %v3213_v15 = vld [vmem:[#allocation2 + $0x570] sm:$0xff] }
 0x464   :  { %3909 = vmatpush1.bf16.msra.mxu0 %v3195_v62  ;;  %4135 = vmatpush1.bf16.msra.mxu1 %v3197_v49  ;;  %v3285_v62 = vld [vmem:[#allocation2 + $0x7b0] sm:$0xff]  ;;  %v3292_v49 = vld [vmem:[#allocation2 + $0x7e8] sm:$0xff] }
 0x465   :  { %3910 = vmatprep.subr.bf16.mxu0 %v3204_v42  ;;  %4136 = vmatprep.subr.bf16.mxu1 %v3206_v12  ;;  %v3291_v42 = vld [vmem:[#allocation2 + $0x7e0] sm:$0xff] }
 0x467   :  { %3842 = vmatmul.mubr.bf16.gmra.mrb[104].mxu0 %v12164_v58  ;;  %4068 = vmatmul.mubr.bf16.gmra.mrb[104].mxu1 %v12164_v58  ;;  %v3230_v58 = vld [vmem:[#allocation2 + $0x5f8] sm:$0xff] }
 0x468   :  { %3911 = vmatpush1.bf16.msra.mxu0 %v3203_v30  ;;  %4137 = vmatpush1.bf16.msra.mxu1 %v3205_v54 }
 0x469   :  { %3912 = vmatprep.subr.bf16.mxu0 %v3212_v53  ;;  %4138 = vmatprep.subr.bf16.mxu1 %v3214_v5 }
 0x46a   :  { %3851 = vmatprep.mubr.bf16.mxu0 %v12170_v25  ;;  %4077 = vmatprep.mubr.bf16.mxu1 %v12170_v25  ;;  %v3229_v25 = vld [vmem:[#allocation2 + $0x5f0] sm:$0xff] }
 0x46c   :  { %3913 = vmatpush1.bf16.msra.mxu0 %v3211_v37  ;;  %4139 = vmatpush1.bf16.msra.mxu1 %v3213_v15 }
 0x46d   :  { %3914 = vmatprep.subr.bf16.mxu0 %v3220_v55  ;;  %4140 = vmatprep.subr.bf16.mxu1 %v3222_v33 }
 0x46f   :  { %3852 = vmatmul.mubr.bf16.gmra.mrb[108].mxu0 %v12180_v22  ;;  %4078 = vmatmul.mubr.bf16.gmra.mrb[108].mxu1 %v12180_v22  ;;  %v3246_v22 = vld [vmem:[#allocation2 + $0x678] sm:$0xff] }
 0x470   :  { %3915 = vmatpush1.bf16.msra.mxu0 %v3219_v7  ;;  %4141 = vmatpush1.bf16.msra.mxu1 %v3221_v1 }
 0x471   :  { %3916 = vmatprep.subr.bf16.mxu0 %v3228_v10  ;;  %4142 = vmatprep.subr.bf16.mxu1 %v3230_v58 }
 0x472   :  { %3861 = vmatprep.mubr.bf16.mxu0 %v12186_v41  ;;  %4087 = vmatprep.mubr.bf16.mxu1 %v12186_v41  ;;  %v3245_v41 = vld [vmem:[#allocation2 + $0x670] sm:$0xff] }
 0x474   :  { %3917 = vmatpush1.bf16.msra.mxu0 %v3227_v26  ;;  %4143 = vmatpush1.bf16.msra.mxu1 %v3229_v25 }
 0x475   :  { %3918 = vmatprep.subr.bf16.mxu0 %v3236_v16  ;;  %4144 = vmatprep.subr.bf16.mxu1 %v3238_v6 }
 0x477   :  { %3862 = vmatmul.mubr.bf16.gmra.mrb[112].mxu0 %v12196_v18  ;;  %4088 = vmatmul.mubr.bf16.gmra.mrb[112].mxu1 %v12196_v18  ;;  %v3262_v18 = vld [vmem:[#allocation2 + $0x6f8] sm:$0xff] }
 0x478   :  { %3919 = vmatpush1.bf16.msra.mxu0 %v3235_v61  ;;  %4145 = vmatpush1.bf16.msra.mxu1 %v3237_v14 }
 0x479   :  { %3920 = vmatprep.subr.bf16.mxu0 %v3244_v43  ;;  %4146 = vmatprep.subr.bf16.mxu1 %v3246_v22 }
 0x47a   :  { %3871 = vmatprep.mubr.bf16.mxu0 %v12202_v21  ;;  %4097 = vmatprep.mubr.bf16.mxu1 %v12202_v21  ;;  %v3261_v21 = vld [vmem:[#allocation2 + $0x6f0] sm:$0xff] }
 0x47c   :  { %3921 = vmatpush1.bf16.msra.mxu0 %v3243_v9  ;;  %4147 = vmatpush1.bf16.msra.mxu1 %v3245_v41 }
 0x47d   :  { %3922 = vmatprep.subr.bf16.mxu0 %v3252_v44  ;;  %4148 = vmatprep.subr.bf16.mxu1 %v3254_v40 }
 0x47f   :  { %3872 = vmatmul.mubr.bf16.gmra.mrb[116].mxu0 %v12212_v47  ;;  %4098 = vmatmul.mubr.bf16.gmra.mrb[116].mxu1 %v12212_v47  ;;  %v3278_v47 = vld [vmem:[#allocation2 + $0x778] sm:$0xff] }
 0x480   :  { %3923 = vmatpush1.bf16.msra.mxu0 %v3251_v32  ;;  %4149 = vmatpush1.bf16.msra.mxu1 %v3253_v59 }
 0x481   :  { %3924 = vmatprep.subr.bf16.mxu0 %v3260_v8  ;;  %4150 = vmatprep.subr.bf16.mxu1 %v3262_v18 }
 0x482   :  { %3881 = vmatprep.mubr.bf16.mxu0 %v12218_v23  ;;  %4107 = vmatprep.mubr.bf16.mxu1 %v12218_v23  ;;  %v3277_v23 = vld [vmem:[#allocation2 + $0x770] sm:$0xff] }
 0x484   :  { %3925 = vmatpush1.bf16.msra.mxu0 %v3259_v4  ;;  %4151 = vmatpush1.bf16.msra.mxu1 %v3261_v21 }
 0x485   :  { %3926 = vmatprep.subr.bf16.mxu0 %v3268_v51  ;;  %4152 = vmatprep.subr.bf16.mxu1 %v3270_v63 }
 0x487   :  { %3882 = vmatmul.mubr.bf16.gmra.mrb[120].mxu0 %v12228_v60  ;;  %4108 = vmatmul.mubr.bf16.gmra.mrb[120].mxu1 %v12228_v60  ;;  %v3294_v60 = vld [vmem:[#allocation2 + $0x7f8] sm:$0xff] }
 0x488   :  { %3927 = vmatpush1.bf16.msra.mxu0 %v3267_v20  ;;  %4153 = vmatpush1.bf16.msra.mxu1 %v3269_v24 }
 0x489   :  { %3928 = vmatprep.subr.bf16.mxu0 %v3276_v34  ;;  %4154 = vmatprep.subr.bf16.mxu1 %v3278_v47 }
 0x48a   :  { %3891 = vmatprep.mubr.bf16.mxu0 %v12234_v19  ;;  %4117 = vmatprep.mubr.bf16.mxu1 %v12234_v19  ;;  %v3293_v19 = vld [vmem:[#allocation2 + $0x7f0] sm:$0xff] }
 0x48c   :  { %3929 = vmatpush1.bf16.msra.mxu0 %v3275_v36  ;;  %4155 = vmatpush1.bf16.msra.mxu1 %v3277_v23 }
 0x48d   :  { %3930 = vmatprep.subr.bf16.mxu0 %v3284_v3  ;;  %4156 = vmatprep.subr.bf16.mxu1 %v3286_v29 }
 0x48f   :  { %3892 = vmatmul.mubr.bf16.gmra.mrb[124].mxu0 %v12244_v35  ;;  %4118 = vmatmul.mubr.bf16.gmra.mrb[124].mxu1 %v12244_v35  ;;  %v12440_v35 = vld [vmem:[#allocation11 + $0x18] sm:$0xff] }
 0x490   :  { %3931 = vmatpush1.bf16.msra.mxu0 %v3283_v45  ;;  %4157 = vmatpush1.bf16.msra.mxu1 %v3285_v62 }
 0x491   :  { %3932 = vmatprep.subr.bf16.mxu0 %v3292_v49  ;;  %4158 = vmatprep.subr.bf16.mxu1 %v3294_v60 }
 0x492   :  { %3934 = vmatprep.mubr.bf16.mxu0 %v12250_v50  ;;  %4160 = vmatprep.mubr.bf16.mxu1 %v12250_v50  ;;  %v16123_v50 = vld [vmem:[#allocation25_spill] sm:$0xff] }
 0x494   :  { %3933 = vmatpush1.bf16.msra.mxu0 %v3291_v42  ;;  %4159 = vmatpush1.bf16.msra.mxu1 %v3293_v19 }
 0x497   :  { %3935 = vmatmul.mubr.bf16.vlgmr.msra.gmra.mrb[96].mxu0 %v12260_v39  ;;  %4161 = vmatmul.mubr.bf16.vlgmr.msra.gmra.mrb[96].mxu1 %v12260_v39  ;;  %v12444_v39 = vrot.slane %v12440_v35, %v16123_v50 }
 0x498   :  { %3944 = vmatprep.mubr.bf16.mxu0 %v12266_v48  ;;  %4170 = vmatprep.mubr.bf16.mxu1 %v12266_v48  ;;  %v16124_v48 = vld [vmem:[#allocation26_spill] sm:$0xff] }
 0x49f   :  { %3945 = vmatmul.mubr.bf16.gmra.mrb[100].mxu0 %v12276_v0  ;;  %4171 = vmatmul.mubr.bf16.gmra.mrb[100].mxu1 %v12276_v0  ;;  %v12448_v0 = vrot.slane %v12440_v35, %v16124_v48 }
 0x4a0   :  { %3954 = vmatprep.mubr.bf16.mxu0 %v12282_v38  ;;  %4180 = vmatprep.mubr.bf16.mxu1 %v12282_v38  ;;  %v16125_v38 = vld [vmem:[#allocation27_spill] sm:$0xff] }
 0x4a7   :  { %3955 = vmatmul.mubr.bf16.gmra.mrb[104].mxu0 %v12292_v31  ;;  %4181 = vmatmul.mubr.bf16.gmra.mrb[104].mxu1 %v12292_v31  ;;  %v12452_v31 = vrot.slane %v12440_v35, %v16125_v38 }
 0x4a8   :  { %3964 = vmatprep.mubr.bf16.mxu0 %v12298_v11  ;;  %4190 = vmatprep.mubr.bf16.mxu1 %v12298_v11  ;;  %v16126_v11 = vld [vmem:[#allocation28_spill] sm:$0xff] }
 0x4af   :  { %3965 = vmatmul.mubr.bf16.gmra.mrb[108].mxu0 %v12308_v52  ;;  %4191 = vmatmul.mubr.bf16.gmra.mrb[108].mxu1 %v12308_v52  ;;  %v12456_v52 = vrot.slane %v12440_v35, %v16126_v11 }
 0x4b0   :  { %3974 = vmatprep.mubr.bf16.mxu0 %v12314_v13  ;;  %4200 = vmatprep.mubr.bf16.mxu1 %v12314_v13 }
 0x4b7   :  { %3975 = vmatmul.mubr.bf16.gmra.mrb[112].mxu0 %v12324_v57  ;;  %4201 = vmatmul.mubr.bf16.gmra.mrb[112].mxu1 %v12324_v57 }
 0x4b8   :  { %3984 = vmatprep.mubr.bf16.mxu0 %v12330_v17  ;;  %4210 = vmatprep.mubr.bf16.mxu1 %v12330_v17 }
 0x4bf   :  { %3985 = vmatmul.mubr.bf16.gmra.mrb[116].mxu0 %v12340_v56  ;;  %4211 = vmatmul.mubr.bf16.gmra.mrb[116].mxu1 %v12340_v56 }
 0x4c0   :  { %3994 = vmatprep.mubr.bf16.mxu0 %v12346_v46  ;;  %4220 = vmatprep.mubr.bf16.mxu1 %v12346_v46 }
 0x4c7   :  { %3995 = vmatmul.mubr.bf16.gmra.mrb[120].mxu0 %v12356_v28  ;;  %4221 = vmatmul.mubr.bf16.gmra.mrb[120].mxu1 %v12356_v28 }
 0x4c8   :  { %4004 = vmatprep.mubr.bf16.mxu0 %v12362_v27  ;;  %4230 = vmatprep.mubr.bf16.mxu1 %v12362_v27 }
 0x4cf   :  { %4005 = vmatmul.mubr.bf16.gmra.mrb[124].mxu0 %v12372_v2  ;;  %4231 = vmatmul.mubr.bf16.gmra.mrb[124].mxu1 %v12372_v2 }
 0x4ea   :  { %v3484_v13 = vpop.f32.mrb[64].mxu0  ;;  %v3710_v57 = vpop.f32.mrb[64].mxu1 }
 0x4eb   :  { %v3486_v17 = vpop.f32.mrb[65].mxu0  ;;  %v3712_v56 = vpop.f32.mrb[65].mxu1  ;;  %v12459_v46 = vadd.f32 %v3484_v13, %v12444_v39  ;;  %v12462_v28 = vadd.f32 %v3710_v57, %v12448_v0 }
 0x4ec   :  { %v3488_v27 = vpop.f32.mrb[66].mxu0  ;;  %v3714_v2 = vpop.f32.mrb[66].mxu1  ;;  %v12465_v12 = vadd.f32 %v3486_v17, %v12452_v31  ;;  %v12468_v30 = vadd.f32 %v3712_v56, %v12456_v52 }
 0x4ed   :  { %v12471_v54 = vadd.f32 %v3488_v27, %v12444_v39  ;;  %v12474_v53 = vadd.f32 %v3714_v2, %v12448_v0  ;;  %v3490_v5 = vpop.f32.mrb[67].mxu0  ;;  %v3716_v37 = vpop.f32.mrb[67].mxu1  ;;  %v4419_v58 = vmul.f32 %v12459_v46, %v12459_v46  ;;  %v4421_v26 = vmul.f32 %v12462_v28, %v12462_v28 }
 0x4ee   :  { %v12477_v15 = vadd.f32 %v3490_v5, %v12452_v31  ;;  %v12480_v55 = vadd.f32 %v3716_v37, %v12456_v52  ;;  %v4420_v25 = vmul.f32 %v12465_v12, %v12465_v12  ;;  %v4422_v16 = vmul.f32 %v12468_v30, %v12468_v30 }
 0x4ef   :  { %v4427_v33 = vmul.f32 %v12471_v54, %v12471_v54  ;;  %v4429_v7 = vmul.f32 %v12474_v53, %v12474_v53  ;;  %v4243_v6 = vadd.f32 %v12471_v54, %v12459_v46  ;;  %v4285_v61 = vadd.f32 %v12474_v53, %v12462_v28 }
 0x4f0   :  { %v4428_v1 = vmul.f32 %v12477_v15, %v12477_v15  ;;  %v4430_v10 = vmul.f32 %v12480_v55, %v12480_v55  ;;  %v4264_v14 = vadd.f32 %v12477_v15, %v12465_v12  ;;  %v4306_v43 = vadd.f32 %v12480_v55, %v12468_v30 }
 0x4f1   :  { %v4547_v41 = vadd.f32 %v4427_v33, %v4419_v58  ;;  %v4589_v44 = vadd.f32 %v4429_v7, %v4421_v26 }
 0x4f2   :  { %v3494_v22 = vpop.f32.mrb[68].mxu0  ;;  %v3720_v9 = vpop.f32.mrb[68].mxu1  ;;  %v4568_v18 = vadd.f32 %v4428_v1, %v4420_v25  ;;  %v4610_v4 = vadd.f32 %v4430_v10, %v4422_v16 }
 0x4f3   :  { %v12507_v40 = vadd.f32 %v3494_v22, %v12444_v39  ;;  %v12510_v32 = vadd.f32 %v3720_v9, %v12448_v0  ;;  %v3496_v59 = vpop.f32.mrb[69].mxu0  ;;  %v3722_v8 = vpop.f32.mrb[69].mxu1 }
 0x4f4   :  { %v12513_v21 = vadd.f32 %v3496_v59, %v12452_v31  ;;  %v12516_v51 = vadd.f32 %v3722_v8, %v12456_v52  ;;  %v3498_v63 = vpop.f32.mrb[70].mxu0  ;;  %v3724_v20 = vpop.f32.mrb[70].mxu1 }
 0x4f5   :  { %16127 = vst [vmem:[#allocation61_spill] sm:$0xff] %v12507_v40  ;;  %16128 = vst [vmem:[#allocation48_spill] sm:$0xff] %v12510_v32  ;;  %v4244_v24 = vadd.f32 %v12507_v40, %v4243_v6  ;;  %v4435_v34 = vmul.f32 %v12507_v40, %v12507_v40  ;;  %v4286_v47 = vadd.f32 %v12510_v32, %v4285_v61  ;;  %v3500_v23 = vpop.f32.mrb[71].mxu0  ;;  %v3726_v3 = vpop.f32.mrb[71].mxu1 }
 0x4f6   :  { %16129 = vst [vmem:[#allocation65_spill] sm:$0xff] %v12513_v21  ;;  %16130 = vst [vmem:[#allocation58_spill] sm:$0xff] %v12516_v51  ;;  %v4437_v36 = vmul.f32 %v12510_v32, %v12510_v32  ;;  %v4265_v29 = vadd.f32 %v12513_v21, %v4264_v14  ;;  %v4436_v45 = vmul.f32 %v12513_v21, %v12513_v21 }
 0x4f7   :  { %v4307_v62 = vadd.f32 %v12516_v51, %v4306_v43  ;;  %v4438_v49 = vmul.f32 %v12516_v51, %v12516_v51  ;;  %v4548_v60 = vadd.f32 %v4547_v41, %v4435_v34  ;;  %v12531_v19 = vadd.f32 %v3498_v63, %v12444_v39 }
 0x4f8   :  { %v4590_v42 = vadd.f32 %v4589_v44, %v4437_v36  ;;  %v12534_v13 = vadd.f32 %v3724_v20, %v12448_v0  ;;  %v4569_v57 = vadd.f32 %v4568_v18, %v4436_v45  ;;  %v12537_v56 = vadd.f32 %v3500_v23, %v12452_v31 }
 0x4f9   :  { %16131 = vst [vmem:[#allocation53_spill] sm:$0xff] %v12531_v19  ;;  %v4611_v17 = vadd.f32 %v4610_v4, %v4438_v49  ;;  %v12540_v27 = vadd.f32 %v3726_v3, %v12456_v52  ;;  %v4245_v2 = vadd.f32 %v12531_v19, %v4244_v24  ;;  %v4443_v5 = vmul.f32 %v12531_v19, %v12531_v19 }
 0x4fa   :  { %16132 = vst [vmem:[#allocation62_spill] sm:$0xff] %v12534_v13  ;;  %16133 = vst [vmem:[#allocation56_spill] sm:$0xff] %v12537_v56  ;;  %v4287_v37 = vadd.f32 %v12534_v13, %v4286_v47  ;;  %v4445_v33 = vmul.f32 %v12534_v13, %v12534_v13  ;;  %v4266_v7 = vadd.f32 %v12537_v56, %v4265_v29  ;;  %v3504_v26 = vpop.f32.mrb[72].mxu0  ;;  %v3730_v25 = vpop.f32.mrb[72].mxu1 }
 0x4fb   :  { %16134 = vst [vmem:[#allocation66_spill] sm:$0xff] %v12540_v27  ;;  %v4444_v1 = vmul.f32 %v12537_v56, %v12537_v56  ;;  %v4308_v10 = vadd.f32 %v12540_v27, %v4307_v62  ;;  %v4446_v58 = vmul.f32 %v12540_v27, %v12540_v27  ;;  %v4549_v16 = vadd.f32 %v4548_v60, %v4443_v5  ;;  %v3506_v43 = vpop.f32.mrb[73].mxu0  ;;  %v3732_v22 = vpop.f32.mrb[73].mxu1 }
 0x4fc   :  { %v4591_v6 = vadd.f32 %v4590_v42, %v4445_v33  ;;  %v12555_v61 = vadd.f32 %v3504_v26, %v12444_v39  ;;  %v12558_v14 = vadd.f32 %v3730_v25, %v12448_v0  ;;  %v12561_v44 = vadd.f32 %v3506_v43, %v12452_v31  ;;  %v3508_v8 = vpop.f32.mrb[74].mxu0  ;;  %v3734_v18 = vpop.f32.mrb[74].mxu1 }
 0x4fd   :  { %v4570_v9 = vadd.f32 %v4569_v57, %v4444_v1  ;;  %v4612_v41 = vadd.f32 %v4611_v17, %v4446_v58  ;;  %v12564_v59 = vadd.f32 %v3732_v22, %v12456_v52  ;;  %v3510_v34 = vpop.f32.mrb[75].mxu0  ;;  %v3736_v47 = vpop.f32.mrb[75].mxu1  ;;  %v12579_v49 = vadd.f32 %v3508_v8, %v12444_v39 }
 0x4fe   :  { %16135 = vst [vmem:[#allocation60_spill] sm:$0xff] %v12555_v61  ;;  %16136 = vst [vmem:[#allocation30_spill] sm:$0xff] %v12558_v14  ;;  %v4246_v4 = vadd.f32 %v12555_v61, %v4245_v2  ;;  %v4451_v63 = vmul.f32 %v12555_v61, %v12555_v61  ;;  %v4288_v20 = vadd.f32 %v12558_v14, %v4287_v37 }
 0x4ff   :  { %16137 = vst [vmem:[#allocation64_spill] sm:$0xff] %v12561_v44  ;;  %16138 = vst [vmem:[#allocation32_spill] sm:$0xff] %v12564_v59  ;;  %v4453_v24 = vmul.f32 %v12558_v14, %v12558_v14  ;;  %v4267_v36 = vadd.f32 %v12561_v44, %v4266_v7  ;;  %v4452_v23 = vmul.f32 %v12561_v44, %v12561_v44 }
 0x500   :  { %v4309_v3 = vadd.f32 %v12564_v59, %v4308_v10  ;;  %v4454_v29 = vmul.f32 %v12564_v59, %v12564_v59  ;;  %v4550_v45 = vadd.f32 %v4549_v16, %v4451_v63  ;;  %16139 = vst [vmem:[#allocation29_spill] sm:$0xff] %v12579_v49  ;;  %v12582_v60 = vadd.f32 %v3734_v18, %v12448_v0 }
 0x501   :  { %v4592_v62 = vadd.f32 %v4591_v6, %v4453_v24  ;;  %v4571_v42 = vadd.f32 %v4570_v9, %v4452_v23  ;;  %v12585_v17 = vadd.f32 %v3510_v34, %v12452_v31  ;;  %v12588_v2 = vadd.f32 %v3736_v47, %v12456_v52 }
 0x502   :  { %16140 = vst [vmem:[#allocation34_spill] sm:$0xff] %v12582_v60  ;;  %v4613_v57 = vadd.f32 %v4612_v41, %v4454_v29  ;;  %v4247_v5 = vadd.f32 %v12579_v49, %v4246_v4  ;;  %v4459_v37 = vmul.f32 %v12579_v49, %v12579_v49  ;;  %v4289_v33 = vadd.f32 %v12582_v60, %v4288_v20  ;;  %v3514_v25 = vpop.f32.mrb[76].mxu0  ;;  %v3740_v16 = vpop.f32.mrb[76].mxu1 }
 0x503   :  { %16141 = vst [vmem:[#allocation31_spill] sm:$0xff] %v12585_v17  ;;  %16142 = vst [vmem:[#allocation36_spill] sm:$0xff] %v12588_v2  ;;  %v4461_v7 = vmul.f32 %v12582_v60, %v12582_v60  ;;  %v4268_v1 = vadd.f32 %v12585_v17, %v4267_v36  ;;  %v4460_v10 = vmul.f32 %v12585_v17, %v12585_v17  ;;  %v3516_v41 = vpop.f32.mrb[77].mxu0  ;;  %v3742_v8 = vpop.f32.mrb[77].mxu1 }
 0x504   :  { %v4310_v58 = vadd.f32 %v12588_v2, %v4309_v3  ;;  %v4462_v26 = vmul.f32 %v12588_v2, %v12588_v2  ;;  %v4551_v6 = vadd.f32 %v4550_v45, %v4459_v37  ;;  %v12603_v22 = vadd.f32 %v3514_v25, %v12444_v39  ;;  %v3518_v24 = vpop.f32.mrb[78].mxu0  ;;  %v3744_v34 = vpop.f32.mrb[78].mxu1 }
 0x505   :  { %v4593_v43 = vadd.f32 %v4592_v62, %v4461_v7  ;;  %v12606_v9 = vadd.f32 %v3740_v16, %v12448_v0  ;;  %v4572_v18 = vadd.f32 %v4571_v42, %v4460_v10  ;;  %v12609_v63 = vadd.f32 %v3516_v41, %v12452_v31  ;;  %v3520_v29 = vpop.f32.mrb[79].mxu0  ;;  %v3746_v45 = vpop.f32.mrb[79].mxu1 }
 0x506   :  { %16143 = vst [vmem:[#allocation33_spill] sm:$0xff] %v12603_v22  ;;  %v4614_v4 = vadd.f32 %v4613_v57, %v4462_v26  ;;  %v12612_v20 = vadd.f32 %v3742_v8, %v12456_v52  ;;  %v4248_v47 = vadd.f32 %v12603_v22, %v4247_v5  ;;  %v4467_v36 = vmul.f32 %v12603_v22, %v12603_v22 }
 0x507   :  { %16144 = vst [vmem:[#allocation46_spill] sm:$0xff] %v12606_v9  ;;  %16145 = vst [vmem:[#allocation43_spill] sm:$0xff] %v12609_v63  ;;  %v4290_v23 = vadd.f32 %v12606_v9, %v4289_v33  ;;  %v4469_v3 = vmul.f32 %v12606_v9, %v12606_v9  ;;  %v4269_v62 = vadd.f32 %v12609_v63, %v4268_v1 }
 0x508   :  { %16146 = vst [vmem:[#allocation47_spill] sm:$0xff] %v12612_v20  ;;  %v4468_v42 = vmul.f32 %v12609_v63, %v12609_v63  ;;  %v4311_v57 = vadd.f32 %v12612_v20, %v4310_v58  ;;  %v4470_v5 = vmul.f32 %v12612_v20, %v12612_v20  ;;  %v4552_v37 = vadd.f32 %v4551_v6, %v4467_v36 }
 0x509   :  { %v4594_v7 = vadd.f32 %v4593_v43, %v4469_v3  ;;  %v12627_v10 = vadd.f32 %v3518_v24, %v12444_v39  ;;  %v12630_v33 = vadd.f32 %v3744_v34, %v12448_v0  ;;  %v12633_v1 = vadd.f32 %v3520_v29, %v12452_v31 }
 0x50a   :  { %v4573_v26 = vadd.f32 %v4572_v18, %v4468_v42  ;;  %v4615_v25 = vadd.f32 %v4614_v4, %v4470_v5  ;;  %v12636_v16 = vadd.f32 %v3746_v45, %v12456_v52  ;;  %v3524_v34 = vpop.f32.mrb[80].mxu0 }
 0x50b   :  { %16147 = vst [vmem:[#allocation52_spill] sm:$0xff] %v12627_v10  ;;  %16148 = vst [vmem:[#allocation49_spill] sm:$0xff] %v12630_v33  ;;  %v4249_v58 = vadd.f32 %v12627_v10, %v4248_v47  ;;  %v4475_v6 = vmul.f32 %v12627_v10, %v12627_v10  ;;  %v4291_v43 = vadd.f32 %v12630_v33, %v4290_v23  ;;  %v3750_v47 = vpop.f32.mrb[80].mxu1  ;;  %v3526_v45 = vpop.f32.mrb[81].mxu0 }
 0x50c   :  { %16149 = vst [vmem:[#allocation55_spill] sm:$0xff] %v12633_v1  ;;  %16150 = vst [vmem:[#allocation51_spill] sm:$0xff] %v12636_v16  ;;  %v4477_v41 = vmul.f32 %v12630_v33, %v12630_v33  ;;  %v4270_v8 = vadd.f32 %v12633_v1, %v4269_v62  ;;  %v4476_v18 = vmul.f32 %v12633_v1, %v12633_v1  ;;  %v3752_v62 = vpop.f32.mrb[81].mxu1 }
 0x50d   :  { %v4312_v4 = vadd.f32 %v12636_v16, %v4311_v57  ;;  %v4478_v24 = vmul.f32 %v12636_v16, %v12636_v16  ;;  %v4553_v36 = vadd.f32 %v4552_v37, %v4475_v6  ;;  %v12651_v29 = vadd.f32 %v3524_v34, %v12444_v39  ;;  %v3528_v16 = vpop.f32.mrb[82].mxu0  ;;  %v3754_v1 = vpop.f32.mrb[82].mxu1 }
 0x50e   :  { %v4595_v3 = vadd.f32 %v4594_v7, %v4477_v41  ;;  %v12654_v23 = vadd.f32 %v3750_v47, %v12448_v0  ;;  %v4574_v42 = vadd.f32 %v4573_v26, %v4476_v18  ;;  %v12657_v33 = vadd.f32 %v3526_v45, %v12452_v31  ;;  %v3530_v26 = vpop.f32.mrb[83].mxu0 }
 0x50f   :  { %16151 = vst [vmem:[#allocation54_spill] sm:$0xff] %v12651_v29  ;;  %v4616_v5 = vadd.f32 %v4615_v25, %v4478_v24  ;;  %v12660_v57 = vadd.f32 %v3752_v62, %v12456_v52  ;;  %v4250_v37 = vadd.f32 %v12651_v29, %v4249_v58  ;;  %v4483_v7 = vmul.f32 %v12651_v29, %v12651_v29  ;;  %v3756_v25 = vpop.f32.mrb[83].mxu1 }
 0x510   :  { %16152 = vst [vmem:[#allocation40_spill] sm:$0xff] %v12654_v23  ;;  %16153 = vst [vmem:[#allocation38_spill] sm:$0xff] %v12657_v33  ;;  %v4292_v6 = vadd.f32 %v12654_v23, %v4291_v43  ;;  %v4485_v41 = vmul.f32 %v12654_v23, %v12654_v23  ;;  %v4271_v18 = vadd.f32 %v12657_v33, %v4270_v8 }
 0x511   :  { %16154 = vst [vmem:[#allocation35_spill] sm:$0xff] %v12660_v57  ;;  %v4484_v24 = vmul.f32 %v12657_v33, %v12657_v33  ;;  %v4313_v34 = vadd.f32 %v12660_v57, %v4312_v4  ;;  %v4486_v58 = vmul.f32 %v12660_v57, %v12660_v57  ;;  %v4554_v47 = vadd.f32 %v4553_v36, %v4483_v7 }
 0x512   :  { %v4596_v45 = vadd.f32 %v4595_v3, %v4485_v41  ;;  %v12675_v62 = vadd.f32 %v3528_v16, %v12444_v39  ;;  %v12678_v43 = vadd.f32 %v3754_v1, %v12448_v0  ;;  %v12681_v8 = vadd.f32 %v3530_v26, %v12452_v31  ;;  %v3534_v41 = vpop.f32.mrb[84].mxu0 }
 0x513   :  { %v4575_v23 = vadd.f32 %v4574_v42, %v4484_v24  ;;  %v4617_v29 = vadd.f32 %v4616_v5, %v4486_v58  ;;  %v12684_v33 = vadd.f32 %v3756_v25, %v12456_v52  ;;  %v12699_v24 = vadd.f32 %v3534_v41, %v12444_v39  ;;  %v3536_v58 = vpop.f32.mrb[85].mxu0 }
 0x514   :  { %16155 = vst [vmem:[#allocation42_spill] sm:$0xff] %v12675_v62  ;;  %16156 = vst [vmem:[#allocation44_spill] sm:$0xff] %v12678_v43  ;;  %v4251_v4 = vadd.f32 %v12675_v62, %v4250_v37  ;;  %v4491_v36 = vmul.f32 %v12675_v62, %v12675_v62  ;;  %v4293_v3 = vadd.f32 %v12678_v43, %v4292_v6  ;;  %v3760_v37 = vpop.f32.mrb[84].mxu1 }
 0x515   :  { %16157 = vst [vmem:[#allocation37_spill] sm:$0xff] %v12681_v8  ;;  %16158 = vst [vmem:[#allocation39_spill] sm:$0xff] %v12684_v33  ;;  %v4493_v16 = vmul.f32 %v12678_v43, %v12678_v43  ;;  %v4272_v1 = vadd.f32 %v12681_v8, %v4271_v18  ;;  %v4492_v42 = vmul.f32 %v12681_v8, %v12681_v8  ;;  %v3762_v18 = vpop.f32.mrb[85].mxu1 }
 0x516   :  { %v4314_v5 = vadd.f32 %v12684_v33, %v4313_v34  ;;  %v4494_v7 = vmul.f32 %v12684_v33, %v12684_v33  ;;  %v4555_v26 = vadd.f32 %v4554_v47, %v4491_v36  ;;  %16159 = vst [vmem:[#allocation50_spill] sm:$0xff] %v12699_v24  ;;  %v12702_v6 = vadd.f32 %v3760_v37, %v12448_v0  ;;  %v3538_v33 = vpop.f32.mrb[86].mxu0  ;;  %v3764_v57 = vpop.f32.mrb[86].mxu1 }
 0x517   :  { %v4597_v25 = vadd.f32 %v4596_v45, %v4493_v16  ;;  %v4576_v43 = vadd.f32 %v4575_v23, %v4492_v42  ;;  %v12705_v8 = vadd.f32 %v3536_v58, %v12452_v31  ;;  %v12708_v34 = vadd.f32 %v3762_v18, %v12456_v52  ;;  %v3540_v23 = vpop.f32.mrb[87].mxu0 }
 0x518   :  { %16160 = vst [vmem:[#allocation41_spill] sm:$0xff] %v12702_v6  ;;  %v4618_v62 = vadd.f32 %v4617_v29, %v4494_v7  ;;  %v4252_v47 = vadd.f32 %v12699_v24, %v4251_v4  ;;  %v4499_v45 = vmul.f32 %v12699_v24, %v12699_v24  ;;  %v4294_v36 = vadd.f32 %v12702_v6, %v4293_v3  ;;  %v3766_v29 = vpop.f32.mrb[87].mxu1 }
 0x519   :  { %16161 = vst [vmem:[#allocation45_spill] sm:$0xff] %v12705_v8  ;;  %16162 = vst [vmem:[#allocation59_spill] sm:$0xff] %v12708_v34  ;;  %v4501_v16 = vmul.f32 %v12702_v6, %v12702_v6  ;;  %v4273_v42 = vadd.f32 %v12705_v8, %v4272_v1  ;;  %v4500_v7 = vmul.f32 %v12705_v8, %v12705_v8 }
 0x51a   :  { %v4315_v41 = vadd.f32 %v12708_v34, %v4314_v5  ;;  %v4502_v4 = vmul.f32 %v12708_v34, %v12708_v34  ;;  %v4556_v37 = vadd.f32 %v4555_v26, %v4499_v45  ;;  %v12723_v18 = vadd.f32 %v3538_v33, %v12444_v39 }
 0x51b   :  { %v4598_v58 = vadd.f32 %v4597_v25, %v4501_v16  ;;  %v12726_v3 = vadd.f32 %v3764_v57, %v12448_v0  ;;  %v4577_v6 = vadd.f32 %v4576_v43, %v4500_v7  ;;  %v12729_v1 = vadd.f32 %v3540_v23, %v12452_v31  ;;  %v3544_v16 = vpop.f32.mrb[88].mxu0 }
 0x51c   :  { %16163 = vst [vmem:[#allocation63_spill] sm:$0xff] %v12723_v18  ;;  %v4619_v24 = vadd.f32 %v4618_v62, %v4502_v4  ;;  %v12732_v8 = vadd.f32 %v3766_v29, %v12456_v52  ;;  %v4253_v5 = vadd.f32 %v12723_v18, %v4252_v47  ;;  %v4507_v26 = vmul.f32 %v12723_v18, %v12723_v18  ;;  %v3770_v47 = vpop.f32.mrb[88].mxu1  ;;  %v3546_v4 = vpop.f32.mrb[89].mxu0 }
 0x51d   :  { %16164 = vst [vmem:[#allocation57_spill] sm:$0xff] %v12726_v3  ;;  %16165 = vst [vmem:[#allocation68_spill] sm:$0xff] %v12729_v1  ;;  %v4295_v25 = vadd.f32 %v12726_v3, %v4294_v36  ;;  %v4509_v33 = vmul.f32 %v12726_v3, %v12726_v3  ;;  %v4274_v57 = vadd.f32 %v12729_v1, %v4273_v42  ;;  %v3772_v42 = vpop.f32.mrb[89].mxu1 }
 0x51e   :  { %16166 = vst [vmem:[#allocation69_spill] sm:$0xff] %v12732_v8  ;;  %v4508_v62 = vmul.f32 %v12729_v1, %v12729_v1  ;;  %v4316_v43 = vadd.f32 %v12732_v8, %v4315_v41  ;;  %v4510_v45 = vmul.f32 %v12732_v8, %v12732_v8  ;;  %v4557_v23 = vadd.f32 %v4556_v37, %v4507_v26  ;;  %v3548_v8 = vpop.f32.mrb[90].mxu0  ;;  %v3774_v34 = vpop.f32.mrb[90].mxu1 }
 0x51f   :  { %v4599_v29 = vadd.f32 %v4598_v58, %v4509_v33  ;;  %v12747_v7 = vadd.f32 %v3544_v16, %v12444_v39  ;;  %v12750_v36 = vadd.f32 %v3770_v47, %v12448_v0  ;;  %v12753_v1 = vadd.f32 %v3546_v4, %v12452_v31 }
 0x520   :  { %v4578_v3 = vadd.f32 %v4577_v6, %v4508_v62  ;;  %v4620_v18 = vadd.f32 %v4619_v24, %v4510_v45  ;;  %v12756_v41 = vadd.f32 %v3772_v42, %v12456_v52  ;;  %v3550_v6 = vpop.f32.mrb[91].mxu0  ;;  %v3776_v24 = vpop.f32.mrb[91].mxu1  ;;  %v12771_v42 = vadd.f32 %v3548_v8, %v12444_v39 }
 0x521   :  { %16167 = vst [vmem:[#allocation70_spill] sm:$0xff] %v12747_v7  ;;  %16168 = vst [vmem:[#allocation71_spill] sm:$0xff] %v12750_v36  ;;  %v4254_v37 = vadd.f32 %v12747_v7, %v4253_v5  ;;  %v4515_v58 = vmul.f32 %v12747_v7, %v12747_v7  ;;  %v4296_v26 = vadd.f32 %v12750_v36, %v4295_v25 }
 0x522   :  { %16169 = vst [vmem:[#allocation72_spill] sm:$0xff] %v12753_v1  ;;  %16170 = vst [vmem:[#allocation73_spill] sm:$0xff] %v12756_v41  ;;  %v4517_v33 = vmul.f32 %v12750_v36, %v12750_v36  ;;  %v4275_v62 = vadd.f32 %v12753_v1, %v4274_v57  ;;  %v4516_v45 = vmul.f32 %v12753_v1, %v12753_v1 }
 0x523   :  { %v4317_v16 = vadd.f32 %v12756_v41, %v4316_v43  ;;  %v4518_v5 = vmul.f32 %v12756_v41, %v12756_v41  ;;  %v4558_v47 = vadd.f32 %v4557_v23, %v4515_v58  ;;  %16171 = vst [vmem:[#allocation74_spill] sm:$0xff] %v12771_v42  ;;  %v12774_v25 = vadd.f32 %v3774_v34, %v12448_v0 }
 0x524   :  { %v4600_v4 = vadd.f32 %v4599_v29, %v4517_v33  ;;  %v4579_v36 = vadd.f32 %v4578_v3, %v4516_v45  ;;  %v12777_v57 = vadd.f32 %v3550_v6, %v12452_v31  ;;  %v12780_v1 = vadd.f32 %v3776_v24, %v12456_v52  ;;  %v3554_v33 = vpop.f32.mrb[92].mxu0 }
 0x525   :  { %16172 = vst [vmem:[#allocation75_spill] sm:$0xff] %v12774_v25  ;;  %v4621_v7 = vadd.f32 %v4620_v18, %v4518_v5  ;;  %v4255_v43 = vadd.f32 %v12771_v42, %v4254_v37  ;;  %v4523_v23 = vmul.f32 %v12771_v42, %v12771_v42  ;;  %v4297_v29 = vadd.f32 %v12774_v25, %v4296_v26  ;;  %v3780_v37 = vpop.f32.mrb[92].mxu1  ;;  %v3556_v5 = vpop.f32.mrb[93].mxu0 }
 0x526   :  { %16173 = vst [vmem:[#allocation76_spill] sm:$0xff] %v12777_v57  ;;  %16174 = vst [vmem:[#allocation77_spill] sm:$0xff] %v12780_v1  ;;  %v4525_v8 = vmul.f32 %v12774_v25, %v12774_v25  ;;  %v4276_v34 = vadd.f32 %v12777_v57, %v4275_v62  ;;  %v4524_v18 = vmul.f32 %v12777_v57, %v12777_v57  ;;  %v3782_v62 = vpop.f32.mrb[93].mxu1 }
 0x527   :  { %v4318_v3 = vadd.f32 %v12780_v1, %v4317_v16  ;;  %v4526_v58 = vmul.f32 %v12780_v1, %v12780_v1  ;;  %v4559_v6 = vadd.f32 %v4558_v47, %v4523_v23  ;;  %v12795_v45 = vadd.f32 %v3554_v33, %v12444_v39  ;;  %v3558_v1 = vpop.f32.mrb[94].mxu0  ;;  %v3784_v41 = vpop.f32.mrb[94].mxu1 }
 0x528   :  { %v4601_v24 = vadd.f32 %v4600_v4, %v4525_v8  ;;  %v12798_v26 = vadd.f32 %v3780_v37, %v12448_v0  ;;  %v4580_v25 = vadd.f32 %v4579_v36, %v4524_v18  ;;  %v12801_v57 = vadd.f32 %v3556_v5, %v12452_v31  ;;  %v3560_v36 = vpop.f32.mrb[95].mxu0 }
 0x529   :  { %16175 = vst [vmem:[#allocation78_spill] sm:$0xff] %v12795_v45  ;;  %v4622_v42 = vadd.f32 %v4621_v7, %v4526_v58  ;;  %v12804_v16 = vadd.f32 %v3782_v62, %v12456_v52  ;;  %v4256_v47 = vadd.f32 %v12795_v45, %v4255_v43  ;;  %v4531_v4 = vmul.f32 %v12795_v45, %v12795_v45  ;;  %v3786_v7 = vpop.f32.mrb[95].mxu1 }
 0x52a   :  { %16176 = vst [vmem:[#allocation79_spill] sm:$0xff] %v12798_v26  ;;  %16177 = vst [vmem:[#allocation80_spill] sm:$0xff] %v12801_v57  ;;  %v4298_v23 = vadd.f32 %v12798_v26, %v4297_v29  ;;  %v4533_v8 = vmul.f32 %v12798_v26, %v12798_v26  ;;  %v4277_v18 = vadd.f32 %v12801_v57, %v4276_v34 }
 0x52b   :  { %16178 = vst [vmem:[#allocation81_spill] sm:$0xff] %v12804_v16  ;;  %v4532_v58 = vmul.f32 %v12801_v57, %v12801_v57  ;;  %v4319_v33 = vadd.f32 %v12804_v16, %v4318_v3  ;;  %v4534_v43 = vmul.f32 %v12804_v16, %v12804_v16  ;;  %v4560_v37 = vadd.f32 %v4559_v6, %v4531_v4 }
 0x52c   :  { %v4602_v5 = vadd.f32 %v4601_v24, %v4533_v8  ;;  %v12819_v62 = vadd.f32 %v3558_v1, %v12444_v39  ;;  %v12822_v29 = vadd.f32 %v3784_v41, %v12448_v0  ;;  %v12825_v34 = vadd.f32 %v3560_v36, %v12452_v31 }
 0x52d   :  { %v4581_v26 = vadd.f32 %v4580_v25, %v4532_v58  ;;  %v4623_v45 = vadd.f32 %v4622_v42, %v4534_v43  ;;  %v12828_v57 = vadd.f32 %v3786_v7, %v12456_v52 }
 0x52e   :  { %16179 = vst [vmem:[#allocation82_spill] sm:$0xff] %v12819_v62  ;;  %16180 = vst [vmem:[#allocation83_spill] sm:$0xff] %v12822_v29  ;;  %v4257_v3 = vadd.f32 %v12819_v62, %v4256_v47  ;;  %v4539_v6 = vmul.f32 %v12819_v62, %v12819_v62  ;;  %v4299_v24 = vadd.f32 %v12822_v29, %v4298_v23 }
 0x52f   :  { %16181 = vst [vmem:[#allocation84_spill] sm:$0xff] %v12825_v34  ;;  %16182 = vst [vmem:[#allocation85_spill] sm:$0xff] %v12828_v57  ;;  %v4541_v39 = vmul.f32 %v12822_v29, %v12822_v29  ;;  %v4278_v0 = vadd.f32 %v12825_v34, %v4277_v18  ;;  %v4540_v1 = vmul.f32 %v12825_v34, %v12825_v34 }
 0x530   :  { %v4320_v31 = vadd.f32 %v12828_v57, %v4319_v33  ;;  %v4542_v52 = vmul.f32 %v12828_v57, %v12828_v57  ;;  %v4258_v41 = vrot.slane %v4257_v3, 4  ;;  %v4561_v42 = vadd.f32 %v4560_v37, %v4539_v6 }
 0x531   :  { %v4300_v25 = vrot.slane %v4299_v24, 4  ;;  %v4603_v47 = vadd.f32 %v4602_v5, %v4541_v39  ;;  %v4279_v4 = vrot.slane %v4278_v0, 4  ;;  %v4582_v8 = vadd.f32 %v4581_v26, %v4540_v1 }
 0x532   :  { %v4321_v23 = vrot.slane %v4320_v31, 4  ;;  %v4624_v36 = vadd.f32 %v4623_v45, %v4542_v52  ;;  %v4259_v7 = vadd.f32 %v4258_v41, %v4257_v3  ;;  %v4562_v58 = vrot.slane %v4561_v42, 4 }
 0x533   :  { %v4301_v43 = vadd.f32 %v4300_v25, %v4299_v24  ;;  %v4604_v18 = vrot.slane %v4603_v47, 4  ;;  %v4280_v29 = vadd.f32 %v4279_v4, %v4278_v0  ;;  %v4583_v62 = vrot.slane %v4582_v8, 4 }
 0x534   :  { %v4322_v34 = vadd.f32 %v4321_v23, %v4320_v31  ;;  %v4625_v16 = vrot.slane %v4624_v36, 4  ;;  %v4260_v33 = vrot.slane %v4259_v7, 2  ;;  %v4563_v10 = vadd.f32 %v4562_v58, %v4561_v42 }
 0x535   :  { %v4302_v20 = vrot.slane %v4301_v43, 2  ;;  %v4605_v57 = vadd.f32 %v4604_v18, %v4603_v47  ;;  %v4281_v9 = vrot.slane %v4280_v29, 2  ;;  %v4584_v37 = vadd.f32 %v4583_v62, %v4582_v8 }
 0x536   :  { %v4323_v6 = vrot.slane %v4322_v34, 2  ;;  %v4626_v5 = vadd.f32 %v4625_v16, %v4624_v36  ;;  %v4261_v39 = vadd.f32 %v4260_v33, %v4259_v7  ;;  %v4564_v26 = vrot.slane %v4563_v10, 2 }
 0x537   :  { %v4303_v1 = vadd.f32 %v4302_v20, %v4301_v43  ;;  %v4606_v45 = vrot.slane %v4605_v57, 2  ;;  %v4282_v3 = vadd.f32 %v4281_v9, %v4280_v29  ;;  %v4585_v52 = vrot.slane %v4584_v37, 2 }
 0x538   :  { %v4324_v24 = vadd.f32 %v4323_v6, %v4322_v34  ;;  %v4627_v41 = vrot.slane %v4626_v5, 2  ;;  %v4262_v0 = vrot.slane %v4261_v39, 1  ;;  %v4565_v25 = vadd.f32 %v4564_v26, %v4563_v10 }
 0x539   :  { %v4304_v31 = vrot.slane %v4303_v1, 1  ;;  %v4607_v4 = vadd.f32 %v4606_v45, %v4605_v57  ;;  %v4283_v23 = vrot.slane %v4282_v3, 1  ;;  %v4586_v42 = vadd.f32 %v4585_v52, %v4584_v37 }
 0x53a   :  { %v4325_v58 = vrot.slane %v4324_v24, 1  ;;  %v4628_v47 = vadd.f32 %v4627_v41, %v4626_v5  ;;  %v4263_v18 = vadd.f32 %v4262_v0, %v4261_v39  ;;  %v4566_v62 = vrot.slane %v4565_v25, 1 }
 0x53b   :  { %v4305_v8 = vadd.f32 %v4304_v31, %v4303_v1  ;;  %v4608_v16 = vrot.slane %v4607_v4, 1  ;;  %v4284_v36 = vadd.f32 %v4283_v23, %v4282_v3  ;;  %v4587_v7 = vrot.slane %v4586_v42, 1 }
 0x53c   :  { %v4326_v20 = vadd.f32 %v4325_v58, %v4324_v24  ;;  %v4629_v43 = vrot.slane %v4628_v47, 1  ;;  %v12842_v9 = vmul.f32 0.0078125, %v4263_v18  ;;  %v4567_v29 = vadd.f32 %v4566_v62, %v4565_v25 }
 0x53d   :  { %v12844_v34 = vmul.f32 0.0078125, %v4305_v8  ;;  %v4609_v10 = vadd.f32 %v4608_v16, %v4607_v4  ;;  %v12846_v33 = vmul.f32 0.0078125, %v4284_v36  ;;  %v4588_v57 = vadd.f32 %v4587_v7, %v4586_v42 }
 0x53e   :  { %v12848_v37 = vmul.f32 0.0078125, %v4326_v20  ;;  %v4630_v6 = vadd.f32 %v4629_v43, %v4628_v47  ;;  %v4715_v5 = vmul.f32 0.0078125, %v4567_v29  ;;  %v4723_v39 = vmul.f32 %v12842_v9, %v12842_v9 }
 0x53f   :  { %v4717_v26 = vmul.f32 0.0078125, %v4609_v10  ;;  %v4725_v1 = vmul.f32 %v12844_v34, %v12844_v34  ;;  %v4716_v45 = vmul.f32 0.0078125, %v4588_v57  ;;  %v4724_v3 = vmul.f32 %v12846_v33, %v12846_v33  ;;  %v16183_v10 = vld [vmem:[#allocation67_spill] sm:$0xff] }
 0x540   :  { %v4718_v52 = vmul.f32 0.0078125, %v4630_v6  ;;  %v4726_v24 = vmul.f32 %v12848_v37, %v12848_v37  ;;  %v4731_v41 = vsub.f32 %v4715_v5, %v4723_v39  ;;  %v16184_v39 = vld [vmem:[#allocation24_spill] sm:$0xff] }
 0x541   :  { %v4733_v0 = vsub.f32 %v4717_v26, %v4725_v1  ;;  %v4732_v25 = vsub.f32 %v4716_v45, %v4724_v3  ;;  %v12867_v26 = vsub.s32 4, %v16184_v39  ;;  %v12870_v1 = vsub.s32 6, %v16184_v39 }
 0x542   :  { %v4734_v31 = vsub.f32 %v4718_v52, %v4726_v24  ;;  %v4739_v4 = vmax.f32 %v4731_v41, 0.0  ;;  %v12873_v45 = vsub.s32 5, %v16184_v39  ;;  %v12876_v3 = vsub.s32 7, %v16184_v39 }
 0x543   :  { %v4741_v23 = vmax.f32 %v4733_v0, 0.0  ;;  %v4740_v42 = vmax.f32 %v4732_v25, 0.0  ;;  %16185 = vst [vmem:[#allocation67_spill] sm:$0xff] %v12867_v26  ;;  %16186 = vst [vmem:[#allocation24_spill] sm:$0xff] %v12870_v1  ;;  %v12880_v52 = vrot.slane %v12440_v35, %v12867_v26  ;;  %v12884_v24 = vrot.slane %v12440_v35, %v12870_v1 }
 0x544   :  { %v4742_v58 = vmax.f32 %v4734_v31, 0.0  ;;  %v4747_v47 = vadd.f32 1e-05, %v4739_v4  ;;  %16187 = vst [vmem:[#allocation86_spill] sm:$0xff] %v12873_v45  ;;  %v12888_v41 = vrot.slane %v12440_v35, %v12873_v45  ;;  %v12892_v0 = vrot.slane %v12440_v35, %v12876_v3 }
 0x545   :  { %v4749_v18 = vadd.f32 1e-05, %v4741_v23  ;;  %v4748_v62 = vadd.f32 1e-05, %v4740_v42 }
 0x546   :  { %v4750_v8 = vadd.f32 1e-05, %v4742_v58  ;;  %9812 = vrsqrt.f32 %v4747_v47 }
 0x547   :  { %9814 = vrsqrt.f32 %v4749_v18 }
 0x548   :  { %9816 = vrsqrt.f32 %v4748_v62 }
 0x549   :  { %9818 = vrsqrt.f32 %v4750_v8 }
 0x550   :  { %v9813_v16 = vpop.eup %9812 }
 0x551   :  { %v9815_v36 = vpop.eup %9814 }
 0x552   :  { %v9817_v7 = vpop.eup %9816 }
 0x553   :  { %v9819_v20 = vpop.eup %9818  ;;  %v4771_v43 = vcombine.low %v9813_v16, %v9817_v7 }
 0x554   :  { %v4772_v29 = vcombine.low %v9815_v36, %v9819_v20 }
 0x555   :  { %v12859_v57 = vrot.slane %v4771_v43, %v16183_v10 }
 0x556   :  { %v12862_v6 = vrot.slane %v4772_v29, %v16183_v10 }
 0x56a   :  { %v3936_v25 = vpop.f32.mrb[96].mxu0  ;;  %v4162_v31 = vpop.f32.mrb[96].mxu1 }
 0x56b   :  { %v3938_v4 = vpop.f32.mrb[97].mxu0  ;;  %v4164_v23 = vpop.f32.mrb[97].mxu1  ;;  %v12895_v42 = vadd.f32 %v3936_v25, %v12880_v52  ;;  %v12898_v58 = vadd.f32 %v4162_v31, %v12884_v24 }
 0x56c   :  { %v3940_v47 = vpop.f32.mrb[98].mxu0  ;;  %v4166_v18 = vpop.f32.mrb[98].mxu1  ;;  %v12901_v62 = vadd.f32 %v3938_v4, %v12888_v41  ;;  %v12904_v8 = vadd.f32 %v4164_v23, %v12892_v0 }
 0x56d   :  { %v12907_v35 = vadd.f32 %v3940_v47, %v12880_v52  ;;  %v12910_v16 = vadd.f32 %v4166_v18, %v12884_v24  ;;  %v3942_v36 = vpop.f32.mrb[99].mxu0  ;;  %v4168_v7 = vpop.f32.mrb[99].mxu1  ;;  %v4423_v4 = vmul.f32 %v12895_v42, %v12895_v42  ;;  %v4425_v23 = vmul.f32 %v12898_v58, %v12898_v58 }
 0x56e   :  { %v12913_v20 = vadd.f32 %v3942_v36, %v12888_v41  ;;  %v12916_v43 = vadd.f32 %v4168_v7, %v12892_v0  ;;  %v4424_v47 = vmul.f32 %v12901_v62, %v12901_v62  ;;  %v4426_v18 = vmul.f32 %v12904_v8, %v12904_v8 }
 0x56f   :  { %v4431_v29 = vmul.f32 %v12907_v35, %v12907_v35  ;;  %v4433_v39 = vmul.f32 %v12910_v16, %v12910_v16  ;;  %v4327_v36 = vadd.f32 %v12907_v35, %v12895_v42  ;;  %v4369_v7 = vadd.f32 %v12910_v16, %v12898_v58 }
 0x570   :  { %v4432_v25 = vmul.f32 %v12913_v20, %v12913_v20  ;;  %v4434_v31 = vmul.f32 %v12916_v43, %v12916_v43  ;;  %v4348_v5 = vadd.f32 %v12913_v20, %v12901_v62  ;;  %v4390_v63 = vadd.f32 %v12916_v43, %v12904_v8 }
 0x571   :  { %v4631_v60 = vadd.f32 %v4431_v29, %v4423_v4  ;;  %v4673_v17 = vadd.f32 %v4433_v39, %v4425_v23 }
 0x572   :  { %v3946_v22 = vpop.f32.mrb[100].mxu0  ;;  %v4172_v2 = vpop.f32.mrb[100].mxu1  ;;  %v4652_v61 = vadd.f32 %v4432_v25, %v4424_v47  ;;  %v4694_v27 = vadd.f32 %v4434_v31, %v4426_v18 }
 0x573   :  { %v12943_v49 = vadd.f32 %v3946_v22, %v12880_v52  ;;  %v12946_v59 = vadd.f32 %v4172_v2, %v12884_v24  ;;  %v3948_v14 = vpop.f32.mrb[101].mxu0  ;;  %v4174_v44 = vpop.f32.mrb[101].mxu1 }
 0x574   :  { %v12949_v13 = vadd.f32 %v3948_v14, %v12888_v41  ;;  %v12952_v56 = vadd.f32 %v4174_v44, %v12892_v0  ;;  %v3950_v19 = vpop.f32.mrb[102].mxu0  ;;  %v4176_v51 = vpop.f32.mrb[102].mxu1 }
 0x575   :  { %16188 = vst [vmem:[#allocation87_spill] sm:$0xff] %v12943_v49  ;;  %16189 = vst [vmem:[#allocation88_spill] sm:$0xff] %v12946_v59  ;;  %v4328_v29 = vadd.f32 %v12943_v49, %v4327_v36  ;;  %v4439_v22 = vmul.f32 %v12943_v49, %v12943_v49  ;;  %v4370_v2 = vadd.f32 %v12946_v59, %v4369_v7  ;;  %v3952_v25 = vpop.f32.mrb[103].mxu0  ;;  %v4178_v31 = vpop.f32.mrb[103].mxu1 }
 0x576   :  { %16190 = vst [vmem:[#allocation89_spill] sm:$0xff] %v12949_v13  ;;  %16191 = vst [vmem:[#allocation90_spill] sm:$0xff] %v12952_v56  ;;  %v4441_v39 = vmul.f32 %v12946_v59, %v12946_v59  ;;  %v4349_v14 = vadd.f32 %v12949_v13, %v4348_v5  ;;  %v4440_v44 = vmul.f32 %v12949_v13, %v12949_v13 }
 0x577   :  { %v4391_v4 = vadd.f32 %v12952_v56, %v4390_v63  ;;  %v4442_v23 = vmul.f32 %v12952_v56, %v12952_v56  ;;  %v4632_v47 = vadd.f32 %v4631_v60, %v4439_v22  ;;  %v12967_v36 = vadd.f32 %v3950_v19, %v12880_v52 }
 0x578   :  { %v4674_v18 = vadd.f32 %v4673_v17, %v4441_v39  ;;  %v12970_v7 = vadd.f32 %v4176_v51, %v12884_v24  ;;  %v4653_v59 = vadd.f32 %v4652_v61, %v4440_v44  ;;  %v12973_v5 = vadd.f32 %v3952_v25, %v12888_v41 }
 0x579   :  { %16192 = vst [vmem:[#allocation91_spill] sm:$0xff] %v12967_v36  ;;  %v4695_v49 = vadd.f32 %v4694_v27, %v4442_v23  ;;  %v12976_v13 = vadd.f32 %v4178_v31, %v12892_v0  ;;  %v4329_v63 = vadd.f32 %v12967_v36, %v4328_v29  ;;  %v4447_v60 = vmul.f32 %v12967_v36, %v12967_v36 }
 0x57a   :  { %16193 = vst [vmem:[#allocation92_spill] sm:$0xff] %v12970_v7  ;;  %16194 = vst [vmem:[#allocation93_spill] sm:$0xff] %v12973_v5  ;;  %v4371_v17 = vadd.f32 %v12970_v7, %v4370_v2  ;;  %v4449_v19 = vmul.f32 %v12970_v7, %v12970_v7  ;;  %v4350_v51 = vadd.f32 %v12973_v5, %v4349_v14  ;;  %v3956_v39 = vpop.f32.mrb[104].mxu0  ;;  %v4182_v29 = vpop.f32.mrb[104].mxu1 }
 0x57b   :  { %16195 = vst [vmem:[#allocation94_spill] sm:$0xff] %v12976_v13  ;;  %v4448_v27 = vmul.f32 %v12973_v5, %v12973_v5  ;;  %v4392_v61 = vadd.f32 %v12976_v13, %v4391_v4  ;;  %v4450_v22 = vmul.f32 %v12976_v13, %v12976_v13  ;;  %v4633_v25 = vadd.f32 %v4632_v47, %v4447_v60  ;;  %v3958_v23 = vpop.f32.mrb[105].mxu0  ;;  %v4184_v14 = vpop.f32.mrb[105].mxu1 }
 0x57c   :  { %v4675_v31 = vadd.f32 %v4674_v18, %v4449_v19  ;;  %v12991_v44 = vadd.f32 %v3956_v39, %v12880_v52  ;;  %v12994_v2 = vadd.f32 %v4182_v29, %v12884_v24  ;;  %v12997_v5 = vadd.f32 %v3958_v23, %v12888_v41  ;;  %v3960_v13 = vpop.f32.mrb[106].mxu0  ;;  %v4186_v56 = vpop.f32.mrb[106].mxu1 }
 0x57d   :  { %v4654_v7 = vadd.f32 %v4653_v59, %v4448_v27  ;;  %v4696_v36 = vadd.f32 %v4695_v49, %v4450_v22  ;;  %v13000_v4 = vadd.f32 %v4184_v14, %v12892_v0  ;;  %v3962_v59 = vpop.f32.mrb[107].mxu0  ;;  %v4188_v49 = vpop.f32.mrb[107].mxu1  ;;  %v13015_v14 = vadd.f32 %v3960_v13, %v12880_v52 }
 0x57e   :  { %16196 = vst [vmem:[#allocation95_spill] sm:$0xff] %v12991_v44  ;;  %16197 = vst [vmem:[#allocation96_spill] sm:$0xff] %v12994_v2  ;;  %v4330_v47 = vadd.f32 %v12991_v44, %v4329_v63  ;;  %v4455_v18 = vmul.f32 %v12991_v44, %v12991_v44  ;;  %v4372_v60 = vadd.f32 %v12994_v2, %v4371_v17 }
 0x57f   :  { %16198 = vst [vmem:[#allocation97_spill] sm:$0xff] %v12997_v5  ;;  %16199 = vst [vmem:[#allocation98_spill] sm:$0xff] %v13000_v4  ;;  %v4457_v19 = vmul.f32 %v12994_v2, %v12994_v2  ;;  %v4351_v27 = vadd.f32 %v12997_v5, %v4350_v51  ;;  %v4456_v22 = vmul.f32 %v12997_v5, %v12997_v5 }
 0x580   :  { %v4393_v39 = vadd.f32 %v13000_v4, %v4392_v61  ;;  %v4458_v63 = vmul.f32 %v13000_v4, %v13000_v4  ;;  %v4634_v29 = vadd.f32 %v4633_v25, %v4455_v18  ;;  %16200 = vst [vmem:[#allocation99_spill] sm:$0xff] %v13015_v14  ;;  %v13018_v17 = vadd.f32 %v4186_v56, %v12884_v24 }
 0x581   :  { %v4676_v23 = vadd.f32 %v4675_v31, %v4457_v19  ;;  %v4655_v2 = vadd.f32 %v4654_v7, %v4456_v22  ;;  %v13021_v51 = vadd.f32 %v3962_v59, %v12888_v41  ;;  %v13024_v5 = vadd.f32 %v4188_v49, %v12892_v0 }
 0x582   :  { %16201 = vst [vmem:[#allocation100_spill] sm:$0xff] %v13018_v17  ;;  %v4697_v44 = vadd.f32 %v4696_v36, %v4458_v63  ;;  %v4331_v61 = vadd.f32 %v13015_v14, %v4330_v47  ;;  %v4463_v25 = vmul.f32 %v13015_v14, %v13015_v14  ;;  %v4373_v31 = vadd.f32 %v13018_v17, %v4372_v60  ;;  %v3966_v19 = vpop.f32.mrb[108].mxu0  ;;  %v4192_v47 = vpop.f32.mrb[108].mxu1 }
 0x583   :  { %16202 = vst [vmem:[#allocation101_spill] sm:$0xff] %v13021_v51  ;;  %16203 = vst [vmem:[#allocation102_spill] sm:$0xff] %v13024_v5  ;;  %v4465_v13 = vmul.f32 %v13018_v17, %v13018_v17  ;;  %v4352_v56 = vadd.f32 %v13021_v51, %v4351_v27  ;;  %v4464_v36 = vmul.f32 %v13021_v51, %v13021_v51  ;;  %v3968_v63 = vpop.f32.mrb[109].mxu0  ;;  %v4194_v27 = vpop.f32.mrb[109].mxu1 }
 0x584   :  { %v4394_v7 = vadd.f32 %v13024_v5, %v4393_v39  ;;  %v4466_v18 = vmul.f32 %v13024_v5, %v13024_v5  ;;  %v4635_v59 = vadd.f32 %v4634_v29, %v4463_v25  ;;  %v13039_v22 = vadd.f32 %v3966_v19, %v12880_v52  ;;  %v3970_v5 = vpop.f32.mrb[110].mxu0  ;;  %v4196_v4 = vpop.f32.mrb[110].mxu1 }
 0x585   :  { %v4677_v49 = vadd.f32 %v4676_v23, %v4465_v13  ;;  %v13042_v60 = vadd.f32 %v4192_v47, %v12884_v24  ;;  %v4656_v17 = vadd.f32 %v4655_v2, %v4464_v36  ;;  %v13045_v51 = vadd.f32 %v3968_v63, %v12888_v41  ;;  %v3972_v2 = vpop.f32.mrb[111].mxu0 }
 0x586   :  { %16204 = vst [vmem:[#allocation103_spill] sm:$0xff] %v13039_v22  ;;  %v4698_v14 = vadd.f32 %v4697_v44, %v4466_v18  ;;  %v13048_v39 = vadd.f32 %v4194_v27, %v12892_v0  ;;  %v4332_v29 = vadd.f32 %v13039_v22, %v4331_v61  ;;  %v4471_v23 = vmul.f32 %v13039_v22, %v13039_v22  ;;  %v4198_v44 = vpop.f32.mrb[111].mxu1 }
 0x587   :  { %16205 = vst [vmem:[#allocation104_spill] sm:$0xff] %v13042_v60  ;;  %16206 = vst [vmem:[#allocation105_spill] sm:$0xff] %v13045_v51  ;;  %v4374_v25 = vadd.f32 %v13042_v60, %v4373_v31  ;;  %v4473_v13 = vmul.f32 %v13042_v60, %v13042_v60  ;;  %v4353_v36 = vadd.f32 %v13045_v51, %v4352_v56 }
 0x588   :  { %16207 = vst [vmem:[#allocation106_spill] sm:$0xff] %v13048_v39  ;;  %v4472_v18 = vmul.f32 %v13045_v51, %v13045_v51  ;;  %v4395_v19 = vadd.f32 %v13048_v39, %v4394_v7  ;;  %v4474_v61 = vmul.f32 %v13048_v39, %v13048_v39  ;;  %v4636_v47 = vadd.f32 %v4635_v59, %v4471_v23 }
 0x589   :  { %v4678_v63 = vadd.f32 %v4677_v49, %v4473_v13  ;;  %v13063_v27 = vadd.f32 %v3970_v5, %v12880_v52  ;;  %v13066_v31 = vadd.f32 %v4196_v4, %v12884_v24  ;;  %v13069_v56 = vadd.f32 %v3972_v2, %v12888_v41 }
 0x58a   :  { %v4657_v60 = vadd.f32 %v4656_v17, %v4472_v18  ;;  %v4699_v22 = vadd.f32 %v4698_v14, %v4474_v61  ;;  %v13072_v51 = vadd.f32 %v4198_v44, %v12892_v0  ;;  %v3976_v13 = vpop.f32.mrb[112].mxu0 }
 0x58b   :  { %16208 = vst [vmem:[#allocation107_spill] sm:$0xff] %v13063_v27  ;;  %16209 = vst [vmem:[#allocation108_spill] sm:$0xff] %v13066_v31  ;;  %v4333_v7 = vadd.f32 %v13063_v27, %v4332_v29  ;;  %v4479_v59 = vmul.f32 %v13063_v27, %v13063_v27  ;;  %v4375_v49 = vadd.f32 %v13066_v31, %v4374_v25  ;;  %v4202_v29 = vpop.f32.mrb[112].mxu1  ;;  %v3978_v61 = vpop.f32.mrb[113].mxu0 }
 0x58c   :  { %16210 = vst [vmem:[#allocation109_spill] sm:$0xff] %v13069_v56  ;;  %16211 = vst [vmem:[#allocation110_spill] sm:$0xff] %v13072_v51  ;;  %v4481_v5 = vmul.f32 %v13066_v31, %v13066_v31  ;;  %v4354_v4 = vadd.f32 %v13069_v56, %v4353_v36  ;;  %v4480_v14 = vmul.f32 %v13069_v56, %v13069_v56  ;;  %v4204_v36 = vpop.f32.mrb[113].mxu1 }
 0x58d   :  { %v4396_v17 = vadd.f32 %v13072_v51, %v4395_v19  ;;  %v4482_v23 = vmul.f32 %v13072_v51, %v13072_v51  ;;  %v4637_v2 = vadd.f32 %v4636_v47, %v4479_v59  ;;  %v13087_v18 = vadd.f32 %v3976_v13, %v12880_v52  ;;  %v3980_v51 = vpop.f32.mrb[114].mxu0  ;;  %v4206_v39 = vpop.f32.mrb[114].mxu1 }
 0x58e   :  { %v4679_v44 = vadd.f32 %v4678_v63, %v4481_v5  ;;  %v13090_v25 = vadd.f32 %v4202_v29, %v12884_v24  ;;  %v4658_v31 = vadd.f32 %v4657_v60, %v4480_v14  ;;  %v13093_v56 = vadd.f32 %v3978_v61, %v12888_v41  ;;  %v3982_v60 = vpop.f32.mrb[115].mxu0 }
 0x58f   :  { %16212 = vst [vmem:[#allocation111_spill] sm:$0xff] %v13087_v18  ;;  %v4700_v27 = vadd.f32 %v4699_v22, %v4482_v23  ;;  %v13096_v19 = vadd.f32 %v4204_v36, %v12892_v0  ;;  %v4334_v47 = vadd.f32 %v13087_v18, %v4333_v7  ;;  %v4487_v63 = vmul.f32 %v13087_v18, %v13087_v18  ;;  %v4208_v22 = vpop.f32.mrb[115].mxu1 }
 0x590   :  { %16213 = vst [vmem:[#allocation112_spill] sm:$0xff] %v13090_v25  ;;  %16214 = vst [vmem:[#allocation113_spill] sm:$0xff] %v13093_v56  ;;  %v4376_v59 = vadd.f32 %v13090_v25, %v4375_v49  ;;  %v4489_v5 = vmul.f32 %v13090_v25, %v13090_v25  ;;  %v4355_v14 = vadd.f32 %v13093_v56, %v4354_v4 }
 0x591   :  { %16215 = vst [vmem:[#allocation114_spill] sm:$0xff] %v13096_v19  ;;  %v4488_v23 = vmul.f32 %v13093_v56, %v13093_v56  ;;  %v4397_v13 = vadd.f32 %v13096_v19, %v4396_v17  ;;  %v4490_v7 = vmul.f32 %v13096_v19, %v13096_v19  ;;  %v4638_v29 = vadd.f32 %v4637_v2, %v4487_v63 }
 0x592   :  { %v4680_v61 = vadd.f32 %v4679_v44, %v4489_v5  ;;  %v13111_v36 = vadd.f32 %v3980_v51, %v12880_v52  ;;  %v13114_v49 = vadd.f32 %v4206_v39, %v12884_v24  ;;  %v13117_v4 = vadd.f32 %v3982_v60, %v12888_v41  ;;  %v3986_v5 = vpop.f32.mrb[116].mxu0 }
 0x593   :  { %v4659_v25 = vadd.f32 %v4658_v31, %v4488_v23  ;;  %v4701_v18 = vadd.f32 %v4700_v27, %v4490_v7  ;;  %v13120_v56 = vadd.f32 %v4208_v22, %v12892_v0  ;;  %v13135_v23 = vadd.f32 %v3986_v5, %v12880_v52  ;;  %v3988_v7 = vpop.f32.mrb[117].mxu0 }
 0x594   :  { %16216 = vst [vmem:[#allocation115_spill] sm:$0xff] %v13111_v36  ;;  %16217 = vst [vmem:[#allocation116_spill] sm:$0xff] %v13114_v49  ;;  %v4335_v17 = vadd.f32 %v13111_v36, %v4334_v47  ;;  %v4495_v2 = vmul.f32 %v13111_v36, %v13111_v36  ;;  %v4377_v44 = vadd.f32 %v13114_v49, %v4376_v59  ;;  %v4212_v47 = vpop.f32.mrb[116].mxu1 }
 0x595   :  { %16218 = vst [vmem:[#allocation117_spill] sm:$0xff] %v13117_v4  ;;  %16219 = vst [vmem:[#allocation118_spill] sm:$0xff] %v13120_v56  ;;  %v4497_v51 = vmul.f32 %v13114_v49, %v13114_v49  ;;  %v4356_v39 = vadd.f32 %v13117_v4, %v4355_v14  ;;  %v4496_v27 = vmul.f32 %v13117_v4, %v13117_v4  ;;  %v4214_v14 = vpop.f32.mrb[117].mxu1 }
 0x596   :  { %v4398_v31 = vadd.f32 %v13120_v56, %v4397_v13  ;;  %v4498_v63 = vmul.f32 %v13120_v56, %v13120_v56  ;;  %v4639_v60 = vadd.f32 %v4638_v29, %v4495_v2  ;;  %16220 = vst [vmem:[#allocation119_spill] sm:$0xff] %v13135_v23  ;;  %v13138_v59 = vadd.f32 %v4212_v47, %v12884_v24  ;;  %v3990_v56 = vpop.f32.mrb[118].mxu0  ;;  %v4216_v19 = vpop.f32.mrb[118].mxu1 }
 0x597   :  { %v4681_v22 = vadd.f32 %v4680_v61, %v4497_v51  ;;  %v4660_v49 = vadd.f32 %v4659_v25, %v4496_v27  ;;  %v13141_v4 = vadd.f32 %v3988_v7, %v12888_v41  ;;  %v13144_v13 = vadd.f32 %v4214_v14, %v12892_v0  ;;  %v3992_v25 = vpop.f32.mrb[119].mxu0 }
 0x598   :  { %16221 = vst [vmem:[#allocation120_spill] sm:$0xff] %v13138_v59  ;;  %v4702_v36 = vadd.f32 %v4701_v18, %v4498_v63  ;;  %v4336_v29 = vadd.f32 %v13135_v23, %v4335_v17  ;;  %v4503_v61 = vmul.f32 %v13135_v23, %v13135_v23  ;;  %v4378_v2 = vadd.f32 %v13138_v59, %v4377_v44  ;;  %v4218_v18 = vpop.f32.mrb[119].mxu1 }
 0x599   :  { %16222 = vst [vmem:[#allocation121_spill] sm:$0xff] %v13141_v4  ;;  %16223 = vst [vmem:[#allocation122_spill] sm:$0xff] %v13144_v13  ;;  %v4505_v51 = vmul.f32 %v13138_v59, %v13138_v59  ;;  %v4357_v27 = vadd.f32 %v13141_v4, %v4356_v39  ;;  %v4504_v63 = vmul.f32 %v13141_v4, %v13141_v4 }
 0x59a   :  { %v4399_v5 = vadd.f32 %v13144_v13, %v4398_v31  ;;  %v4506_v17 = vmul.f32 %v13144_v13, %v13144_v13  ;;  %v4640_v47 = vadd.f32 %v4639_v60, %v4503_v61  ;;  %v13159_v14 = vadd.f32 %v3990_v56, %v12880_v52 }
 0x59b   :  { %v4682_v7 = vadd.f32 %v4681_v22, %v4505_v51  ;;  %v13162_v44 = vadd.f32 %v4216_v19, %v12884_v24  ;;  %v4661_v59 = vadd.f32 %v4660_v49, %v4504_v63  ;;  %v13165_v39 = vadd.f32 %v3992_v25, %v12888_v41  ;;  %v3996_v51 = vpop.f32.mrb[120].mxu0 }
 0x59c   :  { %16224 = vst [vmem:[#allocation123_spill] sm:$0xff] %v13159_v14  ;;  %v4703_v23 = vadd.f32 %v4702_v36, %v4506_v17  ;;  %v13168_v4 = vadd.f32 %v4218_v18, %v12892_v0  ;;  %v4337_v31 = vadd.f32 %v13159_v14, %v4336_v29  ;;  %v4511_v60 = vmul.f32 %v13159_v14, %v13159_v14  ;;  %v4222_v29 = vpop.f32.mrb[120].mxu1  ;;  %v3998_v17 = vpop.f32.mrb[121].mxu0 }
 0x59d   :  { %16225 = vst [vmem:[#allocation124_spill] sm:$0xff] %v13162_v44  ;;  %16226 = vst [vmem:[#allocation125_spill] sm:$0xff] %v13165_v39  ;;  %v4379_v22 = vadd.f32 %v13162_v44, %v4378_v2  ;;  %v4513_v56 = vmul.f32 %v13162_v44, %v13162_v44  ;;  %v4358_v19 = vadd.f32 %v13165_v39, %v4357_v27  ;;  %v4224_v27 = vpop.f32.mrb[121].mxu1 }
 0x59e   :  { %16227 = vst [vmem:[#allocation126_spill] sm:$0xff] %v13168_v4  ;;  %v4512_v36 = vmul.f32 %v13165_v39, %v13165_v39  ;;  %v4400_v49 = vadd.f32 %v13168_v4, %v4399_v5  ;;  %v4514_v61 = vmul.f32 %v13168_v4, %v13168_v4  ;;  %v4641_v25 = vadd.f32 %v4640_v47, %v4511_v60  ;;  %v4000_v4 = vpop.f32.mrb[122].mxu0  ;;  %v4226_v13 = vpop.f32.mrb[122].mxu1 }
 0x59f   :  { %v4683_v18 = vadd.f32 %v4682_v7, %v4513_v56  ;;  %v13183_v63 = vadd.f32 %v3996_v51, %v12880_v52  ;;  %v13186_v2 = vadd.f32 %v4222_v29, %v12884_v24  ;;  %v13189_v39 = vadd.f32 %v3998_v17, %v12888_v41 }
 0x5a0   :  { %v4662_v44 = vadd.f32 %v4661_v59, %v4512_v36  ;;  %v4704_v14 = vadd.f32 %v4703_v23, %v4514_v61  ;;  %v13192_v5 = vadd.f32 %v4224_v27, %v12892_v0  ;;  %v4002_v59 = vpop.f32.mrb[123].mxu0  ;;  %v4228_v23 = vpop.f32.mrb[123].mxu1  ;;  %v13207_v27 = vadd.f32 %v4000_v4, %v12880_v52 }
 0x5a1   :  { %16228 = vst [vmem:[#allocation127_spill] sm:$0xff] %v13183_v63  ;;  %16229 = vst [vmem:[#allocation128_spill] sm:$0xff] %v13186_v2  ;;  %v4338_v47 = vadd.f32 %v13183_v63, %v4337_v31  ;;  %v4519_v7 = vmul.f32 %v13183_v63, %v13183_v63  ;;  %v4380_v60 = vadd.f32 %v13186_v2, %v4379_v22 }
 0x5a2   :  { %16230 = vst [vmem:[#allocation129_spill] sm:$0xff] %v13189_v39  ;;  %16231 = vst [vmem:[#allocation130_spill] sm:$0xff] %v13192_v5  ;;  %v4521_v56 = vmul.f32 %v13186_v2, %v13186_v2  ;;  %v4359_v36 = vadd.f32 %v13189_v39, %v4358_v19  ;;  %v4520_v61 = vmul.f32 %v13189_v39, %v13189_v39 }
 0x5a3   :  { %v4401_v51 = vadd.f32 %v13192_v5, %v4400_v49  ;;  %v4522_v31 = vmul.f32 %v13192_v5, %v13192_v5  ;;  %v4642_v29 = vadd.f32 %v4641_v25, %v4519_v7  ;;  %16232 = vst [vmem:[#allocation131_spill] sm:$0xff] %v13207_v27  ;;  %v13210_v22 = vadd.f32 %v4226_v13, %v12884_v24 }
 0x5a4   :  { %v4684_v17 = vadd.f32 %v4683_v18, %v4521_v56  ;;  %v4663_v2 = vadd.f32 %v4662_v44, %v4520_v61  ;;  %v13213_v19 = vadd.f32 %v4002_v59, %v12888_v41  ;;  %v13216_v39 = vadd.f32 %v4228_v23, %v12892_v0  ;;  %v4006_v56 = vpop.f32.mrb[124].mxu0 }
 0x5a5   :  { %16233 = vst [vmem:[#allocation132_spill] sm:$0xff] %v13210_v22  ;;  %v4705_v63 = vadd.f32 %v4704_v14, %v4522_v31  ;;  %v4339_v49 = vadd.f32 %v13207_v27, %v4338_v47  ;;  %v4527_v25 = vmul.f32 %v13207_v27, %v13207_v27  ;;  %v4381_v18 = vadd.f32 %v13210_v22, %v4380_v60  ;;  %v4232_v47 = vpop.f32.mrb[124].mxu1  ;;  %v4008_v31 = vpop.f32.mrb[125].mxu0 }
 0x5a6   :  { %16234 = vst [vmem:[#allocation133_spill] sm:$0xff] %v13213_v19  ;;  %16235 = vst [vmem:[#allocation134_spill] sm:$0xff] %v13216_v39  ;;  %v4529_v4 = vmul.f32 %v13210_v22, %v13210_v22  ;;  %v4360_v13 = vadd.f32 %v13213_v19, %v4359_v36  ;;  %v4528_v14 = vmul.f32 %v13213_v19, %v13213_v19  ;;  %v4234_v36 = vpop.f32.mrb[125].mxu1 }
 0x5a7   :  { %v4402_v44 = vadd.f32 %v13216_v39, %v4401_v51  ;;  %v4530_v7 = vmul.f32 %v13216_v39, %v13216_v39  ;;  %v4643_v59 = vadd.f32 %v4642_v29, %v4527_v25  ;;  %v13231_v61 = vadd.f32 %v4006_v56, %v12880_v52  ;;  %v4010_v39 = vpop.f32.mrb[126].mxu0  ;;  %v4236_v5 = vpop.f32.mrb[126].mxu1 }
 0x5a8   :  { %v4685_v23 = vadd.f32 %v4684_v17, %v4529_v4  ;;  %v13234_v60 = vadd.f32 %v4232_v47, %v12884_v24  ;;  %v4664_v22 = vadd.f32 %v4663_v2, %v4528_v14  ;;  %v13237_v19 = vadd.f32 %v4008_v31, %v12888_v41  ;;  %v4012_v2 = vpop.f32.mrb[127].mxu0 }
 0x5a9   :  { %16236 = vst [vmem:[#allocation135_spill] sm:$0xff] %v13231_v61  ;;  %v4706_v27 = vadd.f32 %v4705_v63, %v4530_v7  ;;  %v13240_v51 = vadd.f32 %v4234_v36, %v12892_v0  ;;  %v4340_v29 = vadd.f32 %v13231_v61, %v4339_v49  ;;  %v4535_v17 = vmul.f32 %v13231_v61, %v13231_v61  ;;  %v4238_v63 = vpop.f32.mrb[127].mxu1 }
 0x5aa   :  { %16237 = vst [vmem:[#allocation136_spill] sm:$0xff] %v13234_v60  ;;  %16238 = vst [vmem:[#allocation137_spill] sm:$0xff] %v13237_v19  ;;  %v4382_v25 = vadd.f32 %v13234_v60, %v4381_v18  ;;  %v4537_v4 = vmul.f32 %v13234_v60, %v13234_v60  ;;  %v4361_v14 = vadd.f32 %v13237_v19, %v4360_v13 }
 0x5ab   :  { %16239 = vst [vmem:[#allocation138_spill] sm:$0xff] %v13240_v51  ;;  %v4536_v7 = vmul.f32 %v13237_v19, %v13237_v19  ;;  %v4403_v56 = vadd.f32 %v13240_v51, %v4402_v44  ;;  %v4538_v49 = vmul.f32 %v13240_v51, %v13240_v51  ;;  %v4644_v47 = vadd.f32 %v4643_v59, %v4535_v17 }
 0x5ac   :  { %v4686_v31 = vadd.f32 %v4685_v23, %v4537_v4  ;;  %v13255_v36 = vadd.f32 %v4010_v39, %v12880_v52  ;;  %v13258_v18 = vadd.f32 %v4236_v5, %v12884_v24  ;;  %v13261_v13 = vadd.f32 %v4012_v2, %v12888_v41 }
 0x5ad   :  { %v4665_v60 = vadd.f32 %v4664_v22, %v4536_v7  ;;  %v4707_v61 = vadd.f32 %v4706_v27, %v4538_v49  ;;  %v13264_v19 = vadd.f32 %v4238_v63, %v12892_v0 }
 0x5ae   :  { %16240 = vst [vmem:[#allocation139_spill] sm:$0xff] %v13255_v36  ;;  %16241 = vst [vmem:[#allocation140_spill] sm:$0xff] %v13258_v18  ;;  %v4341_v44 = vadd.f32 %v13255_v36, %v4340_v29  ;;  %v4543_v59 = vmul.f32 %v13255_v36, %v13255_v36  ;;  %v4383_v23 = vadd.f32 %v13258_v18, %v4382_v25 }
 0x5af   :  { %16242 = vst [vmem:[#allocation141_spill] sm:$0xff] %v13261_v13  ;;  %16243 = vst [vmem:[#allocation142_spill] sm:$0xff] %v13264_v19  ;;  %v4545_v52 = vmul.f32 %v13258_v18, %v13258_v18  ;;  %v4362_v24 = vadd.f32 %v13261_v13, %v4361_v14  ;;  %v4544_v39 = vmul.f32 %v13261_v13, %v13261_v13 }
 0x5b0   :  { %v4404_v41 = vadd.f32 %v13264_v19, %v4403_v56  ;;  %v4546_v0 = vmul.f32 %v13264_v19, %v13264_v19  ;;  %v4342_v5 = vrot.slane %v4341_v44, 4  ;;  %v4645_v27 = vadd.f32 %v4644_v47, %v4543_v59 }
 0x5b1   :  { %v4384_v22 = vrot.slane %v4383_v23, 4  ;;  %v4687_v29 = vadd.f32 %v4686_v31, %v4545_v52  ;;  %v4363_v17 = vrot.slane %v4362_v24, 4  ;;  %v4666_v4 = vadd.f32 %v4665_v60, %v4544_v39 }
 0x5b2   :  { %v4405_v25 = vrot.slane %v4404_v41, 4  ;;  %v4708_v2 = vadd.f32 %v4707_v61, %v4546_v0  ;;  %v4343_v63 = vadd.f32 %v4342_v5, %v4341_v44  ;;  %v4646_v7 = vrot.slane %v4645_v27, 4 }
 0x5b3   :  { %v4385_v49 = vadd.f32 %v4384_v22, %v4383_v23  ;;  %v4688_v14 = vrot.slane %v4687_v29, 4  ;;  %v4364_v18 = vadd.f32 %v4363_v17, %v4362_v24  ;;  %v4667_v36 = vrot.slane %v4666_v4, 4 }
 0x5b4   :  { %v4406_v13 = vadd.f32 %v4405_v25, %v4404_v41  ;;  %v4709_v51 = vrot.slane %v4708_v2, 4  ;;  %v4344_v56 = vrot.slane %v4343_v63, 2  ;;  %v4647_v32 = vadd.f32 %v4646_v7, %v4645_v27 }
 0x5b5   :  { %v4386_v21 = vrot.slane %v4385_v49, 2  ;;  %v4689_v19 = vadd.f32 %v4688_v14, %v4687_v29  ;;  %v4365_v40 = vrot.slane %v4364_v18, 2  ;;  %v4668_v47 = vadd.f32 %v4667_v36, %v4666_v4 }
 0x5b6   :  { %v4407_v59 = vrot.slane %v4406_v13, 2  ;;  %v4710_v31 = vadd.f32 %v4709_v51, %v4708_v2  ;;  %v4345_v52 = vadd.f32 %v4344_v56, %v4343_v63  ;;  %v4648_v60 = vrot.slane %v4647_v32, 2 }
 0x5b7   :  { %v4387_v39 = vadd.f32 %v4386_v21, %v4385_v49  ;;  %v4690_v61 = vrot.slane %v4689_v19, 2  ;;  %v4366_v44 = vadd.f32 %v4365_v40, %v4364_v18  ;;  %v4669_v0 = vrot.slane %v4668_v47, 2 }
 0x5b8   :  { %v4408_v23 = vadd.f32 %v4407_v59, %v4406_v13  ;;  %v4711_v5 = vrot.slane %v4710_v31, 2  ;;  %v4346_v24 = vrot.slane %v4345_v52, 1  ;;  %v4649_v22 = vadd.f32 %v4648_v60, %v4647_v32 }
 0x5b9   :  { %v4388_v41 = vrot.slane %v4387_v39, 1  ;;  %v4691_v17 = vadd.f32 %v4690_v61, %v4689_v19  ;;  %v4367_v25 = vrot.slane %v4366_v44, 1  ;;  %v4670_v27 = vadd.f32 %v4669_v0, %v4668_v47 }
 0x5ba   :  { %v4409_v7 = vrot.slane %v4408_v23, 1  ;;  %v4712_v29 = vadd.f32 %v4711_v5, %v4710_v31  ;;  %v4347_v14 = vadd.f32 %v4346_v24, %v4345_v52  ;;  %v4650_v36 = vrot.slane %v4649_v22, 1 }
 0x5bb   :  { %v4389_v4 = vadd.f32 %v4388_v41, %v4387_v39  ;;  %v4692_v51 = vrot.slane %v4691_v17, 1  ;;  %v4368_v2 = vadd.f32 %v4367_v25, %v4366_v44  ;;  %v4671_v63 = vrot.slane %v4670_v27, 1 }
 0x5bc   :  { %v4410_v21 = vadd.f32 %v4409_v7, %v4408_v23  ;;  %v4713_v49 = vrot.slane %v4712_v29, 1  ;;  %v4415_v40 = vmul.f32 0.0078125, %v4347_v14  ;;  %v4651_v18 = vadd.f32 %v4650_v36, %v4649_v22 }
 0x5bd   :  { %v4417_v13 = vmul.f32 0.0078125, %v4389_v4  ;;  %v4693_v56 = vadd.f32 %v4692_v51, %v4691_v17  ;;  %v4416_v59 = vmul.f32 0.0078125, %v4368_v2  ;;  %v4672_v32 = vadd.f32 %v4671_v63, %v4670_v27 }
 0x5be   :  { %v4418_v60 = vmul.f32 0.0078125, %v4410_v21  ;;  %v4714_v19 = vadd.f32 %v4713_v49, %v4712_v29  ;;  %v4719_v61 = vmul.f32 0.0078125, %v4651_v18  ;;  %v4727_v47 = vmul.f32 %v4415_v40, %v4415_v40 }
 0x5bf   :  { %v4721_v0 = vmul.f32 0.0078125, %v4693_v56  ;;  %v4729_v31 = vmul.f32 %v4417_v13, %v4417_v13  ;;  %v4720_v52 = vmul.f32 0.0078125, %v4672_v32  ;;  %v4728_v5 = vmul.f32 %v4416_v59, %v4416_v59 }
 0x5c0   :  { %v4722_v39 = vmul.f32 0.0078125, %v4714_v19  ;;  %v4730_v24 = vmul.f32 %v4418_v60, %v4418_v60  ;;  %v4735_v44 = vsub.f32 %v4719_v61, %v4727_v47  ;;  %v16244_v61 = vcombine.low %v12859_v57, %v12862_v6 }
 0x5c1   :  { %v4737_v41 = vsub.f32 %v4721_v0, %v4729_v31  ;;  %v4736_v23 = vsub.f32 %v4720_v52, %v4728_v5  ;;  %v4241_v31 = vld [vmem:[#allocation11 + $0x20] sm:$0xff] }
 0x5c2   :  { %v4738_v25 = vsub.f32 %v4722_v39, %v4730_v24  ;;  %v4743_v7 = vmax.f32 %v4735_v44, 0.0  ;;  %v4811_v47 = vrot.slane %v16244_v61, %v16183_v10  ;;  %v16246_v61 = vld [vmem:[#allocation65_spill] sm:$0xff] }
 0x5c3   :  { %v4745_v22 = vmax.f32 %v4737_v41, 0.0  ;;  %v4744_v14 = vmax.f32 %v4736_v23, 0.0 }
 0x5c4   :  { %v4746_v17 = vmax.f32 %v4738_v25, 0.0  ;;  %v4751_v36 = vadd.f32 1e-05, %v4743_v7 }
 0x5c5   :  { %v4753_v27 = vadd.f32 1e-05, %v4745_v22  ;;  %v4752_v4 = vadd.f32 1e-05, %v4744_v14 }
 0x5c6   :  { %v4754_v29 = vadd.f32 1e-05, %v4746_v17  ;;  %9820 = vrsqrt.f32 %v4751_v36 }
 0x5c7   :  { %9822 = vrsqrt.f32 %v4753_v27 }
 0x5c8   :  { %9824 = vrsqrt.f32 %v4752_v4 }
 0x5c9   :  { %9826 = vrsqrt.f32 %v4754_v29 }
 0x5d0   :  { %v9821_v51 = vpop.eup %9820 }
 0x5d1   :  { %v9823_v2 = vpop.eup %9822 }
 0x5d2   :  { %v9825_v63 = vpop.eup %9824 }
 0x5d3   :  { %v9827_v21 = vpop.eup %9826  ;;  %v4773_v49 = vcombine.low %v9821_v51, %v9825_v63 }
 0x5d4   :  { %v4774_v18 = vcombine.low %v9823_v2, %v9827_v21 }
 0x5d5   :  { %v4795_v56 = vrot.slane %v4773_v49, %v16183_v10 }
 0x5d6   :  { %v4802_v32 = vrot.slane %v4774_v18, %v16183_v10 }
 0x5d8   :  { %v4804_v19 = vcombine.low %v4795_v56, %v4802_v32 }
 0x5da   :  { %v4818_v0 = vrot.slane %v4804_v19, %v16183_v10 }
 0x5dc   :  { %v4819_v52 = vcombine.low %v4811_v47, %v4818_v0  ;;  %v16247_v47 = vld [vmem:[#allocation48_spill] sm:$0xff] }
 0x5de   :  { %v4821_v5 = vmul.f32 %v4819_v52, %v4241_v31  ;;  %v16249_v52 = vld [vmem:[#allocation87_spill] sm:$0xff] }
 0x5e0   :  { %v13286_v39 = vrot.slane %v4821_v5, %v16123_v50  ;;  %v13289_v24 = vrot.slane %v4821_v5, %v16125_v38  ;;  %v13292_v44 = vrot.slane %v4821_v5, %v16124_v48  ;;  %v13295_v41 = vrot.slane %v4821_v5, %v16126_v11 }
 0x5e1   :  { %v13298_v57 = vrot.slane %v4821_v5, %v12867_v26  ;;  %v13301_v6 = vrot.slane %v4821_v5, %v12873_v45  ;;  %v13304_v23 = vrot.slane %v4821_v5, %v12870_v1  ;;  %v13307_v25 = vrot.slane %v4821_v5, %v12876_v3 }
 0x5e2   :  { %v4863_v7 = vmul.f32 %v13286_v39, %v12842_v9  ;;  %v4864_v22 = vmul.f32 %v13289_v24, %v12846_v33  ;;  %v4865_v14 = vmul.f32 %v13292_v44, %v12844_v34  ;;  %v4866_v17 = vmul.f32 %v13295_v41, %v12848_v37 }
 0x5e3   :  { %v4867_v36 = vmul.f32 %v13298_v57, %v4415_v40  ;;  %v4868_v27 = vmul.f32 %v13301_v6, %v4416_v59  ;;  %v4869_v4 = vmul.f32 %v13304_v23, %v4417_v13  ;;  %v4870_v29 = vmul.f32 %v13307_v25, %v4418_v60 }
 0x5e4   :  { %v4879_v51 = vcombine.low %v4863_v7, %v4864_v22  ;;  %v4880_v2 = vcombine.low %v4865_v14, %v4866_v17  ;;  %v13323_v9 = vmul.f32 %v12459_v46, %v13286_v39  ;;  %v13327_v34 = vmul.f32 %v12465_v12, %v13289_v24  ;;  %v16250_v7 = vld [vmem:[#allocation89_spill] sm:$0xff]  ;;  %v16251_v22 = vld [vmem:[#allocation88_spill] sm:$0xff]  ;;  %v16252_v17 = vld [vmem:[#allocation90_spill] sm:$0xff] }
 0x5e5   :  { %v4881_v33 = vcombine.low %v4867_v36, %v4868_v27  ;;  %v4882_v37 = vcombine.low %v4869_v4, %v4870_v29  ;;  %v13331_v40 = vmul.f32 %v12462_v28, %v13292_v44  ;;  %v13335_v13 = vmul.f32 %v12468_v30, %v13295_v41  ;;  %v16253_v4 = vld [vmem:[#allocation53_spill] sm:$0xff] }
 0x5e6   :  { %v4889_v59 = vrot.slane %v4879_v51, %v16183_v10  ;;  %v4896_v60 = vrot.slane %v4880_v2, %v16183_v10  ;;  %v13341_v46 = vmul.f32 %v12895_v42, %v13298_v57  ;;  %v13345_v12 = vmul.f32 %v12901_v62, %v13301_v6  ;;  %v16254_v51 = vld [vmem:[#allocation56_spill] sm:$0xff] }
 0x5e7   :  { %v4903_v63 = vrot.slane %v4881_v33, %v16183_v10  ;;  %v4910_v28 = vrot.slane %v4882_v37, %v16183_v10  ;;  %v13351_v30 = vmul.f32 %v12898_v58, %v13304_v23  ;;  %v13355_v21 = vmul.f32 %v12904_v8, %v13307_v25  ;;  %v16255_v33 = vld [vmem:[#allocation62_spill] sm:$0xff] }
 0x5e8   :  { %v4911_v49 = vcombine.low %v4889_v59, %v4896_v60  ;;  %v13359_v42 = vmul.f32 %v12471_v54, %v13286_v39  ;;  %v13363_v62 = vmul.f32 %v12477_v15, %v13289_v24  ;;  %v13367_v18 = vmul.f32 %v12474_v53, %v13292_v44  ;;  %v16256_v59 = vld [vmem:[#allocation66_spill] sm:$0xff] }
 0x5e9   :  { %v4912_v56 = vcombine.low %v4903_v63, %v4910_v28  ;;  %v13371_v58 = vmul.f32 %v12480_v55, %v13295_v41  ;;  %v13375_v8 = vmul.f32 %v12907_v35, %v13298_v57  ;;  %v13379_v54 = vmul.f32 %v12913_v20, %v13301_v6  ;;  %v16245_v55 = vld [vmem:[#allocation61_spill] sm:$0xff]  ;;  %v16257_v63 = vld [vmem:[#allocation91_spill] sm:$0xff] }
 0x5ea   :  { %v4919_v15 = vrot.slane %v4911_v49, %v16183_v10  ;;  %v13384_v32 = vmul.f32 %v12910_v16, %v13304_v23  ;;  %v13388_v53 = vmul.f32 %v12916_v43, %v13307_v25  ;;  %v13392_v19 = vmul.f32 %v16245_v55, %v13286_v39  ;;  %v16248_v16 = vld [vmem:[#allocation58_spill] sm:$0xff]  ;;  %v16258_v49 = vld [vmem:[#allocation93_spill] sm:$0xff] }
 0x5eb   :  { %v4926_v35 = vrot.slane %v4912_v56, %v16183_v10  ;;  %v13397_v20 = vmul.f32 %v16246_v61, %v13289_v24  ;;  %v13401_v0 = vmul.f32 %v16247_v47, %v13292_v44  ;;  %v13405_v31 = vmul.f32 %v16248_v16, %v13295_v41  ;;  %v4242_v43 = vld [vmem:[#allocation11 + $0x28] sm:$0xff]  ;;  %v16261_v16 = vld [vmem:[#allocation60_spill] sm:$0xff] }
 0x5ec   :  { %v13409_v5 = vmul.f32 %v16249_v52, %v13298_v57  ;;  %v13413_v10 = vmul.f32 %v16250_v7, %v13301_v6  ;;  %v13417_v14 = vmul.f32 %v16251_v22, %v13304_v23  ;;  %v13421_v36 = vmul.f32 %v16252_v17, %v13307_v25  ;;  %v16260_v61 = vld [vmem:[#allocation94_spill] sm:$0xff]  ;;  %v16262_v7 = vld [vmem:[#allocation64_spill] sm:$0xff] }
 0x5ed   :  { %v4927_v27 = vcombine.low %v4919_v15, %v4926_v35  ;;  %v13425_v29 = vmul.f32 %v16253_v4, %v13286_v39  ;;  %v13429_v2 = vmul.f32 %v16254_v51, %v13289_v24  ;;  %v13433_v37 = vmul.f32 %v16255_v33, %v13292_v44  ;;  %v16259_v15 = vld [vmem:[#allocation92_spill] sm:$0xff]  ;;  %v16263_v17 = vld [vmem:[#allocation30_spill] sm:$0xff] }
 0x5ee   :  { %v13437_v60 = vmul.f32 %v16256_v59, %v13295_v41  ;;  %v13441_v28 = vmul.f32 %v16257_v63, %v13298_v57  ;;  %v13445_v56 = vmul.f32 %v16258_v49, %v13301_v6  ;;  %v13449_v55 = vmul.f32 %v16259_v15, %v13304_v23  ;;  %v16264_v51 = vld [vmem:[#allocation32_spill] sm:$0xff]  ;;  %v16267_v59 = vld [vmem:[#allocation97_spill] sm:$0xff] }
 0x5ef   :  { %v13451_v35 = vsub.f32 %v4242_v43, %v4927_v27  ;;  %v13455_v47 = vmul.f32 %v16260_v61, %v13307_v25  ;;  %v13459_v52 = vmul.f32 %v16261_v16, %v13286_v39  ;;  %v13463_v22 = vmul.f32 %v16262_v7, %v13289_v24  ;;  %v16265_v27 = vld [vmem:[#allocation95_spill] sm:$0xff]  ;;  %v16269_v49 = vld [vmem:[#allocation96_spill] sm:$0xff]  ;;  %v16271_v61 = vld [vmem:[#allocation98_spill] sm:$0xff] }
 0x5f0   :  { %v13467_v4 = vmul.f32 %v16263_v17, %v13292_v44  ;;  %v13471_v43 = vmul.f32 %v16264_v51, %v13295_v41  ;;  %v13475_v33 = vmul.f32 %v16265_v27, %v13298_v57  ;;  %v13479_v63 = vmul.f32 %v16267_v59, %v13301_v6  ;;  %v16273_v7 = vld [vmem:[#allocation29_spill] sm:$0xff]  ;;  %v16275_v51 = vld [vmem:[#allocation31_spill] sm:$0xff] }
 0x5f1   :  { %v13483_v15 = vmul.f32 %v16269_v49, %v13304_v23  ;;  %v13487_v16 = vmul.f32 %v16271_v61, %v13307_v25  ;;  %v13491_v17 = vmul.f32 %v16273_v7, %v13286_v39  ;;  %v13495_v27 = vmul.f32 %v16275_v51, %v13289_v24 }
 0x5f2   :  { %16266 = vst [vmem:[#allocation61_spill] sm:$0xff] %v13475_v33  ;;  %16268 = vst [vmem:[#allocation65_spill] sm:$0xff] %v13479_v63  ;;  %v16277_v33 = vld [vmem:[#allocation34_spill] sm:$0xff]  ;;  %v16279_v63 = vld [vmem:[#allocation36_spill] sm:$0xff] }
 0x5f3   :  { %16270 = vst [vmem:[#allocation48_spill] sm:$0xff] %v13483_v15  ;;  %16272 = vst [vmem:[#allocation58_spill] sm:$0xff] %v13487_v16  ;;  %v13499_v59 = vmul.f32 %v16277_v33, %v13292_v44  ;;  %v13503_v49 = vmul.f32 %v16279_v63, %v13295_v41  ;;  %v16281_v15 = vld [vmem:[#allocation99_spill] sm:$0xff]  ;;  %v16283_v16 = vld [vmem:[#allocation101_spill] sm:$0xff] }
 0x5f4   :  { %16274 = vst [vmem:[#allocation87_spill] sm:$0xff] %v13491_v17  ;;  %16276 = vst [vmem:[#allocation89_spill] sm:$0xff] %v13495_v27  ;;  %v13507_v61 = vmul.f32 %v16281_v15, %v13298_v57  ;;  %v13511_v7 = vmul.f32 %v16283_v16, %v13301_v6  ;;  %v16285_v17 = vld [vmem:[#allocation100_spill] sm:$0xff]  ;;  %v16287_v27 = vld [vmem:[#allocation102_spill] sm:$0xff] }
 0x5f5   :  { %16278 = vst [vmem:[#allocation88_spill] sm:$0xff] %v13499_v59  ;;  %16280 = vst [vmem:[#allocation90_spill] sm:$0xff] %v13503_v49  ;;  %v13515_v51 = vmul.f32 %v16285_v17, %v13304_v23  ;;  %v13519_v33 = vmul.f32 %v16287_v27, %v13307_v25  ;;  %v16289_v59 = vld [vmem:[#allocation33_spill] sm:$0xff]  ;;  %v16291_v49 = vld [vmem:[#allocation43_spill] sm:$0xff] }
 0x5f6   :  { %16282 = vst [vmem:[#allocation53_spill] sm:$0xff] %v13507_v61  ;;  %16284 = vst [vmem:[#allocation56_spill] sm:$0xff] %v13511_v7  ;;  %v13523_v63 = vmul.f32 %v16289_v59, %v13286_v39  ;;  %v13527_v15 = vmul.f32 %v16291_v49, %v13289_v24  ;;  %v16293_v61 = vld [vmem:[#allocation46_spill] sm:$0xff]  ;;  %v16295_v7 = vld [vmem:[#allocation47_spill] sm:$0xff] }
 0x5f7   :  { %16286 = vst [vmem:[#allocation62_spill] sm:$0xff] %v13515_v51  ;;  %16288 = vst [vmem:[#allocation66_spill] sm:$0xff] %v13519_v33  ;;  %v13531_v16 = vmul.f32 %v16293_v61, %v13292_v44  ;;  %v13535_v17 = vmul.f32 %v16295_v7, %v13295_v41  ;;  %v16297_v51 = vld [vmem:[#allocation103_spill] sm:$0xff]  ;;  %v16299_v33 = vld [vmem:[#allocation105_spill] sm:$0xff] }
 0x5f8   :  { %16290 = vst [vmem:[#allocation91_spill] sm:$0xff] %v13523_v63  ;;  %16292 = vst [vmem:[#allocation93_spill] sm:$0xff] %v13527_v15  ;;  %v13539_v27 = vmul.f32 %v16297_v51, %v13298_v57  ;;  %v13543_v59 = vmul.f32 %v16299_v33, %v13301_v6  ;;  %v16301_v63 = vld [vmem:[#allocation104_spill] sm:$0xff]  ;;  %v16303_v15 = vld [vmem:[#allocation106_spill] sm:$0xff] }
 0x5f9   :  { %16294 = vst [vmem:[#allocation92_spill] sm:$0xff] %v13531_v16  ;;  %16296 = vst [vmem:[#allocation94_spill] sm:$0xff] %v13535_v17  ;;  %v13547_v49 = vmul.f32 %v16301_v63, %v13304_v23  ;;  %v13551_v61 = vmul.f32 %v16303_v15, %v13307_v25  ;;  %v16305_v16 = vld [vmem:[#allocation52_spill] sm:$0xff]  ;;  %v16307_v17 = vld [vmem:[#allocation55_spill] sm:$0xff] }
 0x5fa   :  { %16298 = vst [vmem:[#allocation60_spill] sm:$0xff] %v13539_v27  ;;  %16300 = vst [vmem:[#allocation64_spill] sm:$0xff] %v13543_v59  ;;  %v13555_v7 = vmul.f32 %v16305_v16, %v13286_v39  ;;  %v13559_v51 = vmul.f32 %v16307_v17, %v13289_v24  ;;  %v16309_v27 = vld [vmem:[#allocation49_spill] sm:$0xff]  ;;  %v16311_v59 = vld [vmem:[#allocation51_spill] sm:$0xff] }
 0x5fb   :  { %16302 = vst [vmem:[#allocation30_spill] sm:$0xff] %v13547_v49  ;;  %16304 = vst [vmem:[#allocation32_spill] sm:$0xff] %v13551_v61  ;;  %v13563_v33 = vmul.f32 %v16309_v27, %v13292_v44  ;;  %v13567_v63 = vmul.f32 %v16311_v59, %v13295_v41  ;;  %v16313_v49 = vld [vmem:[#allocation107_spill] sm:$0xff]  ;;  %v16315_v61 = vld [vmem:[#allocation109_spill] sm:$0xff] }
 0x5fc   :  { %16306 = vst [vmem:[#allocation95_spill] sm:$0xff] %v13555_v7  ;;  %16308 = vst [vmem:[#allocation97_spill] sm:$0xff] %v13559_v51  ;;  %v13571_v15 = vmul.f32 %v16313_v49, %v13298_v57  ;;  %v13575_v16 = vmul.f32 %v16315_v61, %v13301_v6  ;;  %v16317_v7 = vld [vmem:[#allocation108_spill] sm:$0xff]  ;;  %v16319_v51 = vld [vmem:[#allocation110_spill] sm:$0xff] }
 0x5fd   :  { %16310 = vst [vmem:[#allocation96_spill] sm:$0xff] %v13563_v33  ;;  %16312 = vst [vmem:[#allocation98_spill] sm:$0xff] %v13567_v63  ;;  %v13579_v17 = vmul.f32 %v16317_v7, %v13304_v23  ;;  %v13583_v27 = vmul.f32 %v16319_v51, %v13307_v25  ;;  %v16321_v33 = vld [vmem:[#allocation54_spill] sm:$0xff] }
 0x5fe   :  { %16314 = vst [vmem:[#allocation29_spill] sm:$0xff] %v13571_v15  ;;  %16316 = vst [vmem:[#allocation31_spill] sm:$0xff] %v13575_v16  ;;  %v13587_v59 = vmul.f32 %v16321_v33, %v13286_v39  ;;  %v16323_v63 = vld [vmem:[#allocation38_spill] sm:$0xff]  ;;  %v16325_v15 = vld [vmem:[#allocation40_spill] sm:$0xff] }
 0x5ff   :  { %16318 = vst [vmem:[#allocation34_spill] sm:$0xff] %v13579_v17  ;;  %16320 = vst [vmem:[#allocation36_spill] sm:$0xff] %v13583_v27  ;;  %v13591_v49 = vmul.f32 %v16323_v63, %v13289_v24  ;;  %v13595_v61 = vmul.f32 %v16325_v15, %v13292_v44  ;;  %v16327_v16 = vld [vmem:[#allocation35_spill] sm:$0xff]  ;;  %v16331_v27 = vld [vmem:[#allocation113_spill] sm:$0xff] }
 0x600   :  { %16322 = vst [vmem:[#allocation99_spill] sm:$0xff] %v13587_v59  ;;  %v13599_v7 = vmul.f32 %v16327_v16, %v13295_v41  ;;  %v16329_v17 = vld [vmem:[#allocation111_spill] sm:$0xff]  ;;  %v13607_v33 = vmul.f32 %v16331_v27, %v13301_v6  ;;  %v16333_v59 = vld [vmem:[#allocation112_spill] sm:$0xff] }
 0x601   :  { %16324 = vst [vmem:[#allocation101_spill] sm:$0xff] %v13591_v49  ;;  %16326 = vst [vmem:[#allocation100_spill] sm:$0xff] %v13595_v61  ;;  %v13603_v51 = vmul.f32 %v16329_v17, %v13298_v57  ;;  %v13611_v63 = vmul.f32 %v16333_v59, %v13304_v23  ;;  %v16335_v49 = vld [vmem:[#allocation114_spill] sm:$0xff] }
 0x602   :  { %16328 = vst [vmem:[#allocation102_spill] sm:$0xff] %v13599_v7  ;;  %16332 = vst [vmem:[#allocation43_spill] sm:$0xff] %v13607_v33  ;;  %v13615_v15 = vmul.f32 %v16335_v49, %v13307_v25  ;;  %v16337_v61 = vld [vmem:[#allocation42_spill] sm:$0xff]  ;;  %v16339_v7 = vld [vmem:[#allocation37_spill] sm:$0xff] }
 0x603   :  { %16330 = vst [vmem:[#allocation33_spill] sm:$0xff] %v13603_v51  ;;  %16334 = vst [vmem:[#allocation46_spill] sm:$0xff] %v13611_v63  ;;  %v13619_v16 = vmul.f32 %v16337_v61, %v13286_v39  ;;  %v13623_v17 = vmul.f32 %v16339_v7, %v13289_v24  ;;  %v16341_v51 = vld [vmem:[#allocation44_spill] sm:$0xff]  ;;  %v16343_v33 = vld [vmem:[#allocation39_spill] sm:$0xff] }
 0x604   :  { %16336 = vst [vmem:[#allocation47_spill] sm:$0xff] %v13615_v15  ;;  %v13627_v27 = vmul.f32 %v16341_v51, %v13292_v44  ;;  %v13631_v59 = vmul.f32 %v16343_v33, %v13295_v41  ;;  %v16345_v63 = vld [vmem:[#allocation115_spill] sm:$0xff]  ;;  %v16347_v15 = vld [vmem:[#allocation117_spill] sm:$0xff] }
 0x605   :  { %16338 = vst [vmem:[#allocation103_spill] sm:$0xff] %v13619_v16  ;;  %16340 = vst [vmem:[#allocation105_spill] sm:$0xff] %v13623_v17  ;;  %v13635_v49 = vmul.f32 %v16345_v63, %v13298_v57  ;;  %v13639_v61 = vmul.f32 %v16347_v15, %v13301_v6  ;;  %v16349_v16 = vld [vmem:[#allocation116_spill] sm:$0xff]  ;;  %v16351_v17 = vld [vmem:[#allocation118_spill] sm:$0xff] }
 0x606   :  { %16342 = vst [vmem:[#allocation104_spill] sm:$0xff] %v13627_v27  ;;  %16344 = vst [vmem:[#allocation106_spill] sm:$0xff] %v13631_v59  ;;  %v13643_v7 = vmul.f32 %v16349_v16, %v13304_v23  ;;  %v13647_v51 = vmul.f32 %v16351_v17, %v13307_v25  ;;  %v16353_v27 = vld [vmem:[#allocation50_spill] sm:$0xff]  ;;  %v16355_v59 = vld [vmem:[#allocation45_spill] sm:$0xff] }
 0x607   :  { %16346 = vst [vmem:[#allocation52_spill] sm:$0xff] %v13635_v49  ;;  %16348 = vst [vmem:[#allocation55_spill] sm:$0xff] %v13639_v61  ;;  %v13651_v33 = vmul.f32 %v16353_v27, %v13286_v39  ;;  %v13655_v63 = vmul.f32 %v16355_v59, %v13289_v24  ;;  %v16357_v49 = vld [vmem:[#allocation41_spill] sm:$0xff]  ;;  %v16359_v61 = vld [vmem:[#allocation59_spill] sm:$0xff] }
 0x608   :  { %16350 = vst [vmem:[#allocation49_spill] sm:$0xff] %v13643_v7  ;;  %16352 = vst [vmem:[#allocation51_spill] sm:$0xff] %v13647_v51  ;;  %v13659_v15 = vmul.f32 %v16357_v49, %v13292_v44  ;;  %v13663_v16 = vmul.f32 %v16359_v61, %v13295_v41  ;;  %v16361_v7 = vld [vmem:[#allocation119_spill] sm:$0xff]  ;;  %v16363_v51 = vld [vmem:[#allocation121_spill] sm:$0xff] }
 0x609   :  { %16354 = vst [vmem:[#allocation107_spill] sm:$0xff] %v13651_v33  ;;  %16356 = vst [vmem:[#allocation109_spill] sm:$0xff] %v13655_v63  ;;  %v13667_v17 = vmul.f32 %v16361_v7, %v13298_v57  ;;  %v13671_v27 = vmul.f32 %v16363_v51, %v13301_v6  ;;  %v16365_v33 = vld [vmem:[#allocation120_spill] sm:$0xff]  ;;  %v16367_v63 = vld [vmem:[#allocation122_spill] sm:$0xff] }
 0x60a   :  { %16358 = vst [vmem:[#allocation108_spill] sm:$0xff] %v13659_v15  ;;  %16360 = vst [vmem:[#allocation110_spill] sm:$0xff] %v13663_v16  ;;  %v13675_v59 = vmul.f32 %v16365_v33, %v13304_v23  ;;  %v13679_v49 = vmul.f32 %v16367_v63, %v13307_v25  ;;  %v16369_v15 = vld [vmem:[#allocation63_spill] sm:$0xff]  ;;  %v16371_v16 = vld [vmem:[#allocation68_spill] sm:$0xff] }
 0x60b   :  { %16362 = vst [vmem:[#allocation54_spill] sm:$0xff] %v13667_v17  ;;  %16364 = vst [vmem:[#allocation38_spill] sm:$0xff] %v13671_v27  ;;  %v13683_v61 = vmul.f32 %v16369_v15, %v13286_v39  ;;  %v13687_v7 = vmul.f32 %v16371_v16, %v13289_v24  ;;  %v16373_v17 = vld [vmem:[#allocation57_spill] sm:$0xff] }
 0x60c   :  { %16366 = vst [vmem:[#allocation40_spill] sm:$0xff] %v13675_v59  ;;  %16368 = vst [vmem:[#allocation35_spill] sm:$0xff] %v13679_v49  ;;  %v13691_v51 = vmul.f32 %v16373_v17, %v13292_v44  ;;  %v16375_v27 = vld [vmem:[#allocation69_spill] sm:$0xff]  ;;  %v16377_v59 = vld [vmem:[#allocation123_spill] sm:$0xff] }
 0x60d   :  { %16370 = vst [vmem:[#allocation111_spill] sm:$0xff] %v13683_v61  ;;  %16372 = vst [vmem:[#allocation113_spill] sm:$0xff] %v13687_v7  ;;  %v13695_v33 = vmul.f32 %v16375_v27, %v13295_v41  ;;  %v13699_v63 = vmul.f32 %v16377_v59, %v13298_v57  ;;  %v16379_v49 = vld [vmem:[#allocation125_spill] sm:$0xff]  ;;  %v16381_v61 = vld [vmem:[#allocation124_spill] sm:$0xff] }
 0x60e   :  { %16374 = vst [vmem:[#allocation112_spill] sm:$0xff] %v13691_v51  ;;  %v13703_v15 = vmul.f32 %v16379_v49, %v13301_v6  ;;  %v13707_v16 = vmul.f32 %v16381_v61, %v13304_v23  ;;  %v16383_v7 = vld [vmem:[#allocation126_spill] sm:$0xff] }
 0x60f   :  { %16376 = vst [vmem:[#allocation114_spill] sm:$0xff] %v13695_v33  ;;  %16378 = vst [vmem:[#allocation42_spill] sm:$0xff] %v13699_v63  ;;  %v13711_v17 = vmul.f32 %v16383_v7, %v13307_v25  ;;  %v16385_v51 = vld [vmem:[#allocation70_spill] sm:$0xff]  ;;  %v16387_v33 = vld [vmem:[#allocation72_spill] sm:$0xff] }
 0x610   :  { %16380 = vst [vmem:[#allocation37_spill] sm:$0xff] %v13703_v15  ;;  %16382 = vst [vmem:[#allocation44_spill] sm:$0xff] %v13707_v16  ;;  %v13715_v27 = vmul.f32 %v16385_v51, %v13286_v39  ;;  %v13719_v59 = vmul.f32 %v16387_v33, %v13289_v24  ;;  %v16389_v63 = vld [vmem:[#allocation71_spill] sm:$0xff]  ;;  %v16391_v15 = vld [vmem:[#allocation73_spill] sm:$0xff] }
 0x611   :  { %16384 = vst [vmem:[#allocation39_spill] sm:$0xff] %v13711_v17  ;;  %v13723_v49 = vmul.f32 %v16389_v63, %v13292_v44  ;;  %v13727_v61 = vmul.f32 %v16391_v15, %v13295_v41  ;;  %v16393_v16 = vld [vmem:[#allocation127_spill] sm:$0xff]  ;;  %v16395_v17 = vld [vmem:[#allocation129_spill] sm:$0xff] }
 0x612   :  { %16386 = vst [vmem:[#allocation115_spill] sm:$0xff] %v13715_v27  ;;  %16388 = vst [vmem:[#allocation117_spill] sm:$0xff] %v13719_v59  ;;  %v13731_v7 = vmul.f32 %v16393_v16, %v13298_v57  ;;  %v13735_v51 = vmul.f32 %v16395_v17, %v13301_v6  ;;  %v16397_v27 = vld [vmem:[#allocation128_spill] sm:$0xff]  ;;  %v16399_v59 = vld [vmem:[#allocation130_spill] sm:$0xff] }
 0x613   :  { %16390 = vst [vmem:[#allocation116_spill] sm:$0xff] %v13723_v49  ;;  %16392 = vst [vmem:[#allocation118_spill] sm:$0xff] %v13727_v61  ;;  %v13739_v33 = vmul.f32 %v16397_v27, %v13304_v23  ;;  %v13743_v63 = vmul.f32 %v16399_v59, %v13307_v25  ;;  %v16401_v49 = vld [vmem:[#allocation74_spill] sm:$0xff]  ;;  %v16403_v61 = vld [vmem:[#allocation76_spill] sm:$0xff] }
 0x614   :  { %16394 = vst [vmem:[#allocation50_spill] sm:$0xff] %v13731_v7  ;;  %16396 = vst [vmem:[#allocation45_spill] sm:$0xff] %v13735_v51  ;;  %v13747_v15 = vmul.f32 %v16401_v49, %v13286_v39  ;;  %v13751_v16 = vmul.f32 %v16403_v61, %v13289_v24  ;;  %v16405_v7 = vld [vmem:[#allocation75_spill] sm:$0xff]  ;;  %v16407_v51 = vld [vmem:[#allocation77_spill] sm:$0xff] }
 0x615   :  { %16398 = vst [vmem:[#allocation41_spill] sm:$0xff] %v13739_v33  ;;  %16400 = vst [vmem:[#allocation59_spill] sm:$0xff] %v13743_v63  ;;  %v13755_v17 = vmul.f32 %v16405_v7, %v13292_v44  ;;  %v13759_v27 = vmul.f32 %v16407_v51, %v13295_v41  ;;  %v16409_v33 = vld [vmem:[#allocation131_spill] sm:$0xff]  ;;  %v16411_v63 = vld [vmem:[#allocation133_spill] sm:$0xff] }
 0x616   :  { %16402 = vst [vmem:[#allocation119_spill] sm:$0xff] %v13747_v15  ;;  %16404 = vst [vmem:[#allocation121_spill] sm:$0xff] %v13751_v16  ;;  %v13763_v59 = vmul.f32 %v16409_v33, %v13298_v57  ;;  %v13767_v49 = vmul.f32 %v16411_v63, %v13301_v6  ;;  %v16413_v15 = vld [vmem:[#allocation132_spill] sm:$0xff]  ;;  %v16415_v16 = vld [vmem:[#allocation134_spill] sm:$0xff] }
 0x617   :  { %16406 = vst [vmem:[#allocation120_spill] sm:$0xff] %v13755_v17  ;;  %16408 = vst [vmem:[#allocation122_spill] sm:$0xff] %v13759_v27  ;;  %v13771_v61 = vmul.f32 %v16413_v15, %v13304_v23  ;;  %v13775_v7 = vmul.f32 %v16415_v16, %v13307_v25  ;;  %v16417_v17 = vld [vmem:[#allocation78_spill] sm:$0xff]  ;;  %v16419_v27 = vld [vmem:[#allocation80_spill] sm:$0xff] }
 0x618   :  { %16410 = vst [vmem:[#allocation63_spill] sm:$0xff] %v13763_v59  ;;  %16412 = vst [vmem:[#allocation68_spill] sm:$0xff] %v13767_v49  ;;  %v13779_v51 = vmul.f32 %v16417_v17, %v13286_v39  ;;  %v13783_v33 = vmul.f32 %v16419_v27, %v13289_v24  ;;  %v16421_v59 = vld [vmem:[#allocation79_spill] sm:$0xff]  ;;  %v16423_v49 = vld [vmem:[#allocation81_spill] sm:$0xff] }
 0x619   :  { %16414 = vst [vmem:[#allocation57_spill] sm:$0xff] %v13771_v61  ;;  %16416 = vst [vmem:[#allocation69_spill] sm:$0xff] %v13775_v7  ;;  %v13787_v63 = vmul.f32 %v16421_v59, %v13292_v44  ;;  %v13791_v15 = vmul.f32 %v16423_v49, %v13295_v41  ;;  %v16425_v61 = vld [vmem:[#allocation135_spill] sm:$0xff]  ;;  %v16427_v7 = vld [vmem:[#allocation137_spill] sm:$0xff] }
 0x61a   :  { %16418 = vst [vmem:[#allocation123_spill] sm:$0xff] %v13779_v51  ;;  %16420 = vst [vmem:[#allocation125_spill] sm:$0xff] %v13783_v33  ;;  %v13795_v16 = vmul.f32 %v16425_v61, %v13298_v57  ;;  %v13799_v17 = vmul.f32 %v16427_v7, %v13301_v6  ;;  %v16429_v51 = vld [vmem:[#allocation136_spill] sm:$0xff]  ;;  %v16431_v33 = vld [vmem:[#allocation138_spill] sm:$0xff] }
 0x61b   :  { %16422 = vst [vmem:[#allocation124_spill] sm:$0xff] %v13787_v63  ;;  %16424 = vst [vmem:[#allocation126_spill] sm:$0xff] %v13791_v15  ;;  %v13803_v27 = vmul.f32 %v16429_v51, %v13304_v23  ;;  %v13807_v59 = vmul.f32 %v16431_v33, %v13307_v25  ;;  %v16433_v63 = vld [vmem:[#allocation82_spill] sm:$0xff]  ;;  %v16434_v15 = vld [vmem:[#allocation84_spill] sm:$0xff] }
 0x61c   :  { %16426 = vst [vmem:[#allocation70_spill] sm:$0xff] %v13795_v16  ;;  %16428 = vst [vmem:[#allocation72_spill] sm:$0xff] %v13799_v17  ;;  %v13811_v49 = vmul.f32 %v16433_v63, %v13286_v39  ;;  %v13815_v61 = vmul.f32 %v16434_v15, %v13289_v24  ;;  %v16435_v16 = vld [vmem:[#allocation83_spill] sm:$0xff]  ;;  %v16436_v17 = vld [vmem:[#allocation85_spill] sm:$0xff] }
 0x61d   :  { %16430 = vst [vmem:[#allocation71_spill] sm:$0xff] %v13803_v27  ;;  %16432 = vst [vmem:[#allocation73_spill] sm:$0xff] %v13807_v59  ;;  %v13819_v7 = vmul.f32 %v16435_v16, %v13292_v44  ;;  %v13823_v51 = vmul.f32 %v16436_v17, %v13295_v41  ;;  %v16437_v27 = vld [vmem:[#allocation139_spill] sm:$0xff]  ;;  %v16438_v59 = vld [vmem:[#allocation141_spill] sm:$0xff]  ;;  %v13843_v41 = vrot.slane %v13451_v35, %v16123_v50 }
 0x61e   :  { %v13827_v33 = vmul.f32 %v16437_v27, %v13298_v57  ;;  %v13831_v39 = vmul.f32 %v16438_v59, %v13301_v6  ;;  %v16439_v63 = vld [vmem:[#allocation140_spill] sm:$0xff]  ;;  %v16440_v15 = vld [vmem:[#allocation142_spill] sm:$0xff]  ;;  %v13847_v57 = vrot.slane %v13451_v35, %v16125_v38  ;;  %v13851_v6 = vrot.slane %v13451_v35, %v16124_v48  ;;  %v16472_v38 = vld [vmem:[#allocation87_spill] sm:$0xff] }
 0x61f   :  { %v13835_v24 = vmul.f32 %v16439_v63, %v13304_v23  ;;  %v13839_v44 = vmul.f32 %v16440_v15, %v13307_v25  ;;  %v13855_v23 = vrot.slane %v13451_v35, %v16126_v11  ;;  %v13859_v25 = vrot.slane %v13451_v35, %v12867_v26  ;;  %v16466_v26 = vld [vmem:[#allocation65_spill] sm:$0xff]  ;;  %v16470_v11 = vld [vmem:[#allocation58_spill] sm:$0xff]  ;;  %v16476_v50 = vld [vmem:[#allocation88_spill] sm:$0xff] }
 0x620   :  { %v13863_v16 = vrot.slane %v13451_v35, %v12873_v45  ;;  %v13867_v17 = vrot.slane %v13451_v35, %v12870_v1  ;;  %v13871_v27 = vrot.slane %v13451_v35, %v12876_v3  ;;  %v13875_v59 = vadd.f32 %v13843_v41, %v13323_v9  ;;  %v16464_v35 = vld [vmem:[#allocation61_spill] sm:$0xff]  ;;  %v16468_v1 = vld [vmem:[#allocation48_spill] sm:$0xff] }
 0x621   :  { %v13879_v63 = vadd.f32 %v13847_v57, %v13327_v34  ;;  %v13883_v15 = vadd.f32 %v13851_v6, %v13331_v40  ;;  %v13887_v45 = vadd.f32 %v13855_v23, %v13335_v13  ;;  %v13891_v3 = vadd.f32 %v13859_v25, %v13341_v46  ;;  %v16474_v48 = vld [vmem:[#allocation89_spill] sm:$0xff] }
 0x622   :  { %v13895_v9 = vadd.f32 %v13863_v16, %v13345_v12  ;;  %v13899_v34 = vadd.f32 %v13867_v17, %v13351_v30  ;;  %v13903_v40 = vadd.f32 %v13871_v27, %v13355_v21  ;;  %v13907_v13 = vadd.f32 %v13843_v41, %v13359_v42 }
 0x623   :  { %16441 = vst [vmem:[#allocation127_spill] sm:$0xff] %v13891_v3  ;;  %v13911_v46 = vadd.f32 %v13847_v57, %v13363_v62  ;;  %v13915_v12 = vadd.f32 %v13851_v6, %v13367_v18  ;;  %v13919_v30 = vadd.f32 %v13855_v23, %v13371_v58  ;;  %v13923_v21 = vadd.f32 %v13859_v25, %v13375_v8 }
 0x624   :  { %16442 = vst [vmem:[#allocation129_spill] sm:$0xff] %v13895_v9  ;;  %16443 = vst [vmem:[#allocation128_spill] sm:$0xff] %v13899_v34  ;;  %v13927_v42 = vadd.f32 %v13863_v16, %v13379_v54  ;;  %v13931_v62 = vadd.f32 %v13867_v17, %v13384_v32  ;;  %v13935_v18 = vadd.f32 %v13871_v27, %v13388_v53 }
 0x625   :  { %16444 = vst [vmem:[#allocation130_spill] sm:$0xff] %v13903_v40  ;;  %16445 = vst [vmem:[#allocation74_spill] sm:$0xff] %v13915_v12  ;;  %v13939_v58 = vadd.f32 %v13843_v41, %v13392_v19  ;;  %v13943_v8 = vadd.f32 %v13847_v57, %v13397_v20  ;;  %v13947_v54 = vadd.f32 %v13851_v6, %v13401_v0 }
 0x626   :  { %16446 = vst [vmem:[#allocation76_spill] sm:$0xff] %v13923_v21  ;;  %16447 = vst [vmem:[#allocation75_spill] sm:$0xff] %v13927_v42  ;;  %v13951_v32 = vadd.f32 %v13855_v23, %v13405_v31  ;;  %v13955_v53 = vadd.f32 %v13859_v25, %v13409_v5  ;;  %v13959_v19 = vadd.f32 %v13863_v16, %v13413_v10 }
 0x627   :  { %16448 = vst [vmem:[#allocation77_spill] sm:$0xff] %v13931_v62  ;;  %16449 = vst [vmem:[#allocation131_spill] sm:$0xff] %v13935_v18  ;;  %v13963_v20 = vadd.f32 %v13867_v17, %v13417_v14  ;;  %v13967_v0 = vadd.f32 %v13871_v27, %v13421_v36  ;;  %v13971_v31 = vadd.f32 %v13843_v41, %v13425_v29 }
 0x628   :  { %16450 = vst [vmem:[#allocation133_spill] sm:$0xff] %v13947_v54  ;;  %16451 = vst [vmem:[#allocation132_spill] sm:$0xff] %v13951_v32  ;;  %v13975_v5 = vadd.f32 %v13847_v57, %v13429_v2  ;;  %v13979_v10 = vadd.f32 %v13851_v6, %v13433_v37  ;;  %v13983_v14 = vadd.f32 %v13855_v23, %v13437_v60 }
 0x629   :  { %16452 = vst [vmem:[#allocation134_spill] sm:$0xff] %v13955_v53  ;;  %16453 = vst [vmem:[#allocation78_spill] sm:$0xff] %v13959_v19  ;;  %v13987_v36 = vadd.f32 %v13859_v25, %v13441_v28  ;;  %v13991_v29 = vadd.f32 %v13863_v16, %v13445_v56  ;;  %v13995_v2 = vadd.f32 %v13867_v17, %v13449_v55 }
 0x62a   :  { %16454 = vst [vmem:[#allocation80_spill] sm:$0xff] %v13963_v20  ;;  %16455 = vst [vmem:[#allocation79_spill] sm:$0xff] %v13967_v0  ;;  %v13999_v37 = vadd.f32 %v13871_v27, %v13455_v47  ;;  %v14003_v60 = vadd.f32 %v13843_v41, %v13459_v52  ;;  %v14007_v28 = vadd.f32 %v13847_v57, %v13463_v22 }
 0x62b   :  { %16456 = vst [vmem:[#allocation81_spill] sm:$0xff] %v13979_v10  ;;  %16457 = vst [vmem:[#allocation135_spill] sm:$0xff] %v13983_v14  ;;  %v14011_v56 = vadd.f32 %v13851_v6, %v13467_v4  ;;  %v14015_v55 = vadd.f32 %v13855_v23, %v13471_v43  ;;  %v14019_v47 = vadd.f32 %v13859_v25, %v16464_v35 }
 0x62c   :  { %16458 = vst [vmem:[#allocation137_spill] sm:$0xff] %v13987_v36  ;;  %16459 = vst [vmem:[#allocation136_spill] sm:$0xff] %v13991_v29  ;;  %v14023_v52 = vadd.f32 %v13863_v16, %v16466_v26  ;;  %v14027_v22 = vadd.f32 %v13867_v17, %v16468_v1  ;;  %v14031_v4 = vadd.f32 %v13871_v27, %v16470_v11 }
 0x62d   :  { %16460 = vst [vmem:[#allocation138_spill] sm:$0xff] %v13995_v2  ;;  %16461 = vst [vmem:[#allocation82_spill] sm:$0xff] %v13999_v37  ;;  %v14035_v43 = vadd.f32 %v13843_v41, %v16472_v38  ;;  %v14039_v35 = vadd.f32 %v13847_v57, %v16474_v48  ;;  %v14043_v26 = vadd.f32 %v13851_v6, %v16476_v50 }
 0x62e   :  { %16462 = vst [vmem:[#allocation84_spill] sm:$0xff] %v14011_v56  ;;  %16463 = vst [vmem:[#allocation83_spill] sm:$0xff] %v14015_v55 }
 0x62f   :  { %16465 = vst [vmem:[#allocation85_spill] sm:$0xff] %v14019_v47  ;;  %16467 = vst [vmem:[#allocation139_spill] sm:$0xff] %v14023_v52  ;;  %v16478_v52 = vld [vmem:[#allocation90_spill] sm:$0xff] }
 0x630   :  { %16469 = vst [vmem:[#allocation141_spill] sm:$0xff] %v14027_v22  ;;  %16471 = vst [vmem:[#allocation140_spill] sm:$0xff] %v14031_v4  ;;  %v14047_v1 = vadd.f32 %v13855_v23, %v16478_v52  ;;  %v16480_v22 = vld [vmem:[#allocation53_spill] sm:$0xff]  ;;  %v16482_v4 = vld [vmem:[#allocation56_spill] sm:$0xff] }
 0x631   :  { %16473 = vst [vmem:[#allocation142_spill] sm:$0xff] %v14035_v43  ;;  %16475 = vst [vmem:[#allocation61_spill] sm:$0xff] %v14039_v35  ;;  %v14051_v11 = vadd.f32 %v13859_v25, %v16480_v22  ;;  %v14055_v38 = vadd.f32 %v13863_v16, %v16482_v4  ;;  %v16484_v43 = vld [vmem:[#allocation62_spill] sm:$0xff] }
 0x632   :  { %16477 = vst [vmem:[#allocation65_spill] sm:$0xff] %v14043_v26  ;;  %16479 = vst [vmem:[#allocation48_spill] sm:$0xff] %v14047_v1  ;;  %v14059_v48 = vadd.f32 %v13867_v17, %v16484_v43  ;;  %v16486_v35 = vld [vmem:[#allocation66_spill] sm:$0xff]  ;;  %v16488_v26 = vld [vmem:[#allocation91_spill] sm:$0xff] }
 0x633   :  { %16481 = vst [vmem:[#allocation58_spill] sm:$0xff] %v14051_v11  ;;  %16483 = vst [vmem:[#allocation87_spill] sm:$0xff] %v14055_v38  ;;  %v14063_v50 = vadd.f32 %v13871_v27, %v16486_v35  ;;  %v14067_v52 = vadd.f32 %v13843_v41, %v16488_v26  ;;  %v16490_v1 = vld [vmem:[#allocation93_spill] sm:$0xff]  ;;  %v16492_v11 = vld [vmem:[#allocation92_spill] sm:$0xff] }
 0x634   :  { %16485 = vst [vmem:[#allocation89_spill] sm:$0xff] %v14059_v48  ;;  %v14071_v22 = vadd.f32 %v13847_v57, %v16490_v1  ;;  %v14075_v4 = vadd.f32 %v13851_v6, %v16492_v11  ;;  %v16494_v38 = vld [vmem:[#allocation94_spill] sm:$0xff]  ;;  %v16496_v48 = vld [vmem:[#allocation60_spill] sm:$0xff] }
 0x635   :  { %16487 = vst [vmem:[#allocation88_spill] sm:$0xff] %v14063_v50  ;;  %16489 = vst [vmem:[#allocation90_spill] sm:$0xff] %v14067_v52  ;;  %v14079_v43 = vadd.f32 %v13855_v23, %v16494_v38  ;;  %v14083_v35 = vadd.f32 %v13859_v25, %v16496_v48  ;;  %v16498_v50 = vld [vmem:[#allocation64_spill] sm:$0xff]  ;;  %v16500_v52 = vld [vmem:[#allocation30_spill] sm:$0xff] }
 0x636   :  { %16491 = vst [vmem:[#allocation53_spill] sm:$0xff] %v14071_v22  ;;  %16493 = vst [vmem:[#allocation56_spill] sm:$0xff] %v14075_v4  ;;  %v14087_v26 = vadd.f32 %v13863_v16, %v16498_v50  ;;  %v14091_v1 = vadd.f32 %v13867_v17, %v16500_v52  ;;  %v16502_v22 = vld [vmem:[#allocation32_spill] sm:$0xff]  ;;  %v16504_v4 = vld [vmem:[#allocation95_spill] sm:$0xff] }
 0x637   :  { %16495 = vst [vmem:[#allocation62_spill] sm:$0xff] %v14079_v43  ;;  %16497 = vst [vmem:[#allocation66_spill] sm:$0xff] %v14083_v35  ;;  %v14095_v11 = vadd.f32 %v13871_v27, %v16502_v22  ;;  %v14099_v38 = vadd.f32 %v13843_v41, %v16504_v4  ;;  %v16506_v43 = vld [vmem:[#allocation97_spill] sm:$0xff]  ;;  %v16508_v35 = vld [vmem:[#allocation96_spill] sm:$0xff] }
 0x638   :  { %16499 = vst [vmem:[#allocation91_spill] sm:$0xff] %v14087_v26  ;;  %16501 = vst [vmem:[#allocation93_spill] sm:$0xff] %v14091_v1  ;;  %v14103_v48 = vadd.f32 %v13847_v57, %v16506_v43  ;;  %v14107_v50 = vadd.f32 %v13851_v6, %v16508_v35  ;;  %v16510_v26 = vld [vmem:[#allocation98_spill] sm:$0xff]  ;;  %v16512_v1 = vld [vmem:[#allocation29_spill] sm:$0xff] }
 0x639   :  { %16503 = vst [vmem:[#allocation92_spill] sm:$0xff] %v14095_v11  ;;  %16505 = vst [vmem:[#allocation94_spill] sm:$0xff] %v14099_v38  ;;  %v14111_v52 = vadd.f32 %v13855_v23, %v16510_v26  ;;  %v14115_v22 = vadd.f32 %v13859_v25, %v16512_v1  ;;  %v16514_v11 = vld [vmem:[#allocation31_spill] sm:$0xff]  ;;  %v16516_v38 = vld [vmem:[#allocation34_spill] sm:$0xff] }
 0x63a   :  { %16507 = vst [vmem:[#allocation60_spill] sm:$0xff] %v14103_v48  ;;  %16509 = vst [vmem:[#allocation64_spill] sm:$0xff] %v14107_v50  ;;  %v14119_v4 = vadd.f32 %v13863_v16, %v16514_v11  ;;  %v14123_v43 = vadd.f32 %v13867_v17, %v16516_v38  ;;  %v16518_v48 = vld [vmem:[#allocation36_spill] sm:$0xff]  ;;  %v16520_v50 = vld [vmem:[#allocation99_spill] sm:$0xff] }
 0x63b   :  { %16511 = vst [vmem:[#allocation30_spill] sm:$0xff] %v14111_v52  ;;  %16513 = vst [vmem:[#allocation32_spill] sm:$0xff] %v14115_v22  ;;  %v14127_v35 = vadd.f32 %v13871_v27, %v16518_v48  ;;  %v14131_v26 = vadd.f32 %v13843_v41, %v16520_v50  ;;  %v16522_v52 = vld [vmem:[#allocation101_spill] sm:$0xff]  ;;  %v16524_v22 = vld [vmem:[#allocation100_spill] sm:$0xff] }
 0x63c   :  { %16515 = vst [vmem:[#allocation95_spill] sm:$0xff] %v14119_v4  ;;  %16517 = vst [vmem:[#allocation97_spill] sm:$0xff] %v14123_v43  ;;  %v14135_v1 = vadd.f32 %v13847_v57, %v16522_v52  ;;  %v14139_v11 = vadd.f32 %v13851_v6, %v16524_v22  ;;  %v16526_v4 = vld [vmem:[#allocation102_spill] sm:$0xff]  ;;  %v16528_v43 = vld [vmem:[#allocation33_spill] sm:$0xff] }
 0x63d   :  { %16519 = vst [vmem:[#allocation96_spill] sm:$0xff] %v14127_v35  ;;  %16521 = vst [vmem:[#allocation98_spill] sm:$0xff] %v14131_v26  ;;  %v14143_v38 = vadd.f32 %v13855_v23, %v16526_v4  ;;  %v14147_v48 = vadd.f32 %v13859_v25, %v16528_v43  ;;  %v16530_v35 = vld [vmem:[#allocation43_spill] sm:$0xff]  ;;  %v16532_v26 = vld [vmem:[#allocation46_spill] sm:$0xff] }
 0x63e   :  { %16523 = vst [vmem:[#allocation29_spill] sm:$0xff] %v14135_v1  ;;  %16525 = vst [vmem:[#allocation31_spill] sm:$0xff] %v14139_v11  ;;  %v14151_v50 = vadd.f32 %v13863_v16, %v16530_v35  ;;  %v14155_v52 = vadd.f32 %v13867_v17, %v16532_v26  ;;  %v16534_v1 = vld [vmem:[#allocation47_spill] sm:$0xff]  ;;  %v16631_v20 = vld [vmem:[#allocation142_spill] sm:$0xff] }
 0x63f   :  { %16527 = vst [vmem:[#allocation34_spill] sm:$0xff] %v14143_v38  ;;  %16529 = vst [vmem:[#allocation36_spill] sm:$0xff] %v14147_v48  ;;  %v14159_v22 = vadd.f32 %v13871_v27, %v16534_v1  ;;  %v16536_v11 = vld [vmem:[#allocation103_spill] sm:$0xff]  ;;  %v16538_v38 = vld [vmem:[#allocation105_spill] sm:$0xff] }
 0x640   :  { %16531 = vst [vmem:[#allocation99_spill] sm:$0xff] %v14151_v50  ;;  %16533 = vst [vmem:[#allocation101_spill] sm:$0xff] %v14155_v52  ;;  %v14163_v4 = vadd.f32 %v13843_v41, %v16536_v11  ;;  %v14167_v43 = vadd.f32 %v13847_v57, %v16538_v38  ;;  %v16540_v48 = vld [vmem:[#allocation104_spill] sm:$0xff]  ;;  %v16542_v50 = vld [vmem:[#allocation106_spill] sm:$0xff] }
 0x641   :  { %16535 = vst [vmem:[#allocation100_spill] sm:$0xff] %v14159_v22  ;;  %v14171_v35 = vadd.f32 %v13851_v6, %v16540_v48  ;;  %v14175_v26 = vadd.f32 %v13855_v23, %v16542_v50  ;;  %v16544_v52 = vld [vmem:[#allocation52_spill] sm:$0xff]  ;;  %v16546_v22 = vld [vmem:[#allocation55_spill] sm:$0xff]  ;;  %v16632_v2 = vld [vmem:[#allocation61_spill] sm:$0xff] }
 0x642   :  { %16537 = vst [vmem:[#allocation102_spill] sm:$0xff] %v14163_v4  ;;  %16539 = vst [vmem:[#allocation33_spill] sm:$0xff] %v14167_v43  ;;  %v14179_v1 = vadd.f32 %v13859_v25, %v16544_v52  ;;  %v14183_v11 = vadd.f32 %v13863_v16, %v16546_v22  ;;  %v16548_v4 = vld [vmem:[#allocation49_spill] sm:$0xff]  ;;  %v16550_v43 = vld [vmem:[#allocation51_spill] sm:$0xff] }
 0x643   :  { %16541 = vst [vmem:[#allocation43_spill] sm:$0xff] %v14171_v35  ;;  %16543 = vst [vmem:[#allocation46_spill] sm:$0xff] %v14175_v26  ;;  %v14187_v38 = vadd.f32 %v13867_v17, %v16548_v4  ;;  %v14191_v48 = vadd.f32 %v13871_v27, %v16550_v43  ;;  %v16552_v35 = vld [vmem:[#allocation107_spill] sm:$0xff]  ;;  %v16554_v26 = vld [vmem:[#allocation109_spill] sm:$0xff] }
 0x644   :  { %16545 = vst [vmem:[#allocation47_spill] sm:$0xff] %v14179_v1  ;;  %16547 = vst [vmem:[#allocation103_spill] sm:$0xff] %v14183_v11  ;;  %v14195_v50 = vadd.f32 %v13843_v41, %v16552_v35  ;;  %v14199_v52 = vadd.f32 %v13847_v57, %v16554_v26  ;;  %v16556_v1 = vld [vmem:[#allocation108_spill] sm:$0xff]  ;;  %v16558_v11 = vld [vmem:[#allocation110_spill] sm:$0xff] }
 0x645   :  { %16549 = vst [vmem:[#allocation105_spill] sm:$0xff] %v14187_v38  ;;  %16551 = vst [vmem:[#allocation104_spill] sm:$0xff] %v14191_v48  ;;  %v14203_v22 = vadd.f32 %v13851_v6, %v16556_v1  ;;  %v14207_v4 = vadd.f32 %v13855_v23, %v16558_v11  ;;  %v16560_v38 = vld [vmem:[#allocation54_spill] sm:$0xff]  ;;  %v16648_v18 = vld [vmem:[#allocation60_spill] sm:$0xff] }
 0x646   :  { %16553 = vst [vmem:[#allocation106_spill] sm:$0xff] %v14195_v50  ;;  %16555 = vst [vmem:[#allocation52_spill] sm:$0xff] %v14199_v52  ;;  %v14211_v43 = vadd.f32 %v13859_v25, %v16560_v38  ;;  %v16562_v48 = vld [vmem:[#allocation38_spill] sm:$0xff]  ;;  %v16564_v50 = vld [vmem:[#allocation40_spill] sm:$0xff] }
 0x647   :  { %16557 = vst [vmem:[#allocation55_spill] sm:$0xff] %v14203_v22  ;;  %16559 = vst [vmem:[#allocation49_spill] sm:$0xff] %v14207_v4  ;;  %v14215_v35 = vadd.f32 %v13863_v16, %v16562_v48  ;;  %v14219_v26 = vadd.f32 %v13867_v17, %v16564_v50  ;;  %v16566_v52 = vld [vmem:[#allocation35_spill] sm:$0xff]  ;;  %v16570_v4 = vld [vmem:[#allocation113_spill] sm:$0xff] }
 0x648   :  { %16561 = vst [vmem:[#allocation51_spill] sm:$0xff] %v14211_v43  ;;  %v14223_v1 = vadd.f32 %v13871_v27, %v16566_v52  ;;  %v16568_v22 = vld [vmem:[#allocation111_spill] sm:$0xff]  ;;  %v14231_v38 = vadd.f32 %v13847_v57, %v16570_v4  ;;  %v16572_v43 = vld [vmem:[#allocation112_spill] sm:$0xff]  ;;  %v16639_v47 = vld [vmem:[#allocation90_spill] sm:$0xff] }
 0x649   :  { %16563 = vst [vmem:[#allocation107_spill] sm:$0xff] %v14215_v35  ;;  %16565 = vst [vmem:[#allocation109_spill] sm:$0xff] %v14219_v26  ;;  %v14227_v11 = vadd.f32 %v13843_v41, %v16568_v22  ;;  %v14235_v48 = vadd.f32 %v13851_v6, %v16572_v43  ;;  %v16574_v35 = vld [vmem:[#allocation114_spill] sm:$0xff]  ;;  %v16656_v29 = vld [vmem:[#allocation29_spill] sm:$0xff] }
 0x64a   :  { %16567 = vst [vmem:[#allocation108_spill] sm:$0xff] %v14223_v1  ;;  %16571 = vst [vmem:[#allocation54_spill] sm:$0xff] %v14231_v38  ;;  %v14239_v50 = vadd.f32 %v13855_v23, %v16574_v35  ;;  %v16576_v26 = vld [vmem:[#allocation42_spill] sm:$0xff]  ;;  %v16578_v1 = vld [vmem:[#allocation37_spill] sm:$0xff] }
 0x64b   :  { %16569 = vst [vmem:[#allocation110_spill] sm:$0xff] %v14227_v11  ;;  %16573 = vst [vmem:[#allocation38_spill] sm:$0xff] %v14235_v48  ;;  %v14243_v52 = vadd.f32 %v13859_v25, %v16576_v26  ;;  %v14247_v22 = vadd.f32 %v13863_v16, %v16578_v1  ;;  %v16580_v11 = vld [vmem:[#allocation44_spill] sm:$0xff]  ;;  %v16582_v38 = vld [vmem:[#allocation39_spill] sm:$0xff] }
 0x64c   :  { %16575 = vst [vmem:[#allocation40_spill] sm:$0xff] %v14239_v50  ;;  %v14251_v4 = vadd.f32 %v13867_v17, %v16580_v11  ;;  %v14255_v43 = vadd.f32 %v13871_v27, %v16582_v38  ;;  %v16584_v48 = vld [vmem:[#allocation115_spill] sm:$0xff]  ;;  %v16586_v50 = vld [vmem:[#allocation117_spill] sm:$0xff]  ;;  %v16647_v34 = vld [vmem:[#allocation94_spill] sm:$0xff] }
 0x64d   :  { %16577 = vst [vmem:[#allocation35_spill] sm:$0xff] %v14243_v52  ;;  %16579 = vst [vmem:[#allocation111_spill] sm:$0xff] %v14247_v22  ;;  %v14259_v35 = vadd.f32 %v13843_v41, %v16584_v48  ;;  %v14263_v26 = vadd.f32 %v13847_v57, %v16586_v50  ;;  %v16588_v52 = vld [vmem:[#allocation116_spill] sm:$0xff]  ;;  %v16590_v22 = vld [vmem:[#allocation118_spill] sm:$0xff] }
 0x64e   :  { %16581 = vst [vmem:[#allocation113_spill] sm:$0xff] %v14251_v4  ;;  %16583 = vst [vmem:[#allocation112_spill] sm:$0xff] %v14255_v43  ;;  %v14267_v1 = vadd.f32 %v13851_v6, %v16588_v52  ;;  %v14271_v11 = vadd.f32 %v13855_v23, %v16590_v22  ;;  %v16592_v4 = vld [vmem:[#allocation50_spill] sm:$0xff]  ;;  %v16594_v43 = vld [vmem:[#allocation45_spill] sm:$0xff] }
 0x64f   :  { %16585 = vst [vmem:[#allocation114_spill] sm:$0xff] %v14259_v35  ;;  %16587 = vst [vmem:[#allocation42_spill] sm:$0xff] %v14263_v26  ;;  %v14275_v38 = vadd.f32 %v13859_v25, %v16592_v4  ;;  %v14279_v48 = vadd.f32 %v13863_v16, %v16594_v43  ;;  %v16596_v35 = vld [vmem:[#allocation41_spill] sm:$0xff]  ;;  %v16598_v26 = vld [vmem:[#allocation59_spill] sm:$0xff] }
 0x650   :  { %16589 = vst [vmem:[#allocation37_spill] sm:$0xff] %v14267_v1  ;;  %16591 = vst [vmem:[#allocation44_spill] sm:$0xff] %v14271_v11  ;;  %v14283_v50 = vadd.f32 %v13867_v17, %v16596_v35  ;;  %v14287_v52 = vadd.f32 %v13871_v27, %v16598_v26  ;;  %v16600_v1 = vld [vmem:[#allocation119_spill] sm:$0xff]  ;;  %v16602_v11 = vld [vmem:[#allocation121_spill] sm:$0xff] }
 0x651   :  { %16593 = vst [vmem:[#allocation39_spill] sm:$0xff] %v14275_v38  ;;  %16595 = vst [vmem:[#allocation115_spill] sm:$0xff] %v14279_v48  ;;  %v14291_v22 = vadd.f32 %v13843_v41, %v16600_v1  ;;  %v14295_v4 = vadd.f32 %v13847_v57, %v16602_v11  ;;  %v16604_v38 = vld [vmem:[#allocation120_spill] sm:$0xff]  ;;  %v16606_v48 = vld [vmem:[#allocation122_spill] sm:$0xff] }
 0x652   :  { %16597 = vst [vmem:[#allocation117_spill] sm:$0xff] %v14283_v50  ;;  %16599 = vst [vmem:[#allocation116_spill] sm:$0xff] %v14287_v52  ;;  %v14299_v43 = vadd.f32 %v13851_v6, %v16604_v38  ;;  %v14303_v35 = vadd.f32 %v13855_v23, %v16606_v48  ;;  %v16608_v50 = vld [vmem:[#allocation63_spill] sm:$0xff]  ;;  %v16610_v52 = vld [vmem:[#allocation68_spill] sm:$0xff] }
 0x653   :  { %16601 = vst [vmem:[#allocation118_spill] sm:$0xff] %v14291_v22  ;;  %16603 = vst [vmem:[#allocation50_spill] sm:$0xff] %v14295_v4  ;;  %v14307_v26 = vadd.f32 %v13859_v25, %v16608_v50  ;;  %v14311_v1 = vadd.f32 %v13863_v16, %v16610_v52  ;;  %v16612_v22 = vld [vmem:[#allocation57_spill] sm:$0xff]  ;;  %v16655_v53 = vld [vmem:[#allocation98_spill] sm:$0xff] }
 0x654   :  { %16605 = vst [vmem:[#allocation45_spill] sm:$0xff] %v14299_v43  ;;  %16607 = vst [vmem:[#allocation41_spill] sm:$0xff] %v14303_v35  ;;  %v14315_v11 = vadd.f32 %v13867_v17, %v16612_v22  ;;  %v16614_v4 = vld [vmem:[#allocation69_spill] sm:$0xff]  ;;  %v16616_v43 = vld [vmem:[#allocation123_spill] sm:$0xff] }
 0x655   :  { %16609 = vst [vmem:[#allocation59_spill] sm:$0xff] %v14307_v26  ;;  %16611 = vst [vmem:[#allocation119_spill] sm:$0xff] %v14311_v1  ;;  %v14319_v38 = vadd.f32 %v13871_v27, %v16614_v4  ;;  %v14323_v48 = vadd.f32 %v13843_v41, %v16616_v43  ;;  %v16618_v35 = vld [vmem:[#allocation125_spill] sm:$0xff]  ;;  %v16620_v26 = vld [vmem:[#allocation124_spill] sm:$0xff] }
 0x656   :  { %16613 = vst [vmem:[#allocation121_spill] sm:$0xff] %v14315_v11  ;;  %v14327_v50 = vadd.f32 %v13847_v57, %v16618_v35  ;;  %v14331_v52 = vadd.f32 %v13851_v6, %v16620_v26  ;;  %v16621_v1 = vld [vmem:[#allocation126_spill] sm:$0xff]  ;;  %v16664_v42 = vld [vmem:[#allocation33_spill] sm:$0xff]  ;;  %v16672_v19 = vld [vmem:[#allocation52_spill] sm:$0xff] }
 0x657   :  { %16615 = vst [vmem:[#allocation120_spill] sm:$0xff] %v14319_v38  ;;  %16617 = vst [vmem:[#allocation122_spill] sm:$0xff] %v14323_v48  ;;  %v14335_v22 = vadd.f32 %v13855_v23, %v16621_v1  ;;  %v16622_v11 = vld [vmem:[#allocation70_spill] sm:$0xff]  ;;  %v16623_v38 = vld [vmem:[#allocation72_spill] sm:$0xff]  ;;  %v14355_v1 = vadd.f32 %v13843_v41, %v13811_v49  ;;  %v14375_v49 = vadd.f32 %v13863_v16, %v13831_v39 }
 0x658   :  { %16619 = vst [vmem:[#allocation63_spill] sm:$0xff] %v14327_v50  ;;  %v14339_v4 = vadd.f32 %v13859_v25, %v16622_v11  ;;  %v14343_v43 = vadd.f32 %v13863_v16, %v16623_v38  ;;  %v16624_v48 = vld [vmem:[#allocation71_spill] sm:$0xff]  ;;  %v16626_v50 = vld [vmem:[#allocation73_spill] sm:$0xff]  ;;  %v14359_v11 = vadd.f32 %v13847_v57, %v13815_v61  ;;  %v14363_v38 = vadd.f32 %v13851_v6, %v13819_v7  ;;  %v16663_v3 = vld [vmem:[#allocation102_spill] sm:$0xff] }
 0x659   :  { %v14347_v35 = vadd.f32 %v13867_v17, %v16624_v48  ;;  %v14351_v26 = vadd.f32 %v13871_v27, %v16626_v50  ;;  %v14367_v48 = vadd.f32 %v13855_v23, %v13823_v51  ;;  %v14371_v50 = vadd.f32 %v13859_v25, %v13827_v33  ;;  %v16671_v40 = vld [vmem:[#allocation106_spill] sm:$0xff]  ;;  %v16694_v10 = vld [vmem:[#allocation116_spill] sm:$0xff] }
 0x65a   :  { %v14379_v61 = vadd.f32 %v13867_v17, %v13835_v24  ;;  %v14383_v7 = vadd.f32 %v13871_v27, %v13839_v44  ;;  %v16640_v44 = vld [vmem:[#allocation53_spill] sm:$0xff]  ;;  %v16679_v62 = vld [vmem:[#allocation110_spill] sm:$0xff] }
 0x65b   :  { %16625 = vst [vmem:[#allocation68_spill] sm:$0xff] %v14347_v35  ;;  %v16680_v9 = vld [vmem:[#allocation54_spill] sm:$0xff]  ;;  %v16697_v0 = vld [vmem:[#allocation45_spill] sm:$0xff] }
 0x65c   :  { %16627 = vst [vmem:[#allocation57_spill] sm:$0xff] %v14379_v61  ;;  %v16687_v36 = vld [vmem:[#allocation114_spill] sm:$0xff]  ;;  %v16698_v32 = vld [vmem:[#allocation41_spill] sm:$0xff]  ;;  %v16699_v12 = vld [vmem:[#allocation59_spill] sm:$0xff] }
 0x65d   :  { %v16688_v41 = vld [vmem:[#allocation42_spill] sm:$0xff]  ;;  %v16700_v37 = vld [vmem:[#allocation119_spill] sm:$0xff]  ;;  %v16701_v54 = vld [vmem:[#allocation121_spill] sm:$0xff] }
 0x65e   :  { %v16695_v21 = vld [vmem:[#allocation118_spill] sm:$0xff]  ;;  %v16702_v14 = vld [vmem:[#allocation120_spill] sm:$0xff] }
 0x65f   :  { %v16696_v56 = vld [vmem:[#allocation50_spill] sm:$0xff]  ;;  %v16704_v55 = vld [vmem:[#allocation63_spill] sm:$0xff] }
 0x660   :  { %v16703_v51 = vld [vmem:[#allocation122_spill] sm:$0xff] }
 0x661   :  { %10171 = dma.done.wait [#allocation4 + $0x1], 57344 }
 0x662   :  { %10172 = vsyncadd [#allocation4 + $0x1], 4294909952  ;;  %v16705_v33 = vmax.f32 %v13879_v63, 0.0  ;;  %v16706_v25 = vmax.f32 %v13911_v46, 0.0  ;;  %v5424_v27 = vld [vmem:[#allocation3 + $0x8] sm:$0xff]  ;;  %v5426_v6 = vld [vmem:[#allocation3 + $0x18] sm:$0xff] }
 0x663   :  { %v5423_v57 = vld [vmem:[#allocation3] sm:$0xff]  ;;  %5908 = vmatprep.subr.bf16.mxu0 %v5424_v27  ;;  %6360 = vmatprep.subr.bf16.mxu1 %v5426_v6  ;;  %v5425_v23 = vld [vmem:[#allocation3 + $0x10] sm:$0xff]  ;;  %v5430_v63 = vld [vmem:[#allocation3 + $0x38] sm:$0xff]  ;;  %v16709_v35 = vmax.f32 %v13907_v13, 0.0  ;;  %s10199_s5 = smov [#allocation13]  }
 0x664   :  { %v14517_v16 = vpack.c.bf16 %v16706_v25, %v16705_v33  ;;  %v5431_v39 = vld [vmem:[#allocation3 + $0x40] sm:$0xff]  ;;  %v5433_v24 = vld [vmem:[#allocation3 + $0x50] sm:$0xff]  ;;  %5909 = vmatpush1.bf16.msra.mxu0 %v5423_v57  ;;  %6361 = vmatpush1.bf16.msra.mxu1 %v5425_v23  ;;  %v5432_v46 = vld [vmem:[#allocation3 + $0x48] sm:$0xff]  ;;  %s8185_s1 = sshll.u32 %s10199_s5, 4  ;;  %s8186_s1 = int_to_ptr.vmem [resolvable:$true] %s8185_s1 }
 0x665   :  { %5910 = vmatprep.subr.bf16.mxu0 %v5431_v39  ;;  %6362 = vmatprep.subr.bf16.mxu1 %v5433_v24  ;;  %v5438_v33 = vld [vmem:[#allocation3 + $0x78] sm:$0xff]  ;;  %v5440_v25 = vld [vmem:[#allocation3 + $0x88] sm:$0xff]  ;;  %v5437_v17 = vld [vmem:[#allocation3 + $0x70] sm:$0xff]  ;;  %s10141_s22 = scalar_lea.vmem %s8186_s1, 7168  ;;  %p10146_p5 = scmp.lt.s32.totalorder %s8186_s1, %s8186_s1 }
 0x666   :  { %16707 = vst [vmem:[#allocation69_spill] sm:$0xff] %v14517_v16  ;;  %5940 = vmatprep.mubr.bf16.mxu0 %v14517_v16  ;;  %6392 = vmatprep.mubr.bf16.mxu1 %v14517_v16  ;;  %v5439_v16 = vld [vmem:[#allocation3 + $0x80] sm:$0xff]  ;;  %v5445_v61 = vld [vmem:[#allocation3 + $0xb0] sm:$0xff]  ;;  %v5444_v57 = vld [vmem:[#allocation3 + $0xa8] sm:$0xff]  ;;  %p10142_p4 = scmp.ne.s32.totalorder %s8186_s1, %s10141_s22  ;;  %p10147_p6 = scmp.lt.s32.totalorder %s10141_s22, %s10141_s22 }
 0x667   :  { %v5447_v27 = vld [vmem:[#allocation3 + $0xc0] sm:$0xff]  ;;  %v5446_v6 = vld [vmem:[#allocation3 + $0xb8] sm:$0xff]  ;;  %v5452_v39 = vld [vmem:[#allocation3 + $0xe8] sm:$0xff] }
 0x668   :  { %5911 = vmatpush1.bf16.msra.mxu0 %v5430_v63  ;;  %6363 = vmatpush1.bf16.msra.mxu1 %v5432_v46  ;;  %v5454_v23 = vld [vmem:[#allocation3 + $0xf8] sm:$0xff]  ;;  %v5451_v24 = vld [vmem:[#allocation3 + $0xe0] sm:$0xff]  ;;  %v5453_v63 = vld [vmem:[#allocation3 + $0xf0] sm:$0xff]  ;;  %p10148_p7 = por %p10147_p6, %p10146_p5 }
 0x669   :  { %5912 = vmatprep.subr.bf16.mxu0 %v5438_v33  ;;  %6364 = vmatprep.subr.bf16.mxu1 %v5440_v25  ;;  %v5459_v46 = vld [vmem:[#allocation3 + $0x120] sm:$0xff]  ;;  %v5461_v33 = vld [vmem:[#allocation3 + $0x130] sm:$0xff]  ;;  %v5468_v25 = vld [vmem:[#allocation3 + $0x168] sm:$0xff] }
 0x66a   :  { %v5544_v13 = vld [vmem:[#allocation3 + $0x3c8] sm:$0xff]  ;;  %p10149_p8 = pnand %p10148_p7, %p10142_p4 }
 0x66c   :  { %5913 = vmatpush1.bf16.msra.mxu0 %v5437_v17  ;;  %6365 = vmatpush1.bf16.msra.mxu1 %v5439_v16  ;;  %v5458_v17 = vld [vmem:[#allocation3 + $0x118] sm:$0xff]  ;;  %v5460_v16 = vld [vmem:[#allocation3 + $0x128] sm:$0xff] }
 0x66d   :  { %5914 = vmatprep.subr.bf16.mxu0 %v5445_v61  ;;  %6366 = vmatprep.subr.bf16.mxu1 %v5447_v27  ;;  %v5466_v61 = vld [vmem:[#allocation3 + $0x158] sm:$0xff]  ;;  %v5465_v27 = vld [vmem:[#allocation3 + $0x150] sm:$0xff] }
 0x670   :  { %5915 = vmatpush1.bf16.msra.mxu0 %v5444_v57  ;;  %6367 = vmatpush1.bf16.msra.mxu1 %v5446_v6  ;;  %v5467_v57 = vld [vmem:[#allocation3 + $0x160] sm:$0xff]  ;;  %v5473_v6 = vld [vmem:[#allocation3 + $0x190] sm:$0xff] }
 0x671   :  { %5916 = vmatprep.subr.bf16.mxu0 %v5452_v39  ;;  %6368 = vmatprep.subr.bf16.mxu1 %v5454_v23  ;;  %v5475_v39 = vld [vmem:[#allocation3 + $0x1a0] sm:$0xff]  ;;  %v5472_v23 = vld [vmem:[#allocation3 + $0x188] sm:$0xff] }
 0x674   :  { %5917 = vmatpush1.bf16.msra.mxu0 %v5451_v24  ;;  %6369 = vmatpush1.bf16.msra.mxu1 %v5453_v63  ;;  %v5474_v24 = vld [vmem:[#allocation3 + $0x198] sm:$0xff]  ;;  %v5480_v63 = vld [vmem:[#allocation3 + $0x1c8] sm:$0xff] }
 0x675   :  { %5918 = vmatprep.subr.bf16.mxu0 %v5459_v46  ;;  %6370 = vmatprep.subr.bf16.mxu1 %v5461_v33  ;;  %v5482_v46 = vld [vmem:[#allocation3 + $0x1d8] sm:$0xff]  ;;  %v5479_v33 = vld [vmem:[#allocation3 + $0x1c0] sm:$0xff] }
 0x678   :  { %5919 = vmatpush1.bf16.msra.mxu0 %v5458_v17  ;;  %6371 = vmatpush1.bf16.msra.mxu1 %v5460_v16  ;;  %v5481_v17 = vld [vmem:[#allocation3 + $0x1d0] sm:$0xff]  ;;  %v5487_v16 = vld [vmem:[#allocation3 + $0x200] sm:$0xff] }
 0x679   :  { %5920 = vmatprep.subr.bf16.mxu0 %v5466_v61  ;;  %6372 = vmatprep.subr.bf16.mxu1 %v5468_v25  ;;  %v5489_v61 = vld [vmem:[#allocation3 + $0x210] sm:$0xff]  ;;  %v5486_v25 = vld [vmem:[#allocation3 + $0x1f8] sm:$0xff] }
 0x67c   :  { %5921 = vmatpush1.bf16.msra.mxu0 %v5465_v27  ;;  %6373 = vmatpush1.bf16.msra.mxu1 %v5467_v57  ;;  %v5488_v27 = vld [vmem:[#allocation3 + $0x208] sm:$0xff]  ;;  %v5494_v57 = vld [vmem:[#allocation3 + $0x238] sm:$0xff] }
 0x67d   :  { %5922 = vmatprep.subr.bf16.mxu0 %v5473_v6  ;;  %6374 = vmatprep.subr.bf16.mxu1 %v5475_v39  ;;  %v5496_v6 = vld [vmem:[#allocation3 + $0x248] sm:$0xff]  ;;  %v5493_v39 = vld [vmem:[#allocation3 + $0x230] sm:$0xff] }
 0x680   :  { %5923 = vmatpush1.bf16.msra.mxu0 %v5472_v23  ;;  %6375 = vmatpush1.bf16.msra.mxu1 %v5474_v24  ;;  %v5495_v23 = vld [vmem:[#allocation3 + $0x240] sm:$0xff]  ;;  %v5501_v24 = vld [vmem:[#allocation3 + $0x270] sm:$0xff] }
 0x681   :  { %5924 = vmatprep.subr.bf16.mxu0 %v5480_v63  ;;  %6376 = vmatprep.subr.bf16.mxu1 %v5482_v46  ;;  %v5503_v63 = vld [vmem:[#allocation3 + $0x280] sm:$0xff]  ;;  %v5500_v46 = vld [vmem:[#allocation3 + $0x268] sm:$0xff] }
 0x684   :  { %5925 = vmatpush1.bf16.msra.mxu0 %v5479_v33  ;;  %6377 = vmatpush1.bf16.msra.mxu1 %v5481_v17  ;;  %v5502_v33 = vld [vmem:[#allocation3 + $0x278] sm:$0xff]  ;;  %v5508_v17 = vld [vmem:[#allocation3 + $0x2a8] sm:$0xff] }
 0x685   :  { %5926 = vmatprep.subr.bf16.mxu0 %v5487_v16  ;;  %6378 = vmatprep.subr.bf16.mxu1 %v5489_v61  ;;  %v5510_v16 = vld [vmem:[#allocation3 + $0x2b8] sm:$0xff]  ;;  %v5507_v61 = vld [vmem:[#allocation3 + $0x2a0] sm:$0xff] }
 0x688   :  { %5927 = vmatpush1.bf16.msra.mxu0 %v5486_v25  ;;  %6379 = vmatpush1.bf16.msra.mxu1 %v5488_v27  ;;  %v5509_v25 = vld [vmem:[#allocation3 + $0x2b0] sm:$0xff]  ;;  %v5515_v27 = vld [vmem:[#allocation3 + $0x2e0] sm:$0xff] }
 0x689   :  { %5928 = vmatprep.subr.bf16.mxu0 %v5494_v57  ;;  %6380 = vmatprep.subr.bf16.mxu1 %v5496_v6  ;;  %v5517_v57 = vld [vmem:[#allocation3 + $0x2f0] sm:$0xff]  ;;  %v5514_v6 = vld [vmem:[#allocation3 + $0x2d8] sm:$0xff] }
 0x68c   :  { %5929 = vmatpush1.bf16.msra.mxu0 %v5493_v39  ;;  %6381 = vmatpush1.bf16.msra.mxu1 %v5495_v23  ;;  %v5516_v39 = vld [vmem:[#allocation3 + $0x2e8] sm:$0xff]  ;;  %v5522_v23 = vld [vmem:[#allocation3 + $0x318] sm:$0xff] }
 0x68d   :  { %5930 = vmatprep.subr.bf16.mxu0 %v5501_v24  ;;  %6382 = vmatprep.subr.bf16.mxu1 %v5503_v63  ;;  %v5524_v24 = vld [vmem:[#allocation3 + $0x328] sm:$0xff]  ;;  %v5521_v63 = vld [vmem:[#allocation3 + $0x310] sm:$0xff] }
 0x690   :  { %5931 = vmatpush1.bf16.msra.mxu0 %v5500_v46  ;;  %6383 = vmatpush1.bf16.msra.mxu1 %v5502_v33  ;;  %v5523_v46 = vld [vmem:[#allocation3 + $0x320] sm:$0xff]  ;;  %v5529_v33 = vld [vmem:[#allocation3 + $0x350] sm:$0xff] }
 0x691   :  { %5932 = vmatprep.subr.bf16.mxu0 %v5508_v17  ;;  %6384 = vmatprep.subr.bf16.mxu1 %v5510_v16  ;;  %v5531_v17 = vld [vmem:[#allocation3 + $0x360] sm:$0xff]  ;;  %v5528_v16 = vld [vmem:[#allocation3 + $0x348] sm:$0xff] }
 0x694   :  { %5933 = vmatpush1.bf16.msra.mxu0 %v5507_v61  ;;  %6385 = vmatpush1.bf16.msra.mxu1 %v5509_v25  ;;  %v5530_v61 = vld [vmem:[#allocation3 + $0x358] sm:$0xff]  ;;  %v5536_v25 = vld [vmem:[#allocation3 + $0x388] sm:$0xff] }
 0x695   :  { %5934 = vmatprep.subr.bf16.mxu0 %v5515_v27  ;;  %6386 = vmatprep.subr.bf16.mxu1 %v5517_v57  ;;  %v5538_v27 = vld [vmem:[#allocation3 + $0x398] sm:$0xff]  ;;  %v16708_v57 = vmax.f32 %v13875_v59, 0.0 }
 0x696   :  { %v5542_v59 = vld [vmem:[#allocation3 + $0x3b8] sm:$0xff] }
 0x698   :  { %5935 = vmatpush1.bf16.msra.mxu0 %v5514_v6  ;;  %6387 = vmatpush1.bf16.msra.mxu1 %v5516_v39  ;;  %v14525_v6 = vpack.c.bf16 %v16709_v35, %v16708_v57  ;;  %v5535_v39 = vld [vmem:[#allocation3 + $0x380] sm:$0xff]  ;;  %v5550_v35 = vld [vmem:[#allocation3 + $0x3f8] sm:$0xff]  ;;  %v5557_v57 = vld [vmem:[#allocation3 + $0x430] sm:$0xff] }
 0x699   :  { %5936 = vmatprep.subr.bf16.mxu0 %v5522_v23  ;;  %6388 = vmatprep.subr.bf16.mxu1 %v5524_v24  ;;  %v5537_v23 = vld [vmem:[#allocation3 + $0x390] sm:$0xff]  ;;  %v5543_v24 = vld [vmem:[#allocation3 + $0x3c0] sm:$0xff] }
 0x69c   :  { %5937 = vmatpush1.bf16.msra.mxu0 %v5521_v63  ;;  %6389 = vmatpush1.bf16.msra.mxu1 %v5523_v46  ;;  %v5545_v63 = vld [vmem:[#allocation3 + $0x3d0] sm:$0xff]  ;;  %v16710_v46 = vmax.f32 %v13943_v8, 0.0  ;;  %v5552_v8 = vld [vmem:[#allocation3 + $0x408] sm:$0xff] }
 0x69d   :  { %5938 = vmatprep.subr.bf16.mxu0 %v5529_v33  ;;  %6390 = vmatprep.subr.bf16.mxu1 %v5531_v17  ;;  %v16711_v33 = vmax.f32 %v13975_v5, 0.0  ;;  %v16712_v5 = vmax.f32 %v13939_v58, 0.0  ;;  %v5556_v58 = vld [vmem:[#allocation3 + $0x428] sm:$0xff] }
 0x69f   :  { %v14531_v17 = vpack.c.bf16 %v16711_v33, %v16710_v46  ;;  %v5564_v46 = vld [vmem:[#allocation3 + $0x468] sm:$0xff]  ;;  %v16717_v33 = vmax.f32 %v16631_v20, 0.0  ;;  %v5570_v20 = vld [vmem:[#allocation3 + $0x498] sm:$0xff] }
 0x6a0   :  { %5939 = vmatpush1.bf16.msra.mxu0 %v5528_v16  ;;  %6391 = vmatpush1.bf16.msra.mxu1 %v5530_v61  ;;  %v16713_v16 = vmax.f32 %v13971_v31, 0.0  ;;  %v5558_v31 = vld [vmem:[#allocation3 + $0x438] sm:$0xff] }
 0x6a1   :  { %6021 = vmatprep.subr.bf16.mxu0 %v5536_v25  ;;  %6473 = vmatprep.subr.bf16.mxu1 %v5538_v27  ;;  %v5549_v25 = vld [vmem:[#allocation3 + $0x3f0] sm:$0xff]  ;;  %v5551_v27 = vld [vmem:[#allocation3 + $0x400] sm:$0xff] }
 0x6a2   :  { %v14541_v61 = vpack.c.bf16 %v16713_v16, %v16712_v5  ;;  %v5573_v5 = vld [vmem:[#allocation3 + $0x4b0] sm:$0xff]  ;;  %v16718_v16 = vmax.f32 %v16640_v44, 0.0  ;;  %v5580_v44 = vld [vmem:[#allocation3 + $0x4e8] sm:$0xff] }
 0x6a3   :  { %5941 = vmatmul.mubr.bf16.vlgmr.msra.gmra.mrb[128].mxu0 %v14525_v6  ;;  %6393 = vmatmul.mubr.bf16.vlgmr.msra.gmra.mrb[128].mxu1 %v14525_v6 }
 0x6a4   :  { %6022 = vmatpush1.bf16.msra.mxu0 %v5535_v39  ;;  %6474 = vmatpush1.bf16.msra.mxu1 %v5537_v23  ;;  %v5559_v39 = vld [vmem:[#allocation3 + $0x440] sm:$0xff]  ;;  %v16714_v23 = vmax.f32 %v14007_v28, 0.0  ;;  %v5566_v28 = vld [vmem:[#allocation3 + $0x478] sm:$0xff] }
 0x6a5   :  { %6023 = vmatprep.subr.bf16.mxu0 %v5543_v24  ;;  %6475 = vmatprep.subr.bf16.mxu1 %v5545_v63  ;;  %v16715_v24 = vmax.f32 %v16632_v2, 0.0  ;;  %v16716_v2 = vmax.f32 %v14003_v60, 0.0  ;;  %v5572_v60 = vld [vmem:[#allocation3 + $0x4a8] sm:$0xff] }
 0x6a6   :  { %5950 = vmatprep.mubr.bf16.mxu0 %v14531_v17  ;;  %6402 = vmatprep.mubr.bf16.mxu1 %v14531_v17 }
 0x6a7   :  { %v14547_v63 = vpack.c.bf16 %v16715_v24, %v16714_v23  ;;  %v5577_v24 = vld [vmem:[#allocation3 + $0x4d0] sm:$0xff] }
 0x6a8   :  { %6024 = vmatpush1.bf16.msra.mxu0 %v5542_v59  ;;  %6476 = vmatpush1.bf16.msra.mxu1 %v5544_v13  ;;  %v14557_v59 = vpack.c.bf16 %v16717_v33, %v16716_v2  ;;  %v5563_v13 = vld [vmem:[#allocation3 + $0x460] sm:$0xff]  ;;  %v16723_v2 = vmax.f32 %v16664_v42, 0.0  ;;  %v16724_v42 = vmax.f32 %v16655_v53, 0.0  ;;  %v5600_v53 = vld [vmem:[#allocation3 + $0x588] sm:$0xff] }
 0x6a9   :  { %6025 = vmatprep.subr.bf16.mxu0 %v5550_v35  ;;  %6477 = vmatprep.subr.bf16.mxu1 %v5552_v8  ;;  %v5565_v35 = vld [vmem:[#allocation3 + $0x470] sm:$0xff]  ;;  %v5571_v8 = vld [vmem:[#allocation3 + $0x4a0] sm:$0xff] }
 0x6ab   :  { %5951 = vmatmul.mubr.bf16.gmra.mrb[132].mxu0 %v14541_v61  ;;  %6403 = vmatmul.mubr.bf16.gmra.mrb[132].mxu1 %v14541_v61 }
 0x6ac   :  { %6026 = vmatpush1.bf16.msra.mxu0 %v5549_v25  ;;  %6478 = vmatpush1.bf16.msra.mxu1 %v5551_v27  ;;  %v16719_v25 = vmax.f32 %v16648_v18, 0.0  ;;  %v16720_v18 = vmax.f32 %v16639_v47, 0.0  ;;  %v5586_v47 = vld [vmem:[#allocation3 + $0x518] sm:$0xff] }
 0x6ad   :  { %6027 = vmatprep.subr.bf16.mxu0 %v5557_v57  ;;  %6479 = vmatprep.subr.bf16.mxu1 %v5559_v39  ;;  %v5578_v57 = vld [vmem:[#allocation3 + $0x4d8] sm:$0xff]  ;;  %v16721_v39 = vmax.f32 %v16647_v34, 0.0  ;;  %v5584_v34 = vld [vmem:[#allocation3 + $0x508] sm:$0xff] }
 0x6ae   :  { %5960 = vmatprep.mubr.bf16.mxu0 %v14547_v63  ;;  %6412 = vmatprep.mubr.bf16.mxu1 %v14547_v63  ;;  %v14563_v27 = vpack.c.bf16 %v16719_v25, %v16718_v16  ;;  %v5593_v16 = vld [vmem:[#allocation3 + $0x550] sm:$0xff]  ;;  %v5599_v25 = vld [vmem:[#allocation3 + $0x580] sm:$0xff] }
 0x6af   :  { %v14573_v23 = vpack.c.bf16 %v16721_v39, %v16720_v18  ;;  %v5606_v18 = vld [vmem:[#allocation3 + $0x5b8] sm:$0xff]  ;;  %v16729_v39 = vmax.f32 %v16679_v62, 0.0 }
 0x6b0   :  { %6028 = vmatpush1.bf16.msra.mxu0 %v5556_v58  ;;  %6480 = vmatpush1.bf16.msra.mxu1 %v5558_v31  ;;  %v5579_v58 = vld [vmem:[#allocation3 + $0x4e0] sm:$0xff]  ;;  %v5585_v31 = vld [vmem:[#allocation3 + $0x510] sm:$0xff]  ;;  %v5614_v62 = vld [vmem:[#allocation3 + $0x5f8] sm:$0xff] }
 0x6b1   :  { %6029 = vmatprep.subr.bf16.mxu0 %v5564_v46  ;;  %6481 = vmatprep.subr.bf16.mxu1 %v5566_v28  ;;  %v5587_v46 = vld [vmem:[#allocation3 + $0x520] sm:$0xff]  ;;  %v16722_v28 = vmax.f32 %v16656_v29, 0.0  ;;  %v5594_v29 = vld [vmem:[#allocation3 + $0x558] sm:$0xff] }
 0x6b3   :  { %5961 = vmatmul.mubr.bf16.gmra.mrb[136].mxu0 %v14557_v59  ;;  %6413 = vmatmul.mubr.bf16.gmra.mrb[136].mxu1 %v14557_v59  ;;  %v14579_v33 = vpack.c.bf16 %v16723_v2, %v16722_v28  ;;  %v5615_v28 = vld [vmem:[#allocation3 + $0x600] sm:$0xff]  ;;  %v16730_v2 = vmax.f32 %v16688_v41, 0.0  ;;  %v5622_v41 = vld [vmem:[#allocation3 + $0x638] sm:$0xff] }
 0x6b4   :  { %6030 = vmatpush1.bf16.msra.mxu0 %v5563_v13  ;;  %6482 = vmatpush1.bf16.msra.mxu1 %v5565_v35  ;;  %v5592_v13 = vld [vmem:[#allocation3 + $0x548] sm:$0xff]  ;;  %v16725_v35 = vmax.f32 %v16663_v3, 0.0  ;;  %v5598_v3 = vld [vmem:[#allocation3 + $0x578] sm:$0xff] }
 0x6b5   :  { %6031 = vmatprep.subr.bf16.mxu0 %v5571_v8  ;;  %6483 = vmatprep.subr.bf16.mxu1 %v5573_v5  ;;  %v5591_v5 = vld [vmem:[#allocation3 + $0x540] sm:$0xff] }
 0x6b6   :  { %5970 = vmatprep.mubr.bf16.mxu0 %v14563_v27  ;;  %6422 = vmatprep.mubr.bf16.mxu1 %v14563_v27  ;;  %v14589_v8 = vpack.c.bf16 %v16725_v35, %v16724_v42  ;;  %v5619_v35 = vld [vmem:[#allocation3 + $0x620] sm:$0xff] }
 0x6b8   :  { %6032 = vmatpush1.bf16.msra.mxu0 %v5570_v20  ;;  %6484 = vmatpush1.bf16.msra.mxu1 %v5572_v60  ;;  %v5601_v20 = vld [vmem:[#allocation3 + $0x590] sm:$0xff]  ;;  %v16726_v60 = vmax.f32 %v16672_v19, 0.0  ;;  %v5608_v19 = vld [vmem:[#allocation3 + $0x5c8] sm:$0xff] }
 0x6b9   :  { %6033 = vmatprep.subr.bf16.mxu0 %v5578_v57  ;;  %6485 = vmatprep.subr.bf16.mxu1 %v5580_v44  ;;  %v16727_v57 = vmax.f32 %v16680_v9, 0.0  ;;  %v16728_v9 = vmax.f32 %v16671_v40, 0.0  ;;  %v5612_v40 = vld [vmem:[#allocation3 + $0x5e8] sm:$0xff] }
 0x6bb   :  { %5971 = vmatmul.mubr.bf16.gmra.mrb[140].mxu0 %v14573_v23  ;;  %6423 = vmatmul.mubr.bf16.gmra.mrb[140].mxu1 %v14573_v23  ;;  %v14595_v44 = vpack.c.bf16 %v16727_v57, %v16726_v60  ;;  %v16735_v60 = vmax.f32 %v14359_v11, 0.0  ;;  %v16736_v11 = vmax.f32 %v16703_v51, 0.0  ;;  %v5642_v51 = vld [vmem:[#allocation3 + $0x6d8] sm:$0xff] }
 0x6bc   :  { %6034 = vmatpush1.bf16.msra.mxu0 %v5577_v24  ;;  %6486 = vmatpush1.bf16.msra.mxu1 %v5579_v58  ;;  %v14605_v24 = vpack.c.bf16 %v16729_v39, %v16728_v9  ;;  %v5605_v58 = vld [vmem:[#allocation3 + $0x5b0] sm:$0xff]  ;;  %v5635_v9 = vld [vmem:[#allocation3 + $0x6a0] sm:$0xff] }
 0x6bd   :  { %6035 = vmatprep.subr.bf16.mxu0 %v5585_v31  ;;  %6487 = vmatprep.subr.bf16.mxu1 %v5587_v46  ;;  %v5607_v31 = vld [vmem:[#allocation3 + $0x5c0] sm:$0xff]  ;;  %v5613_v46 = vld [vmem:[#allocation3 + $0x5f0] sm:$0xff] }
 0x6be   :  { %5980 = vmatprep.mubr.bf16.mxu0 %v14579_v33  ;;  %6432 = vmatprep.mubr.bf16.mxu1 %v14579_v33  ;;  %v5641_v39 = vld [vmem:[#allocation3 + $0x6d0] sm:$0xff] }
 0x6c0   :  { %6036 = vmatpush1.bf16.msra.mxu0 %v5584_v34  ;;  %6488 = vmatpush1.bf16.msra.mxu1 %v5586_v47  ;;  %v16731_v34 = vmax.f32 %v16696_v56, 0.0  ;;  %v16732_v56 = vmax.f32 %v16687_v36, 0.0  ;;  %v5628_v36 = vld [vmem:[#allocation3 + $0x668] sm:$0xff] }
 0x6c1   :  { %6037 = vmatprep.subr.bf16.mxu0 %v5592_v13  ;;  %6489 = vmatprep.subr.bf16.mxu1 %v5594_v29  ;;  %v5620_v13 = vld [vmem:[#allocation3 + $0x628] sm:$0xff]  ;;  %v16733_v29 = vmax.f32 %v16695_v21, 0.0  ;;  %v5626_v21 = vld [vmem:[#allocation3 + $0x658] sm:$0xff] }
 0x6c2   :  { %v14611_v47 = vpack.c.bf16 %v16731_v34, %v16730_v2  ;;  %v5648_v2 = vld [vmem:[#allocation3 + $0x708] sm:$0xff] }
 0x6c3   :  { %5981 = vmatmul.mubr.bf16.gmra.mrb[144].mxu0 %v14589_v8  ;;  %6433 = vmatmul.mubr.bf16.gmra.mrb[144].mxu1 %v14589_v8  ;;  %v14621_v42 = vpack.c.bf16 %v16733_v29, %v16732_v56  ;;  %v16741_v34 = vld [vmem:[#allocation74_spill] sm:$0xff]  ;;  %v5655_v56 = vld [vmem:[#allocation3 + $0x740] sm:$0xff]  ;;  %v5657_v29 = vld [vmem:[#allocation3 + $0x750] sm:$0xff] }
 0x6c4   :  { %6038 = vmatpush1.bf16.msra.mxu0 %v5591_v5  ;;  %6490 = vmatpush1.bf16.msra.mxu1 %v5593_v16  ;;  %v5621_v5 = vld [vmem:[#allocation3 + $0x630] sm:$0xff]  ;;  %v5627_v16 = vld [vmem:[#allocation3 + $0x660] sm:$0xff] }
 0x6c5   :  { %6039 = vmatprep.subr.bf16.mxu0 %v5599_v25  ;;  %6491 = vmatprep.subr.bf16.mxu1 %v5601_v20  ;;  %v5629_v25 = vld [vmem:[#allocation3 + $0x670] sm:$0xff]  ;;  %v16734_v20 = vmax.f32 %v16704_v55, 0.0  ;;  %v5636_v55 = vld [vmem:[#allocation3 + $0x6a8] sm:$0xff] }
 0x6c6   :  { %5990 = vmatprep.mubr.bf16.mxu0 %v14595_v44  ;;  %6442 = vmatprep.mubr.bf16.mxu1 %v14595_v44 }
 0x6c7   :  { %v14627_v57 = vpack.c.bf16 %v16735_v60, %v16734_v20  ;;  %v5656_v60 = vld [vmem:[#allocation3 + $0x748] sm:$0xff] }
 0x6c8   :  { %6040 = vmatpush1.bf16.msra.mxu0 %v5598_v3  ;;  %6492 = vmatpush1.bf16.msra.mxu1 %v5600_v53  ;;  %v5634_v3 = vld [vmem:[#allocation3 + $0x698] sm:$0xff]  ;;  %v16737_v53 = vmax.f32 %v14355_v1, 0.0  ;;  %v5640_v1 = vld [vmem:[#allocation3 + $0x6c8] sm:$0xff] }
 0x6c9   :  { %6041 = vmatprep.subr.bf16.mxu0 %v5606_v18  ;;  %6493 = vmatprep.subr.bf16.mxu1 %v5608_v19  ;;  %v5633_v19 = vld [vmem:[#allocation3 + $0x690] sm:$0xff] }
 0x6ca   :  { %v14637_v18 = vpack.c.bf16 %v16737_v53, %v16736_v11  ;;  %v16749_v11 = vld [vmem:[#allocation81_spill] sm:$0xff] }
 0x6cb   :  { %5991 = vmatmul.mubr.bf16.gmra.mrb[148].mxu0 %v14605_v24  ;;  %6443 = vmatmul.mubr.bf16.gmra.mrb[148].mxu1 %v14605_v24  ;;  %v16750_v53 = vmax.f32 %v16749_v11, 0.0 }
 0x6cc   :  { %6042 = vmatpush1.bf16.msra.mxu0 %v5605_v58  ;;  %6494 = vmatpush1.bf16.msra.mxu1 %v5607_v31  ;;  %v5643_v58 = vld [vmem:[#allocation3 + $0x6e0] sm:$0xff]  ;;  %v16738_v31 = vmax.f32 %v13887_v45, 0.0  ;;  %v5650_v45 = vld [vmem:[#allocation3 + $0x718] sm:$0xff] }
 0x6cd   :  { %6043 = vmatprep.subr.bf16.mxu0 %v5613_v46  ;;  %6495 = vmatprep.subr.bf16.mxu1 %v5615_v28  ;;  %v16739_v46 = vmax.f32 %v13919_v30, 0.0  ;;  %v16740_v30 = vmax.f32 %v13883_v15, 0.0  ;;  %v5654_v15 = vld [vmem:[#allocation3 + $0x738] sm:$0xff] }
 0x6ce   :  { %6000 = vmatprep.mubr.bf16.mxu0 %v14611_v47  ;;  %6452 = vmatprep.mubr.bf16.mxu1 %v14611_v47 }
 0x6cf   :  { %v14643_v28 = vpack.c.bf16 %v16739_v46, %v16738_v31  ;;  %v5671_v31 = vld [vmem:[#allocation3 + $0x7c0] sm:$0xff]  ;;  %v16751_v46 = vld [vmem:[#allocation83_spill] sm:$0xff] }
 0x6d0   :  { %6044 = vmatpush1.bf16.msra.mxu0 %v5612_v40  ;;  %6496 = vmatpush1.bf16.msra.mxu1 %v5614_v62  ;;  %v16742_v40 = vmax.f32 %v16741_v34, 0.0  ;;  %v5670_v34 = vld [vmem:[#allocation3 + $0x7b8] sm:$0xff] }
 0x6d1   :  { %6045 = vmatprep.subr.bf16.mxu0 %v5620_v13  ;;  %6497 = vmatprep.subr.bf16.mxu1 %v5622_v41  ;;  %v5647_v13 = vld [vmem:[#allocation3 + $0x700] sm:$0xff]  ;;  %v5649_v41 = vld [vmem:[#allocation3 + $0x710] sm:$0xff] }
 0x6d2   :  { %v14653_v62 = vpack.c.bf16 %v16742_v40, %v16740_v30  ;;  %v5668_v30 = vld [vmem:[#allocation3 + $0x7a8] sm:$0xff] }
 0x6d3   :  { %6001 = vmatmul.mubr.bf16.gmra.mrb[152].mxu0 %v14621_v42  ;;  %6453 = vmatmul.mubr.bf16.gmra.mrb[152].mxu1 %v14621_v42  ;;  %v5676_v40 = vld [vmem:[#allocation3 + $0x7e8] sm:$0xff] }
 0x6d4   :  { %6046 = vmatpush1.bf16.msra.mxu0 %v5619_v35  ;;  %6498 = vmatpush1.bf16.msra.mxu1 %v5621_v5  ;;  %v16743_v35 = vld [vmem:[#allocation132_spill] sm:$0xff] }
 0x6d5   :  { %6047 = vmatprep.subr.bf16.mxu0 %v5627_v16  ;;  %6499 = vmatprep.subr.bf16.mxu1 %v5629_v25  ;;  %v16744_v5 = vmax.f32 %v16743_v35, 0.0  ;;  %v16745_v16 = vld [vmem:[#allocation135_spill] sm:$0xff] }
 0x6d6   :  { %6010 = vmatprep.mubr.bf16.mxu0 %v14627_v57  ;;  %6462 = vmatprep.mubr.bf16.mxu1 %v14627_v57  ;;  %v16746_v25 = vmax.f32 %v16745_v16, 0.0  ;;  %v5675_v16 = vld [vmem:[#allocation3 + $0x7e0] sm:$0xff] }
 0x6d8   :  { %6048 = vmatpush1.bf16.msra.mxu0 %v5626_v21  ;;  %6500 = vmatpush1.bf16.msra.mxu1 %v5628_v36  ;;  %v14659_v20 = vpack.c.bf16 %v16746_v25, %v16744_v5  ;;  %v5662_v21 = vld [vmem:[#allocation3 + $0x778] sm:$0xff]  ;;  %v5664_v36 = vld [vmem:[#allocation3 + $0x788] sm:$0xff]  ;;  %v5677_v25 = vld [vmem:[#allocation3 + $0x7f0] sm:$0xff] }
 0x6d9   :  { %6049 = vmatprep.subr.bf16.mxu0 %v5634_v3  ;;  %6501 = vmatprep.subr.bf16.mxu1 %v5636_v55  ;;  %v16747_v3 = vld [vmem:[#allocation133_spill] sm:$0xff] }
 0x6da   :  { %v16748_v55 = vmax.f32 %v16747_v3, 0.0  ;;  %v16761_v3 = vld [vmem:[#allocation30_spill] sm:$0xff] }
 0x6db   :  { %6011 = vmatmul.mubr.bf16.gmra.mrb[156].mxu0 %v14637_v18  ;;  %6463 = vmatmul.mubr.bf16.gmra.mrb[156].mxu1 %v14637_v18 }
 0x6dc   :  { %6050 = vmatpush1.bf16.msra.mxu0 %v5633_v19  ;;  %6502 = vmatpush1.bf16.msra.mxu1 %v5635_v9  ;;  %v14669_v19 = vpack.c.bf16 %v16750_v53, %v16748_v55  ;;  %v5661_v9 = vld [vmem:[#allocation3 + $0x770] sm:$0xff]  ;;  %v16762_v55 = vmax.f32 %v16761_v3, 0.0  ;;  %v5682_v53 = vld [vmem:[#allocation3 + $0x818] sm:$0xff] }
 0x6dd   :  { %6051 = vmatprep.subr.bf16.mxu0 %v5641_v39  ;;  %6503 = vmatprep.subr.bf16.mxu1 %v5643_v58  ;;  %v5663_v39 = vld [vmem:[#allocation3 + $0x780] sm:$0xff]  ;;  %v5669_v58 = vld [vmem:[#allocation3 + $0x7b0] sm:$0xff] }
 0x6de   :  { %6053 = vmatprep.mubr.bf16.mxu0 %v14643_v28  ;;  %6505 = vmatprep.mubr.bf16.mxu1 %v14643_v28 }
 0x6e0   :  { %6052 = vmatpush1.bf16.msra.mxu0 %v5640_v1  ;;  %6504 = vmatpush1.bf16.msra.mxu1 %v5642_v51  ;;  %v16752_v1 = vmax.f32 %v16751_v46, 0.0  ;;  %v16753_v51 = vld [vmem:[#allocation48_spill] sm:$0xff] }
 0x6e1   :  { %6134 = vmatprep.subr.bf16.mxu0 %v5648_v2  ;;  %6586 = vmatprep.subr.bf16.mxu1 %v5650_v45  ;;  %v16754_v2 = vmax.f32 %v16753_v51, 0.0 }
 0x6e3   :  { %6054 = vmatmul.mubr.bf16.vlgmr.msra.gmra.mrb[128].mxu0 %v14653_v62  ;;  %6506 = vmatmul.mubr.bf16.vlgmr.msra.gmra.mrb[128].mxu1 %v14653_v62  ;;  %v14675_v45 = vpack.c.bf16 %v16754_v2, %v16752_v1  ;;  %v16765_v1 = vld [vmem:[#allocation64_spill] sm:$0xff] }
 0x6e4   :  { %6135 = vmatpush1.bf16.msra.mxu0 %v5647_v13  ;;  %6587 = vmatpush1.bf16.msra.mxu1 %v5649_v41  ;;  %v5678_v13 = vld [vmem:[#allocation3 + $0x7f8] sm:$0xff]  ;;  %v16766_v51 = vmax.f32 %v16765_v1, 0.0  ;;  %v16775_v1 = vld [vmem:[#allocation49_spill] sm:$0xff] }
 0x6e5   :  { %6136 = vmatprep.subr.bf16.mxu0 %v5655_v56  ;;  %6588 = vmatprep.subr.bf16.mxu1 %v5657_v29  ;;  %v16755_v41 = vld [vmem:[#allocation84_spill] sm:$0xff]  ;;  %v16757_v29 = vld [vmem:[#allocation65_spill] sm:$0xff] }
 0x6e6   :  { %6063 = vmatprep.mubr.bf16.mxu0 %v14659_v20  ;;  %6515 = vmatprep.mubr.bf16.mxu1 %v14659_v20  ;;  %v16756_v56 = vmax.f32 %v16755_v41, 0.0  ;;  %v16758_v35 = vmax.f32 %v16757_v29, 0.0  ;;  %v16767_v41 = vld [vmem:[#allocation34_spill] sm:$0xff] }
 0x6e7   :  { %v16769_v29 = vld [vmem:[#allocation46_spill] sm:$0xff] }
 0x6e8   :  { %6137 = vmatpush1.bf16.msra.mxu0 %v5654_v15  ;;  %6589 = vmatpush1.bf16.msra.mxu1 %v5656_v60  ;;  %v14685_v5 = vpack.c.bf16 %v16758_v35, %v16756_v56  ;;  %v5683_v15 = vld [vmem:[#allocation3 + $0x820] sm:$0xff]  ;;  %v5685_v60 = vld [vmem:[#allocation3 + $0x830] sm:$0xff]  ;;  %v16768_v56 = vmax.f32 %v16767_v41, 0.0  ;;  %v16770_v35 = vmax.f32 %v16769_v29, 0.0  ;;  %v5712_v41 = vld [vmem:[#allocation3 + $0x908] sm:$0xff] }
 0x6e9   :  { %6138 = vmatprep.subr.bf16.mxu0 %v5662_v21  ;;  %6590 = vmatprep.subr.bf16.mxu1 %v5664_v36  ;;  %v16759_v21 = vld [vmem:[#allocation62_spill] sm:$0xff] }
 0x6ea   :  { %v16760_v36 = vmax.f32 %v16759_v21, 0.0  ;;  %v5706_v21 = vld [vmem:[#allocation3 + $0x8d8] sm:$0xff]  ;;  %v5720_v29 = vld [vmem:[#allocation3 + $0x948] sm:$0xff] }
 0x6eb   :  { %6064 = vmatmul.mubr.bf16.gmra.mrb[132].mxu0 %v14669_v19  ;;  %6516 = vmatmul.mubr.bf16.gmra.mrb[132].mxu1 %v14669_v19 }
 0x6ec   :  { %6139 = vmatpush1.bf16.msra.mxu0 %v5661_v9  ;;  %6591 = vmatpush1.bf16.msra.mxu1 %v5663_v39  ;;  %v14691_v11 = vpack.c.bf16 %v16762_v55, %v16760_v36  ;;  %v5684_v9 = vld [vmem:[#allocation3 + $0x828] sm:$0xff]  ;;  %v5690_v39 = vld [vmem:[#allocation3 + $0x858] sm:$0xff]  ;;  %v16771_v36 = vld [vmem:[#allocation31_spill] sm:$0xff] }
 0x6ed   :  { %6140 = vmatprep.subr.bf16.mxu0 %v5669_v58  ;;  %6592 = vmatprep.subr.bf16.mxu1 %v5671_v31  ;;  %v5692_v58 = vld [vmem:[#allocation3 + $0x868] sm:$0xff]  ;;  %v16763_v31 = vld [vmem:[#allocation56_spill] sm:$0xff]  ;;  %v16772_v3 = vmax.f32 %v16771_v36, 0.0  ;;  %v16773_v55 = vld [vmem:[#allocation43_spill] sm:$0xff] }
 0x6ee   :  { %6073 = vmatprep.mubr.bf16.mxu0 %v14675_v45  ;;  %6525 = vmatprep.mubr.bf16.mxu1 %v14675_v45  ;;  %v16764_v46 = vmax.f32 %v16763_v31, 0.0  ;;  %v5711_v31 = vld [vmem:[#allocation3 + $0x900] sm:$0xff]  ;;  %v5717_v36 = vld [vmem:[#allocation3 + $0x930] sm:$0xff] }
 0x6f0   :  { %6141 = vmatpush1.bf16.msra.mxu0 %v5668_v30  ;;  %6593 = vmatpush1.bf16.msra.mxu1 %v5670_v34  ;;  %v14701_v2 = vpack.c.bf16 %v16766_v51, %v16764_v46  ;;  %v5689_v30 = vld [vmem:[#allocation3 + $0x850] sm:$0xff]  ;;  %v5691_v34 = vld [vmem:[#allocation3 + $0x860] sm:$0xff]  ;;  %v16776_v51 = vmax.f32 %v16775_v1, 0.0  ;;  %v5724_v1 = vld [vmem:[#allocation3 + $0x968] sm:$0xff] }
 0x6f1   :  { %6142 = vmatprep.subr.bf16.mxu0 %v5676_v40  ;;  %6594 = vmatprep.subr.bf16.mxu1 %v5678_v13  ;;  %v5697_v40 = vld [vmem:[#allocation3 + $0x890] sm:$0xff]  ;;  %v5699_v13 = vld [vmem:[#allocation3 + $0x8a0] sm:$0xff] }
 0x6f2   :  { %v5713_v46 = vld [vmem:[#allocation3 + $0x910] sm:$0xff] }
 0x6f3   :  { %6074 = vmatmul.mubr.bf16.gmra.mrb[136].mxu0 %v14685_v5  ;;  %6526 = vmatmul.mubr.bf16.gmra.mrb[136].mxu1 %v14685_v5 }
 0x6f4   :  { %6143 = vmatpush1.bf16.msra.mxu0 %v5675_v16  ;;  %6595 = vmatpush1.bf16.msra.mxu1 %v5677_v25  ;;  %v14707_v16 = vpack.c.bf16 %v16770_v35, %v16768_v56  ;;  %v5696_v25 = vld [vmem:[#allocation3 + $0x888] sm:$0xff]  ;;  %v5718_v56 = vld [vmem:[#allocation3 + $0x938] sm:$0xff]  ;;  %v16779_v35 = vld [vmem:[#allocation55_spill] sm:$0xff] }
 0x6f5   :  { %6144 = vmatprep.subr.bf16.mxu0 %v5683_v15  ;;  %6596 = vmatprep.subr.bf16.mxu1 %v5685_v60  ;;  %v5698_v15 = vld [vmem:[#allocation3 + $0x898] sm:$0xff]  ;;  %v5704_v60 = vld [vmem:[#allocation3 + $0x8c8] sm:$0xff] }
 0x6f6   :  { %6083 = vmatprep.mubr.bf16.mxu0 %v14691_v11  ;;  %6535 = vmatprep.mubr.bf16.mxu1 %v14691_v11 }
 0x6f8   :  { %6145 = vmatpush1.bf16.msra.mxu0 %v5682_v53  ;;  %6597 = vmatpush1.bf16.msra.mxu1 %v5684_v9  ;;  %v16774_v53 = vmax.f32 %v16773_v55, 0.0  ;;  %v5725_v55 = vld [vmem:[#allocation3 + $0x970] sm:$0xff] }
 0x6f9   :  { %6146 = vmatprep.subr.bf16.mxu0 %v5690_v39  ;;  %6598 = vmatprep.subr.bf16.mxu1 %v5692_v58  ;;  %v5703_v39 = vld [vmem:[#allocation3 + $0x8c0] sm:$0xff]  ;;  %v5705_v58 = vld [vmem:[#allocation3 + $0x8d0] sm:$0xff] }
 0x6fa   :  { %v14717_v9 = vpack.c.bf16 %v16774_v53, %v16772_v3  ;;  %v5719_v3 = vld [vmem:[#allocation3 + $0x940] sm:$0xff] }
 0x6fb   :  { %6084 = vmatmul.mubr.bf16.gmra.mrb[140].mxu0 %v14701_v2  ;;  %6536 = vmatmul.mubr.bf16.gmra.mrb[140].mxu1 %v14701_v2  ;;  %v5727_v53 = vld [vmem:[#allocation3 + $0x980] sm:$0xff] }
 0x6fc   :  { %6147 = vmatpush1.bf16.msra.mxu0 %v5689_v30  ;;  %6599 = vmatpush1.bf16.msra.mxu1 %v5691_v34  ;;  %v16777_v30 = vld [vmem:[#allocation40_spill] sm:$0xff] }
 0x6fd   :  { %6148 = vmatprep.subr.bf16.mxu0 %v5697_v40  ;;  %6600 = vmatprep.subr.bf16.mxu1 %v5699_v13  ;;  %v16778_v34 = vmax.f32 %v16777_v30, 0.0  ;;  %v5710_v13 = vld [vmem:[#allocation3 + $0x8f8] sm:$0xff]  ;;  %v5732_v30 = vld [vmem:[#allocation3 + $0x9a8] sm:$0xff] }
 0x6fe   :  { %6093 = vmatprep.mubr.bf16.mxu0 %v14707_v16  ;;  %6545 = vmatprep.mubr.bf16.mxu1 %v14707_v16 }
 0x6ff   :  { %v14723_v40 = vpack.c.bf16 %v16778_v34, %v16776_v51  ;;  %v5726_v51 = vld [vmem:[#allocation3 + $0x978] sm:$0xff] }
 0x700   :  { %6149 = vmatpush1.bf16.msra.mxu0 %v5696_v25  ;;  %6601 = vmatpush1.bf16.msra.mxu1 %v5698_v15  ;;  %v16780_v25 = vmax.f32 %v16779_v35, 0.0  ;;  %v16781_v15 = vld [vmem:[#allocation38_spill] sm:$0xff]  ;;  %v5734_v34 = vld [vmem:[#allocation3 + $0x9b8] sm:$0xff]  ;;  %v5733_v35 = vld [vmem:[#allocation3 + $0x9b0] sm:$0xff] }
 0x701   :  { %6150 = vmatprep.subr.bf16.mxu0 %v5704_v60  ;;  %6602 = vmatprep.subr.bf16.mxu1 %v5706_v21  ;;  %v16782_v60 = vmax.f32 %v16781_v15, 0.0  ;;  %v5741_v15 = vld [vmem:[#allocation3 + $0x9f0] sm:$0xff] }
 0x703   :  { %6094 = vmatmul.mubr.bf16.gmra.mrb[144].mxu0 %v14717_v9  ;;  %6546 = vmatmul.mubr.bf16.gmra.mrb[144].mxu1 %v14717_v9  ;;  %v14733_v21 = vpack.c.bf16 %v16782_v60, %v16780_v25  ;;  %v5739_v25 = vld [vmem:[#allocation3 + $0x9e0] sm:$0xff]  ;;  %v16789_v60 = vmax.f32 %v14335_v22, 0.0  ;;  %v5748_v22 = vld [vmem:[#allocation3 + $0xa28] sm:$0xff] }
 0x704   :  { %6151 = vmatpush1.bf16.msra.mxu0 %v5703_v39  ;;  %6603 = vmatpush1.bf16.msra.mxu1 %v5705_v58  ;;  %v16783_v39 = vld [vmem:[#allocation44_spill] sm:$0xff] }
 0x705   :  { %6152 = vmatprep.subr.bf16.mxu0 %v5711_v31  ;;  %6604 = vmatprep.subr.bf16.mxu1 %v5713_v46  ;;  %v16784_v58 = vmax.f32 %v16783_v39, 0.0  ;;  %v16785_v31 = vmax.f32 %v16698_v32, 0.0  ;;  %v16792_v39 = vmax.f32 %v14363_v38, 0.0  ;;  %v5754_v38 = vld [vmem:[#allocation3 + $0xa58] sm:$0xff] }
 0x706   :  { %6103 = vmatprep.mubr.bf16.mxu0 %v14723_v40  ;;  %6555 = vmatprep.mubr.bf16.mxu1 %v14723_v40 }
 0x707   :  { %v14739_v46 = vpack.c.bf16 %v16785_v31, %v16784_v58  ;;  %v5745_v31 = vld [vmem:[#allocation3 + $0xa10] sm:$0xff] }
 0x708   :  { %6153 = vmatpush1.bf16.msra.mxu0 %v5710_v13  ;;  %6605 = vmatpush1.bf16.msra.mxu1 %v5712_v41  ;;  %v16786_v13 = vld [vmem:[#allocation37_spill] sm:$0xff]  ;;  %v16788_v41 = vmax.f32 %v16697_v0, 0.0  ;;  %v5738_v0 = vld [vmem:[#allocation3 + $0x9d8] sm:$0xff] }
 0x709   :  { %6154 = vmatprep.subr.bf16.mxu0 %v5718_v56  ;;  %6606 = vmatprep.subr.bf16.mxu1 %v5720_v29  ;;  %v16787_v32 = vmax.f32 %v16786_v13, 0.0  ;;  %v5731_v29 = vld [vmem:[#allocation3 + $0x9a0] sm:$0xff] }
 0x70b   :  { %6104 = vmatmul.mubr.bf16.gmra.mrb[148].mxu0 %v14733_v21  ;;  %6556 = vmatmul.mubr.bf16.gmra.mrb[148].mxu1 %v14733_v21  ;;  %v14749_v56 = vpack.c.bf16 %v16788_v41, %v16787_v32  ;;  %v16795_v32 = vld [vmem:[#allocation75_spill] sm:$0xff] }
 0x70c   :  { %6155 = vmatpush1.bf16.msra.mxu0 %v5717_v36  ;;  %6607 = vmatpush1.bf16.msra.mxu1 %v5719_v3  ;;  %v16790_v36 = vmax.f32 %v14367_v48, 0.0  ;;  %v16791_v48 = vmax.f32 %v14331_v52, 0.0  ;;  %v16796_v41 = vmax.f32 %v16795_v32, 0.0  ;;  %v5752_v52 = vld [vmem:[#allocation3 + $0xa48] sm:$0xff] }
 0x70d   :  { %6156 = vmatprep.subr.bf16.mxu0 %v5725_v55  ;;  %6608 = vmatprep.subr.bf16.mxu1 %v5727_v53  ;;  %v5740_v55 = vld [vmem:[#allocation3 + $0x9e8] sm:$0xff]  ;;  %v5746_v53 = vld [vmem:[#allocation3 + $0xa18] sm:$0xff] }
 0x70e   :  { %6113 = vmatprep.mubr.bf16.mxu0 %v14739_v46  ;;  %6565 = vmatprep.mubr.bf16.mxu1 %v14739_v46  ;;  %v14755_v3 = vpack.c.bf16 %v16790_v36, %v16789_v60  ;;  %v14765_v58 = vpack.c.bf16 %v16792_v39, %v16791_v48  ;;  %v16799_v36 = vld [vmem:[#allocation76_spill] sm:$0xff]  ;;  %v5767_v48 = vld [vmem:[#allocation3 + $0xac0] sm:$0xff]  ;;  %v5769_v39 = vld [vmem:[#allocation3 + $0xad0] sm:$0xff] }
 0x70f   :  { %v5768_v32 = vld [vmem:[#allocation3 + $0xac8] sm:$0xff] }
 0x710   :  { %6157 = vmatpush1.bf16.msra.mxu0 %v5724_v1  ;;  %6609 = vmatpush1.bf16.msra.mxu1 %v5726_v51  ;;  %v5747_v1 = vld [vmem:[#allocation3 + $0xa20] sm:$0xff]  ;;  %v5753_v51 = vld [vmem:[#allocation3 + $0xa50] sm:$0xff] }
 0x711   :  { %6158 = vmatprep.subr.bf16.mxu0 %v5732_v30  ;;  %6610 = vmatprep.subr.bf16.mxu1 %v5734_v34  ;;  %v5755_v30 = vld [vmem:[#allocation3 + $0xa60] sm:$0xff] }
 0x712   :  { %v16793_v34 = vld [vmem:[#allocation129_spill] sm:$0xff] }
 0x713   :  { %6114 = vmatmul.mubr.bf16.gmra.mrb[152].mxu0 %v14749_v56  ;;  %6566 = vmatmul.mubr.bf16.gmra.mrb[152].mxu1 %v14749_v56  ;;  %v16794_v13 = vmax.f32 %v16793_v34, 0.0 }
 0x714   :  { %6159 = vmatpush1.bf16.msra.mxu0 %v5731_v29  ;;  %6611 = vmatpush1.bf16.msra.mxu1 %v5733_v35  ;;  %v5760_v35 = vld [vmem:[#allocation3 + $0xa88] sm:$0xff] }
 0x715   :  { %6160 = vmatprep.subr.bf16.mxu0 %v5739_v25  ;;  %6612 = vmatprep.subr.bf16.mxu1 %v5741_v15  ;;  %v14771_v29 = vpack.c.bf16 %v16796_v41, %v16794_v13  ;;  %v5762_v25 = vld [vmem:[#allocation3 + $0xa98] sm:$0xff]  ;;  %v16797_v15 = vld [vmem:[#allocation127_spill] sm:$0xff] }
 0x716   :  { %6123 = vmatprep.mubr.bf16.mxu0 %v14755_v3  ;;  %6575 = vmatprep.mubr.bf16.mxu1 %v14755_v3  ;;  %v16798_v60 = vmax.f32 %v16797_v15, 0.0  ;;  %v5766_v13 = vld [vmem:[#allocation3 + $0xab8] sm:$0xff] }
 0x717   :  { %v5774_v41 = vld [vmem:[#allocation3 + $0xaf8] sm:$0xff] }
 0x718   :  { %6161 = vmatpush1.bf16.msra.mxu0 %v5738_v0  ;;  %6613 = vmatpush1.bf16.msra.mxu1 %v5740_v55  ;;  %v16800_v0 = vmax.f32 %v16799_v36, 0.0  ;;  %v5773_v36 = vld [vmem:[#allocation3 + $0xaf0] sm:$0xff] }
 0x719   :  { %6162 = vmatprep.subr.bf16.mxu0 %v5746_v53  ;;  %6614 = vmatprep.subr.bf16.mxu1 %v5748_v22  ;;  %v5759_v53 = vld [vmem:[#allocation3 + $0xa80] sm:$0xff]  ;;  %v5761_v22 = vld [vmem:[#allocation3 + $0xa90] sm:$0xff] }
 0x71a   :  { %v14781_v55 = vpack.c.bf16 %v16800_v0, %v16798_v60  ;;  %v5775_v0 = vld [vmem:[#allocation3 + $0xb00] sm:$0xff] }
 0x71b   :  { %6124 = vmatmul.mubr.bf16.gmra.mrb[156].mxu0 %v14765_v58  ;;  %6576 = vmatmul.mubr.bf16.gmra.mrb[156].mxu1 %v14765_v58 }
 0x71c   :  { %6163 = vmatpush1.bf16.msra.mxu0 %v5745_v31  ;;  %6615 = vmatpush1.bf16.msra.mxu1 %v5747_v1  ;;  %v16801_v31 = vld [vmem:[#allocation78_spill] sm:$0xff] }
 0x71d   :  { %6164 = vmatprep.subr.bf16.mxu0 %v5753_v51  ;;  %6616 = vmatprep.subr.bf16.mxu1 %v5755_v30  ;;  %v16802_v1 = vmax.f32 %v16801_v31, 0.0  ;;  %v16803_v51 = vld [vmem:[#allocation136_spill] sm:$0xff]  ;;  %v16811_v31 = vld [vmem:[#allocation87_spill] sm:$0xff] }
 0x71e   :  { %6166 = vmatprep.mubr.bf16.mxu0 %v14771_v29  ;;  %6618 = vmatprep.mubr.bf16.mxu1 %v14771_v29  ;;  %v16804_v30 = vmax.f32 %v16803_v51, 0.0 }
 0x720   :  { %6165 = vmatpush1.bf16.msra.mxu0 %v5752_v52  ;;  %6617 = vmatpush1.bf16.msra.mxu1 %v5754_v38  ;;  %v14787_v34 = vpack.c.bf16 %v16804_v30, %v16802_v1  ;;  %v5776_v52 = vld [vmem:[#allocation3 + $0xb08] sm:$0xff]  ;;  %v16812_v1 = vmax.f32 %v16811_v31, 0.0  ;;  %v16821_v31 = vld [vmem:[#allocation95_spill] sm:$0xff] }
 0x721   :  { %6247 = vmatprep.subr.bf16.mxu0 %v5760_v35  ;;  %6699 = vmatprep.subr.bf16.mxu1 %v5762_v25  ;;  %v16805_v38 = vld [vmem:[#allocation134_spill] sm:$0xff]  ;;  %v16807_v25 = vld [vmem:[#allocation137_spill] sm:$0xff] }
 0x722   :  { %v16806_v35 = vmax.f32 %v16805_v38, 0.0  ;;  %v16808_v15 = vmax.f32 %v16807_v25, 0.0  ;;  %v5780_v30 = vld [vmem:[#allocation3 + $0xb28] sm:$0xff] }
 0x723   :  { %6167 = vmatmul.mubr.bf16.vlgmr.msra.gmra.mrb[128].mxu0 %v14781_v55  ;;  %6619 = vmatmul.mubr.bf16.vlgmr.msra.gmra.mrb[128].mxu1 %v14781_v55 }
 0x724   :  { %6248 = vmatpush1.bf16.msra.mxu0 %v5759_v53  ;;  %6700 = vmatpush1.bf16.msra.mxu1 %v5761_v22  ;;  %v14797_v60 = vpack.c.bf16 %v16808_v15, %v16806_v35  ;;  %v5781_v53 = vld [vmem:[#allocation3 + $0xb30] sm:$0xff]  ;;  %v5783_v22 = vld [vmem:[#allocation3 + $0xb40] sm:$0xff]  ;;  %v16816_v35 = vld [vmem:[#allocation58_spill] sm:$0xff] }
 0x725   :  { %6249 = vmatprep.subr.bf16.mxu0 %v5767_v48  ;;  %6701 = vmatprep.subr.bf16.mxu1 %v5769_v39  ;;  %v16809_v48 = vld [vmem:[#allocation139_spill] sm:$0xff]  ;;  %v16817_v25 = vmax.f32 %v16816_v35, 0.0  ;;  %v16826_v35 = vld [vmem:[#allocation32_spill] sm:$0xff] }
 0x726   :  { %6176 = vmatprep.mubr.bf16.mxu0 %v14787_v34  ;;  %6628 = vmatprep.mubr.bf16.mxu1 %v14787_v34  ;;  %v16810_v39 = vmax.f32 %v16809_v48, 0.0  ;;  %v16819_v48 = vld [vmem:[#allocation91_spill] sm:$0xff] }
 0x728   :  { %6250 = vmatpush1.bf16.msra.mxu0 %v5766_v13  ;;  %6702 = vmatpush1.bf16.msra.mxu1 %v5768_v32  ;;  %v14803_v51 = vpack.c.bf16 %v16812_v1, %v16810_v39  ;;  %v5782_v13 = vld [vmem:[#allocation3 + $0xb38] sm:$0xff]  ;;  %v5788_v32 = vld [vmem:[#allocation3 + $0xb68] sm:$0xff]  ;;  %v16820_v39 = vmax.f32 %v16819_v48, 0.0  ;;  %v16822_v1 = vmax.f32 %v16821_v31, 0.0 }
 0x729   :  { %6251 = vmatprep.subr.bf16.mxu0 %v5774_v41  ;;  %6703 = vmatprep.subr.bf16.mxu1 %v5776_v52  ;;  %v5790_v41 = vld [vmem:[#allocation3 + $0xb78] sm:$0xff]  ;;  %v16814_v52 = vld [vmem:[#allocation85_spill] sm:$0xff] }
 0x72a   :  { %16813 = vst [vmem:[#allocation123_spill] sm:$0xff] %v14803_v51  ;;  %v16815_v38 = vmax.f32 %v16814_v52, 0.0  ;;  %v16824_v52 = vld [vmem:[#allocation66_spill] sm:$0xff] }
 0x72b   :  { %6177 = vmatmul.mubr.bf16.gmra.mrb[132].mxu0 %v14797_v60  ;;  %6629 = vmatmul.mubr.bf16.gmra.mrb[132].mxu1 %v14797_v60 }
 0x72c   :  { %6252 = vmatpush1.bf16.msra.mxu0 %v5773_v36  ;;  %6704 = vmatpush1.bf16.msra.mxu1 %v5775_v0  ;;  %v14813_v15 = vpack.c.bf16 %v16817_v25, %v16815_v38  ;;  %v5787_v36 = vld [vmem:[#allocation3 + $0xb60] sm:$0xff]  ;;  %v5789_v0 = vld [vmem:[#allocation3 + $0xb70] sm:$0xff]  ;;  %v16825_v38 = vmax.f32 %v16824_v52, 0.0  ;;  %v16827_v25 = vmax.f32 %v16826_v35, 0.0  ;;  %v16834_v52 = vld [vmem:[#allocation36_spill] sm:$0xff] }
 0x72d   :  { %6253 = vmatprep.subr.bf16.mxu0 %v5781_v53  ;;  %6705 = vmatprep.subr.bf16.mxu1 %v5783_v22  ;;  %v5795_v53 = vld [vmem:[#allocation3 + $0xba0] sm:$0xff]  ;;  %v5797_v22 = vld [vmem:[#allocation3 + $0xbb0] sm:$0xff] }
 0x72e   :  { %6186 = vmatprep.mubr.bf16.mxu0 %v14803_v51  ;;  %6638 = vmatprep.mubr.bf16.mxu1 %v14803_v51  ;;  %16818 = vst [vmem:[#allocation125_spill] sm:$0xff] %v14813_v15  ;;  %v14819_v51 = vpack.c.bf16 %v16822_v1, %v16820_v39  ;;  %v14829_v48 = vpack.c.bf16 %v16827_v25, %v16825_v38  ;;  %v16829_v39 = vld [vmem:[#allocation99_spill] sm:$0xff]  ;;  %v16835_v38 = vmax.f32 %v16834_v52, 0.0 }
 0x72f   :  { %v16830_v31 = vmax.f32 %v16829_v39, 0.0  ;;  %v16831_v1 = vld [vmem:[#allocation103_spill] sm:$0xff] }
 0x730   :  { %6254 = vmatpush1.bf16.msra.mxu0 %v5780_v30  ;;  %6706 = vmatpush1.bf16.msra.mxu1 %v5782_v13  ;;  %16823 = vst [vmem:[#allocation124_spill] sm:$0xff] %v14819_v51  ;;  %v5794_v30 = vld [vmem:[#allocation3 + $0xb98] sm:$0xff]  ;;  %v5796_v13 = vld [vmem:[#allocation3 + $0xba8] sm:$0xff]  ;;  %16828 = vst [vmem:[#allocation126_spill] sm:$0xff] %v14829_v48 }
 0x731   :  { %6255 = vmatprep.subr.bf16.mxu0 %v5788_v32  ;;  %6707 = vmatprep.subr.bf16.mxu1 %v5790_v41  ;;  %v5802_v32 = vld [vmem:[#allocation3 + $0xbd8] sm:$0xff]  ;;  %v5804_v41 = vld [vmem:[#allocation3 + $0xbe8] sm:$0xff]  ;;  %v16838_v39 = vld [vmem:[#allocation107_spill] sm:$0xff] }
 0x732   :  { %v16843_v52 = vld [vmem:[#allocation51_spill] sm:$0xff] }
 0x733   :  { %6187 = vmatmul.mubr.bf16.gmra.mrb[136].mxu0 %v14813_v15  ;;  %6639 = vmatmul.mubr.bf16.gmra.mrb[136].mxu1 %v14813_v15 }
 0x734   :  { %6256 = vmatpush1.bf16.msra.mxu0 %v5787_v36  ;;  %6708 = vmatpush1.bf16.msra.mxu1 %v5789_v0  ;;  %v5801_v36 = vld [vmem:[#allocation3 + $0xbd0] sm:$0xff]  ;;  %v5803_v0 = vld [vmem:[#allocation3 + $0xbe0] sm:$0xff] }
 0x735   :  { %6257 = vmatprep.subr.bf16.mxu0 %v5795_v53  ;;  %6709 = vmatprep.subr.bf16.mxu1 %v5797_v22  ;;  %v5809_v53 = vld [vmem:[#allocation3 + $0xc10] sm:$0xff]  ;;  %v5811_v22 = vld [vmem:[#allocation3 + $0xc20] sm:$0xff] }
 0x736   :  { %6196 = vmatprep.mubr.bf16.mxu0 %v14819_v51  ;;  %6648 = vmatprep.mubr.bf16.mxu1 %v14819_v51  ;;  %v16832_v51 = vmax.f32 %v16831_v1, 0.0  ;;  %v16840_v1 = vld [vmem:[#allocation111_spill] sm:$0xff] }
 0x738   :  { %6258 = vmatpush1.bf16.msra.mxu0 %v5794_v30  ;;  %6710 = vmatpush1.bf16.msra.mxu1 %v5796_v13  ;;  %v14835_v15 = vpack.c.bf16 %v16832_v51, %v16830_v31  ;;  %v5808_v30 = vld [vmem:[#allocation3 + $0xc08] sm:$0xff]  ;;  %v5810_v13 = vld [vmem:[#allocation3 + $0xc18] sm:$0xff]  ;;  %v16836_v51 = vld [vmem:[#allocation47_spill] sm:$0xff]  ;;  %v16839_v31 = vmax.f32 %v16838_v39, 0.0 }
 0x739   :  { %6259 = vmatprep.subr.bf16.mxu0 %v5802_v32  ;;  %6711 = vmatprep.subr.bf16.mxu1 %v5804_v41  ;;  %v5816_v32 = vld [vmem:[#allocation3 + $0xc48] sm:$0xff]  ;;  %v5818_v41 = vld [vmem:[#allocation3 + $0xc58] sm:$0xff]  ;;  %v16837_v35 = vmax.f32 %v16836_v51, 0.0  ;;  %v16847_v39 = vld [vmem:[#allocation115_spill] sm:$0xff] }
 0x73a   :  { %16833 = vst [vmem:[#allocation70_spill] sm:$0xff] %v14835_v15 }
 0x73b   :  { %6197 = vmatmul.mubr.bf16.gmra.mrb[140].mxu0 %v14829_v48  ;;  %6649 = vmatmul.mubr.bf16.gmra.mrb[140].mxu1 %v14829_v48  ;;  %v14845_v25 = vpack.c.bf16 %v16837_v35, %v16835_v38  ;;  %v16844_v38 = vmax.f32 %v16843_v52, 0.0  ;;  %v16850_v52 = vld [vmem:[#allocation39_spill] sm:$0xff] }
 0x73c   :  { %6260 = vmatpush1.bf16.msra.mxu0 %v5801_v36  ;;  %6712 = vmatpush1.bf16.msra.mxu1 %v5803_v0  ;;  %v5815_v36 = vld [vmem:[#allocation3 + $0xc40] sm:$0xff]  ;;  %v5817_v0 = vld [vmem:[#allocation3 + $0xc50] sm:$0xff] }
 0x73d   :  { %6261 = vmatprep.subr.bf16.mxu0 %v5809_v53  ;;  %6713 = vmatprep.subr.bf16.mxu1 %v5811_v22  ;;  %v5823_v53 = vld [vmem:[#allocation3 + $0xc80] sm:$0xff]  ;;  %v5825_v22 = vld [vmem:[#allocation3 + $0xc90] sm:$0xff] }
 0x73e   :  { %6206 = vmatprep.mubr.bf16.mxu0 %v14835_v15  ;;  %6658 = vmatprep.mubr.bf16.mxu1 %v14835_v15  ;;  %v16841_v15 = vmax.f32 %v16840_v1, 0.0  ;;  %v16849_v1 = vmax.f32 %v16700_v37, 0.0  ;;  %v16851_v37 = vmax.f32 %v16850_v52, 0.0  ;;  %v5859_v52 = vld [vmem:[#allocation3 + $0xda0] sm:$0xff] }
 0x740   :  { %6262 = vmatpush1.bf16.msra.mxu0 %v5808_v30  ;;  %6714 = vmatpush1.bf16.msra.mxu1 %v5810_v13  ;;  %v14851_v48 = vpack.c.bf16 %v16841_v15, %v16839_v31  ;;  %v5822_v30 = vld [vmem:[#allocation3 + $0xc78] sm:$0xff]  ;;  %v5824_v13 = vld [vmem:[#allocation3 + $0xc88] sm:$0xff]  ;;  %v16845_v15 = vld [vmem:[#allocation35_spill] sm:$0xff]  ;;  %v16848_v31 = vmax.f32 %v16847_v39, 0.0  ;;  %v16854_v39 = vmax.f32 %v14375_v49, 0.0  ;;  %v16855_v49 = vmax.f32 %v14339_v4, 0.0 }
 0x741   :  { %6263 = vmatprep.subr.bf16.mxu0 %v5816_v32  ;;  %6715 = vmatprep.subr.bf16.mxu1 %v5818_v41  ;;  %v5830_v32 = vld [vmem:[#allocation3 + $0xcb8] sm:$0xff]  ;;  %v5832_v41 = vld [vmem:[#allocation3 + $0xcc8] sm:$0xff]  ;;  %v16846_v51 = vmax.f32 %v16845_v15, 0.0 }
 0x742   :  { %16842 = vst [vmem:[#allocation72_spill] sm:$0xff] %v14851_v48  ;;  %v5864_v4 = vld [vmem:[#allocation3 + $0xdc8] sm:$0xff] }
 0x743   :  { %6207 = vmatmul.mubr.bf16.gmra.mrb[144].mxu0 %v14845_v25  ;;  %6659 = vmatmul.mubr.bf16.gmra.mrb[144].mxu1 %v14845_v25  ;;  %v14861_v35 = vpack.c.bf16 %v16846_v51, %v16844_v38  ;;  %v16852_v38 = vmax.f32 %v16699_v12, 0.0  ;;  %v5843_v51 = vld [vmem:[#allocation3 + $0xd20] sm:$0xff]  ;;  %v5850_v12 = vld [vmem:[#allocation3 + $0xd58] sm:$0xff] }
 0x744   :  { %6264 = vmatpush1.bf16.msra.mxu0 %v5815_v36  ;;  %6716 = vmatpush1.bf16.msra.mxu1 %v5817_v0  ;;  %v5829_v36 = vld [vmem:[#allocation3 + $0xcb0] sm:$0xff]  ;;  %v5831_v0 = vld [vmem:[#allocation3 + $0xcc0] sm:$0xff] }
 0x745   :  { %6265 = vmatprep.subr.bf16.mxu0 %v5823_v53  ;;  %6717 = vmatprep.subr.bf16.mxu1 %v5825_v22  ;;  %v5837_v53 = vld [vmem:[#allocation3 + $0xcf0] sm:$0xff]  ;;  %v5839_v22 = vld [vmem:[#allocation3 + $0xd00] sm:$0xff]  ;;  %v14877_v15 = vpack.c.bf16 %v16852_v38, %v16851_v37 }
 0x746   :  { %6216 = vmatprep.mubr.bf16.mxu0 %v14851_v48  ;;  %6668 = vmatprep.mubr.bf16.mxu1 %v14851_v48  ;;  %v14867_v48 = vpack.c.bf16 %v16849_v1, %v16848_v31  ;;  %v5852_v1 = vld [vmem:[#allocation3 + $0xd68] sm:$0xff]  ;;  %v5865_v37 = vld [vmem:[#allocation3 + $0xdd0] sm:$0xff]  ;;  %v5867_v38 = vld [vmem:[#allocation3 + $0xde0] sm:$0xff] }
 0x748   :  { %6266 = vmatpush1.bf16.msra.mxu0 %v5822_v30  ;;  %6718 = vmatpush1.bf16.msra.mxu1 %v5824_v13  ;;  %v5836_v30 = vld [vmem:[#allocation3 + $0xce8] sm:$0xff]  ;;  %v5838_v13 = vld [vmem:[#allocation3 + $0xcf8] sm:$0xff] }
 0x749   :  { %6267 = vmatprep.subr.bf16.mxu0 %v5830_v32  ;;  %6719 = vmatprep.subr.bf16.mxu1 %v5832_v41  ;;  %v5844_v32 = vld [vmem:[#allocation3 + $0xd28] sm:$0xff]  ;;  %v5846_v41 = vld [vmem:[#allocation3 + $0xd38] sm:$0xff] }
 0x74b   :  { %6217 = vmatmul.mubr.bf16.gmra.mrb[148].mxu0 %v14861_v35  ;;  %6669 = vmatmul.mubr.bf16.gmra.mrb[148].mxu1 %v14861_v35 }
 0x74c   :  { %6268 = vmatpush1.bf16.msra.mxu0 %v5829_v36  ;;  %6720 = vmatpush1.bf16.msra.mxu1 %v5831_v0  ;;  %v5845_v36 = vld [vmem:[#allocation3 + $0xd30] sm:$0xff]  ;;  %v5851_v0 = vld [vmem:[#allocation3 + $0xd60] sm:$0xff] }
 0x74d   :  { %6269 = vmatprep.subr.bf16.mxu0 %v5837_v53  ;;  %6721 = vmatprep.subr.bf16.mxu1 %v5839_v22  ;;  %v5853_v53 = vld [vmem:[#allocation3 + $0xd70] sm:$0xff]  ;;  %v16853_v22 = vmax.f32 %v14343_v43, 0.0  ;;  %v5860_v43 = vld [vmem:[#allocation3 + $0xda8] sm:$0xff] }
 0x74e   :  { %6226 = vmatprep.mubr.bf16.mxu0 %v14867_v48  ;;  %6678 = vmatprep.mubr.bf16.mxu1 %v14867_v48 }
 0x74f   :  { %v14883_v31 = vpack.c.bf16 %v16854_v39, %v16853_v22  ;;  %v5428_v39 = vld [vmem:[#allocation3 + $0x28] sm:$0xff] }
 0x750   :  { %6270 = vmatpush1.bf16.msra.mxu0 %v5836_v30  ;;  %6722 = vmatpush1.bf16.msra.mxu1 %v5838_v13  ;;  %v5858_v30 = vld [vmem:[#allocation3 + $0xd98] sm:$0xff]  ;;  %v16856_v13 = vmax.f32 %v14371_v50, 0.0 }
 0x751   :  { %6271 = vmatprep.subr.bf16.mxu0 %v5844_v32  ;;  %6723 = vmatprep.subr.bf16.mxu1 %v5846_v41  ;;  %v5857_v41 = vld [vmem:[#allocation3 + $0xd90] sm:$0xff]  ;;  %v5866_v50 = vld [vmem:[#allocation3 + $0xdd8] sm:$0xff] }
 0x752   :  { %v14893_v32 = vpack.c.bf16 %v16856_v13, %v16855_v49 }
 0x753   :  { %6227 = vmatmul.mubr.bf16.gmra.mrb[152].mxu0 %v14877_v15  ;;  %6679 = vmatmul.mubr.bf16.gmra.mrb[152].mxu1 %v14877_v15 }
 0x754   :  { %6272 = vmatpush1.bf16.msra.mxu0 %v5843_v51  ;;  %6724 = vmatpush1.bf16.msra.mxu1 %v5845_v36  ;;  %v16857_v51 = vld [vmem:[#allocation130_spill] sm:$0xff] }
 0x755   :  { %6273 = vmatprep.subr.bf16.mxu0 %v5851_v0  ;;  %6725 = vmatprep.subr.bf16.mxu1 %v5853_v53  ;;  %v16858_v36 = vmax.f32 %v16857_v51, 0.0  ;;  %v16859_v0 = vld [vmem:[#allocation131_spill] sm:$0xff]  ;;  %v16868_v51 = vld [vmem:[#allocation82_spill] sm:$0xff] }
 0x756   :  { %6236 = vmatprep.mubr.bf16.mxu0 %v14883_v31  ;;  %6688 = vmatprep.mubr.bf16.mxu1 %v14883_v31  ;;  %v16860_v53 = vmax.f32 %v16859_v0, 0.0 }
 0x758   :  { %6274 = vmatpush1.bf16.msra.mxu0 %v5850_v12  ;;  %6726 = vmatpush1.bf16.msra.mxu1 %v5852_v1  ;;  %v14899_v22 = vpack.c.bf16 %v16860_v53, %v16858_v36  ;;  %v5485_v12 = vld [vmem:[#allocation3 + $0x1f0] sm:$0xff]  ;;  %v16861_v1 = vld [vmem:[#allocation128_spill] sm:$0xff]  ;;  %v16869_v36 = vmax.f32 %v16868_v51, 0.0  ;;  %v5435_v53 = vld [vmem:[#allocation3 + $0x60] sm:$0xff] }
 0x759   :  { %6275 = vmatprep.subr.bf16.mxu0 %v5858_v30  ;;  %6727 = vmatprep.subr.bf16.mxu1 %v5860_v43  ;;  %v16862_v30 = vmax.f32 %v16861_v1, 0.0  ;;  %v16863_v43 = vld [vmem:[#allocation77_spill] sm:$0xff]  ;;  %v5492_v1 = vld [vmem:[#allocation3 + $0x228] sm:$0xff]  ;;  %v16878_v51 = vld [vmem:[#allocation88_spill] sm:$0xff] }
 0x75a   :  { %v16864_v49 = vmax.f32 %v16863_v43, 0.0 }
 0x75b   :  { %6237 = vmatmul.mubr.bf16.gmra.mrb[156].mxu0 %v14893_v32  ;;  %6689 = vmatmul.mubr.bf16.gmra.mrb[156].mxu1 %v14893_v32 }
 0x75c   :  { %6276 = vmatpush1.bf16.msra.mxu0 %v5857_v41  ;;  %6728 = vmatpush1.bf16.msra.mxu1 %v5859_v52  ;;  %v14909_v13 = vpack.c.bf16 %v16864_v49, %v16862_v30  ;;  %v5427_v41 = vld [vmem:[#allocation3 + $0x20] sm:$0xff]  ;;  %v5429_v52 = vld [vmem:[#allocation3 + $0x30] sm:$0xff]  ;;  %v16871_v30 = vld [vmem:[#allocation80_spill] sm:$0xff] }
 0x75d   :  { %6277 = vmatprep.subr.bf16.mxu0 %v5865_v37  ;;  %6729 = vmatprep.subr.bf16.mxu1 %v5867_v38  ;;  %v16866_v37 = vld [vmem:[#allocation79_spill] sm:$0xff]  ;;  %v16872_v43 = vmax.f32 %v16871_v30, 0.0  ;;  %v16873_v49 = vld [vmem:[#allocation138_spill] sm:$0xff] }
 0x75e   :  { %6279 = vmatprep.mubr.bf16.mxu0 %v14899_v22  ;;  %6731 = vmatprep.mubr.bf16.mxu1 %v14899_v22  ;;  %16865 = vst [vmem:[#allocation71_spill] sm:$0xff] %v14909_v13  ;;  %v16867_v38 = vmax.f32 %v16866_v37, 0.0  ;;  %v16874_v37 = vmax.f32 %v16873_v49, 0.0  ;;  %v5456_v30 = vld [vmem:[#allocation3 + $0x108] sm:$0xff]  ;;  %v16883_v49 = vld [vmem:[#allocation89_spill] sm:$0xff] }
 0x760   :  { %6278 = vmatpush1.bf16.msra.mxu0 %v5864_v4  ;;  %6730 = vmatpush1.bf16.msra.mxu1 %v5866_v50  ;;  %v14915_v0 = vpack.c.bf16 %v16869_v36, %v16867_v38  ;;  %v5434_v4 = vld [vmem:[#allocation3 + $0x58] sm:$0xff]  ;;  %v5436_v50 = vld [vmem:[#allocation3 + $0x68] sm:$0xff]  ;;  %v14925_v38 = vpack.c.bf16 %v16874_v37, %v16872_v43  ;;  %v16879_v36 = vmax.f32 %v16878_v51, 0.0  ;;  %v16881_v43 = vld [vmem:[#allocation141_spill] sm:$0xff] }
 0x761   :  { %6812 = vmatprep.subr.bf16.mxu0 %v5428_v39  ;;  %8506 = vmatprep.subr.bf16.mxu1 %v5485_v12  ;;  %v5442_v39 = vld [vmem:[#allocation3 + $0x98] sm:$0xff]  ;;  %v5499_v12 = vld [vmem:[#allocation3 + $0x260] sm:$0xff] }
 0x762   :  { %16870 = vst [vmem:[#allocation73_spill] sm:$0xff] %v14915_v0  ;;  %16875 = vst [vmem:[#allocation142_spill] sm:$0xff] %v14925_v38  ;;  %v16888_v51 = vld [vmem:[#allocation96_spill] sm:$0xff] }
 0x763   :  { %6280 = vmatmul.mubr.bf16.vlgmr.msra.gmra.mrb[128].mxu0 %v14909_v13  ;;  %6732 = vmatmul.mubr.bf16.vlgmr.msra.gmra.mrb[128].mxu1 %v14909_v13  ;;  %v5441_v13 = vld [vmem:[#allocation3 + $0x90] sm:$0xff] }
 0x764   :  { %6813 = vmatpush1.bf16.msra.mxu0 %v5427_v41  ;;  %8507 = vmatpush3.bf16.msra.mxu1 %v5429_v52  ;;  %v16876_v41 = vld [vmem:[#allocation140_spill] sm:$0xff] }
 0x765   :  { %6814 = vmatprep.subr.bf16.mxu0 %v5435_v53  ;;  %6289 = vmatprep.mubr.bf16.mxu0 %v14915_v0  ;;  %v16877_v52 = vmax.f32 %v16876_v41, 0.0  ;;  %v5450_v41 = vld [vmem:[#allocation3 + $0xd8] sm:$0xff] }
 0x766   :  { %6741 = vmatprep.mubr.bf16.mxu1 %v14915_v0  ;;  %8508 = vmatprep.subr.bf16.mxu1 %v5492_v1  ;;  %v5449_v0 = vld [vmem:[#allocation3 + $0xd0] sm:$0xff]  ;;  %v5443_v1 = vld [vmem:[#allocation3 + $0xa0] sm:$0xff] }
 0x767   :  { %v14931_v53 = vpack.c.bf16 %v16879_v36, %v16877_v52  ;;  %v16886_v52 = vld [vmem:[#allocation92_spill] sm:$0xff]  ;;  %v16889_v36 = vmax.f32 %v16888_v51, 0.0 }
 0x768   :  { %6815 = vmatpush1.bf16.msra.mxu0 %v5434_v4  ;;  %8509 = vmatpush3.bf16.msra.mxu1 %v5436_v50  ;;  %v5506_v4 = vld [vmem:[#allocation3 + $0x298] sm:$0xff]  ;;  %v5448_v50 = vld [vmem:[#allocation3 + $0xc8] sm:$0xff] }
 0x769   :  { %16880 = vst [vmem:[#allocation61_spill] sm:$0xff] %v14931_v53  ;;  %6816 = vmatprep.subr.bf16.mxu0 %v5442_v39  ;;  %8510 = vmatprep.subr.bf16.mxu1 %v5499_v12  ;;  %v16882_v39 = vmax.f32 %v16881_v43, 0.0  ;;  %v16884_v12 = vmax.f32 %v16883_v49, 0.0  ;;  %v5520_v43 = vld [vmem:[#allocation3 + $0x308] sm:$0xff] }
 0x76b   :  { %6290 = vmatmul.mubr.bf16.gmra.mrb[132].mxu0 %v14925_v38  ;;  %6742 = vmatmul.mubr.bf16.gmra.mrb[132].mxu1 %v14925_v38  ;;  %v14941_v37 = vpack.c.bf16 %v16884_v12, %v16882_v39  ;;  %v5470_v39 = vld [vmem:[#allocation3 + $0x178] sm:$0xff]  ;;  %v16893_v12 = vld [vmem:[#allocation97_spill] sm:$0xff] }
 0x76c   :  { %6817 = vmatpush1.bf16.msra.mxu0 %v5441_v13  ;;  %6299 = vmatprep.mubr.bf16.mxu0 %v14931_v53  ;;  %v16887_v13 = vmax.f32 %v16886_v52, 0.0 }
 0x76d   :  { %6818 = vmatprep.subr.bf16.mxu0 %v5449_v0  ;;  %6751 = vmatprep.mubr.bf16.mxu1 %v14931_v53  ;;  %16885 = vst [vmem:[#allocation90_spill] sm:$0xff] %v14941_v37  ;;  %v5455_v0 = vld [vmem:[#allocation3 + $0x100] sm:$0xff] }
 0x76e   :  { %8511 = vmatpush3.bf16.msra.mxu1 %v5443_v1  ;;  %v14947_v38 = vpack.c.bf16 %v16889_v36, %v16887_v13  ;;  %v5463_v53 = vld [vmem:[#allocation3 + $0x140] sm:$0xff]  ;;  %v5513_v1 = vld [vmem:[#allocation3 + $0x2d0] sm:$0xff]  ;;  %v16896_v13 = vld [vmem:[#allocation100_spill] sm:$0xff] }
 0x76f   :  { %8512 = vmatprep.subr.bf16.mxu1 %v5506_v4  ;;  %v5457_v4 = vld [vmem:[#allocation3 + $0x110] sm:$0xff]  ;;  %v16897_v51 = vmax.f32 %v16896_v13, 0.0  ;;  %v16898_v36 = vld [vmem:[#allocation104_spill] sm:$0xff]  ;;  %v5471_v13 = vld [vmem:[#allocation3 + $0x180] sm:$0xff] }
 0x770   :  { %6819 = vmatpush1.bf16.msra.mxu0 %v5448_v50  ;;  %16890 = vst [vmem:[#allocation53_spill] sm:$0xff] %v14947_v38  ;;  %v5462_v50 = vld [vmem:[#allocation3 + $0x138] sm:$0xff] }
 0x771   :  { %6820 = vmatprep.subr.bf16.mxu0 %v5456_v30  ;;  %v16891_v30 = vld [vmem:[#allocation93_spill] sm:$0xff] }
 0x772   :  { %8513 = vmatpush3.bf16.msra.mxu1 %v5450_v41  ;;  %v16892_v49 = vmax.f32 %v16891_v30, 0.0  ;;  %v16894_v41 = vmax.f32 %v16893_v12, 0.0  ;;  %v5484_v30 = vld [vmem:[#allocation3 + $0x1e8] sm:$0xff] }
 0x773   :  { %6300 = vmatmul.mubr.bf16.gmra.mrb[136].mxu0 %v14941_v37  ;;  %6752 = vmatmul.mubr.bf16.gmra.mrb[136].mxu1 %v14941_v37 }
 0x774   :  { %6821 = vmatpush1.bf16.msra.mxu0 %v5455_v0  ;;  %6309 = vmatprep.mubr.bf16.mxu0 %v14947_v38  ;;  %v14957_v52 = vpack.c.bf16 %v16894_v41, %v16892_v49  ;;  %v16899_v0 = vmax.f32 %v16898_v36, 0.0  ;;  %v16901_v49 = vld [vmem:[#allocation101_spill] sm:$0xff] }
 0x775   :  { %6822 = vmatprep.subr.bf16.mxu0 %v5463_v53  ;;  %6761 = vmatprep.mubr.bf16.mxu1 %v14947_v38  ;;  %v5469_v53 = vld [vmem:[#allocation3 + $0x170] sm:$0xff] }
 0x776   :  { %8514 = vmatprep.subr.bf16.mxu1 %v5513_v1  ;;  %16895 = vst [vmem:[#allocation94_spill] sm:$0xff] %v14957_v52  ;;  %v14963_v37 = vpack.c.bf16 %v16899_v0, %v16897_v51  ;;  %v5477_v38 = vld [vmem:[#allocation3 + $0x1b0] sm:$0xff]  ;;  %v5464_v1 = vld [vmem:[#allocation3 + $0x148] sm:$0xff]  ;;  %v16905_v51 = vld [vmem:[#allocation108_spill] sm:$0xff] }
 0x777   :  { %8515 = vmatpush3.bf16.msra.mxu1 %v5457_v4  ;;  %v5527_v4 = vld [vmem:[#allocation3 + $0x340] sm:$0xff]  ;;  %v16906_v36 = vmax.f32 %v16905_v51, 0.0  ;;  %v16907_v0 = vld [vmem:[#allocation112_spill] sm:$0xff] }
 0x778   :  { %6823 = vmatpush1.bf16.msra.mxu0 %v5462_v50  ;;  %16900 = vst [vmem:[#allocation60_spill] sm:$0xff] %v14963_v37  ;;  %8516 = vmatprep.subr.bf16.mxu1 %v5520_v43  ;;  %v5476_v50 = vld [vmem:[#allocation3 + $0x1a8] sm:$0xff]  ;;  %v16902_v43 = vmax.f32 %v16901_v49, 0.0  ;;  %v5597_v49 = vld [vmem:[#allocation3 + $0x570] sm:$0xff] }
 0x779   :  { %6824 = vmatprep.subr.bf16.mxu0 %v5470_v39  ;;  %v16903_v39 = vld [vmem:[#allocation105_spill] sm:$0xff] }
 0x77a   :  { %v16904_v12 = vmax.f32 %v16903_v39, 0.0 }
 0x77b   :  { %6310 = vmatmul.mubr.bf16.gmra.mrb[140].mxu0 %v14957_v52  ;;  %6762 = vmatmul.mubr.bf16.gmra.mrb[140].mxu1 %v14957_v52 }
 0x77c   :  { %6825 = vmatpush1.bf16.msra.mxu0 %v5469_v53  ;;  %6319 = vmatprep.mubr.bf16.mxu0 %v14963_v37  ;;  %v14973_v41 = vpack.c.bf16 %v16904_v12, %v16902_v43  ;;  %v16908_v53 = vmax.f32 %v16907_v0, 0.0  ;;  %v5498_v43 = vld [vmem:[#allocation3 + $0x258] sm:$0xff]  ;;  %v16911_v12 = vld [vmem:[#allocation113_spill] sm:$0xff]  ;;  %v16914_v0 = vmax.f32 %v16702_v14, 0.0 }
 0x77d   :  { %6826 = vmatprep.subr.bf16.mxu0 %v5477_v38  ;;  %6771 = vmatprep.mubr.bf16.mxu1 %v14963_v37  ;;  %v5483_v38 = vld [vmem:[#allocation3 + $0x1e0] sm:$0xff] }
 0x77e   :  { %8517 = vmatpush3.bf16.msra.mxu1 %v5464_v1  ;;  %v14979_v52 = vpack.c.bf16 %v16908_v53, %v16906_v36  ;;  %v5491_v37 = vld [vmem:[#allocation3 + $0x220] sm:$0xff]  ;;  %v5534_v1 = vld [vmem:[#allocation3 + $0x378] sm:$0xff]  ;;  %v16913_v36 = vmax.f32 %v16694_v10, 0.0  ;;  %v5512_v10 = vld [vmem:[#allocation3 + $0x2c8] sm:$0xff] }
 0x77f   :  { %8518 = vmatprep.subr.bf16.mxu1 %v5527_v4  ;;  %v5478_v4 = vld [vmem:[#allocation3 + $0x1b8] sm:$0xff] }
 0x780   :  { %6827 = vmatpush1.bf16.msra.mxu0 %v5476_v50  ;;  %v5490_v50 = vld [vmem:[#allocation3 + $0x218] sm:$0xff]  ;;  %v14995_v53 = vpack.c.bf16 %v16914_v0, %v16913_v36 }
 0x781   :  { %6828 = vmatprep.subr.bf16.mxu0 %v5484_v30  ;;  %v16909_v30 = vld [vmem:[#allocation109_spill] sm:$0xff]  ;;  %v5526_v36 = vld [vmem:[#allocation3 + $0x338] sm:$0xff] }
 0x782   :  { %8519 = vmatpush3.bf16.msra.mxu1 %v5471_v13  ;;  %v16910_v39 = vmax.f32 %v16909_v30, 0.0  ;;  %v16912_v13 = vmax.f32 %v16911_v12, 0.0  ;;  %v16919_v30 = vmax.f32 %v14383_v7, 0.0  ;;  %v5511_v12 = vld [vmem:[#allocation3 + $0x2c0] sm:$0xff] }
 0x783   :  { %6320 = vmatmul.mubr.bf16.gmra.mrb[144].mxu0 %v14973_v41  ;;  %6772 = vmatmul.mubr.bf16.gmra.mrb[144].mxu1 %v14973_v41  ;;  %v16922_v7 = vld [vmem:[#allocation57_spill] sm:$0xff] }
 0x784   :  { %6829 = vmatpush1.bf16.msra.mxu0 %v5483_v38  ;;  %6329 = vmatprep.mubr.bf16.mxu0 %v14979_v52  ;;  %v14989_v51 = vpack.c.bf16 %v16912_v13, %v16910_v39  ;;  %v5505_v38 = vld [vmem:[#allocation3 + $0x290] sm:$0xff]  ;;  %v5519_v13 = vld [vmem:[#allocation3 + $0x300] sm:$0xff] }
 0x785   :  { %6830 = vmatprep.subr.bf16.mxu0 %v5491_v37  ;;  %6781 = vmatprep.mubr.bf16.mxu1 %v14979_v52  ;;  %v5497_v37 = vld [vmem:[#allocation3 + $0x250] sm:$0xff] }
 0x786   :  { %8520 = vmatprep.subr.bf16.mxu1 %v5534_v1  ;;  %v5504_v1 = vld [vmem:[#allocation3 + $0x288] sm:$0xff] }
 0x787   :  { %8521 = vmatpush3.bf16.msra.mxu1 %v5478_v4  ;;  %v16915_v4 = vld [vmem:[#allocation117_spill] sm:$0xff] }
 0x788   :  { %6831 = vmatpush1.bf16.msra.mxu0 %v5490_v50  ;;  %8570 = vmatprep.subr.bf16.mxu1 %v5597_v49  ;;  %v16916_v14 = vmax.f32 %v16915_v4, 0.0  ;;  %v16917_v50 = vmax.f32 %v16701_v54, 0.0  ;;  %v5518_v54 = vld [vmem:[#allocation3 + $0x2f8] sm:$0xff]  ;;  %v16924_v4 = vld [vmem:[#allocation69_spill] sm:$0xff] }
 0x789   :  { %6832 = vmatprep.subr.bf16.mxu0 %v5498_v43  ;;  %v16918_v43 = vmax.f32 %v14351_v26, 0.0  ;;  %v16920_v26 = vld [vmem:[#allocation68_spill] sm:$0xff] }
 0x78a   :  { %v15005_v49 = vpack.c.bf16 %v16917_v50, %v16916_v14  ;;  %v16921_v0 = vmax.f32 %v16920_v26, 0.0  ;;  %v5532_v14 = vld [vmem:[#allocation3 + $0x368] sm:$0xff]  ;;  %v5554_v26 = vld [vmem:[#allocation3 + $0x418] sm:$0xff] }
 0x78b   :  { %6330 = vmatmul.mubr.bf16.gmra.mrb[148].mxu0 %v14989_v51  ;;  %6782 = vmatmul.mubr.bf16.gmra.mrb[148].mxu1 %v14989_v51  ;;  %v15011_v39 = vpack.c.bf16 %v16919_v30, %v16918_v43  ;;  %v5540_v50 = vld [vmem:[#allocation3 + $0x3a8] sm:$0xff]  ;;  %v5539_v43 = vld [vmem:[#allocation3 + $0x3a0] sm:$0xff]  ;;  %v5541_v30 = vld [vmem:[#allocation3 + $0x3b0] sm:$0xff] }
 0x78c   :  { %6833 = vmatpush1.bf16.msra.mxu0 %v5497_v37  ;;  %6339 = vmatprep.mubr.bf16.mxu0 %v14995_v53  ;;  %v16923_v37 = vmax.f32 %v16922_v7, 0.0  ;;  %v5553_v7 = vld [vmem:[#allocation3 + $0x410] sm:$0xff] }
 0x78d   :  { %6834 = vmatprep.subr.bf16.mxu0 %v5505_v38  ;;  %6791 = vmatprep.mubr.bf16.mxu1 %v14995_v53 }
 0x78e   :  { %v15021_v38 = vpack.c.bf16 %v16923_v37, %v16921_v0  ;;  %v5611_v0 = vld [vmem:[#allocation3 + $0x5e0] sm:$0xff]  ;;  %v5561_v37 = vld [vmem:[#allocation3 + $0x450] sm:$0xff] }
 0x790   :  { %6835 = vmatpush1.bf16.msra.mxu0 %v5504_v1  ;;  %v5525_v1 = vld [vmem:[#allocation3 + $0x330] sm:$0xff] }
 0x791   :  { %6836 = vmatprep.subr.bf16.mxu0 %v5512_v10  ;;  %v5533_v10 = vld [vmem:[#allocation3 + $0x370] sm:$0xff] }
 0x793   :  { %6340 = vmatmul.mubr.bf16.gmra.mrb[152].mxu0 %v15005_v49  ;;  %6792 = vmatmul.mubr.bf16.gmra.mrb[152].mxu1 %v15005_v49 }
 0x794   :  { %6837 = vmatpush1.bf16.msra.mxu0 %v5511_v12  ;;  %6349 = vmatprep.mubr.bf16.mxu0 %v15011_v39  ;;  %v5547_v12 = vld [vmem:[#allocation3 + $0x3e0] sm:$0xff] }
 0x795   :  { %6838 = vmatprep.subr.bf16.mxu0 %v5519_v13  ;;  %6801 = vmatprep.mubr.bf16.mxu1 %v15011_v39  ;;  %v5604_v13 = vld [vmem:[#allocation3 + $0x5a8] sm:$0xff] }
 0x798   :  { %6839 = vmatpush1.bf16.msra.mxu0 %v5518_v54  ;;  %v5546_v54 = vld [vmem:[#allocation3 + $0x3d8] sm:$0xff] }
 0x799   :  { %6840 = vmatprep.subr.bf16.mxu0 %v5526_v36  ;;  %v5548_v36 = vld [vmem:[#allocation3 + $0x3e8] sm:$0xff] }
 0x79b   :  { %6350 = vmatmul.mubr.bf16.gmra.mrb[156].mxu0 %v15021_v38  ;;  %6802 = vmatmul.mubr.bf16.gmra.mrb[156].mxu1 %v15021_v38 }
 0x79c   :  { %6841 = vmatpush1.bf16.msra.mxu0 %v5525_v1  ;;  %6844 = vmatprep.mubr.bf16.mxu0 %v16924_v4  ;;  %v5618_v1 = vld [vmem:[#allocation3 + $0x618] sm:$0xff] }
 0x79d   :  { %6842 = vmatprep.subr.bf16.mxu0 %v5533_v10  ;;  %7296 = vmatprep.mubr.bf16.mxu1 %v16924_v4  ;;  %v5568_v10 = vld [vmem:[#allocation3 + $0x488] sm:$0xff]  ;;  %v5562_v4 = vld [vmem:[#allocation3 + $0x458] sm:$0xff] }
 0x7a0   :  { %6843 = vmatpush1.bf16.msra.mxu0 %v5532_v14  ;;  %v5567_v14 = vld [vmem:[#allocation3 + $0x480] sm:$0xff] }
 0x7a1   :  { %6925 = vmatprep.subr.bf16.mxu0 %v5540_v50  ;;  %v5575_v50 = vld [vmem:[#allocation3 + $0x4c0] sm:$0xff] }
 0x7a3   :  { %6845 = vmatmul.mubr.bf16.vlgmr.msra.gmra.mrb[160].mxu0 %v14525_v6  ;;  %7297 = vmatmul.mubr.bf16.vlgmr.msra.gmra.mrb[160].mxu1 %v14525_v6  ;;  %v5555_v6 = vld [vmem:[#allocation3 + $0x420] sm:$0xff] }
 0x7a4   :  { %6926 = vmatpush1.bf16.msra.mxu0 %v5539_v43  ;;  %8571 = vmatpush3.bf16.msra.mxu1 %v5541_v30  ;;  %v5569_v43 = vld [vmem:[#allocation3 + $0x490] sm:$0xff]  ;;  %v5632_v30 = vld [vmem:[#allocation3 + $0x688] sm:$0xff] }
 0x7a5   :  { %6927 = vmatprep.subr.bf16.mxu0 %v5547_v12  ;;  %6854 = vmatprep.mubr.bf16.mxu0 %v14531_v17  ;;  %v5582_v12 = vld [vmem:[#allocation3 + $0x4f8] sm:$0xff] }
 0x7a6   :  { %7304 = vmatprep.mubr.bf16.mxu1 %v14531_v17  ;;  %8572 = vmatprep.subr.bf16.mxu1 %v5604_v13  ;;  %v5560_v17 = vld [vmem:[#allocation3 + $0x448] sm:$0xff]  ;;  %v5581_v13 = vld [vmem:[#allocation3 + $0x4f0] sm:$0xff] }
 0x7a8   :  { %6928 = vmatpush1.bf16.msra.mxu0 %v5546_v54  ;;  %8573 = vmatpush3.bf16.msra.mxu1 %v5548_v36  ;;  %v5589_v54 = vld [vmem:[#allocation3 + $0x530] sm:$0xff]  ;;  %v5639_v36 = vld [vmem:[#allocation3 + $0x6c0] sm:$0xff] }
 0x7a9   :  { %6929 = vmatprep.subr.bf16.mxu0 %v5554_v26  ;;  %8574 = vmatprep.subr.bf16.mxu1 %v5611_v0  ;;  %v5596_v26 = vld [vmem:[#allocation3 + $0x568] sm:$0xff]  ;;  %v5583_v0 = vld [vmem:[#allocation3 + $0x500] sm:$0xff] }
 0x7ab   :  { %6855 = vmatmul.mubr.bf16.gmra.mrb[164].mxu0 %v14541_v61  ;;  %7305 = vmatmul.mubr.bf16.gmra.mrb[164].mxu1 %v14541_v61  ;;  %v5625_v61 = vld [vmem:[#allocation3 + $0x650] sm:$0xff] }
 0x7ac   :  { %6930 = vmatpush1.bf16.msra.mxu0 %v5553_v7  ;;  %6864 = vmatprep.mubr.bf16.mxu0 %v14547_v63  ;;  %v5595_v7 = vld [vmem:[#allocation3 + $0x560] sm:$0xff] }
 0x7ad   :  { %6931 = vmatprep.subr.bf16.mxu0 %v5561_v37  ;;  %7312 = vmatprep.mubr.bf16.mxu1 %v14547_v63  ;;  %v5574_v63 = vld [vmem:[#allocation3 + $0x4b8] sm:$0xff]  ;;  %v5603_v37 = vld [vmem:[#allocation3 + $0x5a0] sm:$0xff] }
 0x7ae   :  { %8575 = vmatpush3.bf16.msra.mxu1 %v5555_v6  ;;  %v5590_v6 = vld [vmem:[#allocation3 + $0x538] sm:$0xff] }
 0x7af   :  { %8576 = vmatprep.subr.bf16.mxu1 %v5618_v1  ;;  %v5709_v1 = vld [vmem:[#allocation3 + $0x8f0] sm:$0xff] }
 0x7b0   :  { %6932 = vmatpush1.bf16.msra.mxu0 %v5560_v17  ;;  %v5610_v17 = vld [vmem:[#allocation3 + $0x5d8] sm:$0xff] }
 0x7b1   :  { %6933 = vmatprep.subr.bf16.mxu0 %v5568_v10  ;;  %v5609_v10 = vld [vmem:[#allocation3 + $0x5d0] sm:$0xff] }
 0x7b2   :  { %8577 = vmatpush3.bf16.msra.mxu1 %v5562_v4  ;;  %v5617_v4 = vld [vmem:[#allocation3 + $0x610] sm:$0xff] }
 0x7b3   :  { %6865 = vmatmul.mubr.bf16.gmra.mrb[168].mxu0 %v14557_v59  ;;  %7313 = vmatmul.mubr.bf16.gmra.mrb[168].mxu1 %v14557_v59  ;;  %v5576_v59 = vld [vmem:[#allocation3 + $0x4c8] sm:$0xff] }
 0x7b4   :  { %6934 = vmatpush1.bf16.msra.mxu0 %v5567_v14  ;;  %6874 = vmatprep.mubr.bf16.mxu0 %v14563_v27  ;;  %v5623_v14 = vld [vmem:[#allocation3 + $0x640] sm:$0xff] }
 0x7b5   :  { %6935 = vmatprep.subr.bf16.mxu0 %v5575_v50  ;;  %7320 = vmatprep.mubr.bf16.mxu1 %v14563_v27  ;;  %v5588_v27 = vld [vmem:[#allocation3 + $0x528] sm:$0xff]  ;;  %v5631_v50 = vld [vmem:[#allocation3 + $0x680] sm:$0xff] }
 0x7b6   :  { %8578 = vmatprep.subr.bf16.mxu1 %v5625_v61  ;;  %v5638_v61 = vld [vmem:[#allocation3 + $0x6b8] sm:$0xff] }
 0x7b7   :  { %8579 = vmatpush3.bf16.msra.mxu1 %v5569_v43  ;;  %v5645_v43 = vld [vmem:[#allocation3 + $0x6f0] sm:$0xff] }
 0x7b8   :  { %6936 = vmatpush1.bf16.msra.mxu0 %v5574_v63  ;;  %8580 = vmatprep.subr.bf16.mxu1 %v5632_v30  ;;  %v5652_v63 = vld [vmem:[#allocation3 + $0x728] sm:$0xff]  ;;  %v5653_v30 = vld [vmem:[#allocation3 + $0x730] sm:$0xff] }
 0x7b9   :  { %6937 = vmatprep.subr.bf16.mxu0 %v5582_v12  ;;  %v5659_v12 = vld [vmem:[#allocation3 + $0x760] sm:$0xff] }
 0x7bb   :  { %6875 = vmatmul.mubr.bf16.gmra.mrb[172].mxu0 %v14573_v23  ;;  %7321 = vmatmul.mubr.bf16.gmra.mrb[172].mxu1 %v14573_v23  ;;  %v5646_v23 = vld [vmem:[#allocation3 + $0x6f8] sm:$0xff] }
 0x7bc   :  { %6938 = vmatpush1.bf16.msra.mxu0 %v5581_v13  ;;  %6884 = vmatprep.mubr.bf16.mxu0 %v14579_v33  ;;  %v5716_v13 = vld [vmem:[#allocation3 + $0x928] sm:$0xff] }
 0x7bd   :  { %6939 = vmatprep.subr.bf16.mxu0 %v5589_v54  ;;  %7328 = vmatprep.mubr.bf16.mxu1 %v14579_v33  ;;  %v5602_v33 = vld [vmem:[#allocation3 + $0x598] sm:$0xff]  ;;  %v5660_v54 = vld [vmem:[#allocation3 + $0x768] sm:$0xff] }
 0x7be   :  { %8581 = vmatpush3.bf16.msra.mxu1 %v5576_v59  ;;  %v5723_v59 = vld [vmem:[#allocation3 + $0x960] sm:$0xff] }
 0x7bf   :  { %8582 = vmatprep.subr.bf16.mxu1 %v5639_v36  ;;  %v5665_v36 = vld [vmem:[#allocation3 + $0x790] sm:$0xff] }
 0x7c0   :  { %6940 = vmatpush1.bf16.msra.mxu0 %v5588_v27  ;;  %v5673_v27 = vld [vmem:[#allocation3 + $0x7d0] sm:$0xff] }
 0x7c1   :  { %6941 = vmatprep.subr.bf16.mxu0 %v5596_v26  ;;  %v5730_v26 = vld [vmem:[#allocation3 + $0x998] sm:$0xff] }
 0x7c2   :  { %8583 = vmatpush3.bf16.msra.mxu1 %v5583_v0  ;;  %v5680_v0 = vld [vmem:[#allocation3 + $0x808] sm:$0xff] }
 0x7c3   :  { %6885 = vmatmul.mubr.bf16.gmra.mrb[176].mxu0 %v14589_v8  ;;  %7329 = vmatmul.mubr.bf16.gmra.mrb[176].mxu1 %v14589_v8  ;;  %v5616_v8 = vld [vmem:[#allocation3 + $0x608] sm:$0xff] }
 0x7c4   :  { %6942 = vmatpush1.bf16.msra.mxu0 %v5595_v7  ;;  %6894 = vmatprep.mubr.bf16.mxu0 %v14595_v44  ;;  %v5674_v7 = vld [vmem:[#allocation3 + $0x7d8] sm:$0xff] }
 0x7c5   :  { %6943 = vmatprep.subr.bf16.mxu0 %v5603_v37  ;;  %7336 = vmatprep.mubr.bf16.mxu1 %v14595_v44  ;;  %v5624_v44 = vld [vmem:[#allocation3 + $0x648] sm:$0xff]  ;;  %v5679_v37 = vld [vmem:[#allocation3 + $0x800] sm:$0xff] }
 0x7c6   :  { %8584 = vmatprep.subr.bf16.mxu1 %v5646_v23  ;;  %v5687_v23 = vld [vmem:[#allocation3 + $0x840] sm:$0xff] }
 0x7c7   :  { %8585 = vmatpush3.bf16.msra.mxu1 %v5590_v6  ;;  %v5681_v6 = vld [vmem:[#allocation3 + $0x810] sm:$0xff] }
 0x7c8   :  { %6944 = vmatpush1.bf16.msra.mxu0 %v5602_v33  ;;  %8634 = vmatprep.subr.bf16.mxu1 %v5709_v1  ;;  %v5744_v33 = vld [vmem:[#allocation3 + $0xa08] sm:$0xff]  ;;  %v5694_v1 = vld [vmem:[#allocation3 + $0x878] sm:$0xff] }
 0x7c9   :  { %6945 = vmatprep.subr.bf16.mxu0 %v5610_v17  ;;  %v5693_v17 = vld [vmem:[#allocation3 + $0x870] sm:$0xff] }
 0x7cb   :  { %6895 = vmatmul.mubr.bf16.gmra.mrb[180].mxu0 %v14605_v24  ;;  %7337 = vmatmul.mubr.bf16.gmra.mrb[180].mxu1 %v14605_v24  ;;  %v5630_v24 = vld [vmem:[#allocation3 + $0x678] sm:$0xff] }
 0x7cc   :  { %6946 = vmatpush1.bf16.msra.mxu0 %v5609_v10  ;;  %6904 = vmatprep.mubr.bf16.mxu0 %v14611_v47  ;;  %v5701_v10 = vld [vmem:[#allocation3 + $0x8b0] sm:$0xff] }
 0x7cd   :  { %6947 = vmatprep.subr.bf16.mxu0 %v5617_v4  ;;  %7344 = vmatprep.mubr.bf16.mxu1 %v14611_v47  ;;  %v5637_v47 = vld [vmem:[#allocation3 + $0x6b0] sm:$0xff]  ;;  %v5751_v4 = vld [vmem:[#allocation3 + $0xa40] sm:$0xff] }
 0x7d0   :  { %6948 = vmatpush1.bf16.msra.mxu0 %v5616_v8  ;;  %v5708_v8 = vld [vmem:[#allocation3 + $0x8e8] sm:$0xff] }
 0x7d1   :  { %6949 = vmatprep.subr.bf16.mxu0 %v5624_v44  ;;  %v5695_v44 = vld [vmem:[#allocation3 + $0x880] sm:$0xff] }
 0x7d3   :  { %6905 = vmatmul.mubr.bf16.gmra.mrb[184].mxu0 %v14621_v42  ;;  %7345 = vmatmul.mubr.bf16.gmra.mrb[184].mxu1 %v14621_v42  ;;  %v5644_v42 = vld [vmem:[#allocation3 + $0x6e8] sm:$0xff] }
 0x7d4   :  { %6950 = vmatpush1.bf16.msra.mxu0 %v5623_v14  ;;  %6914 = vmatprep.mubr.bf16.mxu0 %v14627_v57  ;;  %v5707_v14 = vld [vmem:[#allocation3 + $0x8e0] sm:$0xff] }
 0x7d5   :  { %6951 = vmatprep.subr.bf16.mxu0 %v5631_v50  ;;  %7352 = vmatprep.mubr.bf16.mxu1 %v14627_v57  ;;  %v5651_v57 = vld [vmem:[#allocation3 + $0x720] sm:$0xff] }
 0x7d6   :  { %v5715_v50 = vld [vmem:[#allocation3 + $0x920] sm:$0xff] }
 0x7d8   :  { %6952 = vmatpush1.bf16.msra.mxu0 %v5630_v24  ;;  %v5702_v24 = vld [vmem:[#allocation3 + $0x8b8] sm:$0xff] }
 0x7d9   :  { %6953 = vmatprep.subr.bf16.mxu0 %v5638_v61  ;;  %v5821_v61 = vld [vmem:[#allocation3 + $0xc70] sm:$0xff] }
 0x7db   :  { %6915 = vmatmul.mubr.bf16.gmra.mrb[188].mxu0 %v14637_v18  ;;  %7353 = vmatmul.mubr.bf16.gmra.mrb[188].mxu1 %v14637_v18  ;;  %v5658_v18 = vld [vmem:[#allocation3 + $0x758] sm:$0xff] }
 0x7dc   :  { %6954 = vmatpush1.bf16.msra.mxu0 %v5637_v47  ;;  %6957 = vmatprep.mubr.bf16.mxu0 %v14643_v28  ;;  %v5722_v47 = vld [vmem:[#allocation3 + $0x958] sm:$0xff] }
 0x7dd   :  { %6955 = vmatprep.subr.bf16.mxu0 %v5645_v43  ;;  %7393 = vmatprep.mubr.bf16.mxu1 %v14643_v28  ;;  %v5666_v28 = vld [vmem:[#allocation3 + $0x798] sm:$0xff]  ;;  %v5721_v43 = vld [vmem:[#allocation3 + $0x950] sm:$0xff] }
 0x7e0   :  { %6956 = vmatpush1.bf16.msra.mxu0 %v5644_v42  ;;  %v5729_v42 = vld [vmem:[#allocation3 + $0x990] sm:$0xff] }
 0x7e1   :  { %7038 = vmatprep.subr.bf16.mxu0 %v5652_v63  ;;  %v5735_v63 = vld [vmem:[#allocation3 + $0x9c0] sm:$0xff] }
 0x7e3   :  { %6958 = vmatmul.mubr.bf16.vlgmr.msra.gmra.mrb[160].mxu0 %v14653_v62  ;;  %7394 = vmatmul.mubr.bf16.vlgmr.msra.gmra.mrb[192].mxu1 %v14653_v62  ;;  %v5667_v62 = vld [vmem:[#allocation3 + $0x7a0] sm:$0xff] }
 0x7e4   :  { %7039 = vmatpush1.bf16.msra.mxu0 %v5651_v57  ;;  %8635 = vmatpush3.bf16.msra.mxu1 %v5653_v30  ;;  %v5743_v57 = vld [vmem:[#allocation3 + $0xa00] sm:$0xff]  ;;  %v5750_v30 = vld [vmem:[#allocation3 + $0xa38] sm:$0xff] }
 0x7e5   :  { %7040 = vmatprep.subr.bf16.mxu0 %v5659_v12  ;;  %6967 = vmatprep.mubr.bf16.mxu0 %v14659_v20  ;;  %v5757_v12 = vld [vmem:[#allocation3 + $0xa70] sm:$0xff] }
 0x7e6   :  { %7401 = vmatprep.mubr.bf16.mxu1 %v14659_v20  ;;  %8636 = vmatprep.subr.bf16.mxu1 %v5716_v13  ;;  %v5672_v20 = vld [vmem:[#allocation3 + $0x7c8] sm:$0xff] }
 0x7e7   :  { %v5764_v13 = vld [vmem:[#allocation3 + $0xaa8] sm:$0xff] }
 0x7e8   :  { %7041 = vmatpush1.bf16.msra.mxu0 %v5658_v18  ;;  %8637 = vmatpush3.bf16.msra.mxu1 %v5660_v54  ;;  %v5765_v18 = vld [vmem:[#allocation3 + $0xab0] sm:$0xff]  ;;  %v5771_v54 = vld [vmem:[#allocation3 + $0xae0] sm:$0xff] }
 0x7e9   :  { %7042 = vmatprep.subr.bf16.mxu0 %v5666_v28  ;;  %8638 = vmatprep.subr.bf16.mxu1 %v5723_v59  ;;  %v5828_v28 = vld [vmem:[#allocation3 + $0xca8] sm:$0xff] }
 0x7ea   :  { %v5772_v59 = vld [vmem:[#allocation3 + $0xae8] sm:$0xff] }
 0x7eb   :  { %6968 = vmatmul.mubr.bf16.gmra.mrb[164].mxu0 %v14669_v19  ;;  %7402 = vmatmul.mubr.bf16.gmra.mrb[196].mxu1 %v14669_v19  ;;  %v5737_v19 = vld [vmem:[#allocation3 + $0x9d0] sm:$0xff] }
 0x7ec   :  { %7043 = vmatpush1.bf16.msra.mxu0 %v5665_v36  ;;  %6977 = vmatprep.mubr.bf16.mxu0 %v14675_v45  ;;  %v5835_v36 = vld [vmem:[#allocation3 + $0xce0] sm:$0xff] }
 0x7ed   :  { %7044 = vmatprep.subr.bf16.mxu0 %v5673_v27  ;;  %7409 = vmatprep.mubr.bf16.mxu1 %v14675_v45  ;;  %v5686_v45 = vld [vmem:[#allocation3 + $0x838] sm:$0xff]  ;;  %v5777_v27 = vld [vmem:[#allocation3 + $0xb10] sm:$0xff] }
 0x7ee   :  { %8639 = vmatpush3.bf16.msra.mxu1 %v5667_v62  ;;  %v5785_v62 = vld [vmem:[#allocation3 + $0xb50] sm:$0xff] }
 0x7ef   :  { %8640 = vmatprep.subr.bf16.mxu1 %v5730_v26  ;;  %v16925_v26 = vld [vmem:[#allocation123_spill] sm:$0xff] }
 0x7f0   :  { %7045 = vmatpush1.bf16.msra.mxu0 %v5672_v20  ;;  %v5842_v20 = vld [vmem:[#allocation3 + $0xd18] sm:$0xff] }
 0x7f1   :  { %7046 = vmatprep.subr.bf16.mxu0 %v5680_v0  ;;  %v5792_v0 = vld [vmem:[#allocation3 + $0xb88] sm:$0xff] }
 0x7f2   :  { %8641 = vmatpush3.bf16.msra.mxu1 %v5674_v7  ;;  %v5786_v7 = vld [vmem:[#allocation3 + $0xb58] sm:$0xff] }
 0x7f3   :  { %6978 = vmatmul.mubr.bf16.gmra.mrb[168].mxu0 %v14685_v5  ;;  %7410 = vmatmul.mubr.bf16.gmra.mrb[200].mxu1 %v14685_v5  ;;  %v5688_v5 = vld [vmem:[#allocation3 + $0x848] sm:$0xff] }
 0x7f4   :  { %7047 = vmatpush1.bf16.msra.mxu0 %v5679_v37  ;;  %6987 = vmatprep.mubr.bf16.mxu0 %v14691_v11  ;;  %v15099_v37 = vld [vmem:[#allocation11 + $0x30] sm:$0xff] }
 0x7f5   :  { %7048 = vmatprep.subr.bf16.mxu0 %v5687_v23  ;;  %7417 = vmatprep.mubr.bf16.mxu1 %v14691_v11  ;;  %v5700_v11 = vld [vmem:[#allocation3 + $0x8a8] sm:$0xff]  ;;  %v5791_v23 = vld [vmem:[#allocation3 + $0xb80] sm:$0xff] }
 0x7f6   :  { %8642 = vmatprep.subr.bf16.mxu1 %v5737_v19  ;;  %v5799_v19 = vld [vmem:[#allocation3 + $0xbc0] sm:$0xff] }
 0x7f7   :  { %8643 = vmatpush3.bf16.msra.mxu1 %v5681_v6  ;;  %v16927_v6 = vld [vmem:[#allocation25_spill] sm:$0xff] }
 0x7f8   :  { %7049 = vmatpush1.bf16.msra.mxu0 %v5686_v45  ;;  %8644 = vmatprep.subr.bf16.mxu1 %v5744_v33  ;;  %v15105_v45 = vrot.slane %v15099_v37, %v16927_v6  ;;  %v16928_v33 = vld [vmem:[#allocation26_spill] sm:$0xff] }
 0x7f9   :  { %7050 = vmatprep.subr.bf16.mxu0 %v5694_v1  ;;  %v15109_v1 = vrot.slane %v15099_v37, %v16928_v33 }
 0x7fb   :  { %6988 = vmatmul.mubr.bf16.gmra.mrb[172].mxu0 %v14701_v2  ;;  %7418 = vmatmul.mubr.bf16.gmra.mrb[204].mxu1 %v14701_v2  ;;  %v5758_v2 = vld [vmem:[#allocation3 + $0xa78] sm:$0xff] }
 0x7fc   :  { %7051 = vmatpush1.bf16.msra.mxu0 %v5693_v17  ;;  %6997 = vmatprep.mubr.bf16.mxu0 %v14707_v16  ;;  %v5849_v17 = vld [vmem:[#allocation3 + $0xd50] sm:$0xff] }
 0x7fd   :  { %7052 = vmatprep.subr.bf16.mxu0 %v5701_v10  ;;  %7425 = vmatprep.mubr.bf16.mxu1 %v14707_v16  ;;  %v5714_v16 = vld [vmem:[#allocation3 + $0x918] sm:$0xff]  ;;  %v16929_v10 = vld [vmem:[#allocation27_spill] sm:$0xff] }
 0x7fe   :  { %8645 = vmatpush3.bf16.msra.mxu1 %v5688_v5  ;;  %v15113_v5 = vrot.slane %v15099_v37, %v16929_v10  ;;  %v5819_v10 = vld [vmem:[#allocation3 + $0xc60] sm:$0xff] }
 0x7ff   :  { %8646 = vmatprep.subr.bf16.mxu1 %v5751_v4  ;;  %v16930_v4 = vld [vmem:[#allocation28_spill] sm:$0xff] }
 0x800   :  { %7053 = vmatpush1.bf16.msra.mxu0 %v5700_v11  ;;  %v15117_v11 = vrot.slane %v15099_v37, %v16930_v4 }
 0x801   :  { %7054 = vmatprep.subr.bf16.mxu0 %v5708_v8  ;;  %v16931_v8 = vld [vmem:[#allocation124_spill] sm:$0xff] }
 0x802   :  { %8647 = vmatpush3.bf16.msra.mxu1 %v5695_v44  ;;  %v5793_v44 = vld [vmem:[#allocation3 + $0xb90] sm:$0xff] }
 0x803   :  { %6998 = vmatmul.mubr.bf16.gmra.mrb[176].mxu0 %v14717_v9  ;;  %7426 = vmatmul.mubr.bf16.gmra.mrb[208].mxu1 %v14717_v9  ;;  %v5728_v9 = vld [vmem:[#allocation3 + $0x988] sm:$0xff] }
 0x804   :  { %7055 = vmatpush1.bf16.msra.mxu0 %v5707_v14  ;;  %7007 = vmatprep.mubr.bf16.mxu0 %v14723_v40  ;;  %v5798_v14 = vld [vmem:[#allocation3 + $0xbb8] sm:$0xff] }
 0x805   :  { %7056 = vmatprep.subr.bf16.mxu0 %v5715_v50  ;;  %7433 = vmatprep.mubr.bf16.mxu1 %v14723_v40  ;;  %v5736_v40 = vld [vmem:[#allocation3 + $0x9c8] sm:$0xff] }
 0x806   :  { %8648 = vmatprep.subr.bf16.mxu1 %v5758_v2  ;;  %v5856_v50 = vld [vmem:[#allocation3 + $0xd88] sm:$0xff] }
 0x807   :  { %8649 = vmatpush3.bf16.msra.mxu1 %v5702_v24 }
 0x808   :  { %7057 = vmatpush1.bf16.msra.mxu0 %v5714_v16  ;;  %8698 = vmatprep.subr.bf16.mxu1 %v5821_v61  ;;  %v5806_v16 = vld [vmem:[#allocation3 + $0xbf8] sm:$0xff] }
 0x809   :  { %7058 = vmatprep.subr.bf16.mxu0 %v5722_v47 }
 0x80b   :  { %7008 = vmatmul.mubr.bf16.gmra.mrb[180].mxu0 %v14733_v21  ;;  %7434 = vmatmul.mubr.bf16.gmra.mrb[212].mxu1 %v14733_v21  ;;  %v5742_v21 = vld [vmem:[#allocation3 + $0x9f8] sm:$0xff] }
 0x80c   :  { %7059 = vmatpush1.bf16.msra.mxu0 %v5721_v43  ;;  %7017 = vmatprep.mubr.bf16.mxu0 %v14739_v46 }
 0x80d   :  { %7060 = vmatprep.subr.bf16.mxu0 %v5729_v42  ;;  %7441 = vmatprep.mubr.bf16.mxu1 %v14739_v46  ;;  %v5749_v46 = vld [vmem:[#allocation3 + $0xa30] sm:$0xff] }
 0x810   :  { %7061 = vmatpush1.bf16.msra.mxu0 %v5728_v9 }
 0x811   :  { %7062 = vmatprep.subr.bf16.mxu0 %v5736_v40 }
 0x813   :  { %7018 = vmatmul.mubr.bf16.gmra.mrb[184].mxu0 %v14749_v56  ;;  %7442 = vmatmul.mubr.bf16.gmra.mrb[216].mxu1 %v14749_v56  ;;  %v5756_v56 = vld [vmem:[#allocation3 + $0xa68] sm:$0xff] }
 0x814   :  { %7063 = vmatpush1.bf16.msra.mxu0 %v5735_v63  ;;  %7027 = vmatprep.mubr.bf16.mxu0 %v14755_v3 }
 0x815   :  { %7064 = vmatprep.subr.bf16.mxu0 %v5743_v57  ;;  %7449 = vmatprep.mubr.bf16.mxu1 %v14755_v3  ;;  %v5763_v3 = vld [vmem:[#allocation3 + $0xaa0] sm:$0xff] }
 0x818   :  { %7065 = vmatpush1.bf16.msra.mxu0 %v5742_v21 }
 0x819   :  { %7066 = vmatprep.subr.bf16.mxu0 %v5750_v30 }
 0x81b   :  { %7028 = vmatmul.mubr.bf16.gmra.mrb[188].mxu0 %v14765_v58  ;;  %7450 = vmatmul.mubr.bf16.gmra.mrb[220].mxu1 %v14765_v58  ;;  %v5770_v58 = vld [vmem:[#allocation3 + $0xad8] sm:$0xff] }
 0x81c   :  { %7067 = vmatpush1.bf16.msra.mxu0 %v5749_v46  ;;  %7070 = vmatprep.mubr.bf16.mxu0 %v14771_v29 }
 0x81d   :  { %7068 = vmatprep.subr.bf16.mxu0 %v5757_v12  ;;  %7490 = vmatprep.mubr.bf16.mxu1 %v14771_v29  ;;  %v5778_v29 = vld [vmem:[#allocation3 + $0xb18] sm:$0xff]  ;;  %v5805_v12 = vld [vmem:[#allocation3 + $0xbf0] sm:$0xff] }
 0x820   :  { %7069 = vmatpush1.bf16.msra.mxu0 %v5756_v56 }
 0x821   :  { %7151 = vmatprep.subr.bf16.mxu0 %v5764_v13  ;;  %v5813_v13 = vld [vmem:[#allocation3 + $0xc30] sm:$0xff] }
 0x823   :  { %7071 = vmatmul.mubr.bf16.vlgmr.msra.gmra.mrb[160].mxu0 %v14781_v55  ;;  %7491 = vmatmul.mubr.bf16.vlgmr.msra.gmra.mrb[224].mxu1 %v14781_v55  ;;  %v5779_v55 = vld [vmem:[#allocation3 + $0xb20] sm:$0xff] }
 0x824   :  { %7152 = vmatpush1.bf16.msra.mxu0 %v5763_v3  ;;  %8699 = vmatpush3.bf16.msra.mxu1 %v5765_v18  ;;  %v16932_v18 = vld [vmem:[#allocation126_spill] sm:$0xff] }
 0x825   :  { %7153 = vmatprep.subr.bf16.mxu0 %v5771_v54  ;;  %7080 = vmatprep.mubr.bf16.mxu0 %v14787_v34  ;;  %v5800_v54 = vld [vmem:[#allocation3 + $0xbc8] sm:$0xff] }
 0x826   :  { %7498 = vmatprep.mubr.bf16.mxu1 %v14787_v34  ;;  %8700 = vmatprep.subr.bf16.mxu1 %v5828_v28  ;;  %v5784_v34 = vld [vmem:[#allocation3 + $0xb48] sm:$0xff] }
 0x828   :  { %7154 = vmatpush1.bf16.msra.mxu0 %v5770_v58  ;;  %8701 = vmatpush3.bf16.msra.mxu1 %v5772_v59  ;;  %v16933_v58 = vld [vmem:[#allocation70_spill] sm:$0xff]  ;;  %v5863_v59 = vld [vmem:[#allocation3 + $0xdc0] sm:$0xff] }
 0x829   :  { %7155 = vmatprep.subr.bf16.mxu0 %v5778_v29  ;;  %8702 = vmatprep.subr.bf16.mxu1 %v5835_v36  ;;  %v5812_v29 = vld [vmem:[#allocation3 + $0xc28] sm:$0xff] }
 0x82b   :  { %7081 = vmatmul.mubr.bf16.gmra.mrb[164].mxu0 %v14797_v60  ;;  %7499 = vmatmul.mubr.bf16.gmra.mrb[228].mxu1 %v14797_v60  ;;  %v16926_v60 = vld [vmem:[#allocation125_spill] sm:$0xff] }
 0x82c   :  { %7156 = vmatpush1.bf16.msra.mxu0 %v5777_v27  ;;  %7090 = vmatprep.mubr.bf16.mxu0 %v16925_v26 }
 0x82d   :  { %7157 = vmatprep.subr.bf16.mxu0 %v5785_v62  ;;  %7506 = vmatprep.mubr.bf16.mxu1 %v16925_v26  ;;  %v5820_v62 = vld [vmem:[#allocation3 + $0xc68] sm:$0xff] }
 0x82e   :  { %8703 = vmatpush3.bf16.msra.mxu1 %v5779_v55 }
 0x82f   :  { %8704 = vmatprep.subr.bf16.mxu1 %v5842_v20 }
 0x830   :  { %7158 = vmatpush1.bf16.msra.mxu0 %v5784_v34 }
 0x831   :  { %7159 = vmatprep.subr.bf16.mxu0 %v5792_v0  ;;  %v5807_v0 = vld [vmem:[#allocation3 + $0xc00] sm:$0xff] }
 0x832   :  { %8705 = vmatpush3.bf16.msra.mxu1 %v5786_v7 }
 0x833   :  { %7091 = vmatmul.mubr.bf16.gmra.mrb[168].mxu0 %v16926_v60  ;;  %7507 = vmatmul.mubr.bf16.gmra.mrb[232].mxu1 %v16926_v60 }
 0x834   :  { %7160 = vmatpush1.bf16.msra.mxu0 %v5791_v23  ;;  %7100 = vmatprep.mubr.bf16.mxu0 %v16931_v8 }
 0x835   :  { %7161 = vmatprep.subr.bf16.mxu0 %v5799_v19  ;;  %7514 = vmatprep.mubr.bf16.mxu1 %v16931_v8  ;;  %v5827_v8 = vld [vmem:[#allocation3 + $0xca0] sm:$0xff] }
 0x836   :  { %v6281_v2 = vpop.f32.mrb[128].mxu0  ;;  %v6733_v24 = vpop.f32.mrb[128].mxu1  ;;  %8706 = vmatprep.subr.bf16.mxu1 %v5849_v17 }
 0x837   :  { %v8954_v61 = vadd.f32 %v6281_v2, %v15105_v45  ;;  %v8986_v47 = vadd.f32 %v6733_v24, %v15109_v1  ;;  %v6283_v43 = vpop.f32.mrb[129].mxu0  ;;  %v6735_v42 = vpop.f32.mrb[129].mxu1  ;;  %8707 = vmatpush3.bf16.msra.mxu1 %v5793_v44 }
 0x838   :  { %v8955_v9 = vadd.f32 %v6283_v43, %v15113_v5  ;;  %v8987_v40 = vadd.f32 %v6735_v42, %v15117_v11  ;;  %v6285_v63 = vpop.f32.mrb[130].mxu0  ;;  %v6737_v57 = vpop.f32.mrb[130].mxu1  ;;  %7162 = vmatpush1.bf16.msra.mxu0 %v5798_v14  ;;  %8708 = vmatprep.subr.bf16.mxu1 %v5856_v50  ;;  %v5870_v50 = vld [vmem:[#allocation3 + $0xdf8] sm:$0xff] }
 0x839   :  { %9828 = vtanh.f32 %v8954_v61  ;;  %v8956_v21 = vadd.f32 %v6285_v63, %v15105_v45  ;;  %v6287_v30 = vpop.f32.mrb[131].mxu0  ;;  %v6739_v46 = vpop.f32.mrb[131].mxu1  ;;  %7163 = vmatprep.subr.bf16.mxu0 %v5806_v16  ;;  %v8988_v56 = vadd.f32 %v6737_v57, %v15109_v1  ;;  %v16934_v16 = vld [vmem:[#allocation72_spill] sm:$0xff] }
 0x83a   :  { %9830 = vtanh.f32 %v8986_v47  ;;  %v8957_v3 = vadd.f32 %v6287_v30, %v15113_v5  ;;  %v8989_v28 = vadd.f32 %v6739_v46, %v15117_v11  ;;  %v5814_v61 = vld [vmem:[#allocation3 + $0xc38] sm:$0xff] }
 0x83b   :  { %9832 = vtanh.f32 %v8955_v9  ;;  %7101 = vmatmul.mubr.bf16.gmra.mrb[172].mxu0 %v16932_v18  ;;  %7515 = vmatmul.mubr.bf16.gmra.mrb[236].mxu1 %v16932_v18  ;;  %v5826_v43 = vld [vmem:[#allocation3 + $0xc98] sm:$0xff] }
 0x83c   :  { %9834 = vtanh.f32 %v8987_v40  ;;  %7164 = vmatpush1.bf16.msra.mxu0 %v5805_v12  ;;  %7110 = vmatprep.mubr.bf16.mxu0 %v16933_v58  ;;  %v5834_v63 = vld [vmem:[#allocation3 + $0xcd8] sm:$0xff] }
 0x83d   :  { %9836 = vtanh.f32 %v8956_v21  ;;  %7165 = vmatprep.subr.bf16.mxu0 %v5813_v13  ;;  %7522 = vmatprep.mubr.bf16.mxu1 %v16933_v58 }
 0x83e   :  { %9838 = vtanh.f32 %v8988_v56  ;;  %v6291_v36 = vpop.f32.mrb[132].mxu0  ;;  %v6743_v27 = vpop.f32.mrb[132].mxu1  ;;  %8709 = vmatpush3.bf16.msra.mxu1 %v5800_v54 }
 0x83f   :  { %9840 = vtanh.f32 %v8957_v3  ;;  %v8958_v55 = vadd.f32 %v6291_v36, %v15105_v45  ;;  %v8990_v26 = vadd.f32 %v6743_v27, %v15109_v1  ;;  %v6293_v20 = vpop.f32.mrb[133].mxu0  ;;  %v6745_v34 = vpop.f32.mrb[133].mxu1  ;;  %8710 = vmatprep.subr.bf16.mxu1 %v5863_v59  ;;  %v5833_v27 = vld [vmem:[#allocation3 + $0xcd0] sm:$0xff] }
 0x840   :  { %9842 = vtanh.f32 %v8989_v28  ;;  %v8959_v7 = vadd.f32 %v6293_v20, %v15113_v5  ;;  %v8991_v23 = vadd.f32 %v6745_v34, %v15117_v11  ;;  %v6295_v19 = vpop.f32.mrb[134].mxu0  ;;  %v6747_v60 = vpop.f32.mrb[134].mxu1  ;;  %7166 = vmatpush1.bf16.msra.mxu0 %v5812_v29  ;;  %v5841_v20 = vld [vmem:[#allocation3 + $0xd10] sm:$0xff] }
 0x841   :  { %9844 = vtanh.f32 %v8958_v55  ;;  %v8960_v6 = vadd.f32 %v6295_v19, %v15105_v45  ;;  %v6297_v33 = vpop.f32.mrb[135].mxu0  ;;  %v6749_v17 = vpop.f32.mrb[135].mxu1  ;;  %7167 = vmatprep.subr.bf16.mxu0 %v5820_v62  ;;  %v8992_v4 = vadd.f32 %v6747_v60, %v15109_v1 }
 0x842   :  { %9846 = vtanh.f32 %v8990_v26  ;;  %8711 = vmatpush3.bf16.msra.mxu1 %v5807_v0  ;;  %v8961_v14 = vadd.f32 %v6297_v33, %v15113_v5  ;;  %v8993_v24 = vadd.f32 %v6749_v17, %v15117_v11 }
 0x843   :  { %v9829_v44 = vpop.eup %9828  ;;  %9848 = vtanh.f32 %v8959_v7  ;;  %7111 = vmatmul.mubr.bf16.gmra.mrb[176].mxu0 %v14845_v25  ;;  %7523 = vmatmul.mubr.bf16.gmra.mrb[240].mxu1 %v14845_v25 }
 0x844   :  { %v9831_v2 = vpop.eup %9830  ;;  %9850 = vtanh.f32 %v8991_v23  ;;  %7168 = vmatpush1.bf16.msra.mxu0 %v5819_v10  ;;  %7120 = vmatprep.mubr.bf16.mxu0 %v16934_v16 }
 0x845   :  { %v9833_v47 = vpop.eup %9832  ;;  %9852 = vtanh.f32 %v8960_v6  ;;  %7169 = vmatprep.subr.bf16.mxu0 %v5827_v8  ;;  %7530 = vmatprep.mubr.bf16.mxu1 %v16934_v16  ;;  %v5840_v6 = vld [vmem:[#allocation3 + $0xd08] sm:$0xff] }
 0x846   :  { %v9835_v42 = vpop.eup %9834  ;;  %v8442_v9 = vpack.c.bf16 %v9833_v47, %v9829_v44  ;;  %9854 = vtanh.f32 %v8992_v4  ;;  %v6301_v40 = vpop.f32.mrb[136].mxu0  ;;  %8712 = vmatprep.subr.bf16.mxu1 %v5870_v50  ;;  %v5848_v4 = vld [vmem:[#allocation3 + $0xd48] sm:$0xff] }
 0x847   :  { %v6753_v25 = vpop.f32.mrb[136].mxu1  ;;  %v9837_v57 = vpop.eup %9836  ;;  %v8443_v21 = vpack.c.bf16 %v9835_v42, %v9831_v2  ;;  %9856 = vtanh.f32 %v8961_v14  ;;  %v8962_v30 = vadd.f32 %v6301_v40, %v15105_v45  ;;  %8713 = vmatpush3.bf16.msra.mxu1 %v5814_v61 }
 0x848   :  { %v8994_v46 = vadd.f32 %v6753_v25, %v15109_v1  ;;  %v6303_v12 = vpop.f32.mrb[137].mxu0  ;;  %v6755_v56 = vpop.f32.mrb[137].mxu1  ;;  %8116 = vst [vmem:[#allocation13] sm:$0xff] %v8442_v9  ;;  %9858 = vtanh.f32 %v8993_v24  ;;  %7170 = vmatpush1.bf16.msra.mxu0 %v5826_v43 }
 0x849   :  { %v9839_v13 = vpop.eup %9838  ;;  %v8963_v3 = vadd.f32 %v6303_v12, %v15113_v5  ;;  %v8995_v18 = vadd.f32 %v6755_v56, %v15117_v11  ;;  %v6305_v54 = vpop.f32.mrb[138].mxu0  ;;  %8117 = vst [vmem:[#allocation13 + $0x8] sm:$0xff] %v8443_v21  ;;  %9860 = vtanh.f32 %v8962_v30  ;;  %7171 = vmatprep.subr.bf16.mxu0 %v5834_v63  ;;  %v5847_v63 = vld [vmem:[#allocation3 + $0xd40] sm:$0xff] }
 0x84a   :  { %v6757_v28 = vpop.f32.mrb[138].mxu1  ;;  %v9841_v58 = vpop.eup %9840  ;;  %v8964_v59 = vadd.f32 %v6305_v54, %v15105_v45  ;;  %9862 = vtanh.f32 %v8994_v46  ;;  %v5855_v46 = vld [vmem:[#allocation3 + $0xd80] sm:$0xff] }
 0x84b   :  { %v6307_v29 = vpop.f32.mrb[139].mxu0  ;;  %v6759_v36 = vpop.f32.mrb[139].mxu1  ;;  %v8446_v55 = vpack.c.bf16 %v9841_v58, %v9837_v57  ;;  %v8996_v26 = vadd.f32 %v6757_v28, %v15109_v1  ;;  %9864 = vtanh.f32 %v8963_v3  ;;  %7121 = vmatmul.mubr.bf16.gmra.mrb[180].mxu0 %v14861_v35  ;;  %7531 = vmatmul.mubr.bf16.gmra.mrb[244].mxu1 %v14861_v35  ;;  %v5854_v28 = vld [vmem:[#allocation3 + $0xd78] sm:$0xff] }
 0x84c   :  { %v9843_v62 = vpop.eup %9842  ;;  %v8965_v7 = vadd.f32 %v6307_v29, %v15113_v5  ;;  %9866 = vtanh.f32 %v8995_v18  ;;  %v8997_v19 = vadd.f32 %v6759_v36, %v15117_v11  ;;  %7172 = vmatpush1.bf16.msra.mxu0 %v5833_v27  ;;  %7130 = vmatprep.mubr.bf16.mxu0 %v14867_v48  ;;  %v5862_v36 = vld [vmem:[#allocation3 + $0xdb8] sm:$0xff] }
 0x84d   :  { %v9845_v34 = vpop.eup %9844  ;;  %v8447_v0 = vpack.c.bf16 %v9843_v62, %v9839_v13  ;;  %8120 = vst [vmem:[#allocation13 + $0x1c] sm:$0xff] %v8446_v55  ;;  %9868 = vtanh.f32 %v8964_v59  ;;  %7173 = vmatprep.subr.bf16.mxu0 %v5841_v20  ;;  %7538 = vmatprep.mubr.bf16.mxu1 %v14867_v48 }
 0x84e   :  { %v9847_v23 = vpop.eup %9846  ;;  %9870 = vtanh.f32 %v8996_v26  ;;  %v6311_v10 = vpop.f32.mrb[140].mxu0 }
 0x84f   :  { %v9849_v60 = vpop.eup %9848  ;;  %8121 = vst [vmem:[#allocation13 + $0x24] sm:$0xff] %v8447_v0  ;;  %v6763_v35 = vpop.f32.mrb[140].mxu1  ;;  %9872 = vtanh.f32 %v8965_v7  ;;  %v8966_v14 = vadd.f32 %v6311_v10, %v15105_v45  ;;  %v5861_v10 = vld [vmem:[#allocation3 + $0xdb0] sm:$0xff] }
 0x850   :  { %v9851_v33 = vpop.eup %9850  ;;  %v8450_v17 = vpack.c.bf16 %v9849_v60, %v9845_v34  ;;  %v8998_v50 = vadd.f32 %v6763_v35, %v15109_v1  ;;  %v6313_v2 = vpop.f32.mrb[141].mxu0  ;;  %9874 = vtanh.f32 %v8997_v19  ;;  %7174 = vmatpush1.bf16.msra.mxu0 %v5840_v6 }
 0x851   :  { %v9853_v8 = vpop.eup %9852  ;;  %v8451_v44 = vpack.c.bf16 %v9851_v33, %v9847_v23  ;;  %v6765_v24 = vpop.f32.mrb[141].mxu1  ;;  %v8967_v48 = vadd.f32 %v6313_v2, %v15113_v5  ;;  %9876 = vtanh.f32 %v8966_v14  ;;  %7175 = vmatprep.subr.bf16.mxu0 %v5848_v4 }
 0x852   :  { %v9855_v16 = vpop.eup %9854  ;;  %8124 = vst [vmem:[#allocation13 + $0x38] sm:$0xff] %v8450_v17  ;;  %v8999_v61 = vadd.f32 %v6765_v24, %v15117_v11  ;;  %v6315_v47 = vpop.f32.mrb[142].mxu0  ;;  %9878 = vtanh.f32 %v8998_v50 }
 0x853   :  { %v6767_v43 = vpop.f32.mrb[142].mxu1  ;;  %v9857_v42 = vpop.eup %9856  ;;  %8125 = vst [vmem:[#allocation13 + $0x40] sm:$0xff] %v8451_v44  ;;  %v8968_v9 = vadd.f32 %v6315_v47, %v15105_v45  ;;  %9880 = vtanh.f32 %v8967_v48  ;;  %7131 = vmatmul.mubr.bf16.gmra.mrb[184].mxu0 %v14877_v15  ;;  %7539 = vmatmul.mubr.bf16.gmra.mrb[248].mxu1 %v14877_v15  ;;  %v5869_v44 = vld [vmem:[#allocation3 + $0xdf0] sm:$0xff] }
 0x854   :  { %v6317_v40 = vpop.f32.mrb[143].mxu0  ;;  %v6769_v25 = vpop.f32.mrb[143].mxu1  ;;  %v8454_v21 = vpack.c.bf16 %v9857_v42, %v9853_v8  ;;  %v9000_v30 = vadd.f32 %v6767_v43, %v15109_v1  ;;  %9882 = vtanh.f32 %v8999_v61  ;;  %7176 = vmatpush1.bf16.msra.mxu0 %v5847_v63  ;;  %7140 = vmatprep.mubr.bf16.mxu0 %v14883_v31  ;;  %v5868_v61 = vld [vmem:[#allocation3 + $0xde8] sm:$0xff] }
 0x855   :  { %v9859_v57 = vpop.eup %9858  ;;  %v8969_v13 = vadd.f32 %v6317_v40, %v15113_v5  ;;  %v9001_v18 = vadd.f32 %v6769_v25, %v15117_v11  ;;  %9884 = vtanh.f32 %v8968_v9  ;;  %7177 = vmatprep.subr.bf16.mxu0 %v5855_v46  ;;  %7546 = vmatprep.mubr.bf16.mxu1 %v14883_v31 }
 0x856   :  { %v9861_v12 = vpop.eup %9860  ;;  %v8455_v56 = vpack.c.bf16 %v9859_v57, %v9855_v16  ;;  %8128 = vst [vmem:[#allocation13 + $0x54] sm:$0xff] %v8454_v21  ;;  %9886 = vtanh.f32 %v9000_v30  ;;  %v6321_v29 = vpop.f32.mrb[144].mxu0 }
 0x857   :  { %v9863_v3 = vpop.eup %9862  ;;  %v6773_v15 = vpop.f32.mrb[144].mxu1  ;;  %9888 = vtanh.f32 %v8969_v13  ;;  %v8970_v55 = vadd.f32 %v6321_v29, %v15105_v45 }
 0x858   :  { %v9865_v54 = vpop.eup %9864  ;;  %8129 = vst [vmem:[#allocation13 + $0x5c] sm:$0xff] %v8455_v56  ;;  %v9002_v26 = vadd.f32 %v6773_v15, %v15109_v1  ;;  %v6323_v20 = vpop.f32.mrb[145].mxu0  ;;  %9890 = vtanh.f32 %v9001_v18  ;;  %7178 = vmatpush1.bf16.msra.mxu0 %v5854_v28 }
 0x859   :  { %v9867_v58 = vpop.eup %9866  ;;  %v8458_v59 = vpack.c.bf16 %v9865_v54, %v9861_v12  ;;  %v6775_v34 = vpop.f32.mrb[145].mxu1  ;;  %v8971_v31 = vadd.f32 %v6323_v20, %v15113_v5  ;;  %9892 = vtanh.f32 %v8970_v55  ;;  %7179 = vmatprep.subr.bf16.mxu0 %v5862_v36 }
 0x85a   :  { %v9869_v27 = vpop.eup %9868  ;;  %v8459_v62 = vpack.c.bf16 %v9867_v58, %v9863_v3  ;;  %v9003_v7 = vadd.f32 %v6775_v34, %v15117_v11  ;;  %v6325_v23 = vpop.f32.mrb[146].mxu0  ;;  %9894 = vtanh.f32 %v9002_v26  ;;  %v16936_v26 = vld [vmem:[#allocation73_spill] sm:$0xff] }
 0x85b   :  { %v9871_v0 = vpop.eup %9870  ;;  %8132 = vst [vmem:[#allocation13 + $0x70] sm:$0xff] %v8458_v59  ;;  %v6777_v19 = vpop.f32.mrb[146].mxu1  ;;  %v8972_v6 = vadd.f32 %v6325_v23, %v15105_v45  ;;  %9896 = vtanh.f32 %v8971_v31  ;;  %7141 = vmatmul.mubr.bf16.gmra.mrb[188].mxu0 %v14893_v32  ;;  %7547 = vmatmul.mubr.bf16.gmra.mrb[252].mxu1 %v14893_v32 }
 0x85c   :  { %v9873_v60 = vpop.eup %9872  ;;  %8133 = vst [vmem:[#allocation13 + $0x78] sm:$0xff] %v8459_v62  ;;  %v6327_v33 = vpop.f32.mrb[147].mxu0  ;;  %v9004_v8 = vadd.f32 %v6777_v19, %v15109_v1  ;;  %9898 = vtanh.f32 %v9003_v7  ;;  %7180 = vmatpush1.bf16.msra.mxu0 %v5861_v10  ;;  %7183 = vmatprep.mubr.bf16.mxu0 %v14899_v22 }
 0x85d   :  { %v6779_v17 = vpop.f32.mrb[147].mxu1  ;;  %v9875_v35 = vpop.eup %9874  ;;  %v8462_v4 = vpack.c.bf16 %v9873_v60, %v9869_v27  ;;  %v8973_v2 = vadd.f32 %v6327_v33, %v15113_v5  ;;  %9900 = vtanh.f32 %v8972_v6  ;;  %7181 = vmatprep.subr.bf16.mxu0 %v5869_v44  ;;  %7587 = vmatprep.mubr.bf16.mxu1 %v14899_v22  ;;  %v16935_v27 = vld [vmem:[#allocation71_spill] sm:$0xff] }
 0x85e   :  { %v9877_v14 = vpop.eup %9876  ;;  %v8463_v50 = vpack.c.bf16 %v9875_v35, %v9871_v0  ;;  %v9005_v16 = vadd.f32 %v6779_v17, %v15117_v11  ;;  %9902 = vtanh.f32 %v9004_v8  ;;  %v6331_v42 = vpop.f32.mrb[148].mxu0 }
 0x85f   :  { %v9879_v24 = vpop.eup %9878  ;;  %8136 = vst [vmem:[#allocation13 + $0x8c] sm:$0xff] %v8462_v4  ;;  %v6783_v32 = vpop.f32.mrb[148].mxu1  ;;  %9904 = vtanh.f32 %v8973_v2  ;;  %v8974_v25 = vadd.f32 %v6331_v42, %v15105_v45 }
 0x860   :  { %v9881_v48 = vpop.eup %9880  ;;  %8137 = vst [vmem:[#allocation13 + $0x94] sm:$0xff] %v8463_v50  ;;  %v9006_v63 = vadd.f32 %v6783_v32, %v15109_v1  ;;  %v6333_v57 = vpop.f32.mrb[149].mxu0  ;;  %9906 = vtanh.f32 %v9005_v16  ;;  %7182 = vmatpush1.bf16.msra.mxu0 %v5868_v61  ;;  %v16937_v32 = vld [vmem:[#allocation142_spill] sm:$0xff] }
 0x861   :  { %v9883_v47 = vpop.eup %9882  ;;  %v8466_v43 = vpack.c.bf16 %v9881_v48, %v9877_v14  ;;  %v6785_v21 = vpop.f32.mrb[149].mxu1  ;;  %v8975_v46 = vadd.f32 %v6333_v57, %v15113_v5  ;;  %9908 = vtanh.f32 %v8974_v25  ;;  %v16938_v25 = vld [vmem:[#allocation61_spill] sm:$0xff] }
 0x862   :  { %v9885_v9 = vpop.eup %9884  ;;  %v8467_v40 = vpack.c.bf16 %v9883_v47, %v9879_v24  ;;  %v9007_v22 = vadd.f32 %v6785_v21, %v15117_v11  ;;  %v6335_v12 = vpop.f32.mrb[150].mxu0  ;;  %9910 = vtanh.f32 %v9006_v63 }
 0x863   :  { %v9887_v30 = vpop.eup %9886  ;;  %8140 = vst [vmem:[#allocation13 + $0xa8] sm:$0xff] %v8466_v43  ;;  %v6787_v56 = vpop.f32.mrb[150].mxu1  ;;  %v8976_v3 = vadd.f32 %v6335_v12, %v15105_v45  ;;  %9912 = vtanh.f32 %v8975_v46  ;;  %7184 = vmatmul.mubr.bf16.vlgmr.msra.gmra.mrb[160].mxu0 %v16935_v27  ;;  %7588 = vmatmul.mubr.bf16.vlgmr.msra.gmra.mrb[0].mxu1 %v16935_v27 }
 0x864   :  { %v9889_v13 = vpop.eup %9888  ;;  %8141 = vst [vmem:[#allocation13 + $0xb0] sm:$0xff] %v8467_v40  ;;  %v6337_v18 = vpop.f32.mrb[151].mxu0  ;;  %v9008_v59 = vadd.f32 %v6787_v56, %v15109_v1  ;;  %9914 = vtanh.f32 %v9007_v22  ;;  %7193 = vmatprep.mubr.bf16.mxu0 %v16936_v26  ;;  %7595 = vmatprep.mubr.bf16.mxu1 %v16936_v26 }
 0x865   :  { %v6789_v54 = vpop.f32.mrb[151].mxu1  ;;  %v9891_v28 = vpop.eup %9890  ;;  %v8470_v58 = vpack.c.bf16 %v9889_v13, %v9885_v9  ;;  %v8977_v36 = vadd.f32 %v6337_v18, %v15113_v5  ;;  %9916 = vtanh.f32 %v8976_v3 }
 0x866   :  { %v9893_v29 = vpop.eup %9892  ;;  %v8471_v15 = vpack.c.bf16 %v9891_v28, %v9887_v30  ;;  %v9009_v55 = vadd.f32 %v6789_v54, %v15117_v11  ;;  %9918 = vtanh.f32 %v9008_v59  ;;  %v6341_v31 = vpop.f32.mrb[152].mxu0 }
 0x867   :  { %v9895_v62 = vpop.eup %9894  ;;  %8144 = vst [vmem:[#allocation13 + $0xc4] sm:$0xff] %v8470_v58  ;;  %v6793_v7 = vpop.f32.mrb[152].mxu1  ;;  %9920 = vtanh.f32 %v8977_v36  ;;  %v8978_v60 = vadd.f32 %v6341_v31, %v15105_v45 }
 0x868   :  { %v9897_v20 = vpop.eup %9896  ;;  %8145 = vst [vmem:[#allocation13 + $0xcc] sm:$0xff] %v8471_v15  ;;  %v9010_v6 = vadd.f32 %v6793_v7, %v15109_v1  ;;  %v6343_v33 = vpop.f32.mrb[153].mxu0  ;;  %9922 = vtanh.f32 %v9009_v55  ;;  %v16939_v7 = vld [vmem:[#allocation90_spill] sm:$0xff] }
 0x869   :  { %v9899_v34 = vpop.eup %9898  ;;  %v8474_v0 = vpack.c.bf16 %v9897_v20, %v9893_v29  ;;  %v6795_v17 = vpop.f32.mrb[153].mxu1  ;;  %v8979_v35 = vadd.f32 %v6343_v33, %v15113_v5  ;;  %9924 = vtanh.f32 %v8978_v60 }
 0x86a   :  { %v9901_v23 = vpop.eup %9900  ;;  %v8475_v19 = vpack.c.bf16 %v9899_v34, %v9895_v62  ;;  %v9011_v4 = vadd.f32 %v6795_v17, %v15117_v11  ;;  %v6345_v8 = vpop.f32.mrb[154].mxu0  ;;  %9926 = vtanh.f32 %v9010_v6 }
 0x86b   :  { %v9903_v10 = vpop.eup %9902  ;;  %8148 = vst [vmem:[#allocation13 + $0xe0] sm:$0xff] %v8474_v0  ;;  %v6797_v44 = vpop.f32.mrb[154].mxu1  ;;  %v8980_v50 = vadd.f32 %v6345_v8, %v15105_v45  ;;  %9928 = vtanh.f32 %v8979_v35  ;;  %7194 = vmatmul.mubr.bf16.gmra.mrb[164].mxu0 %v16937_v32  ;;  %7596 = vmatmul.mubr.bf16.gmra.mrb[4].mxu1 %v16937_v32 }
 0x86c   :  { %v9905_v14 = vpop.eup %9904  ;;  %8149 = vst [vmem:[#allocation13 + $0xe8] sm:$0xff] %v8475_v19  ;;  %v6347_v2 = vpop.f32.mrb[155].mxu0  ;;  %v9012_v61 = vadd.f32 %v6797_v44, %v15109_v1  ;;  %9930 = vtanh.f32 %v9011_v4  ;;  %7203 = vmatprep.mubr.bf16.mxu0 %v16938_v25  ;;  %7603 = vmatprep.mubr.bf16.mxu1 %v16938_v25  ;;  %v16940_v19 = vld [vmem:[#allocation53_spill] sm:$0xff] }
 0x86d   :  { %v6799_v24 = vpop.f32.mrb[155].mxu1  ;;  %v9907_v16 = vpop.eup %9906  ;;  %v8478_v48 = vpack.c.bf16 %v9905_v14, %v9901_v23  ;;  %v8981_v42 = vadd.f32 %v6347_v2, %v15113_v5  ;;  %9932 = vtanh.f32 %v8980_v50 }
 0x86e   :  { %v9909_v47 = vpop.eup %9908  ;;  %v8479_v43 = vpack.c.bf16 %v9907_v16, %v9903_v10  ;;  %v9013_v40 = vadd.f32 %v6799_v24, %v15117_v11  ;;  %9934 = vtanh.f32 %v9012_v61  ;;  %v6351_v30 = vpop.f32.mrb[156].mxu0 }
 0x86f   :  { %v9911_v9 = vpop.eup %9910  ;;  %8152 = vst [vmem:[#allocation13 + $0xfc] sm:$0xff] %v8478_v48  ;;  %v6803_v46 = vpop.f32.mrb[156].mxu1  ;;  %9936 = vtanh.f32 %v8981_v42  ;;  %v8982_v56 = vadd.f32 %v6351_v30, %v15105_v45  ;;  %v16941_v48 = vld [vmem:[#allocation94_spill] sm:$0xff] }
 0x870   :  { %v9913_v63 = vpop.eup %9912  ;;  %8153 = vst [vmem:[#allocation13 + $0x104] sm:$0xff] %v8479_v43  ;;  %v9014_v13 = vadd.f32 %v6803_v46, %v15109_v1  ;;  %v6353_v3 = vpop.f32.mrb[157].mxu0  ;;  %9938 = vtanh.f32 %v9013_v40 }
 0x871   :  { %v9915_v57 = vpop.eup %9914  ;;  %v8482_v21 = vpack.c.bf16 %v9913_v63, %v9909_v47  ;;  %v6805_v18 = vpop.f32.mrb[157].mxu1  ;;  %v8983_v28 = vadd.f32 %v6353_v3, %v15113_v5  ;;  %9940 = vtanh.f32 %v8982_v56  ;;  %v16942_v47 = vld [vmem:[#allocation60_spill] sm:$0xff] }
 0x872   :  { %v9917_v22 = vpop.eup %9916  ;;  %v8483_v12 = vpack.c.bf16 %v9915_v57, %v9911_v9  ;;  %v9015_v58 = vadd.f32 %v6805_v18, %v15117_v11  ;;  %v6355_v59 = vpop.f32.mrb[158].mxu0  ;;  %9942 = vtanh.f32 %v9014_v13 }
 0x873   :  { %v9919_v54 = vpop.eup %9918  ;;  %8156 = vst [vmem:[#allocation13 + $0x118] sm:$0xff] %v8482_v21  ;;  %v6807_v29 = vpop.f32.mrb[158].mxu1  ;;  %v8984_v36 = vadd.f32 %v6355_v59, %v15105_v45  ;;  %9944 = vtanh.f32 %v8983_v28  ;;  %7204 = vmatmul.mubr.bf16.gmra.mrb[168].mxu0 %v16939_v7  ;;  %7604 = vmatmul.mubr.bf16.gmra.mrb[8].mxu1 %v16939_v7 }
 0x874   :  { %v9921_v15 = vpop.eup %9920  ;;  %8157 = vst [vmem:[#allocation13 + $0x120] sm:$0xff] %v8483_v12  ;;  %v6357_v27 = vpop.f32.mrb[159].mxu0  ;;  %v9016_v20 = vadd.f32 %v6807_v29, %v15109_v1  ;;  %9946 = vtanh.f32 %v9015_v58  ;;  %7213 = vmatprep.mubr.bf16.mxu0 %v16940_v19  ;;  %7611 = vmatprep.mubr.bf16.mxu1 %v16940_v19 }
 0x875   :  { %v6809_v62 = vpop.f32.mrb[159].mxu1  ;;  %v9923_v55 = vpop.eup %9922  ;;  %v8486_v26 = vpack.c.bf16 %v9921_v15, %v9917_v22  ;;  %v8985_v31 = vadd.f32 %v6357_v27, %v15113_v5  ;;  %9948 = vtanh.f32 %v8984_v36 }
 0x876   :  { %v9925_v34 = vpop.eup %9924  ;;  %v8487_v0 = vpack.c.bf16 %v9923_v55, %v9919_v54  ;;  %v9017_v45 = vadd.f32 %v6809_v62, %v15117_v11  ;;  %9950 = vtanh.f32 %v9016_v20  ;;  %v8522_v5 = vpop.f32.mrb[160].mxu1 }
 0x877   :  { %v9927_v23 = vpop.eup %9926  ;;  %8160 = vst [vmem:[#allocation13 + $0x134] sm:$0xff] %v8486_v26  ;;  %9952 = vtanh.f32 %v8985_v31  ;;  %v8523_v10 = vpop.f32.mrb[161].mxu1 }
 0x878   :  { %v9929_v60 = vpop.eup %9928  ;;  %8161 = vst [vmem:[#allocation13 + $0x13c] sm:$0xff] %v8487_v0  ;;  %9954 = vtanh.f32 %v9017_v45  ;;  %v15217_v4 = vadd.f32 %v8523_v10, %v8522_v5  ;;  %v8525_v11 = vpop.f32.mrb[162].mxu1 }
 0x879   :  { %v9931_v1 = vpop.eup %9930  ;;  %v8490_v6 = vpack.c.bf16 %v9929_v60, %v9925_v34  ;;  %v8526_v44 = vpop.f32.mrb[163].mxu1 }
 0x87a   :  { %v9933_v33 = vpop.eup %9932  ;;  %v8491_v17 = vpack.c.bf16 %v9931_v1, %v9927_v23  ;;  %v15219_v2 = vadd.f32 %v8526_v44, %v8525_v11 }
 0x87b   :  { %v9935_v35 = vpop.eup %9934  ;;  %8164 = vst [vmem:[#allocation13 + $0x150] sm:$0xff] %v8490_v6  ;;  %7214 = vmatmul.mubr.bf16.gmra.mrb[172].mxu0 %v16941_v48  ;;  %7612 = vmatmul.mubr.bf16.gmra.mrb[12].mxu1 %v16941_v48 }
 0x87c   :  { %v9937_v8 = vpop.eup %9936  ;;  %8165 = vst [vmem:[#allocation13 + $0x158] sm:$0xff] %v8491_v17  ;;  %7223 = vmatprep.mubr.bf16.mxu0 %v16942_v47  ;;  %7619 = vmatprep.mubr.bf16.mxu1 %v16942_v47 }
 0x87d   :  { %v9939_v14 = vpop.eup %9938  ;;  %v8494_v50 = vpack.c.bf16 %v9937_v8, %v9933_v33  ;;  %v16943_v8 = vld [vmem:[#allocation24_spill] sm:$0xff] }
 0x87e   :  { %v9941_v24 = vpop.eup %9940  ;;  %v8495_v16 = vpack.c.bf16 %v9939_v14, %v9935_v35  ;;  %v8528_v9 = vpop.f32.mrb[164].mxu1  ;;  %v15269_v44 = vrot.slane %v15099_v37, %v16943_v8 }
 0x87f   :  { %v9943_v61 = vpop.eup %9942  ;;  %8168 = vst [vmem:[#allocation13 + $0x16c] sm:$0xff] %v8494_v50  ;;  %v8529_v63 = vpop.f32.mrb[165].mxu1 }
 0x880   :  { %v9945_v43 = vpop.eup %9944  ;;  %8169 = vst [vmem:[#allocation13 + $0x174] sm:$0xff] %v8495_v16  ;;  %v15225_v21 = vadd.f32 %v8529_v63, %v8528_v9  ;;  %v8531_v30 = vpop.f32.mrb[166].mxu1  ;;  %v7302_v47 = vadd.f32 %v15219_v2, %v15269_v44 }
 0x881   :  { %v9947_v42 = vpop.eup %9946  ;;  %v8498_v32 = vpack.c.bf16 %v9945_v43, %v9941_v24  ;;  %v8532_v22 = vpop.f32.mrb[167].mxu1  ;;  %v7299_v24 = vadd.f32 %v15217_v4, %v15269_v44 }
 0x882   :  { %v9949_v40 = vpop.eup %9948  ;;  %v8499_v25 = vpack.c.bf16 %v9947_v42, %v9943_v61  ;;  %v15227_v13 = vadd.f32 %v8532_v22, %v8531_v30  ;;  %v7307_v37 = vadd.f32 %v15225_v21, %v15269_v44 }
 0x883   :  { %v9951_v57 = vpop.eup %9950  ;;  %8172 = vst [vmem:[#allocation13 + $0x188] sm:$0xff] %v8498_v32  ;;  %7224 = vmatmul.mubr.bf16.gmra.mrb[176].mxu0 %v14973_v41  ;;  %7620 = vmatmul.mubr.bf16.gmra.mrb[16].mxu1 %v14973_v41 }
 0x884   :  { %v9953_v46 = vpop.eup %9952  ;;  %8173 = vst [vmem:[#allocation13 + $0x190] sm:$0xff] %v8499_v25  ;;  %7233 = vmatprep.mubr.bf16.mxu0 %v14979_v52  ;;  %7627 = vmatprep.mubr.bf16.mxu1 %v14979_v52  ;;  %v7310_v4 = vadd.f32 %v15227_v13, %v15269_v44 }
 0x885   :  { %v9955_v12 = vpop.eup %9954  ;;  %v8502_v56 = vpack.c.bf16 %v9953_v46, %v9949_v40 }
 0x886   :  { %v8503_v3 = vpack.c.bf16 %v9955_v12, %v9951_v57  ;;  %v8534_v18 = vpop.f32.mrb[168].mxu1 }
 0x887   :  { %8176 = vst [vmem:[#allocation13 + $0x1a4] sm:$0xff] %v8502_v56  ;;  %v8535_v54 = vpop.f32.mrb[169].mxu1 }
 0x888   :  { %8177 = vst [vmem:[#allocation13 + $0x1ac] sm:$0xff] %v8503_v3  ;;  %v15233_v28 = vadd.f32 %v8535_v54, %v8534_v18  ;;  %v8537_v58 = vpop.f32.mrb[170].mxu1 }
 0x889   :  { %v8538_v59 = vpop.f32.mrb[171].mxu1 }
 0x88a   :  { %v15235_v29 = vadd.f32 %v8538_v59, %v8537_v58  ;;  %v7315_v56 = vadd.f32 %v15233_v28, %v15269_v44 }
 0x88b   :  { %7234 = vmatmul.mubr.bf16.gmra.mrb[180].mxu0 %v14989_v51  ;;  %7628 = vmatmul.mubr.bf16.gmra.mrb[20].mxu1 %v14989_v51 }
 0x88c   :  { %7243 = vmatprep.mubr.bf16.mxu0 %v14995_v53  ;;  %7635 = vmatprep.mubr.bf16.mxu1 %v14995_v53  ;;  %v7318_v21 = vadd.f32 %v15235_v29, %v15269_v44 }
 0x88e   :  { %v8540_v41 = vpop.f32.mrb[172].mxu1 }
 0x88f   :  { %v8541_v15 = vpop.f32.mrb[173].mxu1 }
 0x890   :  { %v15241_v52 = vadd.f32 %v8541_v15, %v8540_v41  ;;  %v8543_v36 = vpop.f32.mrb[174].mxu1 }
 0x891   :  { %v8544_v27 = vpop.f32.mrb[175].mxu1 }
 0x892   :  { %v15243_v62 = vadd.f32 %v8544_v27, %v8543_v36  ;;  %v7323_v36 = vadd.f32 %v15241_v52, %v15269_v44 }
 0x893   :  { %7244 = vmatmul.mubr.bf16.gmra.mrb[184].mxu0 %v15005_v49  ;;  %7636 = vmatmul.mubr.bf16.gmra.mrb[24].mxu1 %v15005_v49 }
 0x894   :  { %7253 = vmatprep.mubr.bf16.mxu0 %v15011_v39  ;;  %7643 = vmatprep.mubr.bf16.mxu1 %v15011_v39  ;;  %v7326_v28 = vadd.f32 %v15243_v62, %v15269_v44 }
 0x896   :  { %v8546_v51 = vpop.f32.mrb[176].mxu1 }
 0x897   :  { %v8547_v55 = vpop.f32.mrb[177].mxu1 }
 0x898   :  { %v15249_v26 = vadd.f32 %v8547_v55, %v8546_v51  ;;  %v8549_v53 = vpop.f32.mrb[178].mxu1 }
 0x899   :  { %v8550_v20 = vpop.f32.mrb[179].mxu1 }
 0x89a   :  { %v15251_v34 = vadd.f32 %v8550_v20, %v8549_v53 }
 0x89b   :  { %7254 = vmatmul.mubr.bf16.gmra.mrb[188].mxu0 %v15021_v38  ;;  %7644 = vmatmul.mubr.bf16.gmra.mrb[28].mxu1 %v15021_v38 }
 0x89c   :  { %v7334_v52 = vadd.f32 %v15251_v34, %v15269_v44 }
 0x89e   :  { %v8552_v0 = vpop.f32.mrb[180].mxu1 }
 0x89f   :  { %v8553_v31 = vpop.f32.mrb[181].mxu1 }
 0x8a0   :  { %v15255_v7 = vadd.f32 %v8553_v31, %v8552_v0  ;;  %v8555_v49 = vpop.f32.mrb[182].mxu1 }
 0x8a1   :  { %v8556_v23 = vpop.f32.mrb[183].mxu1 }
 0x8a2   :  { %v15257_v45 = vadd.f32 %v8556_v23, %v8555_v49  ;;  %v7331_v49 = vadd.f32 %v15249_v26, %v15269_v44 }
 0x8a4   :  { %v7342_v26 = vadd.f32 %v15257_v45, %v15269_v44 }
 0x8a6   :  { %v8558_v39 = vpop.f32.mrb[184].mxu1 }
 0x8a7   :  { %v8559_v19 = vpop.f32.mrb[185].mxu1 }
 0x8a8   :  { %v15259_v60 = vadd.f32 %v8559_v19, %v8558_v39  ;;  %v8561_v1 = vpop.f32.mrb[186].mxu1 }
 0x8a9   :  { %v8562_v6 = vpop.f32.mrb[187].mxu1 }
 0x8aa   :  { %v15261_v5 = vadd.f32 %v8562_v6, %v8561_v1 }
 0x8ae   :  { %v8564_v33 = vpop.f32.mrb[188].mxu1 }
 0x8af   :  { %v8565_v17 = vpop.f32.mrb[189].mxu1 }
 0x8b0   :  { %v15263_v10 = vadd.f32 %v8565_v17, %v8564_v33  ;;  %v8567_v38 = vpop.f32.mrb[190].mxu1 }
 0x8b1   :  { %v8568_v35 = vpop.f32.mrb[191].mxu1 }
 0x8b2   :  { %v15265_v11 = vadd.f32 %v8568_v35, %v8567_v38  ;;  %v7339_v38 = vadd.f32 %v15255_v7, %v15269_v44  ;;  %v7350_v7 = vadd.f32 %v15261_v5, %v15269_v44 }
 0x8b6   :  { %v8586_v14 = vpop.f32.mrb[192].mxu1 }
 0x8b7   :  { %v8587_v50 = vpop.f32.mrb[193].mxu1 }
 0x8b8   :  { %v8588_v16 = vadd.f32 %v8587_v50, %v8586_v14  ;;  %v8589_v48 = vpop.f32.mrb[194].mxu1 }
 0x8b9   :  { %v8590_v61 = vpop.f32.mrb[195].mxu1 }
 0x8ba   :  { %v15275_v43 = vadd.f32 %v8588_v16, %v7299_v24  ;;  %v8591_v42 = vadd.f32 %v8590_v61, %v8589_v48  ;;  %v7347_v61 = vadd.f32 %v15259_v60, %v15269_v44  ;;  %v7358_v60 = vadd.f32 %v15265_v11, %v15269_v44 }
 0x8bc   :  { %v15277_v32 = vadd.f32 %v8591_v42, %v7302_v47 }
 0x8be   :  { %v8592_v9 = vpop.f32.mrb[196].mxu1 }
 0x8bf   :  { %v8593_v40 = vpop.f32.mrb[197].mxu1 }
 0x8c0   :  { %v8594_v25 = vadd.f32 %v8593_v40, %v8592_v9  ;;  %v8595_v63 = vpop.f32.mrb[198].mxu1 }
 0x8c1   :  { %v8596_v57 = vpop.f32.mrb[199].mxu1 }
 0x8c2   :  { %v15283_v30 = vadd.f32 %v8594_v25, %v7307_v37  ;;  %v8597_v46 = vadd.f32 %v8596_v57, %v8595_v63  ;;  %v7355_v57 = vadd.f32 %v15263_v10, %v15269_v44 }
 0x8c4   :  { %v15285_v2 = vadd.f32 %v8597_v46, %v7310_v4 }
 0x8c6   :  { %v8598_v22 = vpop.f32.mrb[200].mxu1 }
 0x8c7   :  { %v8599_v12 = vpop.f32.mrb[201].mxu1 }
 0x8c8   :  { %v8600_v3 = vadd.f32 %v8599_v12, %v8598_v22  ;;  %v8601_v18 = vpop.f32.mrb[202].mxu1 }
 0x8c9   :  { %v8602_v54 = vpop.f32.mrb[203].mxu1 }
 0x8ca   :  { %v15291_v58 = vadd.f32 %v8600_v3, %v7315_v56  ;;  %v8603_v59 = vadd.f32 %v8602_v54, %v8601_v18 }
 0x8cc   :  { %v15293_v13 = vadd.f32 %v8603_v59, %v7318_v21 }
 0x8ce   :  { %v8604_v41 = vpop.f32.mrb[204].mxu1 }
 0x8cf   :  { %v8605_v15 = vpop.f32.mrb[205].mxu1 }
 0x8d0   :  { %v8606_v27 = vadd.f32 %v8605_v15, %v8604_v41  ;;  %v8607_v51 = vpop.f32.mrb[206].mxu1 }
 0x8d1   :  { %v8608_v55 = vpop.f32.mrb[207].mxu1 }
 0x8d2   :  { %v15299_v53 = vadd.f32 %v8606_v27, %v7323_v36  ;;  %v8609_v20 = vadd.f32 %v8608_v55, %v8607_v51 }
 0x8d4   :  { %v15301_v29 = vadd.f32 %v8609_v20, %v7326_v28 }
 0x8d6   :  { %v8610_v0 = vpop.f32.mrb[208].mxu1 }
 0x8d7   :  { %v8611_v31 = vpop.f32.mrb[209].mxu1 }
 0x8d8   :  { %v8612_v23 = vadd.f32 %v8611_v31, %v8610_v0  ;;  %v8613_v39 = vpop.f32.mrb[210].mxu1 }
 0x8d9   :  { %v8614_v19 = vpop.f32.mrb[211].mxu1 }
 0x8da   :  { %v15307_v1 = vadd.f32 %v8612_v23, %v7331_v49  ;;  %v8615_v6 = vadd.f32 %v8614_v19, %v8613_v39 }
 0x8dc   :  { %v15309_v62 = vadd.f32 %v8615_v6, %v7334_v52 }
 0x8de   :  { %v8616_v33 = vpop.f32.mrb[212].mxu1 }
 0x8df   :  { %v8617_v17 = vpop.f32.mrb[213].mxu1 }
 0x8e0   :  { %v8618_v35 = vadd.f32 %v8617_v17, %v8616_v33  ;;  %v8619_v8 = vpop.f32.mrb[214].mxu1 }
 0x8e1   :  { %v8620_v14 = vpop.f32.mrb[215].mxu1 }
 0x8e2   :  { %v15315_v50 = vadd.f32 %v8618_v35, %v7339_v38  ;;  %v8621_v24 = vadd.f32 %v8620_v14, %v8619_v8 }
 0x8e4   :  { %v15317_v34 = vadd.f32 %v8621_v24, %v7342_v26 }
 0x8e6   :  { %v8622_v16 = vpop.f32.mrb[216].mxu1 }
 0x8e7   :  { %v8623_v48 = vpop.f32.mrb[217].mxu1 }
 0x8e8   :  { %v8624_v47 = vadd.f32 %v8623_v48, %v8622_v16  ;;  %v8625_v42 = vpop.f32.mrb[218].mxu1 }
 0x8e9   :  { %v8626_v9 = vpop.f32.mrb[219].mxu1 }
 0x8ea   :  { %v15323_v40 = vadd.f32 %v8624_v47, %v7347_v61  ;;  %v8627_v37 = vadd.f32 %v8626_v9, %v8625_v42 }
 0x8ec   :  { %v15325_v45 = vadd.f32 %v8627_v37, %v7350_v7 }
 0x8ee   :  { %v8628_v25 = vpop.f32.mrb[220].mxu1 }
 0x8ef   :  { %v8629_v63 = vpop.f32.mrb[221].mxu1 }
 0x8f0   :  { %v8630_v4 = vadd.f32 %v8629_v63, %v8628_v25  ;;  %v8631_v46 = vpop.f32.mrb[222].mxu1 }
 0x8f1   :  { %v8632_v22 = vpop.f32.mrb[223].mxu1 }
 0x8f2   :  { %v15331_v12 = vadd.f32 %v8630_v4, %v7355_v57  ;;  %v8633_v56 = vadd.f32 %v8632_v22, %v8631_v46 }
 0x8f4   :  { %v15333_v5 = vadd.f32 %v8633_v56, %v7358_v60 }
 0x8f6   :  { %v8650_v3 = vpop.f32.mrb[224].mxu1 }
 0x8f7   :  { %v8651_v18 = vpop.f32.mrb[225].mxu1 }
 0x8f8   :  { %v8652_v54 = vadd.f32 %v8651_v18, %v8650_v3  ;;  %v8653_v21 = vpop.f32.mrb[226].mxu1 }
 0x8f9   :  { %v8654_v59 = vpop.f32.mrb[227].mxu1 }
 0x8fa   :  { %v15336_v41 = vadd.f32 %v8652_v54, %v15275_v43  ;;  %v8655_v10 = vadd.f32 %v8654_v59, %v8653_v21  ;;  %v10052_v21 = vld [vmem:[#allocation11 + $0x30] sm:$0xff] }
 0x8fb   :  { %v16944_v59 = vld [vmem:[#allocation67_spill] sm:$0xff] }
 0x8fc   :  { %v15339_v15 = vadd.f32 %v8655_v10, %v15277_v32  ;;  %v15381_v10 = vrot.slane %v10052_v21, %v16944_v59 }
 0x8fe   :  { %v8656_v36 = vpop.f32.mrb[228].mxu1 }
 0x8ff   :  { %v8657_v27 = vpop.f32.mrb[229].mxu1 }
 0x900   :  { %v8658_v11 = vadd.f32 %v8657_v27, %v8656_v36  ;;  %v8659_v44 = vpop.f32.mrb[230].mxu1  ;;  %v16945_v36 = vld [vmem:[#allocation86_spill] sm:$0xff] }
 0x901   :  { %v8660_v51 = vpop.f32.mrb[231].mxu1  ;;  %v15387_v27 = vrot.slane %v10052_v21, %v16945_v36 }
 0x902   :  { %v15342_v55 = vadd.f32 %v8658_v11, %v15283_v30  ;;  %v8661_v28 = vadd.f32 %v8660_v51, %v8659_v44 }
 0x904   :  { %v15345_v20 = vadd.f32 %v8661_v28, %v15285_v2 }
 0x906   :  { %v8662_v0 = vpop.f32.mrb[232].mxu1 }
 0x907   :  { %v8663_v31 = vpop.f32.mrb[233].mxu1 }
 0x908   :  { %v8664_v43 = vadd.f32 %v8663_v31, %v8662_v0  ;;  %v8665_v49 = vpop.f32.mrb[234].mxu1 }
 0x909   :  { %v8666_v23 = vpop.f32.mrb[235].mxu1 }
 0x90a   :  { %v15348_v32 = vadd.f32 %v8664_v43, %v15291_v58  ;;  %v8667_v39 = vadd.f32 %v8666_v23, %v8665_v49 }
 0x90c   :  { %v15351_v19 = vadd.f32 %v8667_v39, %v15293_v13 }
 0x90e   :  { %v8668_v52 = vpop.f32.mrb[236].mxu1 }
 0x90f   :  { %v8669_v6 = vpop.f32.mrb[237].mxu1 }
 0x910   :  { %v8670_v30 = vadd.f32 %v8669_v6, %v8668_v52  ;;  %v8671_v33 = vpop.f32.mrb[238].mxu1 }
 0x911   :  { %v8672_v17 = vpop.f32.mrb[239].mxu1 }
 0x912   :  { %v15354_v2 = vadd.f32 %v8670_v30, %v15299_v53  ;;  %v8673_v38 = vadd.f32 %v8672_v17, %v8671_v33 }
 0x914   :  { %v15357_v35 = vadd.f32 %v8673_v38, %v15301_v29 }
 0x916   :  { %v8674_v8 = vpop.f32.mrb[240].mxu1 }
 0x917   :  { %v8675_v14 = vpop.f32.mrb[241].mxu1 }
 0x918   :  { %v8676_v58 = vadd.f32 %v8675_v14, %v8674_v8  ;;  %v8677_v26 = vpop.f32.mrb[242].mxu1 }
 0x919   :  { %v8678_v24 = vpop.f32.mrb[243].mxu1 }
 0x91a   :  { %v15360_v13 = vadd.f32 %v8676_v58, %v15307_v1  ;;  %v8679_v16 = vadd.f32 %v8678_v24, %v8677_v26 }
 0x91c   :  { %v15363_v48 = vadd.f32 %v8679_v16, %v15309_v62 }
 0x91e   :  { %v8680_v61 = vpop.f32.mrb[244].mxu1 }
 0x91f   :  { %v8681_v47 = vpop.f32.mrb[245].mxu1 }
 0x920   :  { %v8682_v53 = vadd.f32 %v8681_v47, %v8680_v61  ;;  %v8683_v42 = vpop.f32.mrb[246].mxu1 }
 0x921   :  { %v8684_v9 = vpop.f32.mrb[247].mxu1 }
 0x922   :  { %v15366_v29 = vadd.f32 %v8682_v53, %v15315_v50  ;;  %v8685_v7 = vadd.f32 %v8684_v9, %v8683_v42 }
 0x924   :  { %v15369_v37 = vadd.f32 %v8685_v7, %v15317_v34 }
 0x926   :  { %v8686_v25 = vpop.f32.mrb[248].mxu1 }
 0x927   :  { %v8687_v63 = vpop.f32.mrb[249].mxu1 }
 0x928   :  { %v8688_v1 = vadd.f32 %v8687_v63, %v8686_v25  ;;  %v8689_v57 = vpop.f32.mrb[250].mxu1 }
 0x929   :  { %v8690_v4 = vpop.f32.mrb[251].mxu1 }
 0x92a   :  { %v15372_v62 = vadd.f32 %v8688_v1, %v15323_v40  ;;  %v8691_v46 = vadd.f32 %v8690_v4, %v8689_v57 }
 0x92c   :  { %v15375_v22 = vadd.f32 %v8691_v46, %v15325_v45 }
 0x92e   :  { %v8692_v60 = vpop.f32.mrb[252].mxu1 }
 0x92f   :  { %v8693_v56 = vpop.f32.mrb[253].mxu1 }
 0x930   :  { %v8694_v50 = vadd.f32 %v8693_v56, %v8692_v60  ;;  %v8695_v3 = vpop.f32.mrb[254].mxu1 }
 0x931   :  { %v8696_v18 = vpop.f32.mrb[255].mxu1 }
 0x932   :  { %v15378_v34 = vadd.f32 %v8694_v50, %v15331_v12  ;;  %v8697_v54 = vadd.f32 %v8696_v18, %v8695_v3 }
 0x934   :  { %v15384_v40 = vadd.f32 %v8697_v54, %v15333_v5 }
 0x936   :  { %v7185_v45 = vpop.f32.mrb[160].mxu0  ;;  %v8714_v11 = vpop.f32.mrb[0].mxu1 }
 0x937   :  { %v9018_v44 = vadd.f32 %v7185_v45, %v15381_v10  ;;  %v7187_v51 = vpop.f32.mrb[161].mxu0  ;;  %v8715_v28 = vpop.f32.mrb[1].mxu1 }
 0x938   :  { %v9019_v12 = vadd.f32 %v7187_v51, %v15387_v27  ;;  %v8716_v0 = vadd.f32 %v8715_v28, %v8714_v11  ;;  %v7189_v31 = vpop.f32.mrb[162].mxu0  ;;  %v8717_v43 = vpop.f32.mrb[2].mxu1 }
 0x939   :  { %9956 = vtanh.f32 %v9018_v44  ;;  %v9020_v49 = vadd.f32 %v7189_v31, %v15381_v10  ;;  %v7191_v23 = vpop.f32.mrb[163].mxu0  ;;  %v8718_v5 = vpop.f32.mrb[3].mxu1 }
 0x93a   :  { %9958 = vtanh.f32 %v9019_v12  ;;  %v7590_v39 = vadd.f32 %v8716_v0, %v15336_v41  ;;  %v9021_v52 = vadd.f32 %v7191_v23, %v15387_v27  ;;  %v8719_v6 = vadd.f32 %v8718_v5, %v8717_v43 }
 0x93b   :  { %9960 = vtanh.f32 %v9020_v49 }
 0x93c   :  { %9962 = vtanh.f32 %v7590_v39  ;;  %v7593_v30 = vadd.f32 %v8719_v6, %v15339_v15 }
 0x93d   :  { %9964 = vtanh.f32 %v9021_v52 }
 0x93e   :  { %9966 = vtanh.f32 %v7593_v30  ;;  %v7195_v33 = vpop.f32.mrb[164].mxu0  ;;  %v8720_v17 = vpop.f32.mrb[4].mxu1 }
 0x93f   :  { %v9022_v38 = vadd.f32 %v7195_v33, %v15381_v10  ;;  %v7197_v8 = vpop.f32.mrb[165].mxu0  ;;  %v8721_v14 = vpop.f32.mrb[5].mxu1 }
 0x940   :  { %v9023_v58 = vadd.f32 %v7197_v8, %v15387_v27  ;;  %v8722_v26 = vadd.f32 %v8721_v14, %v8720_v17  ;;  %v7199_v24 = vpop.f32.mrb[166].mxu0  ;;  %v8723_v41 = vpop.f32.mrb[6].mxu1 }
 0x941   :  { %9968 = vtanh.f32 %v9022_v38  ;;  %v9024_v16 = vadd.f32 %v7199_v24, %v15381_v10  ;;  %v7201_v61 = vpop.f32.mrb[167].mxu0  ;;  %v8724_v47 = vpop.f32.mrb[7].mxu1 }
 0x942   :  { %9970 = vtanh.f32 %v9023_v58  ;;  %v7598_v15 = vadd.f32 %v8722_v26, %v15342_v55  ;;  %v9025_v53 = vadd.f32 %v7201_v61, %v15387_v27  ;;  %v8725_v42 = vadd.f32 %v8724_v47, %v8723_v41 }
 0x943   :  { %v9957_v9 = vpop.eup %9956  ;;  %9972 = vtanh.f32 %v9024_v16 }
 0x944   :  { %v9959_v7 = vpop.eup %9958  ;;  %9974 = vtanh.f32 %v7598_v15  ;;  %v7601_v25 = vadd.f32 %v8725_v42, %v15345_v20 }
 0x945   :  { %v9961_v63 = vpop.eup %9960  ;;  %v8444_v1 = vpack.c.bf16 %v9959_v7, %v9957_v9  ;;  %9976 = vtanh.f32 %v9025_v53 }
 0x946   :  { %v9963_v57 = vpop.eup %9962  ;;  %9978 = vtanh.f32 %v7601_v25  ;;  %v7205_v4 = vpop.f32.mrb[168].mxu0 }
 0x947   :  { %v8726_v46 = vpop.f32.mrb[8].mxu1  ;;  %v9965_v60 = vpop.eup %9964  ;;  %8118 = vst [vmem:[#allocation13 + $0x10] sm:$0xff] %v8444_v1  ;;  %v8445_v56 = vpack.c.bf16 %v9963_v57, %v9963_v57  ;;  %v9026_v55 = vadd.f32 %v7205_v4, %v15381_v10 }
 0x948   :  { %v7207_v50 = vpop.f32.mrb[169].mxu0  ;;  %v8727_v3 = vpop.f32.mrb[9].mxu1  ;;  %v8448_v54 = vpack.c.bf16 %v9965_v60, %v9961_v63 }
 0x949   :  { %v9967_v18 = vpop.eup %9966  ;;  %v9027_v21 = vadd.f32 %v7207_v50, %v15387_v27  ;;  %v8728_v59 = vadd.f32 %v8727_v3, %v8726_v46  ;;  %v7209_v20 = vpop.f32.mrb[170].mxu0  ;;  %8119 = vst [vmem:[#allocation13 + $0x18] sm:$0xf] %v8445_v56  ;;  %9980 = vtanh.f32 %v9026_v55 }
 0x94a   :  { %v8729_v36 = vpop.f32.mrb[10].mxu1  ;;  %v8449_v45 = vpack.c.bf16 %v9967_v18, %v9967_v18  ;;  %v9028_v11 = vadd.f32 %v7209_v20, %v15381_v10  ;;  %v7211_v44 = vpop.f32.mrb[171].mxu0  ;;  %8122 = vst [vmem:[#allocation13 + $0x2c] sm:$0xff] %v8448_v54 }
 0x94b   :  { %v8730_v51 = vpop.f32.mrb[11].mxu1  ;;  %9982 = vtanh.f32 %v9027_v21  ;;  %v7606_v28 = vadd.f32 %v8728_v59, %v15348_v32  ;;  %v9029_v12 = vadd.f32 %v7211_v44, %v15387_v27  ;;  %v9969_v31 = vpop.eup %9968 }
 0x94c   :  { %v8731_v0 = vadd.f32 %v8730_v51, %v8729_v36  ;;  %8123 = vst [vmem:[#allocation13 + $0x34] sm:$0xf] %v8449_v45  ;;  %9984 = vtanh.f32 %v9028_v11  ;;  %v9971_v43 = vpop.eup %9970 }
 0x94d   :  { %9986 = vtanh.f32 %v7606_v28  ;;  %v9973_v23 = vpop.eup %9972  ;;  %v8452_v5 = vpack.c.bf16 %v9971_v43, %v9969_v31 }
 0x94e   :  { %v7609_v49 = vadd.f32 %v8731_v0, %v15351_v19  ;;  %9988 = vtanh.f32 %v9029_v12  ;;  %v9975_v39 = vpop.eup %9974  ;;  %v7215_v52 = vpop.f32.mrb[172].mxu0 }
 0x94f   :  { %v8732_v6 = vpop.f32.mrb[12].mxu1  ;;  %v9977_v30 = vpop.eup %9976  ;;  %8126 = vst [vmem:[#allocation13 + $0x48] sm:$0xff] %v8452_v5  ;;  %v8453_v32 = vpack.c.bf16 %v9975_v39, %v9975_v39  ;;  %v9030_v33 = vadd.f32 %v7215_v52, %v15381_v10 }
 0x950   :  { %9990 = vtanh.f32 %v7609_v49  ;;  %v7217_v17 = vpop.f32.mrb[173].mxu0  ;;  %v8733_v38 = vpop.f32.mrb[13].mxu1  ;;  %v8456_v14 = vpack.c.bf16 %v9977_v30, %v9973_v23 }
 0x951   :  { %v9979_v8 = vpop.eup %9978  ;;  %v9031_v58 = vadd.f32 %v7217_v17, %v15387_v27  ;;  %v8734_v26 = vadd.f32 %v8733_v38, %v8732_v6  ;;  %v7219_v19 = vpop.f32.mrb[174].mxu0  ;;  %8127 = vst [vmem:[#allocation13 + $0x50] sm:$0xf] %v8453_v32  ;;  %9992 = vtanh.f32 %v9030_v33 }
 0x952   :  { %v8735_v24 = vpop.f32.mrb[14].mxu1  ;;  %v8457_v41 = vpack.c.bf16 %v9979_v8, %v9979_v8  ;;  %v9032_v16 = vadd.f32 %v7219_v19, %v15381_v10  ;;  %v7221_v61 = vpop.f32.mrb[175].mxu0  ;;  %8130 = vst [vmem:[#allocation13 + $0x64] sm:$0xff] %v8456_v14 }
 0x953   :  { %v8736_v47 = vpop.f32.mrb[15].mxu1  ;;  %9994 = vtanh.f32 %v9031_v58  ;;  %v7614_v15 = vadd.f32 %v8734_v26, %v15354_v2  ;;  %v9033_v53 = vadd.f32 %v7221_v61, %v15387_v27  ;;  %v9981_v9 = vpop.eup %9980 }
 0x954   :  { %v8737_v42 = vadd.f32 %v8736_v47, %v8735_v24  ;;  %8131 = vst [vmem:[#allocation13 + $0x6c] sm:$0xf] %v8457_v41  ;;  %9996 = vtanh.f32 %v9032_v16 }
 0x955   :  { %v9983_v7 = vpop.eup %9982  ;;  %9998 = vtanh.f32 %v7614_v15 }
 0x956   :  { %v7617_v25 = vadd.f32 %v8737_v42, %v15357_v35  ;;  %v9985_v63 = vpop.eup %9984  ;;  %v8460_v1 = vpack.c.bf16 %v9983_v7, %v9981_v9  ;;  %10000 = vtanh.f32 %v9033_v53  ;;  %v7225_v4 = vpop.f32.mrb[176].mxu0 }
 0x957   :  { %v9987_v57 = vpop.eup %9986  ;;  %v8738_v46 = vpop.f32.mrb[16].mxu1  ;;  %v9034_v56 = vadd.f32 %v7225_v4, %v15381_v10 }
 0x958   :  { %10002 = vtanh.f32 %v7617_v25  ;;  %v9989_v60 = vpop.eup %9988  ;;  %8134 = vst [vmem:[#allocation13 + $0x80] sm:$0xff] %v8460_v1  ;;  %v8461_v2 = vpack.c.bf16 %v9987_v57, %v9987_v57  ;;  %v7227_v55 = vpop.f32.mrb[177].mxu0 }
 0x959   :  { %v8739_v50 = vpop.f32.mrb[17].mxu1  ;;  %v8464_v18 = vpack.c.bf16 %v9989_v60, %v9985_v63  ;;  %v9035_v54 = vadd.f32 %v7227_v55, %v15387_v27  ;;  %v7229_v35 = vpop.f32.mrb[178].mxu0  ;;  %10004 = vtanh.f32 %v9034_v56 }
 0x95a   :  { %v9991_v3 = vpop.eup %9990  ;;  %v8740_v21 = vadd.f32 %v8739_v50, %v8738_v46  ;;  %v8741_v59 = vpop.f32.mrb[18].mxu1  ;;  %8135 = vst [vmem:[#allocation13 + $0x88] sm:$0xf] %v8461_v2  ;;  %v9036_v36 = vadd.f32 %v7229_v35, %v15381_v10 }
 0x95b   :  { %v8465_v20 = vpack.c.bf16 %v9991_v3, %v9991_v3  ;;  %v7231_v45 = vpop.f32.mrb[179].mxu0  ;;  %v8742_v11 = vpop.f32.mrb[19].mxu1  ;;  %8138 = vst [vmem:[#allocation13 + $0x9c] sm:$0xff] %v8464_v18  ;;  %10006 = vtanh.f32 %v9035_v54 }
 0x95c   :  { %v7622_v44 = vadd.f32 %v8740_v21, %v15360_v13  ;;  %v9037_v51 = vadd.f32 %v7231_v45, %v15387_v27  ;;  %v8743_v28 = vadd.f32 %v8742_v11, %v8741_v59  ;;  %v9993_v12 = vpop.eup %9992  ;;  %10008 = vtanh.f32 %v9036_v36 }
 0x95d   :  { %8139 = vst [vmem:[#allocation13 + $0xa4] sm:$0xf] %v8465_v20  ;;  %v9995_v0 = vpop.eup %9994 }
 0x95e   :  { %10010 = vtanh.f32 %v7622_v44  ;;  %v7625_v31 = vadd.f32 %v8743_v28, %v15363_v48  ;;  %v9997_v43 = vpop.eup %9996  ;;  %v8468_v49 = vpack.c.bf16 %v9995_v0, %v9993_v12  ;;  %v7235_v5 = vpop.f32.mrb[180].mxu0 }
 0x95f   :  { %10012 = vtanh.f32 %v9037_v51  ;;  %v9999_v23 = vpop.eup %9998  ;;  %v8744_v39 = vpop.f32.mrb[20].mxu1  ;;  %v9038_v6 = vadd.f32 %v7235_v5, %v15381_v10 }
 0x960   :  { %10014 = vtanh.f32 %v7625_v31  ;;  %v10001_v52 = vpop.eup %10000  ;;  %8142 = vst [vmem:[#allocation13 + $0xb8] sm:$0xff] %v8468_v49  ;;  %v8469_v13 = vpack.c.bf16 %v9999_v23, %v9999_v23  ;;  %v7237_v30 = vpop.f32.mrb[181].mxu0 }
 0x961   :  { %v8745_v32 = vpop.f32.mrb[21].mxu1  ;;  %v8472_v17 = vpack.c.bf16 %v10001_v52, %v9997_v43  ;;  %v9039_v38 = vadd.f32 %v7237_v30, %v15387_v27  ;;  %v7239_v48 = vpop.f32.mrb[182].mxu0  ;;  %10016 = vtanh.f32 %v9038_v6 }
 0x962   :  { %v10003_v33 = vpop.eup %10002  ;;  %v8746_v8 = vadd.f32 %v8745_v32, %v8744_v39  ;;  %v8747_v14 = vpop.f32.mrb[22].mxu1  ;;  %8143 = vst [vmem:[#allocation13 + $0xc0] sm:$0xf] %v8469_v13  ;;  %v9040_v26 = vadd.f32 %v7239_v48, %v15381_v10 }
 0x963   :  { %v8473_v58 = vpack.c.bf16 %v10003_v33, %v10003_v33  ;;  %v7241_v19 = vpop.f32.mrb[183].mxu0  ;;  %v8748_v24 = vpop.f32.mrb[23].mxu1  ;;  %8146 = vst [vmem:[#allocation13 + $0xd4] sm:$0xff] %v8472_v17  ;;  %10018 = vtanh.f32 %v9039_v38 }
 0x964   :  { %v7630_v41 = vadd.f32 %v8746_v8, %v15366_v29  ;;  %v9041_v16 = vadd.f32 %v7241_v19, %v15387_v27  ;;  %v8749_v61 = vadd.f32 %v8748_v24, %v8747_v14  ;;  %v10005_v47 = vpop.eup %10004  ;;  %10020 = vtanh.f32 %v9040_v26 }
 0x965   :  { %8147 = vst [vmem:[#allocation13 + $0xdc] sm:$0xf] %v8473_v58  ;;  %v10007_v15 = vpop.eup %10006 }
 0x966   :  { %10022 = vtanh.f32 %v7630_v41  ;;  %v7633_v53 = vadd.f32 %v8749_v61, %v15369_v37  ;;  %v10009_v42 = vpop.eup %10008  ;;  %v8476_v9 = vpack.c.bf16 %v10007_v15, %v10005_v47  ;;  %v7245_v25 = vpop.f32.mrb[184].mxu0 }
 0x967   :  { %10024 = vtanh.f32 %v9041_v16  ;;  %v8750_v63 = vpop.f32.mrb[24].mxu1  ;;  %v9042_v57 = vadd.f32 %v7245_v25, %v15381_v10  ;;  %v7247_v4 = vpop.f32.mrb[185].mxu0 }
 0x968   :  { %v10011_v7 = vpop.eup %10010  ;;  %10026 = vtanh.f32 %v7633_v53  ;;  %8150 = vst [vmem:[#allocation13 + $0xf0] sm:$0xff] %v8476_v9  ;;  %v8751_v46 = vpop.f32.mrb[25].mxu1  ;;  %v9043_v56 = vadd.f32 %v7247_v4, %v15387_v27 }
 0x969   :  { %v10013_v1 = vpop.eup %10012  ;;  %v8477_v29 = vpack.c.bf16 %v10011_v7, %v10011_v7  ;;  %v8752_v55 = vadd.f32 %v8751_v46, %v8750_v63  ;;  %v7249_v37 = vpop.f32.mrb[186].mxu0  ;;  %10028 = vtanh.f32 %v9042_v57 }
 0x96a   :  { %v10015_v60 = vpop.eup %10014  ;;  %v8480_v2 = vpack.c.bf16 %v10013_v1, %v10009_v42  ;;  %v8753_v50 = vpop.f32.mrb[26].mxu1  ;;  %v9044_v18 = vadd.f32 %v7249_v37, %v15381_v10  ;;  %10030 = vtanh.f32 %v9043_v56 }
 0x96b   :  { %8151 = vst [vmem:[#allocation13 + $0xf8] sm:$0xf] %v8477_v29  ;;  %v8481_v3 = vpack.c.bf16 %v10015_v60, %v10015_v60  ;;  %v7251_v54 = vpop.f32.mrb[187].mxu0  ;;  %v8754_v21 = vpop.f32.mrb[27].mxu1  ;;  %v7638_v35 = vadd.f32 %v8752_v55, %v15372_v62 }
 0x96c   :  { %8154 = vst [vmem:[#allocation13 + $0x10c] sm:$0xff] %v8480_v2  ;;  %v9045_v59 = vadd.f32 %v7251_v54, %v15387_v27  ;;  %v8755_v20 = vadd.f32 %v8754_v21, %v8753_v50  ;;  %v10017_v36 = vpop.eup %10016  ;;  %10032 = vtanh.f32 %v9044_v18 }
 0x96d   :  { %8155 = vst [vmem:[#allocation13 + $0x114] sm:$0xf] %v8481_v3  ;;  %v10019_v45 = vpop.eup %10018  ;;  %10034 = vtanh.f32 %v7638_v35 }
 0x96e   :  { %v7641_v11 = vadd.f32 %v8755_v20, %v15375_v22  ;;  %v10021_v44 = vpop.eup %10020  ;;  %v8484_v51 = vpack.c.bf16 %v10019_v45, %v10017_v36  ;;  %10036 = vtanh.f32 %v9045_v59  ;;  %v7255_v12 = vpop.f32.mrb[188].mxu0 }
 0x96f   :  { %v8756_v0 = vpop.f32.mrb[28].mxu1  ;;  %v9046_v43 = vadd.f32 %v7255_v12, %v15381_v10  ;;  %v7257_v49 = vpop.f32.mrb[189].mxu0 }
 0x970   :  { %v10023_v28 = vpop.eup %10022  ;;  %10038 = vtanh.f32 %v7641_v11  ;;  %8158 = vst [vmem:[#allocation13 + $0x128] sm:$0xff] %v8484_v51  ;;  %v8757_v23 = vpop.f32.mrb[29].mxu1  ;;  %v9047_v52 = vadd.f32 %v7257_v49, %v15387_v27 }
 0x971   :  { %v10025_v31 = vpop.eup %10024  ;;  %v8485_v62 = vpack.c.bf16 %v10023_v28, %v10023_v28  ;;  %v8758_v13 = vadd.f32 %v8757_v23, %v8756_v0  ;;  %v7259_v22 = vpop.f32.mrb[190].mxu0  ;;  %10040 = vtanh.f32 %v9046_v43 }
 0x972   :  { %v10027_v5 = vpop.eup %10026  ;;  %v8488_v39 = vpack.c.bf16 %v10025_v31, %v10021_v44  ;;  %v8759_v6 = vpop.f32.mrb[30].mxu1  ;;  %v9048_v32 = vadd.f32 %v7259_v22, %v15381_v10  ;;  %10042 = vtanh.f32 %v9047_v52 }
 0x973   :  { %8159 = vst [vmem:[#allocation13 + $0x130] sm:$0xf] %v8485_v62  ;;  %v8489_v30 = vpack.c.bf16 %v10027_v5, %v10027_v5  ;;  %v7261_v33 = vpop.f32.mrb[191].mxu0  ;;  %v8760_v17 = vpop.f32.mrb[31].mxu1  ;;  %v7646_v38 = vadd.f32 %v8758_v13, %v15378_v34 }
 0x974   :  { %8162 = vst [vmem:[#allocation13 + $0x144] sm:$0xff] %v8488_v39  ;;  %v9049_v8 = vadd.f32 %v7261_v33, %v15387_v27  ;;  %v8761_v48 = vadd.f32 %v8760_v17, %v8759_v6  ;;  %v10029_v14 = vpop.eup %10028  ;;  %10044 = vtanh.f32 %v9048_v32 }
 0x975   :  { %8163 = vst [vmem:[#allocation13 + $0x14c] sm:$0xf] %v8489_v30  ;;  %v10031_v58 = vpop.eup %10030  ;;  %10046 = vtanh.f32 %v7646_v38 }
 0x976   :  { %v7649_v26 = vadd.f32 %v8761_v48, %v15384_v40  ;;  %v10033_v19 = vpop.eup %10032  ;;  %v8492_v24 = vpack.c.bf16 %v10031_v58, %v10029_v14  ;;  %10048 = vtanh.f32 %v9049_v8 }
 0x977   :  { %v10035_v10 = vpop.eup %10034 }
 0x978   :  { %10050 = vtanh.f32 %v7649_v26  ;;  %v10037_v41 = vpop.eup %10036  ;;  %8166 = vst [vmem:[#allocation13 + $0x160] sm:$0xff] %v8492_v24  ;;  %v8493_v16 = vpack.c.bf16 %v10035_v10, %v10035_v10 }
 0x979   :  { %v8496_v34 = vpack.c.bf16 %v10037_v41, %v10033_v19 }
 0x97a   :  { %v10039_v61 = vpop.eup %10038  ;;  %8167 = vst [vmem:[#allocation13 + $0x168] sm:$0xf] %v8493_v16 }
 0x97b   :  { %v8497_v27 = vpack.c.bf16 %v10039_v61, %v10039_v61  ;;  %8170 = vst [vmem:[#allocation13 + $0x17c] sm:$0xff] %v8496_v34  ;;  %v10041_v47 = vpop.eup %10040 }
 0x97c   :  { %v10043_v15 = vpop.eup %10042 }
 0x97d   :  { %8171 = vst [vmem:[#allocation13 + $0x184] sm:$0xf] %v8497_v27  ;;  %v8500_v42 = vpack.c.bf16 %v10043_v15, %v10041_v47 }
 0x97e   :  { %v10045_v53 = vpop.eup %10044 }
 0x97f   :  { %v10047_v9 = vpop.eup %10046  ;;  %8174 = vst [vmem:[#allocation13 + $0x198] sm:$0xff] %v8500_v42 }
 0x980   :  { %v10049_v40 = vpop.eup %10048  ;;  %v8501_v7 = vpack.c.bf16 %v10047_v9, %v10047_v9 }
 0x981   :  { %v8504_v63 = vpack.c.bf16 %v10049_v40, %v10045_v53 }
 0x982   :  { %v10051_v25 = vpop.eup %10050  ;;  %8175 = vst [vmem:[#allocation13 + $0x1a0] sm:$0xf] %v8501_v7 }
 0x983   :  { %v8505_v1 = vpack.c.bf16 %v10051_v25, %v10051_v25  ;;  %8178 = vst [vmem:[#allocation13 + $0x1b4] sm:$0xff] %v8504_v63 }
 0x985   :  { %8179 = vst [vmem:[#allocation13 + $0x1bc] sm:$0xf] %v8505_v1 }
 0x986   :  { %10152 = shalt.err (!%p10149_p8)
}
 0x987   :  { %s10153_s2 = scalar_lea.hbm %s15457_s6, 7168 }
 0x988   :  { %p10154_p9 = scmp.ne.s32.totalorder %s15457_s6, %s10153_s2  ;;  %p10157_p10 = scmp.lt.u32.totalorder %s10153_s2, %s15457_s6 }
 0x98a   :  { %p10159_p11 = pnand %p10157_p10, %p10154_p9 }
 0x98c   :  { %10162 = shalt.err (!%p10159_p11)
}
 0x98d   :  { %s10200_s28 = smov 28  }
 0x98e   :  { %8191 = dma.vmem_to_hbm [thread:$0]  %s8186_s1, 7168, %s15457_s6, [#allocation7], %s10195_s17, %s10195_s17, %s10200_s28  }
 0x98f   :  { %10173 = dma.done.wait [#allocation7], 7168  }
 0x990   :  { %10174 = vsyncadd [#allocation7], 4294960128 }
 0x991   :  { %8195 = vsyncpa [#allocation6], 1 }
 0x992   :  { %8196 = vsyncpa [#allocation9], 1 }
 0x993   :  { %8197 = vsyncpa [#allocation12], 1 }
 0x994   :  { %8198 = vsyncpa [#allocation7], 1 }
 0x995   :  { %8199 = vsyncmov [#allocation4] }
 0x998   :  { %s8200_s29 = vpop.sfrf %8199 }
 0x999   :  { %p8440_p12 = scmp.ne.s32.totalorder %s8200_s29, 0 }
 0x99b   :  { %8204 = shalt.err (%p8440_p12)  }
 0x99c   :  { %8206 = vsyncmov [#allocation4 + $0x1] }
 0x99f   :  { %s8207_s30 = vpop.sfrf %8206 }
 0x9a0   :  { %p8441_p13 = scmp.ne.s32.totalorder %s8207_s30, 0 }
 0x9a2   :  { %8211 = shalt.err (%p8441_p13)  }

</bundles_post_ra>
